<compile_context>
chip_gen: v5e
topology: v5e:2x2
jax: 0.10.0
libtpu: 0.0.40
codegen_flags: <defaults>
</compile_context>

<pallas_src>
import math
import functools

import jax
import jax.numpy as jnp
from jax import lax
from jax.experimental import pallas as pl
from jax.experimental.pallas import tpu as pltpu

TIKHONOV_REGULARIZATION = 0.5 / math.pi
LN_EPS = 1e-5
F32_EPS = float(jnp.finfo(jnp.float32).eps)


# ----------------------------------------------------------------------------
# Pallas kernel: single invocation, all mixtures + full horizon unrolled.
# ----------------------------------------------------------------------------
def _generative_kernel(
    s_m0_ref, s_v0_ref,            # [B, H]      t=0 head outputs (mixture-invariant)
    g1t1_ref,                      # [M, B, 4H]  full non-h1 layer-0 gate contrib at t=1
    xg_ref,                        # [M, B, 4H]  x@w_ih0[H:] + b0 + b_mean@w_ih0[:H]  (t>=2)
    w0m_ref,                       # [M, H, 4H]  w_mean @ w_ih0[:H]   (mean head pre-composed)
    w0hh_ref,                      # [M, H, 4H]  w_hh0
    w1ih_ref, w1hh_ref,            # [M, H, 4H]  layer-1 ih / hh
    b1_ref,                        # [M, 1, 4H]
    h0_ref, c0_ref,                # [M, 2, H]   per-layer initial states
    w_heads_ref, b_heads_ref,      # [H, 2H] = [w_mean | w_vars], [1, 2H]
    s_mean_ref, s_vars_ref,        # [M, B, T*H] lane-dense output slabs
):
    B, H = s_m0_ref.shape
    M = g1t1_ref.shape[0]
    T = s_mean_ref.shape[2] // H

    s_m0 = s_m0_ref[...]
    s_v0 = s_v0_ref[...]
    w_heads = w_heads_ref[...]
    # JAX does not CSE broadcast_in_dim -> hoist bias broadcasts out of loops.
    b_headsb = jnp.broadcast_to(b_heads_ref[...], (B, 2 * H))

    # ---- per-mixture hoisted weights / states (static Python lists) -------
    h1 = [jnp.broadcast_to(h0_ref[m, 0:1, :], (B, H)) for m in range(M)]
    c1 = [jnp.broadcast_to(c0_ref[m, 0:1, :], (B, H)) for m in range(M)]
    h2 = [jnp.broadcast_to(h0_ref[m, 1:2, :], (B, H)) for m in range(M)]
    c2 = [jnp.broadcast_to(c0_ref[m, 1:2, :], (B, H)) for m in range(M)]
    b1b = [jnp.broadcast_to(b1_ref[m], (B, 4 * H)) for m in range(M)]
    g1t1 = [g1t1_ref[m] for m in range(M)]
    xg = [xg_ref[m] for m in range(M)]
    w0m = [w0m_ref[m] for m in range(M)]
    w0hh = [w0hh_ref[m] for m in range(M)]
    w1ih = [w1ih_ref[m] for m in range(M)]
    w1hh = [w1hh_ref[m] for m in range(M)]

    # Per-step results accumulated in vregs; single slab store at the end.
    sm_acc = [[s_m0] for _ in range(M)]
    sv_acc = [[s_v0] for _ in range(M)]

    # Horizon small & static -> unroll t; interleave the M independent chains.
    for t in range(1, T):
        for m in range(M):
            # --- LSTM layer 0 (PyTorch gate order i, f, g, o) --------------
            if t == 1:
                g1 = g1t1[m] + jnp.dot(h1[m], w0hh[m],
                                       preferred_element_type=jnp.float32)
            else:
                g1 = (xg[m]
                      + jnp.dot(h2[m], w0m[m],
                                preferred_element_type=jnp.float32)
                      + jnp.dot(h1[m], w0hh[m],
                                preferred_element_type=jnp.float32))
            sg = jax.nn.sigmoid(g1)          # full [B,4H] vreg -> 1 EUP push
            th = jnp.tanh(g1)                # full [B,4H] vreg -> 1 EUP push
            c1[m] = sg[:, H:2 * H] * c1[m] + sg[:, 0:H] * th[:, 2 * H:3 * H]
            h1[m] = sg[:, 3 * H:4 * H] * jnp.tanh(c1[m])

            # --- LSTM layer 1 ----------------------------------------------
            g2 = (b1b[m]
                  + jnp.dot(h1[m], w1ih[m], preferred_element_type=jnp.float32)
                  + jnp.dot(h2[m], w1hh[m], preferred_element_type=jnp.float32))
            sg2 = jax.nn.sigmoid(g2)
            th2 = jnp.tanh(g2)
            c2[m] = sg2[:, H:2 * H] * c2[m] + sg2[:, 0:H] * th2[:, 2 * H:3 * H]
            h2[m] = sg2[:, 3 * H:4 * H] * jnp.tanh(c2[m])

            # --- fused mean/vars head (off the recurrence chain) ------------
            hv = jnp.dot(h2[m], w_heads,
                         preferred_element_type=jnp.float32) + b_headsb
            sm_acc[m].append(hv[:, 0:H])
            sv_acc[m].append(jax.nn.softplus(hv[:, H:2 * H]) + F32_EPS)

    # ---- one full-width (256-lane) slab store per mixture per output ------
    for m in range(M):
        s_mean_ref[m, :, :] = jnp.concatenate(sm_acc[m], axis=-1)
        s_vars_ref[m, :, :] = jnp.concatenate(sv_acc[m], axis=-1)


# ----------------------------------------------------------------------------
# Wrapper
# ----------------------------------------------------------------------------
@functools.partial(jax.jit, static_argnames=("horizon",))
def generative_forward(x, p, horizon):
    B, D = x.shape
    H = p["w_mean"].shape[0]
    M = p["w_ih0"].shape[0]
    T = horizon

    # ---- mixture-invariant prologue (tiny; fuses under jit) ---------------
    h = jnp.dot(x, p["w_in"]) + p["b_in"]
    mu = jnp.mean(h, axis=-1, keepdims=True)
    var = jnp.mean(jnp.square(h - mu), axis=-1, keepdims=True)
    h = (h - mu) * lax.rsqrt(var + LN_EPS) * p["gamma"] + p["beta"]
    init_state = h * jax.nn.sigmoid(h)                           # SiLU, [B, H]
    s_m0 = jnp.dot(init_state, p["w_mean"]) + p["b_mean"]        # t=0 mean head
    s_v0 = jax.nn.softplus(jnp.dot(init_state, p["w_vars"]) + p["b_vars"]) + F32_EPS

    # ---- pre-packed / pre-composed weights ---------------------------------
    w_ih0_s = p["w_ih0"][:, :H, :]                               # [M, H, 4H] (s part)
    w_ih0_x = p["w_ih0"][:, H:, :]                               # [M, D, 4H] (x part)

    xg_base = jnp.einsum("bd,mdn->mbn", x, w_ih0_x) + p["b0"]    # [M, B, 4H]
    # Full non-h1 contribution to layer-0 gates at t=1 (uses s_m0 directly).
    g1_t1 = xg_base + jnp.einsum("bh,mhn->mbn", s_m0, w_ih0_s)   # [M, B, 4H]
    # For t>=2: fold the mean-head bias through w_ih0[:H].
    xg_rest = xg_base + jnp.einsum("oh,mhn->mon", p["b_mean"], w_ih0_s)
    # Pre-compose mean head into layer-0's recurrent input weight.
    w0m = jnp.einsum("hk,mkn->mhn", p["w_mean"], w_ih0_s)        # [M, H, 4H]

    w_heads = jnp.concatenate([p["w_mean"], p["w_vars"]], axis=1)  # [H, 2H]
    b_heads = jnp.concatenate([p["b_mean"], p["b_vars"]], axis=1)  # [1, 2H]

    vmem = pl.BlockSpec(memory_space=pltpu.MemorySpace.VMEM)
    s_mean_flat, s_vars_flat = pl.pallas_call(
        _generative_kernel,
        out_shape=[
            jax.ShapeDtypeStruct((M, B, T * H), jnp.float32),
            jax.ShapeDtypeStruct((M, B, T * H), jnp.float32),
        ],
        in_specs=[vmem] * 13,
        out_specs=[vmem, vmem],
    )(s_m0, s_v0, g1_t1, xg_rest, w0m, p["w_hh0"], p["w_ih1"], p["w_hh1"],
      p["b1"], p["h0"], p["c0"], w_heads, b_heads)

    s_mean = s_mean_flat.reshape(M, B, T, H).transpose(1, 0, 2, 3)  # [B, M, T, H]
    s_vars = s_vars_flat.reshape(M, B, T, H).transpose(1, 0, 2, 3)

    # Emission mean (lane width O=3 -> keep outside the kernel; trivial for XLA).
    y_base = jnp.dot(x, p["w_emis"][H:, :]) + p["b_emis"]           # [B, O]
    y_mean = (jnp.einsum("bmth,ho->bmto", s_mean, p["w_emis"][:H, :])
              + y_base[:, None, None, :])
    # y_vars = emission_vars**2 + 0.5/pi, broadcast (input independent constant).
    y_vars = jnp.broadcast_to(
        jnp.square(p["emission_vars"]) + TIKHONOV_REGULARIZATION, y_mean.shape)
    return s_mean, s_vars, y_mean, y_vars


# ----------------------------------------------------------------------------
# Deterministic parameter construction (synthetic; mirrors module __init__ shapes)
# ----------------------------------------------------------------------------
def init_params(key, D, H, M, O):
    ks = jax.random.split(key, 16)

    def rn(k, shape, scale):
        return (scale * jax.random.normal(k, shape)).astype(jnp.float32)

    # _init_states: [2*M, 2*H]; mixture i uses rows i:i+2 -> (h, c) per layer.
    init_states = rn(ks[0], (2 * M, 2 * H), 1.0)
    idx = jnp.arange(M)[:, None] + jnp.arange(2)[None, :]       # [M, 2]
    blocks = init_states[idx]                                    # [M, 2, 2H]
    h0 = blocks[..., :H]
    c0 = blocks[..., H:]

    p = dict(
        # input_head: Linear(D->H) + LayerNorm(H) (+ SiLU)
        w_in=rn(ks[1], (D, H), 1.0 / math.sqrt(D)),
        b_in=jnp.zeros((1, H), jnp.float32),
        gamma=jnp.ones((1, H), jnp.float32),
        beta=jnp.zeros((1, H), jnp.float32),
        # mean_head / vars_head: Linear(H->H) (module init_scale is tiny;
        # small nonzero values used here for a meaningful synthetic test)
        w_mean=rn(ks[2], (H, H), 0.1),
        b_mean=jnp.zeros((1, H), jnp.float32),
        w_vars=rn(ks[3], (H, H), 0.1),
        b_vars=jnp.zeros((1, H), jnp.float32),
        # per-mixture 2-layer LSTM (weights pre-transposed to [in, 4H];
        # b = b_ih + b_hh, which the module initializes to zeros)
        w_ih0=rn(ks[4], (M, H + D, 4 * H), 1.0 / math.sqrt(H + D)),
        w_hh0=rn(ks[5], (M, H, 4 * H), 1.0 / math.sqrt(H)),
        b0=jnp.zeros((M, 1, 4 * H), jnp.float32),
        w_ih1=rn(ks[6], (M, H, 4 * H), 1.0 / math.sqrt(H)),
        w_hh1=rn(ks[7], (M, H, 4 * H), 1.0 / math.sqrt(H)),
        b1=jnp.zeros((M, 1, 4 * H), jnp.float32),
        h0=h0,
        c0=c0,
        # emission: Linear(H+D -> O), emission_vars: [O]
        w_emis=rn(ks[8], (H + D, O), 0.1),
        b_emis=jnp.zeros((1, O), jnp.float32),
        emission_vars=jnp.zeros((O,), jnp.float32),
    )
    return p


# ----------------------------------------------------------------------------
# Pure-JAX reference (same math) for correctness checking
# ----------------------------------------------------------------------------
def reference_forward(x, p, M, T):
    B, D = x.shape
    H = p["w_mean"].shape[0]
    dot = functools.partial(jnp.dot, precision=lax.Precision.HIGHEST)

    h = dot(x, p["w_in"]) + p["b_in"]
    mu = h.mean(-1, keepdims=True)
    var = ((h - mu) ** 2).mean(-1, keepdims=True)
    h = (h - mu) / jnp.sqrt(var + LN_EPS) * p["gamma"] + p["beta"]
    init_state = h * jax.nn.sigmoid(h)

    def heads(feat):
        s_m = dot(feat, p["w_mean"]) + p["b_mean"]
        s_v = jax.nn.softplus(dot(feat, p["w_vars"]) + p["b_vars"]) + F32_EPS
        return s_m, s_v

    s_means, s_varss = [], []
    for m in range(M):
        sm_t, sv_t = [], []
        s_m, s_v = heads(init_state)
        sm_t.append(s_m)
        sv_t.append(s_v)
        h1 = jnp.broadcast_to(p["h0"][m, 0], (B, H))
        c1 = jnp.broadcast_to(p["c0"][m, 0], (B, H))
        h2 = jnp.broadcast_to(p["h0"][m, 1], (B, H))
        c2 = jnp.broadcast_to(p["c0"][m, 1], (B, H))
        inp = jnp.concatenate([s_m, x], -1)
        for _t in range(1, T):
            g1 = dot(inp, p["w_ih0"][m]) + dot(h1, p["w_hh0"][m]) + p["b0"][m, 0]
            c1 = jax.nn.sigmoid(g1[:, H:2 * H]) * c1 + \
                jax.nn.sigmoid(g1[:, :H]) * jnp.tanh(g1[:, 2 * H:3 * H])
            h1 = jax.nn.sigmoid(g1[:, 3 * H:]) * jnp.tanh(c1)
            g2 = dot(h1, p["w_ih1"][m]) + dot(h2, p["w_hh1"][m]) + p["b1"][m, 0]
            c2 = jax.nn.sigmoid(g2[:, H:2 * H]) * c2 + \
                jax.nn.sigmoid(g2[:, :H]) * jnp.tanh(g2[:, 2 * H:3 * H])
            h2 = jax.nn.sigmoid(g2[:, 3 * H:]) * jnp.tanh(c2)
            s_m, s_v = heads(h2)
            sm_t.append(s_m)
            sv_t.append(s_v)
            inp = jnp.concatenate([s_m, x], -1)
        s_means.append(jnp.stack(sm_t, 1))
        s_varss.append(jnp.stack(sv_t, 1))
    s_mean = jnp.stack(s_means, 1)                               # [B, M, T, H]
    s_vars = jnp.stack(s_varss, 1)
    x_e = jnp.broadcast_to(x[:, None, None, :], (B, M, T, D))
    y_mean = dot(jnp.concatenate([s_mean, x_e], -1), p["w_emis"]) + p["b_emis"]
    y_vars = jnp.broadcast_to(
        jnp.square(p["emission_vars"]) + TIKHONOV_REGULARIZATION, y_mean.shape)
    return s_mean, s_vars, y_mean, y_vars


if __name__ == "__main__":
    B, D, H, M, T, O = 4, 16, 32, 3, 8, 3

    key = jax.random.PRNGKey(0)
    kx, kp = jax.random.split(key)
    x = jax.random.normal(kx, (B, D), jnp.float32)
    params = init_params(kp, D, H, M, O)

    s_mean, s_vars, y_mean, y_vars = generative_forward(x, params, horizon=T)
    jax.block_until_ready((s_mean, s_vars, y_mean, y_vars))

    # Sanity check against a pure-JAX reference (loose tol: MXU f32 passes).
    r_sm, r_sv, r_ym, r_yv = reference_forward(x, params, M, T)
    assert s_mean.shape == (B, M, T, H) and s_vars.shape == (B, M, T, H)
    assert y_mean.shape == (B, M, T, O) and y_vars.shape == (B, M, T, O)
    for got, ref in ((s_mean, r_sm), (s_vars, r_sv), (y_mean, r_ym), (y_vars, r_yv)):
        err = float(jnp.max(jnp.abs(got - ref)))
        assert err < 5e-2, f"mismatch, max abs err {err}"

    print("KERNEL_OK")
</pallas_src>

<mosaic_0001>
module attributes {stable_mosaic.version = 11 : i64} {
  func.func @_generative_kernel(%arg0: memref<4x32xf32, #tpu.memory_space<vmem>>, %arg1: memref<4x32xf32, #tpu.memory_space<vmem>>, %arg2: memref<3x4x128xf32, #tpu.memory_space<vmem>>, %arg3: memref<3x4x128xf32, #tpu.memory_space<vmem>>, %arg4: memref<3x32x128xf32, #tpu.memory_space<vmem>>, %arg5: memref<3x32x128xf32, #tpu.memory_space<vmem>>, %arg6: memref<3x32x128xf32, #tpu.memory_space<vmem>>, %arg7: memref<3x32x128xf32, #tpu.memory_space<vmem>>, %arg8: memref<3x1x128xf32, #tpu.memory_space<vmem>>, %arg9: memref<3x2x32xf32, #tpu.memory_space<vmem>>, %arg10: memref<3x2x32xf32, #tpu.memory_space<vmem>>, %arg11: memref<32x64xf32, #tpu.memory_space<vmem>>, %arg12: memref<1x64xf32, #tpu.memory_space<vmem>>, %arg13: memref<3x4x256xf32, #tpu.memory_space<vmem>>, %arg14: memref<3x4x256xf32, #tpu.memory_space<vmem>>) attributes {dimension_semantics = [], scalar_prefetch = 0 : i64, scratch_operands = 0 : i64, tpu.core_type = #tpu.core_type<tc>} {
    %c0 = arith.constant 0 : index
    %c0_0 = arith.constant 0 : index
    %0 = vector.load %arg0[%c0, %c0_0] : memref<4x32xf32, #tpu.memory_space<vmem>>, vector<4x32xf32>
    %c0_1 = arith.constant 0 : index
    %c0_2 = arith.constant 0 : index
    %1 = vector.load %arg1[%c0_1, %c0_2] : memref<4x32xf32, #tpu.memory_space<vmem>>, vector<4x32xf32>
    %c0_3 = arith.constant 0 : index
    %c0_4 = arith.constant 0 : index
    %2 = vector.load %arg11[%c0_3, %c0_4] : memref<32x64xf32, #tpu.memory_space<vmem>>, vector<32x64xf32>
    %c0_5 = arith.constant 0 : index
    %c0_6 = arith.constant 0 : index
    %3 = vector.load %arg12[%c0_5, %c0_6] : memref<1x64xf32, #tpu.memory_space<vmem>>, vector<1x64xf32>
    %4 = vector.shape_cast %3 : vector<1x64xf32> to vector<1x64xf32>
    %5 = vector.broadcast %4 : vector<1x64xf32> to vector<4x64xf32>
    %c0_7 = arith.constant 0 : index
    %c0_8 = arith.constant 0 : index
    %c0_9 = arith.constant 0 : index
    %6 = vector.load %arg9[%c0_7, %c0_8, %c0_9] : memref<3x2x32xf32, #tpu.memory_space<vmem>>, vector<1x1x32xf32>
    %7 = vector.shape_cast %6 : vector<1x1x32xf32> to vector<1x32xf32>
    %8 = vector.shape_cast %7 : vector<1x32xf32> to vector<1x32xf32>
    %9 = vector.broadcast %8 : vector<1x32xf32> to vector<4x32xf32>
    %c1 = arith.constant 1 : index
    %c0_10 = arith.constant 0 : index
    %c0_11 = arith.constant 0 : index
    %10 = vector.load %arg9[%c1, %c0_10, %c0_11] : memref<3x2x32xf32, #tpu.memory_space<vmem>>, vector<1x1x32xf32>
    %11 = vector.shape_cast %10 : vector<1x1x32xf32> to vector<1x32xf32>
    %12 = vector.shape_cast %11 : vector<1x32xf32> to vector<1x32xf32>
    %13 = vector.broadcast %12 : vector<1x32xf32> to vector<4x32xf32>
    %c2 = arith.constant 2 : index
    %c0_12 = arith.constant 0 : index
    %c0_13 = arith.constant 0 : index
    %14 = vector.load %arg9[%c2, %c0_12, %c0_13] : memref<3x2x32xf32, #tpu.memory_space<vmem>>, vector<1x1x32xf32>
    %15 = vector.shape_cast %14 : vector<1x1x32xf32> to vector<1x32xf32>
    %16 = vector.shape_cast %15 : vector<1x32xf32> to vector<1x32xf32>
    %17 = vector.broadcast %16 : vector<1x32xf32> to vector<4x32xf32>
    %c0_14 = arith.constant 0 : index
    %c0_15 = arith.constant 0 : index
    %c0_16 = arith.constant 0 : index
    %18 = vector.load %arg10[%c0_14, %c0_15, %c0_16] : memref<3x2x32xf32, #tpu.memory_space<vmem>>, vector<1x1x32xf32>
    %19 = vector.shape_cast %18 : vector<1x1x32xf32> to vector<1x32xf32>
    %20 = vector.shape_cast %19 : vector<1x32xf32> to vector<1x32xf32>
    %21 = vector.broadcast %20 : vector<1x32xf32> to vector<4x32xf32>
    %c1_17 = arith.constant 1 : index
    %c0_18 = arith.constant 0 : index
    %c0_19 = arith.constant 0 : index
    %22 = vector.load %arg10[%c1_17, %c0_18, %c0_19] : memref<3x2x32xf32, #tpu.memory_space<vmem>>, vector<1x1x32xf32>
    %23 = vector.shape_cast %22 : vector<1x1x32xf32> to vector<1x32xf32>
    %24 = vector.shape_cast %23 : vector<1x32xf32> to vector<1x32xf32>
    %25 = vector.broadcast %24 : vector<1x32xf32> to vector<4x32xf32>
    %c2_20 = arith.constant 2 : index
    %c0_21 = arith.constant 0 : index
    %c0_22 = arith.constant 0 : index
    %26 = vector.load %arg10[%c2_20, %c0_21, %c0_22] : memref<3x2x32xf32, #tpu.memory_space<vmem>>, vector<1x1x32xf32>
    %27 = vector.shape_cast %26 : vector<1x1x32xf32> to vector<1x32xf32>
    %28 = vector.shape_cast %27 : vector<1x32xf32> to vector<1x32xf32>
    %29 = vector.broadcast %28 : vector<1x32xf32> to vector<4x32xf32>
    %c0_23 = arith.constant 0 : index
    %c1_24 = arith.constant 1 : index
    %c0_25 = arith.constant 0 : index
    %30 = vector.load %arg9[%c0_23, %c1_24, %c0_25] : memref<3x2x32xf32, #tpu.memory_space<vmem>>, vector<1x1x32xf32>
    %31 = vector.shape_cast %30 : vector<1x1x32xf32> to vector<1x32xf32>
    %32 = vector.shape_cast %31 : vector<1x32xf32> to vector<1x32xf32>
    %33 = vector.broadcast %32 : vector<1x32xf32> to vector<4x32xf32>
    %c1_26 = arith.constant 1 : index
    %c1_27 = arith.constant 1 : index
    %c0_28 = arith.constant 0 : index
    %34 = vector.load %arg9[%c1_26, %c1_27, %c0_28] : memref<3x2x32xf32, #tpu.memory_space<vmem>>, vector<1x1x32xf32>
    %35 = vector.shape_cast %34 : vector<1x1x32xf32> to vector<1x32xf32>
    %36 = vector.shape_cast %35 : vector<1x32xf32> to vector<1x32xf32>
    %37 = vector.broadcast %36 : vector<1x32xf32> to vector<4x32xf32>
    %c2_29 = arith.constant 2 : index
    %c1_30 = arith.constant 1 : index
    %c0_31 = arith.constant 0 : index
    %38 = vector.load %arg9[%c2_29, %c1_30, %c0_31] : memref<3x2x32xf32, #tpu.memory_space<vmem>>, vector<1x1x32xf32>
    %39 = vector.shape_cast %38 : vector<1x1x32xf32> to vector<1x32xf32>
    %40 = vector.shape_cast %39 : vector<1x32xf32> to vector<1x32xf32>
    %41 = vector.broadcast %40 : vector<1x32xf32> to vector<4x32xf32>
    %c0_32 = arith.constant 0 : index
    %c1_33 = arith.constant 1 : index
    %c0_34 = arith.constant 0 : index
    %42 = vector.load %arg10[%c0_32, %c1_33, %c0_34] : memref<3x2x32xf32, #tpu.memory_space<vmem>>, vector<1x1x32xf32>
    %43 = vector.shape_cast %42 : vector<1x1x32xf32> to vector<1x32xf32>
    %44 = vector.shape_cast %43 : vector<1x32xf32> to vector<1x32xf32>
    %45 = vector.broadcast %44 : vector<1x32xf32> to vector<4x32xf32>
    %c1_35 = arith.constant 1 : index
    %c1_36 = arith.constant 1 : index
    %c0_37 = arith.constant 0 : index
    %46 = vector.load %arg10[%c1_35, %c1_36, %c0_37] : memref<3x2x32xf32, #tpu.memory_space<vmem>>, vector<1x1x32xf32>
    %47 = vector.shape_cast %46 : vector<1x1x32xf32> to vector<1x32xf32>
    %48 = vector.shape_cast %47 : vector<1x32xf32> to vector<1x32xf32>
    %49 = vector.broadcast %48 : vector<1x32xf32> to vector<4x32xf32>
    %c2_38 = arith.constant 2 : index
    %c1_39 = arith.constant 1 : index
    %c0_40 = arith.constant 0 : index
    %50 = vector.load %arg10[%c2_38, %c1_39, %c0_40] : memref<3x2x32xf32, #tpu.memory_space<vmem>>, vector<1x1x32xf32>
    %51 = vector.shape_cast %50 : vector<1x1x32xf32> to vector<1x32xf32>
    %52 = vector.shape_cast %51 : vector<1x32xf32> to vector<1x32xf32>
    %53 = vector.broadcast %52 : vector<1x32xf32> to vector<4x32xf32>
    %c0_41 = arith.constant 0 : index
    %c0_42 = arith.constant 0 : index
    %c0_43 = arith.constant 0 : index
    %54 = vector.load %arg8[%c0_41, %c0_42, %c0_43] : memref<3x1x128xf32, #tpu.memory_space<vmem>>, vector<1x1x128xf32>
    %55 = vector.shape_cast %54 : vector<1x1x128xf32> to vector<1x128xf32>
    %56 = vector.shape_cast %55 : vector<1x128xf32> to vector<1x128xf32>
    %57 = vector.broadcast %56 : vector<1x128xf32> to vector<4x128xf32>
    %c1_44 = arith.constant 1 : index
    %c0_45 = arith.constant 0 : index
    %c0_46 = arith.constant 0 : index
    %58 = vector.load %arg8[%c1_44, %c0_45, %c0_46] : memref<3x1x128xf32, #tpu.memory_space<vmem>>, vector<1x1x128xf32>
    %59 = vector.shape_cast %58 : vector<1x1x128xf32> to vector<1x128xf32>
    %60 = vector.shape_cast %59 : vector<1x128xf32> to vector<1x128xf32>
    %61 = vector.broadcast %60 : vector<1x128xf32> to vector<4x128xf32>
    %c2_47 = arith.constant 2 : index
    %c0_48 = arith.constant 0 : index
    %c0_49 = arith.constant 0 : index
    %62 = vector.load %arg8[%c2_47, %c0_48, %c0_49] : memref<3x1x128xf32, #tpu.memory_space<vmem>>, vector<1x1x128xf32>
    %63 = vector.shape_cast %62 : vector<1x1x128xf32> to vector<1x128xf32>
    %64 = vector.shape_cast %63 : vector<1x128xf32> to vector<1x128xf32>
    %65 = vector.broadcast %64 : vector<1x128xf32> to vector<4x128xf32>
    %c0_50 = arith.constant 0 : index
    %c0_51 = arith.constant 0 : index
    %c0_52 = arith.constant 0 : index
    %66 = vector.load %arg2[%c0_50, %c0_51, %c0_52] : memref<3x4x128xf32, #tpu.memory_space<vmem>>, vector<1x4x128xf32>
    %67 = vector.shape_cast %66 : vector<1x4x128xf32> to vector<4x128xf32>
    %c1_53 = arith.constant 1 : index
    %c0_54 = arith.constant 0 : index
    %c0_55 = arith.constant 0 : index
    %68 = vector.load %arg2[%c1_53, %c0_54, %c0_55] : memref<3x4x128xf32, #tpu.memory_space<vmem>>, vector<1x4x128xf32>
    %69 = vector.shape_cast %68 : vector<1x4x128xf32> to vector<4x128xf32>
    %c2_56 = arith.constant 2 : index
    %c0_57 = arith.constant 0 : index
    %c0_58 = arith.constant 0 : index
    %70 = vector.load %arg2[%c2_56, %c0_57, %c0_58] : memref<3x4x128xf32, #tpu.memory_space<vmem>>, vector<1x4x128xf32>
    %71 = vector.shape_cast %70 : vector<1x4x128xf32> to vector<4x128xf32>
    %c0_59 = arith.constant 0 : index
    %c0_60 = arith.constant 0 : index
    %c0_61 = arith.constant 0 : index
    %72 = vector.load %arg3[%c0_59, %c0_60, %c0_61] : memref<3x4x128xf32, #tpu.memory_space<vmem>>, vector<1x4x128xf32>
    %73 = vector.shape_cast %72 : vector<1x4x128xf32> to vector<4x128xf32>
    %c1_62 = arith.constant 1 : index
    %c0_63 = arith.constant 0 : index
    %c0_64 = arith.constant 0 : index
    %74 = vector.load %arg3[%c1_62, %c0_63, %c0_64] : memref<3x4x128xf32, #tpu.memory_space<vmem>>, vector<1x4x128xf32>
    %75 = vector.shape_cast %74 : vector<1x4x128xf32> to vector<4x128xf32>
    %c2_65 = arith.constant 2 : index
    %c0_66 = arith.constant 0 : index
    %c0_67 = arith.constant 0 : index
    %76 = vector.load %arg3[%c2_65, %c0_66, %c0_67] : memref<3x4x128xf32, #tpu.memory_space<vmem>>, vector<1x4x128xf32>
    %77 = vector.shape_cast %76 : vector<1x4x128xf32> to vector<4x128xf32>
    %c0_68 = arith.constant 0 : index
    %c0_69 = arith.constant 0 : index
    %c0_70 = arith.constant 0 : index
    %78 = vector.load %arg4[%c0_68, %c0_69, %c0_70] : memref<3x32x128xf32, #tpu.memory_space<vmem>>, vector<1x32x128xf32>
    %79 = vector.shape_cast %78 : vector<1x32x128xf32> to vector<32x128xf32>
    %c1_71 = arith.constant 1 : index
    %c0_72 = arith.constant 0 : index
    %c0_73 = arith.constant 0 : index
    %80 = vector.load %arg4[%c1_71, %c0_72, %c0_73] : memref<3x32x128xf32, #tpu.memory_space<vmem>>, vector<1x32x128xf32>
    %81 = vector.shape_cast %80 : vector<1x32x128xf32> to vector<32x128xf32>
    %c2_74 = arith.constant 2 : index
    %c0_75 = arith.constant 0 : index
    %c0_76 = arith.constant 0 : index
    %82 = vector.load %arg4[%c2_74, %c0_75, %c0_76] : memref<3x32x128xf32, #tpu.memory_space<vmem>>, vector<1x32x128xf32>
    %83 = vector.shape_cast %82 : vector<1x32x128xf32> to vector<32x128xf32>
    %c0_77 = arith.constant 0 : index
    %c0_78 = arith.constant 0 : index
    %c0_79 = arith.constant 0 : index
    %84 = vector.load %arg5[%c0_77, %c0_78, %c0_79] : memref<3x32x128xf32, #tpu.memory_space<vmem>>, vector<1x32x128xf32>
    %85 = vector.shape_cast %84 : vector<1x32x128xf32> to vector<32x128xf32>
    %c1_80 = arith.constant 1 : index
    %c0_81 = arith.constant 0 : index
    %c0_82 = arith.constant 0 : index
    %86 = vector.load %arg5[%c1_80, %c0_81, %c0_82] : memref<3x32x128xf32, #tpu.memory_space<vmem>>, vector<1x32x128xf32>
    %87 = vector.shape_cast %86 : vector<1x32x128xf32> to vector<32x128xf32>
    %c2_83 = arith.constant 2 : index
    %c0_84 = arith.constant 0 : index
    %c0_85 = arith.constant 0 : index
    %88 = vector.load %arg5[%c2_83, %c0_84, %c0_85] : memref<3x32x128xf32, #tpu.memory_space<vmem>>, vector<1x32x128xf32>
    %89 = vector.shape_cast %88 : vector<1x32x128xf32> to vector<32x128xf32>
    %c0_86 = arith.constant 0 : index
    %c0_87 = arith.constant 0 : index
    %c0_88 = arith.constant 0 : index
    %90 = vector.load %arg6[%c0_86, %c0_87, %c0_88] : memref<3x32x128xf32, #tpu.memory_space<vmem>>, vector<1x32x128xf32>
    %91 = vector.shape_cast %90 : vector<1x32x128xf32> to vector<32x128xf32>
    %c1_89 = arith.constant 1 : index
    %c0_90 = arith.constant 0 : index
    %c0_91 = arith.constant 0 : index
    %92 = vector.load %arg6[%c1_89, %c0_90, %c0_91] : memref<3x32x128xf32, #tpu.memory_space<vmem>>, vector<1x32x128xf32>
    %93 = vector.shape_cast %92 : vector<1x32x128xf32> to vector<32x128xf32>
    %c2_92 = arith.constant 2 : index
    %c0_93 = arith.constant 0 : index
    %c0_94 = arith.constant 0 : index
    %94 = vector.load %arg6[%c2_92, %c0_93, %c0_94] : memref<3x32x128xf32, #tpu.memory_space<vmem>>, vector<1x32x128xf32>
    %95 = vector.shape_cast %94 : vector<1x32x128xf32> to vector<32x128xf32>
    %c0_95 = arith.constant 0 : index
    %c0_96 = arith.constant 0 : index
    %c0_97 = arith.constant 0 : index
    %96 = vector.load %arg7[%c0_95, %c0_96, %c0_97] : memref<3x32x128xf32, #tpu.memory_space<vmem>>, vector<1x32x128xf32>
    %97 = vector.shape_cast %96 : vector<1x32x128xf32> to vector<32x128xf32>
    %c1_98 = arith.constant 1 : index
    %c0_99 = arith.constant 0 : index
    %c0_100 = arith.constant 0 : index
    %98 = vector.load %arg7[%c1_98, %c0_99, %c0_100] : memref<3x32x128xf32, #tpu.memory_space<vmem>>, vector<1x32x128xf32>
    %99 = vector.shape_cast %98 : vector<1x32x128xf32> to vector<32x128xf32>
    %c2_101 = arith.constant 2 : index
    %c0_102 = arith.constant 0 : index
    %c0_103 = arith.constant 0 : index
    %100 = vector.load %arg7[%c2_101, %c0_102, %c0_103] : memref<3x32x128xf32, #tpu.memory_space<vmem>>, vector<1x32x128xf32>
    %101 = vector.shape_cast %100 : vector<1x32x128xf32> to vector<32x128xf32>
    %cst = arith.constant dense<0.000000e+00> : vector<4x128xf32>
    %102 = tpu.matmul %9, %85, %cst {dimension_numbers = #tpu.dot_dimension_numbers<[1], [0], [0], [1], [0, 0, 1, 1], [], []>} : vector<4x32xf32>, vector<32x128xf32>, vector<4x128xf32> -> vector<4x128xf32>
    %103 = arith.addf %67, %102 : vector<4x128xf32>
    %104 = arith.negf %103 : vector<4x128xf32>
    %105 = math.exp %104 : vector<4x128xf32>
    %cst_104 = arith.constant 1.000000e+00 : f32
    %106 = vector.broadcast %cst_104 : f32 to vector<4x128xf32>
    %107 = arith.addf %106, %105 : vector<4x128xf32>
    %108 = arith.divf %106, %107 : vector<4x128xf32>
    %109 = math.tanh %103 : vector<4x128xf32>
    %110 = vector.extract_strided_slice %108 {offsets = [0, 32], sizes = [4, 32], strides = [1, 1]} : vector<4x128xf32> to vector<4x32xf32>
    %111 = arith.mulf %110, %21 : vector<4x32xf32>
    %112 = vector.extract_strided_slice %108 {offsets = [0, 0], sizes = [4, 32], strides = [1, 1]} : vector<4x128xf32> to vector<4x32xf32>
    %113 = vector.extract_strided_slice %109 {offsets = [0, 64], sizes = [4, 32], strides = [1, 1]} : vector<4x128xf32> to vector<4x32xf32>
    %114 = arith.mulf %112, %113 : vector<4x32xf32>
    %115 = arith.addf %111, %114 : vector<4x32xf32>
    %116 = vector.extract_strided_slice %108 {offsets = [0, 96], sizes = [4, 32], strides = [1, 1]} : vector<4x128xf32> to vector<4x32xf32>
    %117 = math.tanh %115 : vector<4x32xf32>
    %118 = arith.mulf %116, %117 : vector<4x32xf32>
    %cst_105 = arith.constant dense<0.000000e+00> : vector<4x128xf32>
    %119 = tpu.matmul %118, %91, %cst_105 {dimension_numbers = #tpu.dot_dimension_numbers<[1], [0], [0], [1], [0, 0, 1, 1], [], []>} : vector<4x32xf32>, vector<32x128xf32>, vector<4x128xf32> -> vector<4x128xf32>
    %120 = arith.addf %57, %119 : vector<4x128xf32>
    %cst_106 = arith.constant dense<0.000000e+00> : vector<4x128xf32>
    %121 = tpu.matmul %33, %97, %cst_106 {dimension_numbers = #tpu.dot_dimension_numbers<[1], [0], [0], [1], [0, 0, 1, 1], [], []>} : vector<4x32xf32>, vector<32x128xf32>, vector<4x128xf32> -> vector<4x128xf32>
    %122 = arith.addf %120, %121 : vector<4x128xf32>
    %123 = arith.negf %122 : vector<4x128xf32>
    %124 = math.exp %123 : vector<4x128xf32>
    %cst_107 = arith.constant 1.000000e+00 : f32
    %125 = vector.broadcast %cst_107 : f32 to vector<4x128xf32>
    %126 = arith.addf %125, %124 : vector<4x128xf32>
    %127 = arith.divf %125, %126 : vector<4x128xf32>
    %128 = math.tanh %122 : vector<4x128xf32>
    %129 = vector.extract_strided_slice %127 {offsets = [0, 32], sizes = [4, 32], strides = [1, 1]} : vector<4x128xf32> to vector<4x32xf32>
    %130 = arith.mulf %129, %45 : vector<4x32xf32>
    %131 = vector.extract_strided_slice %127 {offsets = [0, 0], sizes = [4, 32], strides = [1, 1]} : vector<4x128xf32> to vector<4x32xf32>
    %132 = vector.extract_strided_slice %128 {offsets = [0, 64], sizes = [4, 32], strides = [1, 1]} : vector<4x128xf32> to vector<4x32xf32>
    %133 = arith.mulf %131, %132 : vector<4x32xf32>
    %134 = arith.addf %130, %133 : vector<4x32xf32>
    %135 = vector.extract_strided_slice %127 {offsets = [0, 96], sizes = [4, 32], strides = [1, 1]} : vector<4x128xf32> to vector<4x32xf32>
    %136 = math.tanh %134 : vector<4x32xf32>
    %137 = arith.mulf %135, %136 : vector<4x32xf32>
    %cst_108 = arith.constant dense<0.000000e+00> : vector<4x64xf32>
    %138 = tpu.matmul %137, %2, %cst_108 {dimension_numbers = #tpu.dot_dimension_numbers<[1], [0], [0], [1], [0, 0, 1, 1], [], []>} : vector<4x32xf32>, vector<32x64xf32>, vector<4x64xf32> -> vector<4x64xf32>
    %139 = arith.addf %138, %5 : vector<4x64xf32>
    %140 = vector.extract_strided_slice %139 {offsets = [0, 0], sizes = [4, 32], strides = [1, 1]} : vector<4x64xf32> to vector<4x32xf32>
    %141 = vector.extract_strided_slice %139 {offsets = [0, 32], sizes = [4, 32], strides = [1, 1]} : vector<4x64xf32> to vector<4x32xf32>
    %cst_109 = arith.constant 0.000000e+00 : f32
    %142 = vector.broadcast %cst_109 : f32 to vector<4x32xf32>
    %143 = arith.maximumf %141, %142 : vector<4x32xf32>
    %144 = vector.broadcast %cst_109 : f32 to vector<4x32xf32>
    %145 = arith.subf %141, %144 : vector<4x32xf32>
    %146 = arith.cmpf one, %145, %145 : vector<4x32xf32>
    %147 = vector.broadcast %cst_109 : f32 to vector<4x32xf32>
    %148 = arith.addf %141, %147 : vector<4x32xf32>
    %149 = math.absf %145 : vector<4x32xf32>
    %cst_110 = arith.constant 0.000000e+00 : f32
    %150 = vector.broadcast %cst_110 : f32 to vector<4x32xf32>
    %151 = arith.subf %150, %149 : vector<4x32xf32>
    %152 = math.exp %151 : vector<4x32xf32>
    %153 = math.log1p %152 : vector<4x32xf32>
    %154 = arith.addf %143, %153 : vector<4x32xf32>
    %155 = arith.select %146, %148, %154 : vector<4x32xi1>, vector<4x32xf32>
    %cst_111 = arith.constant 1.1920929E-7 : f32
    %156 = vector.broadcast %cst_111 : f32 to vector<4x32xf32>
    %157 = arith.addf %155, %156 : vector<4x32xf32>
    %cst_112 = arith.constant dense<0.000000e+00> : vector<4x128xf32>
    %158 = tpu.matmul %13, %87, %cst_112 {dimension_numbers = #tpu.dot_dimension_numbers<[1], [0], [0], [1], [0, 0, 1, 1], [], []>} : vector<4x32xf32>, vector<32x128xf32>, vector<4x128xf32> -> vector<4x128xf32>
    %159 = arith.addf %69, %158 : vector<4x128xf32>
    %160 = arith.negf %159 : vector<4x128xf32>
    %161 = math.exp %160 : vector<4x128xf32>
    %cst_113 = arith.constant 1.000000e+00 : f32
    %162 = vector.broadcast %cst_113 : f32 to vector<4x128xf32>
    %163 = arith.addf %162, %161 : vector<4x128xf32>
    %164 = arith.divf %162, %163 : vector<4x128xf32>
    %165 = math.tanh %159 : vector<4x128xf32>
    %166 = vector.extract_strided_slice %164 {offsets = [0, 32], sizes = [4, 32], strides = [1, 1]} : vector<4x128xf32> to vector<4x32xf32>
    %167 = arith.mulf %166, %25 : vector<4x32xf32>
    %168 = vector.extract_strided_slice %164 {offsets = [0, 0], sizes = [4, 32], strides = [1, 1]} : vector<4x128xf32> to vector<4x32xf32>
    %169 = vector.extract_strided_slice %165 {offsets = [0, 64], sizes = [4, 32], strides = [1, 1]} : vector<4x128xf32> to vector<4x32xf32>
    %170 = arith.mulf %168, %169 : vector<4x32xf32>
    %171 = arith.addf %167, %170 : vector<4x32xf32>
    %172 = vector.extract_strided_slice %164 {offsets = [0, 96], sizes = [4, 32], strides = [1, 1]} : vector<4x128xf32> to vector<4x32xf32>
    %173 = math.tanh %171 : vector<4x32xf32>
    %174 = arith.mulf %172, %173 : vector<4x32xf32>
    %cst_114 = arith.constant dense<0.000000e+00> : vector<4x128xf32>
    %175 = tpu.matmul %174, %93, %cst_114 {dimension_numbers = #tpu.dot_dimension_numbers<[1], [0], [0], [1], [0, 0, 1, 1], [], []>} : vector<4x32xf32>, vector<32x128xf32>, vector<4x128xf32> -> vector<4x128xf32>
    %176 = arith.addf %61, %175 : vector<4x128xf32>
    %cst_115 = arith.constant dense<0.000000e+00> : vector<4x128xf32>
    %177 = tpu.matmul %37, %99, %cst_115 {dimension_numbers = #tpu.dot_dimension_numbers<[1], [0], [0], [1], [0, 0, 1, 1], [], []>} : vector<4x32xf32>, vector<32x128xf32>, vector<4x128xf32> -> vector<4x128xf32>
    %178 = arith.addf %176, %177 : vector<4x128xf32>
    %179 = arith.negf %178 : vector<4x128xf32>
    %180 = math.exp %179 : vector<4x128xf32>
    %cst_116 = arith.constant 1.000000e+00 : f32
    %181 = vector.broadcast %cst_116 : f32 to vector<4x128xf32>
    %182 = arith.addf %181, %180 : vector<4x128xf32>
    %183 = arith.divf %181, %182 : vector<4x128xf32>
    %184 = math.tanh %178 : vector<4x128xf32>
    %185 = vector.extract_strided_slice %183 {offsets = [0, 32], sizes = [4, 32], strides = [1, 1]} : vector<4x128xf32> to vector<4x32xf32>
    %186 = arith.mulf %185, %49 : vector<4x32xf32>
    %187 = vector.extract_strided_slice %183 {offsets = [0, 0], sizes = [4, 32], strides = [1, 1]} : vector<4x128xf32> to vector<4x32xf32>
    %188 = vector.extract_strided_slice %184 {offsets = [0, 64], sizes = [4, 32], strides = [1, 1]} : vector<4x128xf32> to vector<4x32xf32>
    %189 = arith.mulf %187, %188 : vector<4x32xf32>
    %190 = arith.addf %186, %189 : vector<4x32xf32>
    %191 = vector.extract_strided_slice %183 {offsets = [0, 96], sizes = [4, 32], strides = [1, 1]} : vector<4x128xf32> to vector<4x32xf32>
    %192 = math.tanh %190 : vector<4x32xf32>
    %193 = arith.mulf %191, %192 : vector<4x32xf32>
    %cst_117 = arith.constant dense<0.000000e+00> : vector<4x64xf32>
    %194 = tpu.matmul %193, %2, %cst_117 {dimension_numbers = #tpu.dot_dimension_numbers<[1], [0], [0], [1], [0, 0, 1, 1], [], []>} : vector<4x32xf32>, vector<32x64xf32>, vector<4x64xf32> -> vector<4x64xf32>
    %195 = arith.addf %194, %5 : vector<4x64xf32>
    %196 = vector.extract_strided_slice %195 {offsets = [0, 0], sizes = [4, 32], strides = [1, 1]} : vector<4x64xf32> to vector<4x32xf32>
    %197 = vector.extract_strided_slice %195 {offsets = [0, 32], sizes = [4, 32], strides = [1, 1]} : vector<4x64xf32> to vector<4x32xf32>
    %cst_118 = arith.constant 0.000000e+00 : f32
    %198 = vector.broadcast %cst_118 : f32 to vector<4x32xf32>
    %199 = arith.maximumf %197, %198 : vector<4x32xf32>
    %200 = vector.broadcast %cst_118 : f32 to vector<4x32xf32>
    %201 = arith.subf %197, %200 : vector<4x32xf32>
    %202 = arith.cmpf one, %201, %201 : vector<4x32xf32>
    %203 = vector.broadcast %cst_118 : f32 to vector<4x32xf32>
    %204 = arith.addf %197, %203 : vector<4x32xf32>
    %205 = math.absf %201 : vector<4x32xf32>
    %cst_119 = arith.constant 0.000000e+00 : f32
    %206 = vector.broadcast %cst_119 : f32 to vector<4x32xf32>
    %207 = arith.subf %206, %205 : vector<4x32xf32>
    %208 = math.exp %207 : vector<4x32xf32>
    %209 = math.log1p %208 : vector<4x32xf32>
    %210 = arith.addf %199, %209 : vector<4x32xf32>
    %211 = arith.select %202, %204, %210 : vector<4x32xi1>, vector<4x32xf32>
    %cst_120 = arith.constant 1.1920929E-7 : f32
    %212 = vector.broadcast %cst_120 : f32 to vector<4x32xf32>
    %213 = arith.addf %211, %212 : vector<4x32xf32>
    %cst_121 = arith.constant dense<0.000000e+00> : vector<4x128xf32>
    %214 = tpu.matmul %17, %89, %cst_121 {dimension_numbers = #tpu.dot_dimension_numbers<[1], [0], [0], [1], [0, 0, 1, 1], [], []>} : vector<4x32xf32>, vector<32x128xf32>, vector<4x128xf32> -> vector<4x128xf32>
    %215 = arith.addf %71, %214 : vector<4x128xf32>
    %216 = arith.negf %215 : vector<4x128xf32>
    %217 = math.exp %216 : vector<4x128xf32>
    %cst_122 = arith.constant 1.000000e+00 : f32
    %218 = vector.broadcast %cst_122 : f32 to vector<4x128xf32>
    %219 = arith.addf %218, %217 : vector<4x128xf32>
    %220 = arith.divf %218, %219 : vector<4x128xf32>
    %221 = math.tanh %215 : vector<4x128xf32>
    %222 = vector.extract_strided_slice %220 {offsets = [0, 32], sizes = [4, 32], strides = [1, 1]} : vector<4x128xf32> to vector<4x32xf32>
    %223 = arith.mulf %222, %29 : vector<4x32xf32>
    %224 = vector.extract_strided_slice %220 {offsets = [0, 0], sizes = [4, 32], strides = [1, 1]} : vector<4x128xf32> to vector<4x32xf32>
    %225 = vector.extract_strided_slice %221 {offsets = [0, 64], sizes = [4, 32], strides = [1, 1]} : vector<4x128xf32> to vector<4x32xf32>
    %226 = arith.mulf %224, %225 : vector<4x32xf32>
    %227 = arith.addf %223, %226 : vector<4x32xf32>
    %228 = vector.extract_strided_slice %220 {offsets = [0, 96], sizes = [4, 32], strides = [1, 1]} : vector<4x128xf32> to vector<4x32xf32>
    %229 = math.tanh %227 : vector<4x32xf32>
    %230 = arith.mulf %228, %229 : vector<4x32xf32>
    %cst_123 = arith.constant dense<0.000000e+00> : vector<4x128xf32>
    %231 = tpu.matmul %230, %95, %cst_123 {dimension_numbers = #tpu.dot_dimension_numbers<[1], [0], [0], [1], [0, 0, 1, 1], [], []>} : vector<4x32xf32>, vector<32x128xf32>, vector<4x128xf32> -> vector<4x128xf32>
    %232 = arith.addf %65, %231 : vector<4x128xf32>
    %cst_124 = arith.constant dense<0.000000e+00> : vector<4x128xf32>
    %233 = tpu.matmul %41, %101, %cst_124 {dimension_numbers = #tpu.dot_dimension_numbers<[1], [0], [0], [1], [0, 0, 1, 1], [], []>} : vector<4x32xf32>, vector<32x128xf32>, vector<4x128xf32> -> vector<4x128xf32>
    %234 = arith.addf %232, %233 : vector<4x128xf32>
    %235 = arith.negf %234 : vector<4x128xf32>
    %236 = math.exp %235 : vector<4x128xf32>
    %cst_125 = arith.constant 1.000000e+00 : f32
    %237 = vector.broadcast %cst_125 : f32 to vector<4x128xf32>
    %238 = arith.addf %237, %236 : vector<4x128xf32>
    %239 = arith.divf %237, %238 : vector<4x128xf32>
    %240 = math.tanh %234 : vector<4x128xf32>
    %241 = vector.extract_strided_slice %239 {offsets = [0, 32], sizes = [4, 32], strides = [1, 1]} : vector<4x128xf32> to vector<4x32xf32>
    %242 = arith.mulf %241, %53 : vector<4x32xf32>
    %243 = vector.extract_strided_slice %239 {offsets = [0, 0], sizes = [4, 32], strides = [1, 1]} : vector<4x128xf32> to vector<4x32xf32>
    %244 = vector.extract_strided_slice %240 {offsets = [0, 64], sizes = [4, 32], strides = [1, 1]} : vector<4x128xf32> to vector<4x32xf32>
    %245 = arith.mulf %243, %244 : vector<4x32xf32>
    %246 = arith.addf %242, %245 : vector<4x32xf32>
    %247 = vector.extract_strided_slice %239 {offsets = [0, 96], sizes = [4, 32], strides = [1, 1]} : vector<4x128xf32> to vector<4x32xf32>
    %248 = math.tanh %246 : vector<4x32xf32>
    %249 = arith.mulf %247, %248 : vector<4x32xf32>
    %cst_126 = arith.constant dense<0.000000e+00> : vector<4x64xf32>
    %250 = tpu.matmul %249, %2, %cst_126 {dimension_numbers = #tpu.dot_dimension_numbers<[1], [0], [0], [1], [0, 0, 1, 1], [], []>} : vector<4x32xf32>, vector<32x64xf32>, vector<4x64xf32> -> vector<4x64xf32>
    %251 = arith.addf %250, %5 : vector<4x64xf32>
    %252 = vector.extract_strided_slice %251 {offsets = [0, 0], sizes = [4, 32], strides = [1, 1]} : vector<4x64xf32> to vector<4x32xf32>
    %253 = vector.extract_strided_slice %251 {offsets = [0, 32], sizes = [4, 32], strides = [1, 1]} : vector<4x64xf32> to vector<4x32xf32>
    %cst_127 = arith.constant 0.000000e+00 : f32
    %254 = vector.broadcast %cst_127 : f32 to vector<4x32xf32>
    %255 = arith.maximumf %253, %254 : vector<4x32xf32>
    %256 = vector.broadcast %cst_127 : f32 to vector<4x32xf32>
    %257 = arith.subf %253, %256 : vector<4x32xf32>
    %258 = arith.cmpf one, %257, %257 : vector<4x32xf32>
    %259 = vector.broadcast %cst_127 : f32 to vector<4x32xf32>
    %260 = arith.addf %253, %259 : vector<4x32xf32>
    %261 = math.absf %257 : vector<4x32xf32>
    %cst_128 = arith.constant 0.000000e+00 : f32
    %262 = vector.broadcast %cst_128 : f32 to vector<4x32xf32>
    %263 = arith.subf %262, %261 : vector<4x32xf32>
    %264 = math.exp %263 : vector<4x32xf32>
    %265 = math.log1p %264 : vector<4x32xf32>
    %266 = arith.addf %255, %265 : vector<4x32xf32>
    %267 = arith.select %258, %260, %266 : vector<4x32xi1>, vector<4x32xf32>
    %cst_129 = arith.constant 1.1920929E-7 : f32
    %268 = vector.broadcast %cst_129 : f32 to vector<4x32xf32>
    %269 = arith.addf %267, %268 : vector<4x32xf32>
    %cst_130 = arith.constant dense<0.000000e+00> : vector<4x128xf32>
    %270 = tpu.matmul %137, %79, %cst_130 {dimension_numbers = #tpu.dot_dimension_numbers<[1], [0], [0], [1], [0, 0, 1, 1], [], []>} : vector<4x32xf32>, vector<32x128xf32>, vector<4x128xf32> -> vector<4x128xf32>
    %271 = arith.addf %73, %270 : vector<4x128xf32>
    %cst_131 = arith.constant dense<0.000000e+00> : vector<4x128xf32>
    %272 = tpu.matmul %118, %85, %cst_131 {dimension_numbers = #tpu.dot_dimension_numbers<[1], [0], [0], [1], [0, 0, 1, 1], [], []>} : vector<4x32xf32>, vector<32x128xf32>, vector<4x128xf32> -> vector<4x128xf32>
    %273 = arith.addf %271, %272 : vector<4x128xf32>
    %274 = arith.negf %273 : vector<4x128xf32>
    %275 = math.exp %274 : vector<4x128xf32>
    %cst_132 = arith.constant 1.000000e+00 : f32
    %276 = vector.broadcast %cst_132 : f32 to vector<4x128xf32>
    %277 = arith.addf %276, %275 : vector<4x128xf32>
    %278 = arith.divf %276, %277 : vector<4x128xf32>
    %279 = math.tanh %273 : vector<4x128xf32>
    %280 = vector.extract_strided_slice %278 {offsets = [0, 32], sizes = [4, 32], strides = [1, 1]} : vector<4x128xf32> to vector<4x32xf32>
    %281 = arith.mulf %280, %115 : vector<4x32xf32>
    %282 = vector.extract_strided_slice %278 {offsets = [0, 0], sizes = [4, 32], strides = [1, 1]} : vector<4x128xf32> to vector<4x32xf32>
    %283 = vector.extract_strided_slice %279 {offsets = [0, 64], sizes = [4, 32], strides = [1, 1]} : vector<4x128xf32> to vector<4x32xf32>
    %284 = arith.mulf %282, %283 : vector<4x32xf32>
    %285 = arith.addf %281, %284 : vector<4x32xf32>
    %286 = vector.extract_strided_slice %278 {offsets = [0, 96], sizes = [4, 32], strides = [1, 1]} : vector<4x128xf32> to vector<4x32xf32>
    %287 = math.tanh %285 : vector<4x32xf32>
    %288 = arith.mulf %286, %287 : vector<4x32xf32>
    %cst_133 = arith.constant dense<0.000000e+00> : vector<4x128xf32>
    %289 = tpu.matmul %288, %91, %cst_133 {dimension_numbers = #tpu.dot_dimension_numbers<[1], [0], [0], [1], [0, 0, 1, 1], [], []>} : vector<4x32xf32>, vector<32x128xf32>, vector<4x128xf32> -> vector<4x128xf32>
    %290 = arith.addf %57, %289 : vector<4x128xf32>
    %cst_134 = arith.constant dense<0.000000e+00> : vector<4x128xf32>
    %291 = tpu.matmul %137, %97, %cst_134 {dimension_numbers = #tpu.dot_dimension_numbers<[1], [0], [0], [1], [0, 0, 1, 1], [], []>} : vector<4x32xf32>, vector<32x128xf32>, vector<4x128xf32> -> vector<4x128xf32>
    %292 = arith.addf %290, %291 : vector<4x128xf32>
    %293 = arith.negf %292 : vector<4x128xf32>
    %294 = math.exp %293 : vector<4x128xf32>
    %cst_135 = arith.constant 1.000000e+00 : f32
    %295 = vector.broadcast %cst_135 : f32 to vector<4x128xf32>
    %296 = arith.addf %295, %294 : vector<4x128xf32>
    %297 = arith.divf %295, %296 : vector<4x128xf32>
    %298 = math.tanh %292 : vector<4x128xf32>
    %299 = vector.extract_strided_slice %297 {offsets = [0, 32], sizes = [4, 32], strides = [1, 1]} : vector<4x128xf32> to vector<4x32xf32>
    %300 = arith.mulf %299, %134 : vector<4x32xf32>
    %301 = vector.extract_strided_slice %297 {offsets = [0, 0], sizes = [4, 32], strides = [1, 1]} : vector<4x128xf32> to vector<4x32xf32>
    %302 = vector.extract_strided_slice %298 {offsets = [0, 64], sizes = [4, 32], strides = [1, 1]} : vector<4x128xf32> to vector<4x32xf32>
    %303 = arith.mulf %301, %302 : vector<4x32xf32>
    %304 = arith.addf %300, %303 : vector<4x32xf32>
    %305 = vector.extract_strided_slice %297 {offsets = [0, 96], sizes = [4, 32], strides = [1, 1]} : vector<4x128xf32> to vector<4x32xf32>
    %306 = math.tanh %304 : vector<4x32xf32>
    %307 = arith.mulf %305, %306 : vector<4x32xf32>
    %cst_136 = arith.constant dense<0.000000e+00> : vector<4x64xf32>
    %308 = tpu.matmul %307, %2, %cst_136 {dimension_numbers = #tpu.dot_dimension_numbers<[1], [0], [0], [1], [0, 0, 1, 1], [], []>} : vector<4x32xf32>, vector<32x64xf32>, vector<4x64xf32> -> vector<4x64xf32>
    %309 = arith.addf %308, %5 : vector<4x64xf32>
    %310 = vector.extract_strided_slice %309 {offsets = [0, 0], sizes = [4, 32], strides = [1, 1]} : vector<4x64xf32> to vector<4x32xf32>
    %311 = vector.extract_strided_slice %309 {offsets = [0, 32], sizes = [4, 32], strides = [1, 1]} : vector<4x64xf32> to vector<4x32xf32>
    %cst_137 = arith.constant 0.000000e+00 : f32
    %312 = vector.broadcast %cst_137 : f32 to vector<4x32xf32>
    %313 = arith.maximumf %311, %312 : vector<4x32xf32>
    %314 = vector.broadcast %cst_137 : f32 to vector<4x32xf32>
    %315 = arith.subf %311, %314 : vector<4x32xf32>
    %316 = arith.cmpf one, %315, %315 : vector<4x32xf32>
    %317 = vector.broadcast %cst_137 : f32 to vector<4x32xf32>
    %318 = arith.addf %311, %317 : vector<4x32xf32>
    %319 = math.absf %315 : vector<4x32xf32>
    %cst_138 = arith.constant 0.000000e+00 : f32
    %320 = vector.broadcast %cst_138 : f32 to vector<4x32xf32>
    %321 = arith.subf %320, %319 : vector<4x32xf32>
    %322 = math.exp %321 : vector<4x32xf32>
    %323 = math.log1p %322 : vector<4x32xf32>
    %324 = arith.addf %313, %323 : vector<4x32xf32>
    %325 = arith.select %316, %318, %324 : vector<4x32xi1>, vector<4x32xf32>
    %cst_139 = arith.constant 1.1920929E-7 : f32
    %326 = vector.broadcast %cst_139 : f32 to vector<4x32xf32>
    %327 = arith.addf %325, %326 : vector<4x32xf32>
    %cst_140 = arith.constant dense<0.000000e+00> : vector<4x128xf32>
    %328 = tpu.matmul %193, %81, %cst_140 {dimension_numbers = #tpu.dot_dimension_numbers<[1], [0], [0], [1], [0, 0, 1, 1], [], []>} : vector<4x32xf32>, vector<32x128xf32>, vector<4x128xf32> -> vector<4x128xf32>
    %329 = arith.addf %75, %328 : vector<4x128xf32>
    %cst_141 = arith.constant dense<0.000000e+00> : vector<4x128xf32>
    %330 = tpu.matmul %174, %87, %cst_141 {dimension_numbers = #tpu.dot_dimension_numbers<[1], [0], [0], [1], [0, 0, 1, 1], [], []>} : vector<4x32xf32>, vector<32x128xf32>, vector<4x128xf32> -> vector<4x128xf32>
    %331 = arith.addf %329, %330 : vector<4x128xf32>
    %332 = arith.negf %331 : vector<4x128xf32>
    %333 = math.exp %332 : vector<4x128xf32>
    %cst_142 = arith.constant 1.000000e+00 : f32
    %334 = vector.broadcast %cst_142 : f32 to vector<4x128xf32>
    %335 = arith.addf %334, %333 : vector<4x128xf32>
    %336 = arith.divf %334, %335 : vector<4x128xf32>
    %337 = math.tanh %331 : vector<4x128xf32>
    %338 = vector.extract_strided_slice %336 {offsets = [0, 32], sizes = [4, 32], strides = [1, 1]} : vector<4x128xf32> to vector<4x32xf32>
    %339 = arith.mulf %338, %171 : vector<4x32xf32>
    %340 = vector.extract_strided_slice %336 {offsets = [0, 0], sizes = [4, 32], strides = [1, 1]} : vector<4x128xf32> to vector<4x32xf32>
    %341 = vector.extract_strided_slice %337 {offsets = [0, 64], sizes = [4, 32], strides = [1, 1]} : vector<4x128xf32> to vector<4x32xf32>
    %342 = arith.mulf %340, %341 : vector<4x32xf32>
    %343 = arith.addf %339, %342 : vector<4x32xf32>
    %344 = vector.extract_strided_slice %336 {offsets = [0, 96], sizes = [4, 32], strides = [1, 1]} : vector<4x128xf32> to vector<4x32xf32>
    %345 = math.tanh %343 : vector<4x32xf32>
    %346 = arith.mulf %344, %345 : vector<4x32xf32>
    %cst_143 = arith.constant dense<0.000000e+00> : vector<4x128xf32>
    %347 = tpu.matmul %346, %93, %cst_143 {dimension_numbers = #tpu.dot_dimension_numbers<[1], [0], [0], [1], [0, 0, 1, 1], [], []>} : vector<4x32xf32>, vector<32x128xf32>, vector<4x128xf32> -> vector<4x128xf32>
    %348 = arith.addf %61, %347 : vector<4x128xf32>
    %cst_144 = arith.constant dense<0.000000e+00> : vector<4x128xf32>
    %349 = tpu.matmul %193, %99, %cst_144 {dimension_numbers = #tpu.dot_dimension_numbers<[1], [0], [0], [1], [0, 0, 1, 1], [], []>} : vector<4x32xf32>, vector<32x128xf32>, vector<4x128xf32> -> vector<4x128xf32>
    %350 = arith.addf %348, %349 : vector<4x128xf32>
    %351 = arith.negf %350 : vector<4x128xf32>
    %352 = math.exp %351 : vector<4x128xf32>
    %cst_145 = arith.constant 1.000000e+00 : f32
    %353 = vector.broadcast %cst_145 : f32 to vector<4x128xf32>
    %354 = arith.addf %353, %352 : vector<4x128xf32>
    %355 = arith.divf %353, %354 : vector<4x128xf32>
    %356 = math.tanh %350 : vector<4x128xf32>
    %357 = vector.extract_strided_slice %355 {offsets = [0, 32], sizes = [4, 32], strides = [1, 1]} : vector<4x128xf32> to vector<4x32xf32>
    %358 = arith.mulf %357, %190 : vector<4x32xf32>
    %359 = vector.extract_strided_slice %355 {offsets = [0, 0], sizes = [4, 32], strides = [1, 1]} : vector<4x128xf32> to vector<4x32xf32>
    %360 = vector.extract_strided_slice %356 {offsets = [0, 64], sizes = [4, 32], strides = [1, 1]} : vector<4x128xf32> to vector<4x32xf32>
    %361 = arith.mulf %359, %360 : vector<4x32xf32>
    %362 = arith.addf %358, %361 : vector<4x32xf32>
    %363 = vector.extract_strided_slice %355 {offsets = [0, 96], sizes = [4, 32], strides = [1, 1]} : vector<4x128xf32> to vector<4x32xf32>
    %364 = math.tanh %362 : vector<4x32xf32>
    %365 = arith.mulf %363, %364 : vector<4x32xf32>
    %cst_146 = arith.constant dense<0.000000e+00> : vector<4x64xf32>
    %366 = tpu.matmul %365, %2, %cst_146 {dimension_numbers = #tpu.dot_dimension_numbers<[1], [0], [0], [1], [0, 0, 1, 1], [], []>} : vector<4x32xf32>, vector<32x64xf32>, vector<4x64xf32> -> vector<4x64xf32>
    %367 = arith.addf %366, %5 : vector<4x64xf32>
    %368 = vector.extract_strided_slice %367 {offsets = [0, 0], sizes = [4, 32], strides = [1, 1]} : vector<4x64xf32> to vector<4x32xf32>
    %369 = vector.extract_strided_slice %367 {offsets = [0, 32], sizes = [4, 32], strides = [1, 1]} : vector<4x64xf32> to vector<4x32xf32>
    %cst_147 = arith.constant 0.000000e+00 : f32
    %370 = vector.broadcast %cst_147 : f32 to vector<4x32xf32>
    %371 = arith.maximumf %369, %370 : vector<4x32xf32>
    %372 = vector.broadcast %cst_147 : f32 to vector<4x32xf32>
    %373 = arith.subf %369, %372 : vector<4x32xf32>
    %374 = arith.cmpf one, %373, %373 : vector<4x32xf32>
    %375 = vector.broadcast %cst_147 : f32 to vector<4x32xf32>
    %376 = arith.addf %369, %375 : vector<4x32xf32>
    %377 = math.absf %373 : vector<4x32xf32>
    %cst_148 = arith.constant 0.000000e+00 : f32
    %378 = vector.broadcast %cst_148 : f32 to vector<4x32xf32>
    %379 = arith.subf %378, %377 : vector<4x32xf32>
    %380 = math.exp %379 : vector<4x32xf32>
    %381 = math.log1p %380 : vector<4x32xf32>
    %382 = arith.addf %371, %381 : vector<4x32xf32>
    %383 = arith.select %374, %376, %382 : vector<4x32xi1>, vector<4x32xf32>
    %cst_149 = arith.constant 1.1920929E-7 : f32
    %384 = vector.broadcast %cst_149 : f32 to vector<4x32xf32>
    %385 = arith.addf %383, %384 : vector<4x32xf32>
    %cst_150 = arith.constant dense<0.000000e+00> : vector<4x128xf32>
    %386 = tpu.matmul %249, %83, %cst_150 {dimension_numbers = #tpu.dot_dimension_numbers<[1], [0], [0], [1], [0, 0, 1, 1], [], []>} : vector<4x32xf32>, vector<32x128xf32>, vector<4x128xf32> -> vector<4x128xf32>
    %387 = arith.addf %77, %386 : vector<4x128xf32>
    %cst_151 = arith.constant dense<0.000000e+00> : vector<4x128xf32>
    %388 = tpu.matmul %230, %89, %cst_151 {dimension_numbers = #tpu.dot_dimension_numbers<[1], [0], [0], [1], [0, 0, 1, 1], [], []>} : vector<4x32xf32>, vector<32x128xf32>, vector<4x128xf32> -> vector<4x128xf32>
    %389 = arith.addf %387, %388 : vector<4x128xf32>
    %390 = arith.negf %389 : vector<4x128xf32>
    %391 = math.exp %390 : vector<4x128xf32>
    %cst_152 = arith.constant 1.000000e+00 : f32
    %392 = vector.broadcast %cst_152 : f32 to vector<4x128xf32>
    %393 = arith.addf %392, %391 : vector<4x128xf32>
    %394 = arith.divf %392, %393 : vector<4x128xf32>
    %395 = math.tanh %389 : vector<4x128xf32>
    %396 = vector.extract_strided_slice %394 {offsets = [0, 32], sizes = [4, 32], strides = [1, 1]} : vector<4x128xf32> to vector<4x32xf32>
    %397 = arith.mulf %396, %227 : vector<4x32xf32>
    %398 = vector.extract_strided_slice %394 {offsets = [0, 0], sizes = [4, 32], strides = [1, 1]} : vector<4x128xf32> to vector<4x32xf32>
    %399 = vector.extract_strided_slice %395 {offsets = [0, 64], sizes = [4, 32], strides = [1, 1]} : vector<4x128xf32> to vector<4x32xf32>
    %400 = arith.mulf %398, %399 : vector<4x32xf32>
    %401 = arith.addf %397, %400 : vector<4x32xf32>
    %402 = vector.extract_strided_slice %394 {offsets = [0, 96], sizes = [4, 32], strides = [1, 1]} : vector<4x128xf32> to vector<4x32xf32>
    %403 = math.tanh %401 : vector<4x32xf32>
    %404 = arith.mulf %402, %403 : vector<4x32xf32>
    %cst_153 = arith.constant dense<0.000000e+00> : vector<4x128xf32>
    %405 = tpu.matmul %404, %95, %cst_153 {dimension_numbers = #tpu.dot_dimension_numbers<[1], [0], [0], [1], [0, 0, 1, 1], [], []>} : vector<4x32xf32>, vector<32x128xf32>, vector<4x128xf32> -> vector<4x128xf32>
    %406 = arith.addf %65, %405 : vector<4x128xf32>
    %cst_154 = arith.constant dense<0.000000e+00> : vector<4x128xf32>
    %407 = tpu.matmul %249, %101, %cst_154 {dimension_numbers = #tpu.dot_dimension_numbers<[1], [0], [0], [1], [0, 0, 1, 1], [], []>} : vector<4x32xf32>, vector<32x128xf32>, vector<4x128xf32> -> vector<4x128xf32>
    %408 = arith.addf %406, %407 : vector<4x128xf32>
    %409 = arith.negf %408 : vector<4x128xf32>
    %410 = math.exp %409 : vector<4x128xf32>
    %cst_155 = arith.constant 1.000000e+00 : f32
    %411 = vector.broadcast %cst_155 : f32 to vector<4x128xf32>
    %412 = arith.addf %411, %410 : vector<4x128xf32>
    %413 = arith.divf %411, %412 : vector<4x128xf32>
    %414 = math.tanh %408 : vector<4x128xf32>
    %415 = vector.extract_strided_slice %413 {offsets = [0, 32], sizes = [4, 32], strides = [1, 1]} : vector<4x128xf32> to vector<4x32xf32>
    %416 = arith.mulf %415, %246 : vector<4x32xf32>
    %417 = vector.extract_strided_slice %413 {offsets = [0, 0], sizes = [4, 32], strides = [1, 1]} : vector<4x128xf32> to vector<4x32xf32>
    %418 = vector.extract_strided_slice %414 {offsets = [0, 64], sizes = [4, 32], strides = [1, 1]} : vector<4x128xf32> to vector<4x32xf32>
    %419 = arith.mulf %417, %418 : vector<4x32xf32>
    %420 = arith.addf %416, %419 : vector<4x32xf32>
    %421 = vector.extract_strided_slice %413 {offsets = [0, 96], sizes = [4, 32], strides = [1, 1]} : vector<4x128xf32> to vector<4x32xf32>
    %422 = math.tanh %420 : vector<4x32xf32>
    %423 = arith.mulf %421, %422 : vector<4x32xf32>
    %cst_156 = arith.constant dense<0.000000e+00> : vector<4x64xf32>
    %424 = tpu.matmul %423, %2, %cst_156 {dimension_numbers = #tpu.dot_dimension_numbers<[1], [0], [0], [1], [0, 0, 1, 1], [], []>} : vector<4x32xf32>, vector<32x64xf32>, vector<4x64xf32> -> vector<4x64xf32>
    %425 = arith.addf %424, %5 : vector<4x64xf32>
    %426 = vector.extract_strided_slice %425 {offsets = [0, 0], sizes = [4, 32], strides = [1, 1]} : vector<4x64xf32> to vector<4x32xf32>
    %427 = vector.extract_strided_slice %425 {offsets = [0, 32], sizes = [4, 32], strides = [1, 1]} : vector<4x64xf32> to vector<4x32xf32>
    %cst_157 = arith.constant 0.000000e+00 : f32
    %428 = vector.broadcast %cst_157 : f32 to vector<4x32xf32>
    %429 = arith.maximumf %427, %428 : vector<4x32xf32>
    %430 = vector.broadcast %cst_157 : f32 to vector<4x32xf32>
    %431 = arith.subf %427, %430 : vector<4x32xf32>
    %432 = arith.cmpf one, %431, %431 : vector<4x32xf32>
    %433 = vector.broadcast %cst_157 : f32 to vector<4x32xf32>
    %434 = arith.addf %427, %433 : vector<4x32xf32>
    %435 = math.absf %431 : vector<4x32xf32>
    %cst_158 = arith.constant 0.000000e+00 : f32
    %436 = vector.broadcast %cst_158 : f32 to vector<4x32xf32>
    %437 = arith.subf %436, %435 : vector<4x32xf32>
    %438 = math.exp %437 : vector<4x32xf32>
    %439 = math.log1p %438 : vector<4x32xf32>
    %440 = arith.addf %429, %439 : vector<4x32xf32>
    %441 = arith.select %432, %434, %440 : vector<4x32xi1>, vector<4x32xf32>
    %cst_159 = arith.constant 1.1920929E-7 : f32
    %442 = vector.broadcast %cst_159 : f32 to vector<4x32xf32>
    %443 = arith.addf %441, %442 : vector<4x32xf32>
    %cst_160 = arith.constant dense<0.000000e+00> : vector<4x128xf32>
    %444 = tpu.matmul %307, %79, %cst_160 {dimension_numbers = #tpu.dot_dimension_numbers<[1], [0], [0], [1], [0, 0, 1, 1], [], []>} : vector<4x32xf32>, vector<32x128xf32>, vector<4x128xf32> -> vector<4x128xf32>
    %445 = arith.addf %73, %444 : vector<4x128xf32>
    %cst_161 = arith.constant dense<0.000000e+00> : vector<4x128xf32>
    %446 = tpu.matmul %288, %85, %cst_161 {dimension_numbers = #tpu.dot_dimension_numbers<[1], [0], [0], [1], [0, 0, 1, 1], [], []>} : vector<4x32xf32>, vector<32x128xf32>, vector<4x128xf32> -> vector<4x128xf32>
    %447 = arith.addf %445, %446 : vector<4x128xf32>
    %448 = arith.negf %447 : vector<4x128xf32>
    %449 = math.exp %448 : vector<4x128xf32>
    %cst_162 = arith.constant 1.000000e+00 : f32
    %450 = vector.broadcast %cst_162 : f32 to vector<4x128xf32>
    %451 = arith.addf %450, %449 : vector<4x128xf32>
    %452 = arith.divf %450, %451 : vector<4x128xf32>
    %453 = math.tanh %447 : vector<4x128xf32>
    %454 = vector.extract_strided_slice %452 {offsets = [0, 32], sizes = [4, 32], strides = [1, 1]} : vector<4x128xf32> to vector<4x32xf32>
    %455 = arith.mulf %454, %285 : vector<4x32xf32>
    %456 = vector.extract_strided_slice %452 {offsets = [0, 0], sizes = [4, 32], strides = [1, 1]} : vector<4x128xf32> to vector<4x32xf32>
    %457 = vector.extract_strided_slice %453 {offsets = [0, 64], sizes = [4, 32], strides = [1, 1]} : vector<4x128xf32> to vector<4x32xf32>
    %458 = arith.mulf %456, %457 : vector<4x32xf32>
    %459 = arith.addf %455, %458 : vector<4x32xf32>
    %460 = vector.extract_strided_slice %452 {offsets = [0, 96], sizes = [4, 32], strides = [1, 1]} : vector<4x128xf32> to vector<4x32xf32>
    %461 = math.tanh %459 : vector<4x32xf32>
    %462 = arith.mulf %460, %461 : vector<4x32xf32>
    %cst_163 = arith.constant dense<0.000000e+00> : vector<4x128xf32>
    %463 = tpu.matmul %462, %91, %cst_163 {dimension_numbers = #tpu.dot_dimension_numbers<[1], [0], [0], [1], [0, 0, 1, 1], [], []>} : vector<4x32xf32>, vector<32x128xf32>, vector<4x128xf32> -> vector<4x128xf32>
    %464 = arith.addf %57, %463 : vector<4x128xf32>
    %cst_164 = arith.constant dense<0.000000e+00> : vector<4x128xf32>
    %465 = tpu.matmul %307, %97, %cst_164 {dimension_numbers = #tpu.dot_dimension_numbers<[1], [0], [0], [1], [0, 0, 1, 1], [], []>} : vector<4x32xf32>, vector<32x128xf32>, vector<4x128xf32> -> vector<4x128xf32>
    %466 = arith.addf %464, %465 : vector<4x128xf32>
    %467 = arith.negf %466 : vector<4x128xf32>
    %468 = math.exp %467 : vector<4x128xf32>
    %cst_165 = arith.constant 1.000000e+00 : f32
    %469 = vector.broadcast %cst_165 : f32 to vector<4x128xf32>
    %470 = arith.addf %469, %468 : vector<4x128xf32>
    %471 = arith.divf %469, %470 : vector<4x128xf32>
    %472 = math.tanh %466 : vector<4x128xf32>
    %473 = vector.extract_strided_slice %471 {offsets = [0, 32], sizes = [4, 32], strides = [1, 1]} : vector<4x128xf32> to vector<4x32xf32>
    %474 = arith.mulf %473, %304 : vector<4x32xf32>
    %475 = vector.extract_strided_slice %471 {offsets = [0, 0], sizes = [4, 32], strides = [1, 1]} : vector<4x128xf32> to vector<4x32xf32>
    %476 = vector.extract_strided_slice %472 {offsets = [0, 64], sizes = [4, 32], strides = [1, 1]} : vector<4x128xf32> to vector<4x32xf32>
    %477 = arith.mulf %475, %476 : vector<4x32xf32>
    %478 = arith.addf %474, %477 : vector<4x32xf32>
    %479 = vector.extract_strided_slice %471 {offsets = [0, 96], sizes = [4, 32], strides = [1, 1]} : vector<4x128xf32> to vector<4x32xf32>
    %480 = math.tanh %478 : vector<4x32xf32>
    %481 = arith.mulf %479, %480 : vector<4x32xf32>
    %cst_166 = arith.constant dense<0.000000e+00> : vector<4x64xf32>
    %482 = tpu.matmul %481, %2, %cst_166 {dimension_numbers = #tpu.dot_dimension_numbers<[1], [0], [0], [1], [0, 0, 1, 1], [], []>} : vector<4x32xf32>, vector<32x64xf32>, vector<4x64xf32> -> vector<4x64xf32>
    %483 = arith.addf %482, %5 : vector<4x64xf32>
    %484 = vector.extract_strided_slice %483 {offsets = [0, 0], sizes = [4, 32], strides = [1, 1]} : vector<4x64xf32> to vector<4x32xf32>
    %485 = vector.extract_strided_slice %483 {offsets = [0, 32], sizes = [4, 32], strides = [1, 1]} : vector<4x64xf32> to vector<4x32xf32>
    %cst_167 = arith.constant 0.000000e+00 : f32
    %486 = vector.broadcast %cst_167 : f32 to vector<4x32xf32>
    %487 = arith.maximumf %485, %486 : vector<4x32xf32>
    %488 = vector.broadcast %cst_167 : f32 to vector<4x32xf32>
    %489 = arith.subf %485, %488 : vector<4x32xf32>
    %490 = arith.cmpf one, %489, %489 : vector<4x32xf32>
    %491 = vector.broadcast %cst_167 : f32 to vector<4x32xf32>
    %492 = arith.addf %485, %491 : vector<4x32xf32>
    %493 = math.absf %489 : vector<4x32xf32>
    %cst_168 = arith.constant 0.000000e+00 : f32
    %494 = vector.broadcast %cst_168 : f32 to vector<4x32xf32>
    %495 = arith.subf %494, %493 : vector<4x32xf32>
    %496 = math.exp %495 : vector<4x32xf32>
    %497 = math.log1p %496 : vector<4x32xf32>
    %498 = arith.addf %487, %497 : vector<4x32xf32>
    %499 = arith.select %490, %492, %498 : vector<4x32xi1>, vector<4x32xf32>
    %cst_169 = arith.constant 1.1920929E-7 : f32
    %500 = vector.broadcast %cst_169 : f32 to vector<4x32xf32>
    %501 = arith.addf %499, %500 : vector<4x32xf32>
    %cst_170 = arith.constant dense<0.000000e+00> : vector<4x128xf32>
    %502 = tpu.matmul %365, %81, %cst_170 {dimension_numbers = #tpu.dot_dimension_numbers<[1], [0], [0], [1], [0, 0, 1, 1], [], []>} : vector<4x32xf32>, vector<32x128xf32>, vector<4x128xf32> -> vector<4x128xf32>
    %503 = arith.addf %75, %502 : vector<4x128xf32>
    %cst_171 = arith.constant dense<0.000000e+00> : vector<4x128xf32>
    %504 = tpu.matmul %346, %87, %cst_171 {dimension_numbers = #tpu.dot_dimension_numbers<[1], [0], [0], [1], [0, 0, 1, 1], [], []>} : vector<4x32xf32>, vector<32x128xf32>, vector<4x128xf32> -> vector<4x128xf32>
    %505 = arith.addf %503, %504 : vector<4x128xf32>
    %506 = arith.negf %505 : vector<4x128xf32>
    %507 = math.exp %506 : vector<4x128xf32>
    %cst_172 = arith.constant 1.000000e+00 : f32
    %508 = vector.broadcast %cst_172 : f32 to vector<4x128xf32>
    %509 = arith.addf %508, %507 : vector<4x128xf32>
    %510 = arith.divf %508, %509 : vector<4x128xf32>
    %511 = math.tanh %505 : vector<4x128xf32>
    %512 = vector.extract_strided_slice %510 {offsets = [0, 32], sizes = [4, 32], strides = [1, 1]} : vector<4x128xf32> to vector<4x32xf32>
    %513 = arith.mulf %512, %343 : vector<4x32xf32>
    %514 = vector.extract_strided_slice %510 {offsets = [0, 0], sizes = [4, 32], strides = [1, 1]} : vector<4x128xf32> to vector<4x32xf32>
    %515 = vector.extract_strided_slice %511 {offsets = [0, 64], sizes = [4, 32], strides = [1, 1]} : vector<4x128xf32> to vector<4x32xf32>
    %516 = arith.mulf %514, %515 : vector<4x32xf32>
    %517 = arith.addf %513, %516 : vector<4x32xf32>
    %518 = vector.extract_strided_slice %510 {offsets = [0, 96], sizes = [4, 32], strides = [1, 1]} : vector<4x128xf32> to vector<4x32xf32>
    %519 = math.tanh %517 : vector<4x32xf32>
    %520 = arith.mulf %518, %519 : vector<4x32xf32>
    %cst_173 = arith.constant dense<0.000000e+00> : vector<4x128xf32>
    %521 = tpu.matmul %520, %93, %cst_173 {dimension_numbers = #tpu.dot_dimension_numbers<[1], [0], [0], [1], [0, 0, 1, 1], [], []>} : vector<4x32xf32>, vector<32x128xf32>, vector<4x128xf32> -> vector<4x128xf32>
    %522 = arith.addf %61, %521 : vector<4x128xf32>
    %cst_174 = arith.constant dense<0.000000e+00> : vector<4x128xf32>
    %523 = tpu.matmul %365, %99, %cst_174 {dimension_numbers = #tpu.dot_dimension_numbers<[1], [0], [0], [1], [0, 0, 1, 1], [], []>} : vector<4x32xf32>, vector<32x128xf32>, vector<4x128xf32> -> vector<4x128xf32>
    %524 = arith.addf %522, %523 : vector<4x128xf32>
    %525 = arith.negf %524 : vector<4x128xf32>
    %526 = math.exp %525 : vector<4x128xf32>
    %cst_175 = arith.constant 1.000000e+00 : f32
    %527 = vector.broadcast %cst_175 : f32 to vector<4x128xf32>
    %528 = arith.addf %527, %526 : vector<4x128xf32>
    %529 = arith.divf %527, %528 : vector<4x128xf32>
    %530 = math.tanh %524 : vector<4x128xf32>
    %531 = vector.extract_strided_slice %529 {offsets = [0, 32], sizes = [4, 32], strides = [1, 1]} : vector<4x128xf32> to vector<4x32xf32>
    %532 = arith.mulf %531, %362 : vector<4x32xf32>
    %533 = vector.extract_strided_slice %529 {offsets = [0, 0], sizes = [4, 32], strides = [1, 1]} : vector<4x128xf32> to vector<4x32xf32>
    %534 = vector.extract_strided_slice %530 {offsets = [0, 64], sizes = [4, 32], strides = [1, 1]} : vector<4x128xf32> to vector<4x32xf32>
    %535 = arith.mulf %533, %534 : vector<4x32xf32>
    %536 = arith.addf %532, %535 : vector<4x32xf32>
    %537 = vector.extract_strided_slice %529 {offsets = [0, 96], sizes = [4, 32], strides = [1, 1]} : vector<4x128xf32> to vector<4x32xf32>
    %538 = math.tanh %536 : vector<4x32xf32>
    %539 = arith.mulf %537, %538 : vector<4x32xf32>
    %cst_176 = arith.constant dense<0.000000e+00> : vector<4x64xf32>
    %540 = tpu.matmul %539, %2, %cst_176 {dimension_numbers = #tpu.dot_dimension_numbers<[1], [0], [0], [1], [0, 0, 1, 1], [], []>} : vector<4x32xf32>, vector<32x64xf32>, vector<4x64xf32> -> vector<4x64xf32>
    %541 = arith.addf %540, %5 : vector<4x64xf32>
    %542 = vector.extract_strided_slice %541 {offsets = [0, 0], sizes = [4, 32], strides = [1, 1]} : vector<4x64xf32> to vector<4x32xf32>
    %543 = vector.extract_strided_slice %541 {offsets = [0, 32], sizes = [4, 32], strides = [1, 1]} : vector<4x64xf32> to vector<4x32xf32>
    %cst_177 = arith.constant 0.000000e+00 : f32
    %544 = vector.broadcast %cst_177 : f32 to vector<4x32xf32>
    %545 = arith.maximumf %543, %544 : vector<4x32xf32>
    %546 = vector.broadcast %cst_177 : f32 to vector<4x32xf32>
    %547 = arith.subf %543, %546 : vector<4x32xf32>
    %548 = arith.cmpf one, %547, %547 : vector<4x32xf32>
    %549 = vector.broadcast %cst_177 : f32 to vector<4x32xf32>
    %550 = arith.addf %543, %549 : vector<4x32xf32>
    %551 = math.absf %547 : vector<4x32xf32>
    %cst_178 = arith.constant 0.000000e+00 : f32
    %552 = vector.broadcast %cst_178 : f32 to vector<4x32xf32>
    %553 = arith.subf %552, %551 : vector<4x32xf32>
    %554 = math.exp %553 : vector<4x32xf32>
    %555 = math.log1p %554 : vector<4x32xf32>
    %556 = arith.addf %545, %555 : vector<4x32xf32>
    %557 = arith.select %548, %550, %556 : vector<4x32xi1>, vector<4x32xf32>
    %cst_179 = arith.constant 1.1920929E-7 : f32
    %558 = vector.broadcast %cst_179 : f32 to vector<4x32xf32>
    %559 = arith.addf %557, %558 : vector<4x32xf32>
    %cst_180 = arith.constant dense<0.000000e+00> : vector<4x128xf32>
    %560 = tpu.matmul %423, %83, %cst_180 {dimension_numbers = #tpu.dot_dimension_numbers<[1], [0], [0], [1], [0, 0, 1, 1], [], []>} : vector<4x32xf32>, vector<32x128xf32>, vector<4x128xf32> -> vector<4x128xf32>
    %561 = arith.addf %77, %560 : vector<4x128xf32>
    %cst_181 = arith.constant dense<0.000000e+00> : vector<4x128xf32>
    %562 = tpu.matmul %404, %89, %cst_181 {dimension_numbers = #tpu.dot_dimension_numbers<[1], [0], [0], [1], [0, 0, 1, 1], [], []>} : vector<4x32xf32>, vector<32x128xf32>, vector<4x128xf32> -> vector<4x128xf32>
    %563 = arith.addf %561, %562 : vector<4x128xf32>
    %564 = arith.negf %563 : vector<4x128xf32>
    %565 = math.exp %564 : vector<4x128xf32>
    %cst_182 = arith.constant 1.000000e+00 : f32
    %566 = vector.broadcast %cst_182 : f32 to vector<4x128xf32>
    %567 = arith.addf %566, %565 : vector<4x128xf32>
    %568 = arith.divf %566, %567 : vector<4x128xf32>
    %569 = math.tanh %563 : vector<4x128xf32>
    %570 = vector.extract_strided_slice %568 {offsets = [0, 32], sizes = [4, 32], strides = [1, 1]} : vector<4x128xf32> to vector<4x32xf32>
    %571 = arith.mulf %570, %401 : vector<4x32xf32>
    %572 = vector.extract_strided_slice %568 {offsets = [0, 0], sizes = [4, 32], strides = [1, 1]} : vector<4x128xf32> to vector<4x32xf32>
    %573 = vector.extract_strided_slice %569 {offsets = [0, 64], sizes = [4, 32], strides = [1, 1]} : vector<4x128xf32> to vector<4x32xf32>
    %574 = arith.mulf %572, %573 : vector<4x32xf32>
    %575 = arith.addf %571, %574 : vector<4x32xf32>
    %576 = vector.extract_strided_slice %568 {offsets = [0, 96], sizes = [4, 32], strides = [1, 1]} : vector<4x128xf32> to vector<4x32xf32>
    %577 = math.tanh %575 : vector<4x32xf32>
    %578 = arith.mulf %576, %577 : vector<4x32xf32>
    %cst_183 = arith.constant dense<0.000000e+00> : vector<4x128xf32>
    %579 = tpu.matmul %578, %95, %cst_183 {dimension_numbers = #tpu.dot_dimension_numbers<[1], [0], [0], [1], [0, 0, 1, 1], [], []>} : vector<4x32xf32>, vector<32x128xf32>, vector<4x128xf32> -> vector<4x128xf32>
    %580 = arith.addf %65, %579 : vector<4x128xf32>
    %cst_184 = arith.constant dense<0.000000e+00> : vector<4x128xf32>
    %581 = tpu.matmul %423, %101, %cst_184 {dimension_numbers = #tpu.dot_dimension_numbers<[1], [0], [0], [1], [0, 0, 1, 1], [], []>} : vector<4x32xf32>, vector<32x128xf32>, vector<4x128xf32> -> vector<4x128xf32>
    %582 = arith.addf %580, %581 : vector<4x128xf32>
    %583 = arith.negf %582 : vector<4x128xf32>
    %584 = math.exp %583 : vector<4x128xf32>
    %cst_185 = arith.constant 1.000000e+00 : f32
    %585 = vector.broadcast %cst_185 : f32 to vector<4x128xf32>
    %586 = arith.addf %585, %584 : vector<4x128xf32>
    %587 = arith.divf %585, %586 : vector<4x128xf32>
    %588 = math.tanh %582 : vector<4x128xf32>
    %589 = vector.extract_strided_slice %587 {offsets = [0, 32], sizes = [4, 32], strides = [1, 1]} : vector<4x128xf32> to vector<4x32xf32>
    %590 = arith.mulf %589, %420 : vector<4x32xf32>
    %591 = vector.extract_strided_slice %587 {offsets = [0, 0], sizes = [4, 32], strides = [1, 1]} : vector<4x128xf32> to vector<4x32xf32>
    %592 = vector.extract_strided_slice %588 {offsets = [0, 64], sizes = [4, 32], strides = [1, 1]} : vector<4x128xf32> to vector<4x32xf32>
    %593 = arith.mulf %591, %592 : vector<4x32xf32>
    %594 = arith.addf %590, %593 : vector<4x32xf32>
    %595 = vector.extract_strided_slice %587 {offsets = [0, 96], sizes = [4, 32], strides = [1, 1]} : vector<4x128xf32> to vector<4x32xf32>
    %596 = math.tanh %594 : vector<4x32xf32>
    %597 = arith.mulf %595, %596 : vector<4x32xf32>
    %cst_186 = arith.constant dense<0.000000e+00> : vector<4x64xf32>
    %598 = tpu.matmul %597, %2, %cst_186 {dimension_numbers = #tpu.dot_dimension_numbers<[1], [0], [0], [1], [0, 0, 1, 1], [], []>} : vector<4x32xf32>, vector<32x64xf32>, vector<4x64xf32> -> vector<4x64xf32>
    %599 = arith.addf %598, %5 : vector<4x64xf32>
    %600 = vector.extract_strided_slice %599 {offsets = [0, 0], sizes = [4, 32], strides = [1, 1]} : vector<4x64xf32> to vector<4x32xf32>
    %601 = vector.extract_strided_slice %599 {offsets = [0, 32], sizes = [4, 32], strides = [1, 1]} : vector<4x64xf32> to vector<4x32xf32>
    %cst_187 = arith.constant 0.000000e+00 : f32
    %602 = vector.broadcast %cst_187 : f32 to vector<4x32xf32>
    %603 = arith.maximumf %601, %602 : vector<4x32xf32>
    %604 = vector.broadcast %cst_187 : f32 to vector<4x32xf32>
    %605 = arith.subf %601, %604 : vector<4x32xf32>
    %606 = arith.cmpf one, %605, %605 : vector<4x32xf32>
    %607 = vector.broadcast %cst_187 : f32 to vector<4x32xf32>
    %608 = arith.addf %601, %607 : vector<4x32xf32>
    %609 = math.absf %605 : vector<4x32xf32>
    %cst_188 = arith.constant 0.000000e+00 : f32
    %610 = vector.broadcast %cst_188 : f32 to vector<4x32xf32>
    %611 = arith.subf %610, %609 : vector<4x32xf32>
    %612 = math.exp %611 : vector<4x32xf32>
    %613 = math.log1p %612 : vector<4x32xf32>
    %614 = arith.addf %603, %613 : vector<4x32xf32>
    %615 = arith.select %606, %608, %614 : vector<4x32xi1>, vector<4x32xf32>
    %cst_189 = arith.constant 1.1920929E-7 : f32
    %616 = vector.broadcast %cst_189 : f32 to vector<4x32xf32>
    %617 = arith.addf %615, %616 : vector<4x32xf32>
    %cst_190 = arith.constant dense<0.000000e+00> : vector<4x128xf32>
    %618 = tpu.matmul %481, %79, %cst_190 {dimension_numbers = #tpu.dot_dimension_numbers<[1], [0], [0], [1], [0, 0, 1, 1], [], []>} : vector<4x32xf32>, vector<32x128xf32>, vector<4x128xf32> -> vector<4x128xf32>
    %619 = arith.addf %73, %618 : vector<4x128xf32>
    %cst_191 = arith.constant dense<0.000000e+00> : vector<4x128xf32>
    %620 = tpu.matmul %462, %85, %cst_191 {dimension_numbers = #tpu.dot_dimension_numbers<[1], [0], [0], [1], [0, 0, 1, 1], [], []>} : vector<4x32xf32>, vector<32x128xf32>, vector<4x128xf32> -> vector<4x128xf32>
    %621 = arith.addf %619, %620 : vector<4x128xf32>
    %622 = arith.negf %621 : vector<4x128xf32>
    %623 = math.exp %622 : vector<4x128xf32>
    %cst_192 = arith.constant 1.000000e+00 : f32
    %624 = vector.broadcast %cst_192 : f32 to vector<4x128xf32>
    %625 = arith.addf %624, %623 : vector<4x128xf32>
    %626 = arith.divf %624, %625 : vector<4x128xf32>
    %627 = math.tanh %621 : vector<4x128xf32>
    %628 = vector.extract_strided_slice %626 {offsets = [0, 32], sizes = [4, 32], strides = [1, 1]} : vector<4x128xf32> to vector<4x32xf32>
    %629 = arith.mulf %628, %459 : vector<4x32xf32>
    %630 = vector.extract_strided_slice %626 {offsets = [0, 0], sizes = [4, 32], strides = [1, 1]} : vector<4x128xf32> to vector<4x32xf32>
    %631 = vector.extract_strided_slice %627 {offsets = [0, 64], sizes = [4, 32], strides = [1, 1]} : vector<4x128xf32> to vector<4x32xf32>
    %632 = arith.mulf %630, %631 : vector<4x32xf32>
    %633 = arith.addf %629, %632 : vector<4x32xf32>
    %634 = vector.extract_strided_slice %626 {offsets = [0, 96], sizes = [4, 32], strides = [1, 1]} : vector<4x128xf32> to vector<4x32xf32>
    %635 = math.tanh %633 : vector<4x32xf32>
    %636 = arith.mulf %634, %635 : vector<4x32xf32>
    %cst_193 = arith.constant dense<0.000000e+00> : vector<4x128xf32>
    %637 = tpu.matmul %636, %91, %cst_193 {dimension_numbers = #tpu.dot_dimension_numbers<[1], [0], [0], [1], [0, 0, 1, 1], [], []>} : vector<4x32xf32>, vector<32x128xf32>, vector<4x128xf32> -> vector<4x128xf32>
    %638 = arith.addf %57, %637 : vector<4x128xf32>
    %cst_194 = arith.constant dense<0.000000e+00> : vector<4x128xf32>
    %639 = tpu.matmul %481, %97, %cst_194 {dimension_numbers = #tpu.dot_dimension_numbers<[1], [0], [0], [1], [0, 0, 1, 1], [], []>} : vector<4x32xf32>, vector<32x128xf32>, vector<4x128xf32> -> vector<4x128xf32>
    %640 = arith.addf %638, %639 : vector<4x128xf32>
    %641 = arith.negf %640 : vector<4x128xf32>
    %642 = math.exp %641 : vector<4x128xf32>
    %cst_195 = arith.constant 1.000000e+00 : f32
    %643 = vector.broadcast %cst_195 : f32 to vector<4x128xf32>
    %644 = arith.addf %643, %642 : vector<4x128xf32>
    %645 = arith.divf %643, %644 : vector<4x128xf32>
    %646 = math.tanh %640 : vector<4x128xf32>
    %647 = vector.extract_strided_slice %645 {offsets = [0, 32], sizes = [4, 32], strides = [1, 1]} : vector<4x128xf32> to vector<4x32xf32>
    %648 = arith.mulf %647, %478 : vector<4x32xf32>
    %649 = vector.extract_strided_slice %645 {offsets = [0, 0], sizes = [4, 32], strides = [1, 1]} : vector<4x128xf32> to vector<4x32xf32>
    %650 = vector.extract_strided_slice %646 {offsets = [0, 64], sizes = [4, 32], strides = [1, 1]} : vector<4x128xf32> to vector<4x32xf32>
    %651 = arith.mulf %649, %650 : vector<4x32xf32>
    %652 = arith.addf %648, %651 : vector<4x32xf32>
    %653 = vector.extract_strided_slice %645 {offsets = [0, 96], sizes = [4, 32], strides = [1, 1]} : vector<4x128xf32> to vector<4x32xf32>
    %654 = math.tanh %652 : vector<4x32xf32>
    %655 = arith.mulf %653, %654 : vector<4x32xf32>
    %cst_196 = arith.constant dense<0.000000e+00> : vector<4x64xf32>
    %656 = tpu.matmul %655, %2, %cst_196 {dimension_numbers = #tpu.dot_dimension_numbers<[1], [0], [0], [1], [0, 0, 1, 1], [], []>} : vector<4x32xf32>, vector<32x64xf32>, vector<4x64xf32> -> vector<4x64xf32>
    %657 = arith.addf %656, %5 : vector<4x64xf32>
    %658 = vector.extract_strided_slice %657 {offsets = [0, 0], sizes = [4, 32], strides = [1, 1]} : vector<4x64xf32> to vector<4x32xf32>
    %659 = vector.extract_strided_slice %657 {offsets = [0, 32], sizes = [4, 32], strides = [1, 1]} : vector<4x64xf32> to vector<4x32xf32>
    %cst_197 = arith.constant 0.000000e+00 : f32
    %660 = vector.broadcast %cst_197 : f32 to vector<4x32xf32>
    %661 = arith.maximumf %659, %660 : vector<4x32xf32>
    %662 = vector.broadcast %cst_197 : f32 to vector<4x32xf32>
    %663 = arith.subf %659, %662 : vector<4x32xf32>
    %664 = arith.cmpf one, %663, %663 : vector<4x32xf32>
    %665 = vector.broadcast %cst_197 : f32 to vector<4x32xf32>
    %666 = arith.addf %659, %665 : vector<4x32xf32>
    %667 = math.absf %663 : vector<4x32xf32>
    %cst_198 = arith.constant 0.000000e+00 : f32
    %668 = vector.broadcast %cst_198 : f32 to vector<4x32xf32>
    %669 = arith.subf %668, %667 : vector<4x32xf32>
    %670 = math.exp %669 : vector<4x32xf32>
    %671 = math.log1p %670 : vector<4x32xf32>
    %672 = arith.addf %661, %671 : vector<4x32xf32>
    %673 = arith.select %664, %666, %672 : vector<4x32xi1>, vector<4x32xf32>
    %cst_199 = arith.constant 1.1920929E-7 : f32
    %674 = vector.broadcast %cst_199 : f32 to vector<4x32xf32>
    %675 = arith.addf %673, %674 : vector<4x32xf32>
    %cst_200 = arith.constant dense<0.000000e+00> : vector<4x128xf32>
    %676 = tpu.matmul %539, %81, %cst_200 {dimension_numbers = #tpu.dot_dimension_numbers<[1], [0], [0], [1], [0, 0, 1, 1], [], []>} : vector<4x32xf32>, vector<32x128xf32>, vector<4x128xf32> -> vector<4x128xf32>
    %677 = arith.addf %75, %676 : vector<4x128xf32>
    %cst_201 = arith.constant dense<0.000000e+00> : vector<4x128xf32>
    %678 = tpu.matmul %520, %87, %cst_201 {dimension_numbers = #tpu.dot_dimension_numbers<[1], [0], [0], [1], [0, 0, 1, 1], [], []>} : vector<4x32xf32>, vector<32x128xf32>, vector<4x128xf32> -> vector<4x128xf32>
    %679 = arith.addf %677, %678 : vector<4x128xf32>
    %680 = arith.negf %679 : vector<4x128xf32>
    %681 = math.exp %680 : vector<4x128xf32>
    %cst_202 = arith.constant 1.000000e+00 : f32
    %682 = vector.broadcast %cst_202 : f32 to vector<4x128xf32>
    %683 = arith.addf %682, %681 : vector<4x128xf32>
    %684 = arith.divf %682, %683 : vector<4x128xf32>
    %685 = math.tanh %679 : vector<4x128xf32>
    %686 = vector.extract_strided_slice %684 {offsets = [0, 32], sizes = [4, 32], strides = [1, 1]} : vector<4x128xf32> to vector<4x32xf32>
    %687 = arith.mulf %686, %517 : vector<4x32xf32>
    %688 = vector.extract_strided_slice %684 {offsets = [0, 0], sizes = [4, 32], strides = [1, 1]} : vector<4x128xf32> to vector<4x32xf32>
    %689 = vector.extract_strided_slice %685 {offsets = [0, 64], sizes = [4, 32], strides = [1, 1]} : vector<4x128xf32> to vector<4x32xf32>
    %690 = arith.mulf %688, %689 : vector<4x32xf32>
    %691 = arith.addf %687, %690 : vector<4x32xf32>
    %692 = vector.extract_strided_slice %684 {offsets = [0, 96], sizes = [4, 32], strides = [1, 1]} : vector<4x128xf32> to vector<4x32xf32>
    %693 = math.tanh %691 : vector<4x32xf32>
    %694 = arith.mulf %692, %693 : vector<4x32xf32>
    %cst_203 = arith.constant dense<0.000000e+00> : vector<4x128xf32>
    %695 = tpu.matmul %694, %93, %cst_203 {dimension_numbers = #tpu.dot_dimension_numbers<[1], [0], [0], [1], [0, 0, 1, 1], [], []>} : vector<4x32xf32>, vector<32x128xf32>, vector<4x128xf32> -> vector<4x128xf32>
    %696 = arith.addf %61, %695 : vector<4x128xf32>
    %cst_204 = arith.constant dense<0.000000e+00> : vector<4x128xf32>
    %697 = tpu.matmul %539, %99, %cst_204 {dimension_numbers = #tpu.dot_dimension_numbers<[1], [0], [0], [1], [0, 0, 1, 1], [], []>} : vector<4x32xf32>, vector<32x128xf32>, vector<4x128xf32> -> vector<4x128xf32>
    %698 = arith.addf %696, %697 : vector<4x128xf32>
    %699 = arith.negf %698 : vector<4x128xf32>
    %700 = math.exp %699 : vector<4x128xf32>
    %cst_205 = arith.constant 1.000000e+00 : f32
    %701 = vector.broadcast %cst_205 : f32 to vector<4x128xf32>
    %702 = arith.addf %701, %700 : vector<4x128xf32>
    %703 = arith.divf %701, %702 : vector<4x128xf32>
    %704 = math.tanh %698 : vector<4x128xf32>
    %705 = vector.extract_strided_slice %703 {offsets = [0, 32], sizes = [4, 32], strides = [1, 1]} : vector<4x128xf32> to vector<4x32xf32>
    %706 = arith.mulf %705, %536 : vector<4x32xf32>
    %707 = vector.extract_strided_slice %703 {offsets = [0, 0], sizes = [4, 32], strides = [1, 1]} : vector<4x128xf32> to vector<4x32xf32>
    %708 = vector.extract_strided_slice %704 {offsets = [0, 64], sizes = [4, 32], strides = [1, 1]} : vector<4x128xf32> to vector<4x32xf32>
    %709 = arith.mulf %707, %708 : vector<4x32xf32>
    %710 = arith.addf %706, %709 : vector<4x32xf32>
    %711 = vector.extract_strided_slice %703 {offsets = [0, 96], sizes = [4, 32], strides = [1, 1]} : vector<4x128xf32> to vector<4x32xf32>
    %712 = math.tanh %710 : vector<4x32xf32>
    %713 = arith.mulf %711, %712 : vector<4x32xf32>
    %cst_206 = arith.constant dense<0.000000e+00> : vector<4x64xf32>
    %714 = tpu.matmul %713, %2, %cst_206 {dimension_numbers = #tpu.dot_dimension_numbers<[1], [0], [0], [1], [0, 0, 1, 1], [], []>} : vector<4x32xf32>, vector<32x64xf32>, vector<4x64xf32> -> vector<4x64xf32>
    %715 = arith.addf %714, %5 : vector<4x64xf32>
    %716 = vector.extract_strided_slice %715 {offsets = [0, 0], sizes = [4, 32], strides = [1, 1]} : vector<4x64xf32> to vector<4x32xf32>
    %717 = vector.extract_strided_slice %715 {offsets = [0, 32], sizes = [4, 32], strides = [1, 1]} : vector<4x64xf32> to vector<4x32xf32>
    %cst_207 = arith.constant 0.000000e+00 : f32
    %718 = vector.broadcast %cst_207 : f32 to vector<4x32xf32>
    %719 = arith.maximumf %717, %718 : vector<4x32xf32>
    %720 = vector.broadcast %cst_207 : f32 to vector<4x32xf32>
    %721 = arith.subf %717, %720 : vector<4x32xf32>
    %722 = arith.cmpf one, %721, %721 : vector<4x32xf32>
    %723 = vector.broadcast %cst_207 : f32 to vector<4x32xf32>
    %724 = arith.addf %717, %723 : vector<4x32xf32>
    %725 = math.absf %721 : vector<4x32xf32>
    %cst_208 = arith.constant 0.000000e+00 : f32
    %726 = vector.broadcast %cst_208 : f32 to vector<4x32xf32>
    %727 = arith.subf %726, %725 : vector<4x32xf32>
    %728 = math.exp %727 : vector<4x32xf32>
    %729 = math.log1p %728 : vector<4x32xf32>
    %730 = arith.addf %719, %729 : vector<4x32xf32>
    %731 = arith.select %722, %724, %730 : vector<4x32xi1>, vector<4x32xf32>
    %cst_209 = arith.constant 1.1920929E-7 : f32
    %732 = vector.broadcast %cst_209 : f32 to vector<4x32xf32>
    %733 = arith.addf %731, %732 : vector<4x32xf32>
    %cst_210 = arith.constant dense<0.000000e+00> : vector<4x128xf32>
    %734 = tpu.matmul %597, %83, %cst_210 {dimension_numbers = #tpu.dot_dimension_numbers<[1], [0], [0], [1], [0, 0, 1, 1], [], []>} : vector<4x32xf32>, vector<32x128xf32>, vector<4x128xf32> -> vector<4x128xf32>
    %735 = arith.addf %77, %734 : vector<4x128xf32>
    %cst_211 = arith.constant dense<0.000000e+00> : vector<4x128xf32>
    %736 = tpu.matmul %578, %89, %cst_211 {dimension_numbers = #tpu.dot_dimension_numbers<[1], [0], [0], [1], [0, 0, 1, 1], [], []>} : vector<4x32xf32>, vector<32x128xf32>, vector<4x128xf32> -> vector<4x128xf32>
    %737 = arith.addf %735, %736 : vector<4x128xf32>
    %738 = arith.negf %737 : vector<4x128xf32>
    %739 = math.exp %738 : vector<4x128xf32>
    %cst_212 = arith.constant 1.000000e+00 : f32
    %740 = vector.broadcast %cst_212 : f32 to vector<4x128xf32>
    %741 = arith.addf %740, %739 : vector<4x128xf32>
    %742 = arith.divf %740, %741 : vector<4x128xf32>
    %743 = math.tanh %737 : vector<4x128xf32>
    %744 = vector.extract_strided_slice %742 {offsets = [0, 32], sizes = [4, 32], strides = [1, 1]} : vector<4x128xf32> to vector<4x32xf32>
    %745 = arith.mulf %744, %575 : vector<4x32xf32>
    %746 = vector.extract_strided_slice %742 {offsets = [0, 0], sizes = [4, 32], strides = [1, 1]} : vector<4x128xf32> to vector<4x32xf32>
    %747 = vector.extract_strided_slice %743 {offsets = [0, 64], sizes = [4, 32], strides = [1, 1]} : vector<4x128xf32> to vector<4x32xf32>
    %748 = arith.mulf %746, %747 : vector<4x32xf32>
    %749 = arith.addf %745, %748 : vector<4x32xf32>
    %750 = vector.extract_strided_slice %742 {offsets = [0, 96], sizes = [4, 32], strides = [1, 1]} : vector<4x128xf32> to vector<4x32xf32>
    %751 = math.tanh %749 : vector<4x32xf32>
    %752 = arith.mulf %750, %751 : vector<4x32xf32>
    %cst_213 = arith.constant dense<0.000000e+00> : vector<4x128xf32>
    %753 = tpu.matmul %752, %95, %cst_213 {dimension_numbers = #tpu.dot_dimension_numbers<[1], [0], [0], [1], [0, 0, 1, 1], [], []>} : vector<4x32xf32>, vector<32x128xf32>, vector<4x128xf32> -> vector<4x128xf32>
    %754 = arith.addf %65, %753 : vector<4x128xf32>
    %cst_214 = arith.constant dense<0.000000e+00> : vector<4x128xf32>
    %755 = tpu.matmul %597, %101, %cst_214 {dimension_numbers = #tpu.dot_dimension_numbers<[1], [0], [0], [1], [0, 0, 1, 1], [], []>} : vector<4x32xf32>, vector<32x128xf32>, vector<4x128xf32> -> vector<4x128xf32>
    %756 = arith.addf %754, %755 : vector<4x128xf32>
    %757 = arith.negf %756 : vector<4x128xf32>
    %758 = math.exp %757 : vector<4x128xf32>
    %cst_215 = arith.constant 1.000000e+00 : f32
    %759 = vector.broadcast %cst_215 : f32 to vector<4x128xf32>
    %760 = arith.addf %759, %758 : vector<4x128xf32>
    %761 = arith.divf %759, %760 : vector<4x128xf32>
    %762 = math.tanh %756 : vector<4x128xf32>
    %763 = vector.extract_strided_slice %761 {offsets = [0, 32], sizes = [4, 32], strides = [1, 1]} : vector<4x128xf32> to vector<4x32xf32>
    %764 = arith.mulf %763, %594 : vector<4x32xf32>
    %765 = vector.extract_strided_slice %761 {offsets = [0, 0], sizes = [4, 32], strides = [1, 1]} : vector<4x128xf32> to vector<4x32xf32>
    %766 = vector.extract_strided_slice %762 {offsets = [0, 64], sizes = [4, 32], strides = [1, 1]} : vector<4x128xf32> to vector<4x32xf32>
    %767 = arith.mulf %765, %766 : vector<4x32xf32>
    %768 = arith.addf %764, %767 : vector<4x32xf32>
    %769 = vector.extract_strided_slice %761 {offsets = [0, 96], sizes = [4, 32], strides = [1, 1]} : vector<4x128xf32> to vector<4x32xf32>
    %770 = math.tanh %768 : vector<4x32xf32>
    %771 = arith.mulf %769, %770 : vector<4x32xf32>
    %cst_216 = arith.constant dense<0.000000e+00> : vector<4x64xf32>
    %772 = tpu.matmul %771, %2, %cst_216 {dimension_numbers = #tpu.dot_dimension_numbers<[1], [0], [0], [1], [0, 0, 1, 1], [], []>} : vector<4x32xf32>, vector<32x64xf32>, vector<4x64xf32> -> vector<4x64xf32>
    %773 = arith.addf %772, %5 : vector<4x64xf32>
    %774 = vector.extract_strided_slice %773 {offsets = [0, 0], sizes = [4, 32], strides = [1, 1]} : vector<4x64xf32> to vector<4x32xf32>
    %775 = vector.extract_strided_slice %773 {offsets = [0, 32], sizes = [4, 32], strides = [1, 1]} : vector<4x64xf32> to vector<4x32xf32>
    %cst_217 = arith.constant 0.000000e+00 : f32
    %776 = vector.broadcast %cst_217 : f32 to vector<4x32xf32>
    %777 = arith.maximumf %775, %776 : vector<4x32xf32>
    %778 = vector.broadcast %cst_217 : f32 to vector<4x32xf32>
    %779 = arith.subf %775, %778 : vector<4x32xf32>
    %780 = arith.cmpf one, %779, %779 : vector<4x32xf32>
    %781 = vector.broadcast %cst_217 : f32 to vector<4x32xf32>
    %782 = arith.addf %775, %781 : vector<4x32xf32>
    %783 = math.absf %779 : vector<4x32xf32>
    %cst_218 = arith.constant 0.000000e+00 : f32
    %784 = vector.broadcast %cst_218 : f32 to vector<4x32xf32>
    %785 = arith.subf %784, %783 : vector<4x32xf32>
    %786 = math.exp %785 : vector<4x32xf32>
    %787 = math.log1p %786 : vector<4x32xf32>
    %788 = arith.addf %777, %787 : vector<4x32xf32>
    %789 = arith.select %780, %782, %788 : vector<4x32xi1>, vector<4x32xf32>
    %cst_219 = arith.constant 1.1920929E-7 : f32
    %790 = vector.broadcast %cst_219 : f32 to vector<4x32xf32>
    %791 = arith.addf %789, %790 : vector<4x32xf32>
    %cst_220 = arith.constant dense<0.000000e+00> : vector<4x128xf32>
    %792 = tpu.matmul %655, %79, %cst_220 {dimension_numbers = #tpu.dot_dimension_numbers<[1], [0], [0], [1], [0, 0, 1, 1], [], []>} : vector<4x32xf32>, vector<32x128xf32>, vector<4x128xf32> -> vector<4x128xf32>
    %793 = arith.addf %73, %792 : vector<4x128xf32>
    %cst_221 = arith.constant dense<0.000000e+00> : vector<4x128xf32>
    %794 = tpu.matmul %636, %85, %cst_221 {dimension_numbers = #tpu.dot_dimension_numbers<[1], [0], [0], [1], [0, 0, 1, 1], [], []>} : vector<4x32xf32>, vector<32x128xf32>, vector<4x128xf32> -> vector<4x128xf32>
    %795 = arith.addf %793, %794 : vector<4x128xf32>
    %796 = arith.negf %795 : vector<4x128xf32>
    %797 = math.exp %796 : vector<4x128xf32>
    %cst_222 = arith.constant 1.000000e+00 : f32
    %798 = vector.broadcast %cst_222 : f32 to vector<4x128xf32>
    %799 = arith.addf %798, %797 : vector<4x128xf32>
    %800 = arith.divf %798, %799 : vector<4x128xf32>
    %801 = math.tanh %795 : vector<4x128xf32>
    %802 = vector.extract_strided_slice %800 {offsets = [0, 32], sizes = [4, 32], strides = [1, 1]} : vector<4x128xf32> to vector<4x32xf32>
    %803 = arith.mulf %802, %633 : vector<4x32xf32>
    %804 = vector.extract_strided_slice %800 {offsets = [0, 0], sizes = [4, 32], strides = [1, 1]} : vector<4x128xf32> to vector<4x32xf32>
    %805 = vector.extract_strided_slice %801 {offsets = [0, 64], sizes = [4, 32], strides = [1, 1]} : vector<4x128xf32> to vector<4x32xf32>
    %806 = arith.mulf %804, %805 : vector<4x32xf32>
    %807 = arith.addf %803, %806 : vector<4x32xf32>
    %808 = vector.extract_strided_slice %800 {offsets = [0, 96], sizes = [4, 32], strides = [1, 1]} : vector<4x128xf32> to vector<4x32xf32>
    %809 = math.tanh %807 : vector<4x32xf32>
    %810 = arith.mulf %808, %809 : vector<4x32xf32>
    %cst_223 = arith.constant dense<0.000000e+00> : vector<4x128xf32>
    %811 = tpu.matmul %810, %91, %cst_223 {dimension_numbers = #tpu.dot_dimension_numbers<[1], [0], [0], [1], [0, 0, 1, 1], [], []>} : vector<4x32xf32>, vector<32x128xf32>, vector<4x128xf32> -> vector<4x128xf32>
    %812 = arith.addf %57, %811 : vector<4x128xf32>
    %cst_224 = arith.constant dense<0.000000e+00> : vector<4x128xf32>
    %813 = tpu.matmul %655, %97, %cst_224 {dimension_numbers = #tpu.dot_dimension_numbers<[1], [0], [0], [1], [0, 0, 1, 1], [], []>} : vector<4x32xf32>, vector<32x128xf32>, vector<4x128xf32> -> vector<4x128xf32>
    %814 = arith.addf %812, %813 : vector<4x128xf32>
    %815 = arith.negf %814 : vector<4x128xf32>
    %816 = math.exp %815 : vector<4x128xf32>
    %cst_225 = arith.constant 1.000000e+00 : f32
    %817 = vector.broadcast %cst_225 : f32 to vector<4x128xf32>
    %818 = arith.addf %817, %816 : vector<4x128xf32>
    %819 = arith.divf %817, %818 : vector<4x128xf32>
    %820 = math.tanh %814 : vector<4x128xf32>
    %821 = vector.extract_strided_slice %819 {offsets = [0, 32], sizes = [4, 32], strides = [1, 1]} : vector<4x128xf32> to vector<4x32xf32>
    %822 = arith.mulf %821, %652 : vector<4x32xf32>
    %823 = vector.extract_strided_slice %819 {offsets = [0, 0], sizes = [4, 32], strides = [1, 1]} : vector<4x128xf32> to vector<4x32xf32>
    %824 = vector.extract_strided_slice %820 {offsets = [0, 64], sizes = [4, 32], strides = [1, 1]} : vector<4x128xf32> to vector<4x32xf32>
    %825 = arith.mulf %823, %824 : vector<4x32xf32>
    %826 = arith.addf %822, %825 : vector<4x32xf32>
    %827 = vector.extract_strided_slice %819 {offsets = [0, 96], sizes = [4, 32], strides = [1, 1]} : vector<4x128xf32> to vector<4x32xf32>
    %828 = math.tanh %826 : vector<4x32xf32>
    %829 = arith.mulf %827, %828 : vector<4x32xf32>
    %cst_226 = arith.constant dense<0.000000e+00> : vector<4x64xf32>
    %830 = tpu.matmul %829, %2, %cst_226 {dimension_numbers = #tpu.dot_dimension_numbers<[1], [0], [0], [1], [0, 0, 1, 1], [], []>} : vector<4x32xf32>, vector<32x64xf32>, vector<4x64xf32> -> vector<4x64xf32>
    %831 = arith.addf %830, %5 : vector<4x64xf32>
    %832 = vector.extract_strided_slice %831 {offsets = [0, 0], sizes = [4, 32], strides = [1, 1]} : vector<4x64xf32> to vector<4x32xf32>
    %833 = vector.extract_strided_slice %831 {offsets = [0, 32], sizes = [4, 32], strides = [1, 1]} : vector<4x64xf32> to vector<4x32xf32>
    %cst_227 = arith.constant 0.000000e+00 : f32
    %834 = vector.broadcast %cst_227 : f32 to vector<4x32xf32>
    %835 = arith.maximumf %833, %834 : vector<4x32xf32>
    %836 = vector.broadcast %cst_227 : f32 to vector<4x32xf32>
    %837 = arith.subf %833, %836 : vector<4x32xf32>
    %838 = arith.cmpf one, %837, %837 : vector<4x32xf32>
    %839 = vector.broadcast %cst_227 : f32 to vector<4x32xf32>
    %840 = arith.addf %833, %839 : vector<4x32xf32>
    %841 = math.absf %837 : vector<4x32xf32>
    %cst_228 = arith.constant 0.000000e+00 : f32
    %842 = vector.broadcast %cst_228 : f32 to vector<4x32xf32>
    %843 = arith.subf %842, %841 : vector<4x32xf32>
    %844 = math.exp %843 : vector<4x32xf32>
    %845 = math.log1p %844 : vector<4x32xf32>
    %846 = arith.addf %835, %845 : vector<4x32xf32>
    %847 = arith.select %838, %840, %846 : vector<4x32xi1>, vector<4x32xf32>
    %cst_229 = arith.constant 1.1920929E-7 : f32
    %848 = vector.broadcast %cst_229 : f32 to vector<4x32xf32>
    %849 = arith.addf %847, %848 : vector<4x32xf32>
    %cst_230 = arith.constant dense<0.000000e+00> : vector<4x128xf32>
    %850 = tpu.matmul %713, %81, %cst_230 {dimension_numbers = #tpu.dot_dimension_numbers<[1], [0], [0], [1], [0, 0, 1, 1], [], []>} : vector<4x32xf32>, vector<32x128xf32>, vector<4x128xf32> -> vector<4x128xf32>
    %851 = arith.addf %75, %850 : vector<4x128xf32>
    %cst_231 = arith.constant dense<0.000000e+00> : vector<4x128xf32>
    %852 = tpu.matmul %694, %87, %cst_231 {dimension_numbers = #tpu.dot_dimension_numbers<[1], [0], [0], [1], [0, 0, 1, 1], [], []>} : vector<4x32xf32>, vector<32x128xf32>, vector<4x128xf32> -> vector<4x128xf32>
    %853 = arith.addf %851, %852 : vector<4x128xf32>
    %854 = arith.negf %853 : vector<4x128xf32>
    %855 = math.exp %854 : vector<4x128xf32>
    %cst_232 = arith.constant 1.000000e+00 : f32
    %856 = vector.broadcast %cst_232 : f32 to vector<4x128xf32>
    %857 = arith.addf %856, %855 : vector<4x128xf32>
    %858 = arith.divf %856, %857 : vector<4x128xf32>
    %859 = math.tanh %853 : vector<4x128xf32>
    %860 = vector.extract_strided_slice %858 {offsets = [0, 32], sizes = [4, 32], strides = [1, 1]} : vector<4x128xf32> to vector<4x32xf32>
    %861 = arith.mulf %860, %691 : vector<4x32xf32>
    %862 = vector.extract_strided_slice %858 {offsets = [0, 0], sizes = [4, 32], strides = [1, 1]} : vector<4x128xf32> to vector<4x32xf32>
    %863 = vector.extract_strided_slice %859 {offsets = [0, 64], sizes = [4, 32], strides = [1, 1]} : vector<4x128xf32> to vector<4x32xf32>
    %864 = arith.mulf %862, %863 : vector<4x32xf32>
    %865 = arith.addf %861, %864 : vector<4x32xf32>
    %866 = vector.extract_strided_slice %858 {offsets = [0, 96], sizes = [4, 32], strides = [1, 1]} : vector<4x128xf32> to vector<4x32xf32>
    %867 = math.tanh %865 : vector<4x32xf32>
    %868 = arith.mulf %866, %867 : vector<4x32xf32>
    %cst_233 = arith.constant dense<0.000000e+00> : vector<4x128xf32>
    %869 = tpu.matmul %868, %93, %cst_233 {dimension_numbers = #tpu.dot_dimension_numbers<[1], [0], [0], [1], [0, 0, 1, 1], [], []>} : vector<4x32xf32>, vector<32x128xf32>, vector<4x128xf32> -> vector<4x128xf32>
    %870 = arith.addf %61, %869 : vector<4x128xf32>
    %cst_234 = arith.constant dense<0.000000e+00> : vector<4x128xf32>
    %871 = tpu.matmul %713, %99, %cst_234 {dimension_numbers = #tpu.dot_dimension_numbers<[1], [0], [0], [1], [0, 0, 1, 1], [], []>} : vector<4x32xf32>, vector<32x128xf32>, vector<4x128xf32> -> vector<4x128xf32>
    %872 = arith.addf %870, %871 : vector<4x128xf32>
    %873 = arith.negf %872 : vector<4x128xf32>
    %874 = math.exp %873 : vector<4x128xf32>
    %cst_235 = arith.constant 1.000000e+00 : f32
    %875 = vector.broadcast %cst_235 : f32 to vector<4x128xf32>
    %876 = arith.addf %875, %874 : vector<4x128xf32>
    %877 = arith.divf %875, %876 : vector<4x128xf32>
    %878 = math.tanh %872 : vector<4x128xf32>
    %879 = vector.extract_strided_slice %877 {offsets = [0, 32], sizes = [4, 32], strides = [1, 1]} : vector<4x128xf32> to vector<4x32xf32>
    %880 = arith.mulf %879, %710 : vector<4x32xf32>
    %881 = vector.extract_strided_slice %877 {offsets = [0, 0], sizes = [4, 32], strides = [1, 1]} : vector<4x128xf32> to vector<4x32xf32>
    %882 = vector.extract_strided_slice %878 {offsets = [0, 64], sizes = [4, 32], strides = [1, 1]} : vector<4x128xf32> to vector<4x32xf32>
    %883 = arith.mulf %881, %882 : vector<4x32xf32>
    %884 = arith.addf %880, %883 : vector<4x32xf32>
    %885 = vector.extract_strided_slice %877 {offsets = [0, 96], sizes = [4, 32], strides = [1, 1]} : vector<4x128xf32> to vector<4x32xf32>
    %886 = math.tanh %884 : vector<4x32xf32>
    %887 = arith.mulf %885, %886 : vector<4x32xf32>
    %cst_236 = arith.constant dense<0.000000e+00> : vector<4x64xf32>
    %888 = tpu.matmul %887, %2, %cst_236 {dimension_numbers = #tpu.dot_dimension_numbers<[1], [0], [0], [1], [0, 0, 1, 1], [], []>} : vector<4x32xf32>, vector<32x64xf32>, vector<4x64xf32> -> vector<4x64xf32>
    %889 = arith.addf %888, %5 : vector<4x64xf32>
    %890 = vector.extract_strided_slice %889 {offsets = [0, 0], sizes = [4, 32], strides = [1, 1]} : vector<4x64xf32> to vector<4x32xf32>
    %891 = vector.extract_strided_slice %889 {offsets = [0, 32], sizes = [4, 32], strides = [1, 1]} : vector<4x64xf32> to vector<4x32xf32>
    %cst_237 = arith.constant 0.000000e+00 : f32
    %892 = vector.broadcast %cst_237 : f32 to vector<4x32xf32>
    %893 = arith.maximumf %891, %892 : vector<4x32xf32>
    %894 = vector.broadcast %cst_237 : f32 to vector<4x32xf32>
    %895 = arith.subf %891, %894 : vector<4x32xf32>
    %896 = arith.cmpf one, %895, %895 : vector<4x32xf32>
    %897 = vector.broadcast %cst_237 : f32 to vector<4x32xf32>
    %898 = arith.addf %891, %897 : vector<4x32xf32>
    %899 = math.absf %895 : vector<4x32xf32>
    %cst_238 = arith.constant 0.000000e+00 : f32
    %900 = vector.broadcast %cst_238 : f32 to vector<4x32xf32>
    %901 = arith.subf %900, %899 : vector<4x32xf32>
    %902 = math.exp %901 : vector<4x32xf32>
    %903 = math.log1p %902 : vector<4x32xf32>
    %904 = arith.addf %893, %903 : vector<4x32xf32>
    %905 = arith.select %896, %898, %904 : vector<4x32xi1>, vector<4x32xf32>
    %cst_239 = arith.constant 1.1920929E-7 : f32
    %906 = vector.broadcast %cst_239 : f32 to vector<4x32xf32>
    %907 = arith.addf %905, %906 : vector<4x32xf32>
    %cst_240 = arith.constant dense<0.000000e+00> : vector<4x128xf32>
    %908 = tpu.matmul %771, %83, %cst_240 {dimension_numbers = #tpu.dot_dimension_numbers<[1], [0], [0], [1], [0, 0, 1, 1], [], []>} : vector<4x32xf32>, vector<32x128xf32>, vector<4x128xf32> -> vector<4x128xf32>
    %909 = arith.addf %77, %908 : vector<4x128xf32>
    %cst_241 = arith.constant dense<0.000000e+00> : vector<4x128xf32>
    %910 = tpu.matmul %752, %89, %cst_241 {dimension_numbers = #tpu.dot_dimension_numbers<[1], [0], [0], [1], [0, 0, 1, 1], [], []>} : vector<4x32xf32>, vector<32x128xf32>, vector<4x128xf32> -> vector<4x128xf32>
    %911 = arith.addf %909, %910 : vector<4x128xf32>
    %912 = arith.negf %911 : vector<4x128xf32>
    %913 = math.exp %912 : vector<4x128xf32>
    %cst_242 = arith.constant 1.000000e+00 : f32
    %914 = vector.broadcast %cst_242 : f32 to vector<4x128xf32>
    %915 = arith.addf %914, %913 : vector<4x128xf32>
    %916 = arith.divf %914, %915 : vector<4x128xf32>
    %917 = math.tanh %911 : vector<4x128xf32>
    %918 = vector.extract_strided_slice %916 {offsets = [0, 32], sizes = [4, 32], strides = [1, 1]} : vector<4x128xf32> to vector<4x32xf32>
    %919 = arith.mulf %918, %749 : vector<4x32xf32>
    %920 = vector.extract_strided_slice %916 {offsets = [0, 0], sizes = [4, 32], strides = [1, 1]} : vector<4x128xf32> to vector<4x32xf32>
    %921 = vector.extract_strided_slice %917 {offsets = [0, 64], sizes = [4, 32], strides = [1, 1]} : vector<4x128xf32> to vector<4x32xf32>
    %922 = arith.mulf %920, %921 : vector<4x32xf32>
    %923 = arith.addf %919, %922 : vector<4x32xf32>
    %924 = vector.extract_strided_slice %916 {offsets = [0, 96], sizes = [4, 32], strides = [1, 1]} : vector<4x128xf32> to vector<4x32xf32>
    %925 = math.tanh %923 : vector<4x32xf32>
    %926 = arith.mulf %924, %925 : vector<4x32xf32>
    %cst_243 = arith.constant dense<0.000000e+00> : vector<4x128xf32>
    %927 = tpu.matmul %926, %95, %cst_243 {dimension_numbers = #tpu.dot_dimension_numbers<[1], [0], [0], [1], [0, 0, 1, 1], [], []>} : vector<4x32xf32>, vector<32x128xf32>, vector<4x128xf32> -> vector<4x128xf32>
    %928 = arith.addf %65, %927 : vector<4x128xf32>
    %cst_244 = arith.constant dense<0.000000e+00> : vector<4x128xf32>
    %929 = tpu.matmul %771, %101, %cst_244 {dimension_numbers = #tpu.dot_dimension_numbers<[1], [0], [0], [1], [0, 0, 1, 1], [], []>} : vector<4x32xf32>, vector<32x128xf32>, vector<4x128xf32> -> vector<4x128xf32>
    %930 = arith.addf %928, %929 : vector<4x128xf32>
    %931 = arith.negf %930 : vector<4x128xf32>
    %932 = math.exp %931 : vector<4x128xf32>
    %cst_245 = arith.constant 1.000000e+00 : f32
    %933 = vector.broadcast %cst_245 : f32 to vector<4x128xf32>
    %934 = arith.addf %933, %932 : vector<4x128xf32>
    %935 = arith.divf %933, %934 : vector<4x128xf32>
    %936 = math.tanh %930 : vector<4x128xf32>
    %937 = vector.extract_strided_slice %935 {offsets = [0, 32], sizes = [4, 32], strides = [1, 1]} : vector<4x128xf32> to vector<4x32xf32>
    %938 = arith.mulf %937, %768 : vector<4x32xf32>
    %939 = vector.extract_strided_slice %935 {offsets = [0, 0], sizes = [4, 32], strides = [1, 1]} : vector<4x128xf32> to vector<4x32xf32>
    %940 = vector.extract_strided_slice %936 {offsets = [0, 64], sizes = [4, 32], strides = [1, 1]} : vector<4x128xf32> to vector<4x32xf32>
    %941 = arith.mulf %939, %940 : vector<4x32xf32>
    %942 = arith.addf %938, %941 : vector<4x32xf32>
    %943 = vector.extract_strided_slice %935 {offsets = [0, 96], sizes = [4, 32], strides = [1, 1]} : vector<4x128xf32> to vector<4x32xf32>
    %944 = math.tanh %942 : vector<4x32xf32>
    %945 = arith.mulf %943, %944 : vector<4x32xf32>
    %cst_246 = arith.constant dense<0.000000e+00> : vector<4x64xf32>
    %946 = tpu.matmul %945, %2, %cst_246 {dimension_numbers = #tpu.dot_dimension_numbers<[1], [0], [0], [1], [0, 0, 1, 1], [], []>} : vector<4x32xf32>, vector<32x64xf32>, vector<4x64xf32> -> vector<4x64xf32>
    %947 = arith.addf %946, %5 : vector<4x64xf32>
    %948 = vector.extract_strided_slice %947 {offsets = [0, 0], sizes = [4, 32], strides = [1, 1]} : vector<4x64xf32> to vector<4x32xf32>
    %949 = vector.extract_strided_slice %947 {offsets = [0, 32], sizes = [4, 32], strides = [1, 1]} : vector<4x64xf32> to vector<4x32xf32>
    %cst_247 = arith.constant 0.000000e+00 : f32
    %950 = vector.broadcast %cst_247 : f32 to vector<4x32xf32>
    %951 = arith.maximumf %949, %950 : vector<4x32xf32>
    %952 = vector.broadcast %cst_247 : f32 to vector<4x32xf32>
    %953 = arith.subf %949, %952 : vector<4x32xf32>
    %954 = arith.cmpf one, %953, %953 : vector<4x32xf32>
    %955 = vector.broadcast %cst_247 : f32 to vector<4x32xf32>
    %956 = arith.addf %949, %955 : vector<4x32xf32>
    %957 = math.absf %953 : vector<4x32xf32>
    %cst_248 = arith.constant 0.000000e+00 : f32
    %958 = vector.broadcast %cst_248 : f32 to vector<4x32xf32>
    %959 = arith.subf %958, %957 : vector<4x32xf32>
    %960 = math.exp %959 : vector<4x32xf32>
    %961 = math.log1p %960 : vector<4x32xf32>
    %962 = arith.addf %951, %961 : vector<4x32xf32>
    %963 = arith.select %954, %956, %962 : vector<4x32xi1>, vector<4x32xf32>
    %cst_249 = arith.constant 1.1920929E-7 : f32
    %964 = vector.broadcast %cst_249 : f32 to vector<4x32xf32>
    %965 = arith.addf %963, %964 : vector<4x32xf32>
    %cst_250 = arith.constant dense<0.000000e+00> : vector<4x128xf32>
    %966 = tpu.matmul %829, %79, %cst_250 {dimension_numbers = #tpu.dot_dimension_numbers<[1], [0], [0], [1], [0, 0, 1, 1], [], []>} : vector<4x32xf32>, vector<32x128xf32>, vector<4x128xf32> -> vector<4x128xf32>
    %967 = arith.addf %73, %966 : vector<4x128xf32>
    %cst_251 = arith.constant dense<0.000000e+00> : vector<4x128xf32>
    %968 = tpu.matmul %810, %85, %cst_251 {dimension_numbers = #tpu.dot_dimension_numbers<[1], [0], [0], [1], [0, 0, 1, 1], [], []>} : vector<4x32xf32>, vector<32x128xf32>, vector<4x128xf32> -> vector<4x128xf32>
    %969 = arith.addf %967, %968 : vector<4x128xf32>
    %970 = arith.negf %969 : vector<4x128xf32>
    %971 = math.exp %970 : vector<4x128xf32>
    %cst_252 = arith.constant 1.000000e+00 : f32
    %972 = vector.broadcast %cst_252 : f32 to vector<4x128xf32>
    %973 = arith.addf %972, %971 : vector<4x128xf32>
    %974 = arith.divf %972, %973 : vector<4x128xf32>
    %975 = math.tanh %969 : vector<4x128xf32>
    %976 = vector.extract_strided_slice %974 {offsets = [0, 32], sizes = [4, 32], strides = [1, 1]} : vector<4x128xf32> to vector<4x32xf32>
    %977 = arith.mulf %976, %807 : vector<4x32xf32>
    %978 = vector.extract_strided_slice %974 {offsets = [0, 0], sizes = [4, 32], strides = [1, 1]} : vector<4x128xf32> to vector<4x32xf32>
    %979 = vector.extract_strided_slice %975 {offsets = [0, 64], sizes = [4, 32], strides = [1, 1]} : vector<4x128xf32> to vector<4x32xf32>
    %980 = arith.mulf %978, %979 : vector<4x32xf32>
    %981 = arith.addf %977, %980 : vector<4x32xf32>
    %982 = vector.extract_strided_slice %974 {offsets = [0, 96], sizes = [4, 32], strides = [1, 1]} : vector<4x128xf32> to vector<4x32xf32>
    %983 = math.tanh %981 : vector<4x32xf32>
    %984 = arith.mulf %982, %983 : vector<4x32xf32>
    %cst_253 = arith.constant dense<0.000000e+00> : vector<4x128xf32>
    %985 = tpu.matmul %984, %91, %cst_253 {dimension_numbers = #tpu.dot_dimension_numbers<[1], [0], [0], [1], [0, 0, 1, 1], [], []>} : vector<4x32xf32>, vector<32x128xf32>, vector<4x128xf32> -> vector<4x128xf32>
    %986 = arith.addf %57, %985 : vector<4x128xf32>
    %cst_254 = arith.constant dense<0.000000e+00> : vector<4x128xf32>
    %987 = tpu.matmul %829, %97, %cst_254 {dimension_numbers = #tpu.dot_dimension_numbers<[1], [0], [0], [1], [0, 0, 1, 1], [], []>} : vector<4x32xf32>, vector<32x128xf32>, vector<4x128xf32> -> vector<4x128xf32>
    %988 = arith.addf %986, %987 : vector<4x128xf32>
    %989 = arith.negf %988 : vector<4x128xf32>
    %990 = math.exp %989 : vector<4x128xf32>
    %cst_255 = arith.constant 1.000000e+00 : f32
    %991 = vector.broadcast %cst_255 : f32 to vector<4x128xf32>
    %992 = arith.addf %991, %990 : vector<4x128xf32>
    %993 = arith.divf %991, %992 : vector<4x128xf32>
    %994 = math.tanh %988 : vector<4x128xf32>
    %995 = vector.extract_strided_slice %993 {offsets = [0, 32], sizes = [4, 32], strides = [1, 1]} : vector<4x128xf32> to vector<4x32xf32>
    %996 = arith.mulf %995, %826 : vector<4x32xf32>
    %997 = vector.extract_strided_slice %993 {offsets = [0, 0], sizes = [4, 32], strides = [1, 1]} : vector<4x128xf32> to vector<4x32xf32>
    %998 = vector.extract_strided_slice %994 {offsets = [0, 64], sizes = [4, 32], strides = [1, 1]} : vector<4x128xf32> to vector<4x32xf32>
    %999 = arith.mulf %997, %998 : vector<4x32xf32>
    %1000 = arith.addf %996, %999 : vector<4x32xf32>
    %1001 = vector.extract_strided_slice %993 {offsets = [0, 96], sizes = [4, 32], strides = [1, 1]} : vector<4x128xf32> to vector<4x32xf32>
    %1002 = math.tanh %1000 : vector<4x32xf32>
    %1003 = arith.mulf %1001, %1002 : vector<4x32xf32>
    %cst_256 = arith.constant dense<0.000000e+00> : vector<4x64xf32>
    %1004 = tpu.matmul %1003, %2, %cst_256 {dimension_numbers = #tpu.dot_dimension_numbers<[1], [0], [0], [1], [0, 0, 1, 1], [], []>} : vector<4x32xf32>, vector<32x64xf32>, vector<4x64xf32> -> vector<4x64xf32>
    %1005 = arith.addf %1004, %5 : vector<4x64xf32>
    %1006 = vector.extract_strided_slice %1005 {offsets = [0, 0], sizes = [4, 32], strides = [1, 1]} : vector<4x64xf32> to vector<4x32xf32>
    %1007 = vector.extract_strided_slice %1005 {offsets = [0, 32], sizes = [4, 32], strides = [1, 1]} : vector<4x64xf32> to vector<4x32xf32>
    %cst_257 = arith.constant 0.000000e+00 : f32
    %1008 = vector.broadcast %cst_257 : f32 to vector<4x32xf32>
    %1009 = arith.maximumf %1007, %1008 : vector<4x32xf32>
    %1010 = vector.broadcast %cst_257 : f32 to vector<4x32xf32>
    %1011 = arith.subf %1007, %1010 : vector<4x32xf32>
    %1012 = arith.cmpf one, %1011, %1011 : vector<4x32xf32>
    %1013 = vector.broadcast %cst_257 : f32 to vector<4x32xf32>
    %1014 = arith.addf %1007, %1013 : vector<4x32xf32>
    %1015 = math.absf %1011 : vector<4x32xf32>
    %cst_258 = arith.constant 0.000000e+00 : f32
    %1016 = vector.broadcast %cst_258 : f32 to vector<4x32xf32>
    %1017 = arith.subf %1016, %1015 : vector<4x32xf32>
    %1018 = math.exp %1017 : vector<4x32xf32>
    %1019 = math.log1p %1018 : vector<4x32xf32>
    %1020 = arith.addf %1009, %1019 : vector<4x32xf32>
    %1021 = arith.select %1012, %1014, %1020 : vector<4x32xi1>, vector<4x32xf32>
    %cst_259 = arith.constant 1.1920929E-7 : f32
    %1022 = vector.broadcast %cst_259 : f32 to vector<4x32xf32>
    %1023 = arith.addf %1021, %1022 : vector<4x32xf32>
    %cst_260 = arith.constant dense<0.000000e+00> : vector<4x128xf32>
    %1024 = tpu.matmul %887, %81, %cst_260 {dimension_numbers = #tpu.dot_dimension_numbers<[1], [0], [0], [1], [0, 0, 1, 1], [], []>} : vector<4x32xf32>, vector<32x128xf32>, vector<4x128xf32> -> vector<4x128xf32>
    %1025 = arith.addf %75, %1024 : vector<4x128xf32>
    %cst_261 = arith.constant dense<0.000000e+00> : vector<4x128xf32>
    %1026 = tpu.matmul %868, %87, %cst_261 {dimension_numbers = #tpu.dot_dimension_numbers<[1], [0], [0], [1], [0, 0, 1, 1], [], []>} : vector<4x32xf32>, vector<32x128xf32>, vector<4x128xf32> -> vector<4x128xf32>
    %1027 = arith.addf %1025, %1026 : vector<4x128xf32>
    %1028 = arith.negf %1027 : vector<4x128xf32>
    %1029 = math.exp %1028 : vector<4x128xf32>
    %cst_262 = arith.constant 1.000000e+00 : f32
    %1030 = vector.broadcast %cst_262 : f32 to vector<4x128xf32>
    %1031 = arith.addf %1030, %1029 : vector<4x128xf32>
    %1032 = arith.divf %1030, %1031 : vector<4x128xf32>
    %1033 = math.tanh %1027 : vector<4x128xf32>
    %1034 = vector.extract_strided_slice %1032 {offsets = [0, 32], sizes = [4, 32], strides = [1, 1]} : vector<4x128xf32> to vector<4x32xf32>
    %1035 = arith.mulf %1034, %865 : vector<4x32xf32>
    %1036 = vector.extract_strided_slice %1032 {offsets = [0, 0], sizes = [4, 32], strides = [1, 1]} : vector<4x128xf32> to vector<4x32xf32>
    %1037 = vector.extract_strided_slice %1033 {offsets = [0, 64], sizes = [4, 32], strides = [1, 1]} : vector<4x128xf32> to vector<4x32xf32>
    %1038 = arith.mulf %1036, %1037 : vector<4x32xf32>
    %1039 = arith.addf %1035, %1038 : vector<4x32xf32>
    %1040 = vector.extract_strided_slice %1032 {offsets = [0, 96], sizes = [4, 32], strides = [1, 1]} : vector<4x128xf32> to vector<4x32xf32>
    %1041 = math.tanh %1039 : vector<4x32xf32>
    %1042 = arith.mulf %1040, %1041 : vector<4x32xf32>
    %cst_263 = arith.constant dense<0.000000e+00> : vector<4x128xf32>
    %1043 = tpu.matmul %1042, %93, %cst_263 {dimension_numbers = #tpu.dot_dimension_numbers<[1], [0], [0], [1], [0, 0, 1, 1], [], []>} : vector<4x32xf32>, vector<32x128xf32>, vector<4x128xf32> -> vector<4x128xf32>
    %1044 = arith.addf %61, %1043 : vector<4x128xf32>
    %cst_264 = arith.constant dense<0.000000e+00> : vector<4x128xf32>
    %1045 = tpu.matmul %887, %99, %cst_264 {dimension_numbers = #tpu.dot_dimension_numbers<[1], [0], [0], [1], [0, 0, 1, 1], [], []>} : vector<4x32xf32>, vector<32x128xf32>, vector<4x128xf32> -> vector<4x128xf32>
    %1046 = arith.addf %1044, %1045 : vector<4x128xf32>
    %1047 = arith.negf %1046 : vector<4x128xf32>
    %1048 = math.exp %1047 : vector<4x128xf32>
    %cst_265 = arith.constant 1.000000e+00 : f32
    %1049 = vector.broadcast %cst_265 : f32 to vector<4x128xf32>
    %1050 = arith.addf %1049, %1048 : vector<4x128xf32>
    %1051 = arith.divf %1049, %1050 : vector<4x128xf32>
    %1052 = math.tanh %1046 : vector<4x128xf32>
    %1053 = vector.extract_strided_slice %1051 {offsets = [0, 32], sizes = [4, 32], strides = [1, 1]} : vector<4x128xf32> to vector<4x32xf32>
    %1054 = arith.mulf %1053, %884 : vector<4x32xf32>
    %1055 = vector.extract_strided_slice %1051 {offsets = [0, 0], sizes = [4, 32], strides = [1, 1]} : vector<4x128xf32> to vector<4x32xf32>
    %1056 = vector.extract_strided_slice %1052 {offsets = [0, 64], sizes = [4, 32], strides = [1, 1]} : vector<4x128xf32> to vector<4x32xf32>
    %1057 = arith.mulf %1055, %1056 : vector<4x32xf32>
    %1058 = arith.addf %1054, %1057 : vector<4x32xf32>
    %1059 = vector.extract_strided_slice %1051 {offsets = [0, 96], sizes = [4, 32], strides = [1, 1]} : vector<4x128xf32> to vector<4x32xf32>
    %1060 = math.tanh %1058 : vector<4x32xf32>
    %1061 = arith.mulf %1059, %1060 : vector<4x32xf32>
    %cst_266 = arith.constant dense<0.000000e+00> : vector<4x64xf32>
    %1062 = tpu.matmul %1061, %2, %cst_266 {dimension_numbers = #tpu.dot_dimension_numbers<[1], [0], [0], [1], [0, 0, 1, 1], [], []>} : vector<4x32xf32>, vector<32x64xf32>, vector<4x64xf32> -> vector<4x64xf32>
    %1063 = arith.addf %1062, %5 : vector<4x64xf32>
    %1064 = vector.extract_strided_slice %1063 {offsets = [0, 0], sizes = [4, 32], strides = [1, 1]} : vector<4x64xf32> to vector<4x32xf32>
    %1065 = vector.extract_strided_slice %1063 {offsets = [0, 32], sizes = [4, 32], strides = [1, 1]} : vector<4x64xf32> to vector<4x32xf32>
    %cst_267 = arith.constant 0.000000e+00 : f32
    %1066 = vector.broadcast %cst_267 : f32 to vector<4x32xf32>
    %1067 = arith.maximumf %1065, %1066 : vector<4x32xf32>
    %1068 = vector.broadcast %cst_267 : f32 to vector<4x32xf32>
    %1069 = arith.subf %1065, %1068 : vector<4x32xf32>
    %1070 = arith.cmpf one, %1069, %1069 : vector<4x32xf32>
    %1071 = vector.broadcast %cst_267 : f32 to vector<4x32xf32>
    %1072 = arith.addf %1065, %1071 : vector<4x32xf32>
    %1073 = math.absf %1069 : vector<4x32xf32>
    %cst_268 = arith.constant 0.000000e+00 : f32
    %1074 = vector.broadcast %cst_268 : f32 to vector<4x32xf32>
    %1075 = arith.subf %1074, %1073 : vector<4x32xf32>
    %1076 = math.exp %1075 : vector<4x32xf32>
    %1077 = math.log1p %1076 : vector<4x32xf32>
    %1078 = arith.addf %1067, %1077 : vector<4x32xf32>
    %1079 = arith.select %1070, %1072, %1078 : vector<4x32xi1>, vector<4x32xf32>
    %cst_269 = arith.constant 1.1920929E-7 : f32
    %1080 = vector.broadcast %cst_269 : f32 to vector<4x32xf32>
    %1081 = arith.addf %1079, %1080 : vector<4x32xf32>
    %cst_270 = arith.constant dense<0.000000e+00> : vector<4x128xf32>
    %1082 = tpu.matmul %945, %83, %cst_270 {dimension_numbers = #tpu.dot_dimension_numbers<[1], [0], [0], [1], [0, 0, 1, 1], [], []>} : vector<4x32xf32>, vector<32x128xf32>, vector<4x128xf32> -> vector<4x128xf32>
    %1083 = arith.addf %77, %1082 : vector<4x128xf32>
    %cst_271 = arith.constant dense<0.000000e+00> : vector<4x128xf32>
    %1084 = tpu.matmul %926, %89, %cst_271 {dimension_numbers = #tpu.dot_dimension_numbers<[1], [0], [0], [1], [0, 0, 1, 1], [], []>} : vector<4x32xf32>, vector<32x128xf32>, vector<4x128xf32> -> vector<4x128xf32>
    %1085 = arith.addf %1083, %1084 : vector<4x128xf32>
    %1086 = arith.negf %1085 : vector<4x128xf32>
    %1087 = math.exp %1086 : vector<4x128xf32>
    %cst_272 = arith.constant 1.000000e+00 : f32
    %1088 = vector.broadcast %cst_272 : f32 to vector<4x128xf32>
    %1089 = arith.addf %1088, %1087 : vector<4x128xf32>
    %1090 = arith.divf %1088, %1089 : vector<4x128xf32>
    %1091 = math.tanh %1085 : vector<4x128xf32>
    %1092 = vector.extract_strided_slice %1090 {offsets = [0, 32], sizes = [4, 32], strides = [1, 1]} : vector<4x128xf32> to vector<4x32xf32>
    %1093 = arith.mulf %1092, %923 : vector<4x32xf32>
    %1094 = vector.extract_strided_slice %1090 {offsets = [0, 0], sizes = [4, 32], strides = [1, 1]} : vector<4x128xf32> to vector<4x32xf32>
    %1095 = vector.extract_strided_slice %1091 {offsets = [0, 64], sizes = [4, 32], strides = [1, 1]} : vector<4x128xf32> to vector<4x32xf32>
    %1096 = arith.mulf %1094, %1095 : vector<4x32xf32>
    %1097 = arith.addf %1093, %1096 : vector<4x32xf32>
    %1098 = vector.extract_strided_slice %1090 {offsets = [0, 96], sizes = [4, 32], strides = [1, 1]} : vector<4x128xf32> to vector<4x32xf32>
    %1099 = math.tanh %1097 : vector<4x32xf32>
    %1100 = arith.mulf %1098, %1099 : vector<4x32xf32>
    %cst_273 = arith.constant dense<0.000000e+00> : vector<4x128xf32>
    %1101 = tpu.matmul %1100, %95, %cst_273 {dimension_numbers = #tpu.dot_dimension_numbers<[1], [0], [0], [1], [0, 0, 1, 1], [], []>} : vector<4x32xf32>, vector<32x128xf32>, vector<4x128xf32> -> vector<4x128xf32>
    %1102 = arith.addf %65, %1101 : vector<4x128xf32>
    %cst_274 = arith.constant dense<0.000000e+00> : vector<4x128xf32>
    %1103 = tpu.matmul %945, %101, %cst_274 {dimension_numbers = #tpu.dot_dimension_numbers<[1], [0], [0], [1], [0, 0, 1, 1], [], []>} : vector<4x32xf32>, vector<32x128xf32>, vector<4x128xf32> -> vector<4x128xf32>
    %1104 = arith.addf %1102, %1103 : vector<4x128xf32>
    %1105 = arith.negf %1104 : vector<4x128xf32>
    %1106 = math.exp %1105 : vector<4x128xf32>
    %cst_275 = arith.constant 1.000000e+00 : f32
    %1107 = vector.broadcast %cst_275 : f32 to vector<4x128xf32>
    %1108 = arith.addf %1107, %1106 : vector<4x128xf32>
    %1109 = arith.divf %1107, %1108 : vector<4x128xf32>
    %1110 = math.tanh %1104 : vector<4x128xf32>
    %1111 = vector.extract_strided_slice %1109 {offsets = [0, 32], sizes = [4, 32], strides = [1, 1]} : vector<4x128xf32> to vector<4x32xf32>
    %1112 = arith.mulf %1111, %942 : vector<4x32xf32>
    %1113 = vector.extract_strided_slice %1109 {offsets = [0, 0], sizes = [4, 32], strides = [1, 1]} : vector<4x128xf32> to vector<4x32xf32>
    %1114 = vector.extract_strided_slice %1110 {offsets = [0, 64], sizes = [4, 32], strides = [1, 1]} : vector<4x128xf32> to vector<4x32xf32>
    %1115 = arith.mulf %1113, %1114 : vector<4x32xf32>
    %1116 = arith.addf %1112, %1115 : vector<4x32xf32>
    %1117 = vector.extract_strided_slice %1109 {offsets = [0, 96], sizes = [4, 32], strides = [1, 1]} : vector<4x128xf32> to vector<4x32xf32>
    %1118 = math.tanh %1116 : vector<4x32xf32>
    %1119 = arith.mulf %1117, %1118 : vector<4x32xf32>
    %cst_276 = arith.constant dense<0.000000e+00> : vector<4x64xf32>
    %1120 = tpu.matmul %1119, %2, %cst_276 {dimension_numbers = #tpu.dot_dimension_numbers<[1], [0], [0], [1], [0, 0, 1, 1], [], []>} : vector<4x32xf32>, vector<32x64xf32>, vector<4x64xf32> -> vector<4x64xf32>
    %1121 = arith.addf %1120, %5 : vector<4x64xf32>
    %1122 = vector.extract_strided_slice %1121 {offsets = [0, 0], sizes = [4, 32], strides = [1, 1]} : vector<4x64xf32> to vector<4x32xf32>
    %1123 = vector.extract_strided_slice %1121 {offsets = [0, 32], sizes = [4, 32], strides = [1, 1]} : vector<4x64xf32> to vector<4x32xf32>
    %cst_277 = arith.constant 0.000000e+00 : f32
    %1124 = vector.broadcast %cst_277 : f32 to vector<4x32xf32>
    %1125 = arith.maximumf %1123, %1124 : vector<4x32xf32>
    %1126 = vector.broadcast %cst_277 : f32 to vector<4x32xf32>
    %1127 = arith.subf %1123, %1126 : vector<4x32xf32>
    %1128 = arith.cmpf one, %1127, %1127 : vector<4x32xf32>
    %1129 = vector.broadcast %cst_277 : f32 to vector<4x32xf32>
    %1130 = arith.addf %1123, %1129 : vector<4x32xf32>
    %1131 = math.absf %1127 : vector<4x32xf32>
    %cst_278 = arith.constant 0.000000e+00 : f32
    %1132 = vector.broadcast %cst_278 : f32 to vector<4x32xf32>
    %1133 = arith.subf %1132, %1131 : vector<4x32xf32>
    %1134 = math.exp %1133 : vector<4x32xf32>
    %1135 = math.log1p %1134 : vector<4x32xf32>
    %1136 = arith.addf %1125, %1135 : vector<4x32xf32>
    %1137 = arith.select %1128, %1130, %1136 : vector<4x32xi1>, vector<4x32xf32>
    %cst_279 = arith.constant 1.1920929E-7 : f32
    %1138 = vector.broadcast %cst_279 : f32 to vector<4x32xf32>
    %1139 = arith.addf %1137, %1138 : vector<4x32xf32>
    %cst_280 = arith.constant dense<0.000000e+00> : vector<4x128xf32>
    %1140 = tpu.matmul %1003, %79, %cst_280 {dimension_numbers = #tpu.dot_dimension_numbers<[1], [0], [0], [1], [0, 0, 1, 1], [], []>} : vector<4x32xf32>, vector<32x128xf32>, vector<4x128xf32> -> vector<4x128xf32>
    %1141 = arith.addf %73, %1140 : vector<4x128xf32>
    %cst_281 = arith.constant dense<0.000000e+00> : vector<4x128xf32>
    %1142 = tpu.matmul %984, %85, %cst_281 {dimension_numbers = #tpu.dot_dimension_numbers<[1], [0], [0], [1], [0, 0, 1, 1], [], []>} : vector<4x32xf32>, vector<32x128xf32>, vector<4x128xf32> -> vector<4x128xf32>
    %1143 = arith.addf %1141, %1142 : vector<4x128xf32>
    %1144 = arith.negf %1143 : vector<4x128xf32>
    %1145 = math.exp %1144 : vector<4x128xf32>
    %cst_282 = arith.constant 1.000000e+00 : f32
    %1146 = vector.broadcast %cst_282 : f32 to vector<4x128xf32>
    %1147 = arith.addf %1146, %1145 : vector<4x128xf32>
    %1148 = arith.divf %1146, %1147 : vector<4x128xf32>
    %1149 = math.tanh %1143 : vector<4x128xf32>
    %1150 = vector.extract_strided_slice %1148 {offsets = [0, 32], sizes = [4, 32], strides = [1, 1]} : vector<4x128xf32> to vector<4x32xf32>
    %1151 = arith.mulf %1150, %981 : vector<4x32xf32>
    %1152 = vector.extract_strided_slice %1148 {offsets = [0, 0], sizes = [4, 32], strides = [1, 1]} : vector<4x128xf32> to vector<4x32xf32>
    %1153 = vector.extract_strided_slice %1149 {offsets = [0, 64], sizes = [4, 32], strides = [1, 1]} : vector<4x128xf32> to vector<4x32xf32>
    %1154 = arith.mulf %1152, %1153 : vector<4x32xf32>
    %1155 = arith.addf %1151, %1154 : vector<4x32xf32>
    %1156 = vector.extract_strided_slice %1148 {offsets = [0, 96], sizes = [4, 32], strides = [1, 1]} : vector<4x128xf32> to vector<4x32xf32>
    %1157 = math.tanh %1155 : vector<4x32xf32>
    %1158 = arith.mulf %1156, %1157 : vector<4x32xf32>
    %cst_283 = arith.constant dense<0.000000e+00> : vector<4x128xf32>
    %1159 = tpu.matmul %1158, %91, %cst_283 {dimension_numbers = #tpu.dot_dimension_numbers<[1], [0], [0], [1], [0, 0, 1, 1], [], []>} : vector<4x32xf32>, vector<32x128xf32>, vector<4x128xf32> -> vector<4x128xf32>
    %1160 = arith.addf %57, %1159 : vector<4x128xf32>
    %cst_284 = arith.constant dense<0.000000e+00> : vector<4x128xf32>
    %1161 = tpu.matmul %1003, %97, %cst_284 {dimension_numbers = #tpu.dot_dimension_numbers<[1], [0], [0], [1], [0, 0, 1, 1], [], []>} : vector<4x32xf32>, vector<32x128xf32>, vector<4x128xf32> -> vector<4x128xf32>
    %1162 = arith.addf %1160, %1161 : vector<4x128xf32>
    %1163 = arith.negf %1162 : vector<4x128xf32>
    %1164 = math.exp %1163 : vector<4x128xf32>
    %cst_285 = arith.constant 1.000000e+00 : f32
    %1165 = vector.broadcast %cst_285 : f32 to vector<4x128xf32>
    %1166 = arith.addf %1165, %1164 : vector<4x128xf32>
    %1167 = arith.divf %1165, %1166 : vector<4x128xf32>
    %1168 = math.tanh %1162 : vector<4x128xf32>
    %1169 = vector.extract_strided_slice %1167 {offsets = [0, 32], sizes = [4, 32], strides = [1, 1]} : vector<4x128xf32> to vector<4x32xf32>
    %1170 = arith.mulf %1169, %1000 : vector<4x32xf32>
    %1171 = vector.extract_strided_slice %1167 {offsets = [0, 0], sizes = [4, 32], strides = [1, 1]} : vector<4x128xf32> to vector<4x32xf32>
    %1172 = vector.extract_strided_slice %1168 {offsets = [0, 64], sizes = [4, 32], strides = [1, 1]} : vector<4x128xf32> to vector<4x32xf32>
    %1173 = arith.mulf %1171, %1172 : vector<4x32xf32>
    %1174 = arith.addf %1170, %1173 : vector<4x32xf32>
    %1175 = vector.extract_strided_slice %1167 {offsets = [0, 96], sizes = [4, 32], strides = [1, 1]} : vector<4x128xf32> to vector<4x32xf32>
    %1176 = math.tanh %1174 : vector<4x32xf32>
    %1177 = arith.mulf %1175, %1176 : vector<4x32xf32>
    %cst_286 = arith.constant dense<0.000000e+00> : vector<4x64xf32>
    %1178 = tpu.matmul %1177, %2, %cst_286 {dimension_numbers = #tpu.dot_dimension_numbers<[1], [0], [0], [1], [0, 0, 1, 1], [], []>} : vector<4x32xf32>, vector<32x64xf32>, vector<4x64xf32> -> vector<4x64xf32>
    %1179 = arith.addf %1178, %5 : vector<4x64xf32>
    %1180 = vector.extract_strided_slice %1179 {offsets = [0, 0], sizes = [4, 32], strides = [1, 1]} : vector<4x64xf32> to vector<4x32xf32>
    %1181 = vector.extract_strided_slice %1179 {offsets = [0, 32], sizes = [4, 32], strides = [1, 1]} : vector<4x64xf32> to vector<4x32xf32>
    %cst_287 = arith.constant 0.000000e+00 : f32
    %1182 = vector.broadcast %cst_287 : f32 to vector<4x32xf32>
    %1183 = arith.maximumf %1181, %1182 : vector<4x32xf32>
    %1184 = vector.broadcast %cst_287 : f32 to vector<4x32xf32>
    %1185 = arith.subf %1181, %1184 : vector<4x32xf32>
    %1186 = arith.cmpf one, %1185, %1185 : vector<4x32xf32>
    %1187 = vector.broadcast %cst_287 : f32 to vector<4x32xf32>
    %1188 = arith.addf %1181, %1187 : vector<4x32xf32>
    %1189 = math.absf %1185 : vector<4x32xf32>
    %cst_288 = arith.constant 0.000000e+00 : f32
    %1190 = vector.broadcast %cst_288 : f32 to vector<4x32xf32>
    %1191 = arith.subf %1190, %1189 : vector<4x32xf32>
    %1192 = math.exp %1191 : vector<4x32xf32>
    %1193 = math.log1p %1192 : vector<4x32xf32>
    %1194 = arith.addf %1183, %1193 : vector<4x32xf32>
    %1195 = arith.select %1186, %1188, %1194 : vector<4x32xi1>, vector<4x32xf32>
    %cst_289 = arith.constant 1.1920929E-7 : f32
    %1196 = vector.broadcast %cst_289 : f32 to vector<4x32xf32>
    %1197 = arith.addf %1195, %1196 : vector<4x32xf32>
    %cst_290 = arith.constant dense<0.000000e+00> : vector<4x128xf32>
    %1198 = tpu.matmul %1061, %81, %cst_290 {dimension_numbers = #tpu.dot_dimension_numbers<[1], [0], [0], [1], [0, 0, 1, 1], [], []>} : vector<4x32xf32>, vector<32x128xf32>, vector<4x128xf32> -> vector<4x128xf32>
    %1199 = arith.addf %75, %1198 : vector<4x128xf32>
    %cst_291 = arith.constant dense<0.000000e+00> : vector<4x128xf32>
    %1200 = tpu.matmul %1042, %87, %cst_291 {dimension_numbers = #tpu.dot_dimension_numbers<[1], [0], [0], [1], [0, 0, 1, 1], [], []>} : vector<4x32xf32>, vector<32x128xf32>, vector<4x128xf32> -> vector<4x128xf32>
    %1201 = arith.addf %1199, %1200 : vector<4x128xf32>
    %1202 = arith.negf %1201 : vector<4x128xf32>
    %1203 = math.exp %1202 : vector<4x128xf32>
    %cst_292 = arith.constant 1.000000e+00 : f32
    %1204 = vector.broadcast %cst_292 : f32 to vector<4x128xf32>
    %1205 = arith.addf %1204, %1203 : vector<4x128xf32>
    %1206 = arith.divf %1204, %1205 : vector<4x128xf32>
    %1207 = math.tanh %1201 : vector<4x128xf32>
    %1208 = vector.extract_strided_slice %1206 {offsets = [0, 32], sizes = [4, 32], strides = [1, 1]} : vector<4x128xf32> to vector<4x32xf32>
    %1209 = arith.mulf %1208, %1039 : vector<4x32xf32>
    %1210 = vector.extract_strided_slice %1206 {offsets = [0, 0], sizes = [4, 32], strides = [1, 1]} : vector<4x128xf32> to vector<4x32xf32>
    %1211 = vector.extract_strided_slice %1207 {offsets = [0, 64], sizes = [4, 32], strides = [1, 1]} : vector<4x128xf32> to vector<4x32xf32>
    %1212 = arith.mulf %1210, %1211 : vector<4x32xf32>
    %1213 = arith.addf %1209, %1212 : vector<4x32xf32>
    %1214 = vector.extract_strided_slice %1206 {offsets = [0, 96], sizes = [4, 32], strides = [1, 1]} : vector<4x128xf32> to vector<4x32xf32>
    %1215 = math.tanh %1213 : vector<4x32xf32>
    %1216 = arith.mulf %1214, %1215 : vector<4x32xf32>
    %cst_293 = arith.constant dense<0.000000e+00> : vector<4x128xf32>
    %1217 = tpu.matmul %1216, %93, %cst_293 {dimension_numbers = #tpu.dot_dimension_numbers<[1], [0], [0], [1], [0, 0, 1, 1], [], []>} : vector<4x32xf32>, vector<32x128xf32>, vector<4x128xf32> -> vector<4x128xf32>
    %1218 = arith.addf %61, %1217 : vector<4x128xf32>
    %cst_294 = arith.constant dense<0.000000e+00> : vector<4x128xf32>
    %1219 = tpu.matmul %1061, %99, %cst_294 {dimension_numbers = #tpu.dot_dimension_numbers<[1], [0], [0], [1], [0, 0, 1, 1], [], []>} : vector<4x32xf32>, vector<32x128xf32>, vector<4x128xf32> -> vector<4x128xf32>
    %1220 = arith.addf %1218, %1219 : vector<4x128xf32>
    %1221 = arith.negf %1220 : vector<4x128xf32>
    %1222 = math.exp %1221 : vector<4x128xf32>
    %cst_295 = arith.constant 1.000000e+00 : f32
    %1223 = vector.broadcast %cst_295 : f32 to vector<4x128xf32>
    %1224 = arith.addf %1223, %1222 : vector<4x128xf32>
    %1225 = arith.divf %1223, %1224 : vector<4x128xf32>
    %1226 = math.tanh %1220 : vector<4x128xf32>
    %1227 = vector.extract_strided_slice %1225 {offsets = [0, 32], sizes = [4, 32], strides = [1, 1]} : vector<4x128xf32> to vector<4x32xf32>
    %1228 = arith.mulf %1227, %1058 : vector<4x32xf32>
    %1229 = vector.extract_strided_slice %1225 {offsets = [0, 0], sizes = [4, 32], strides = [1, 1]} : vector<4x128xf32> to vector<4x32xf32>
    %1230 = vector.extract_strided_slice %1226 {offsets = [0, 64], sizes = [4, 32], strides = [1, 1]} : vector<4x128xf32> to vector<4x32xf32>
    %1231 = arith.mulf %1229, %1230 : vector<4x32xf32>
    %1232 = arith.addf %1228, %1231 : vector<4x32xf32>
    %1233 = vector.extract_strided_slice %1225 {offsets = [0, 96], sizes = [4, 32], strides = [1, 1]} : vector<4x128xf32> to vector<4x32xf32>
    %1234 = math.tanh %1232 : vector<4x32xf32>
    %1235 = arith.mulf %1233, %1234 : vector<4x32xf32>
    %cst_296 = arith.constant dense<0.000000e+00> : vector<4x64xf32>
    %1236 = tpu.matmul %1235, %2, %cst_296 {dimension_numbers = #tpu.dot_dimension_numbers<[1], [0], [0], [1], [0, 0, 1, 1], [], []>} : vector<4x32xf32>, vector<32x64xf32>, vector<4x64xf32> -> vector<4x64xf32>
    %1237 = arith.addf %1236, %5 : vector<4x64xf32>
    %1238 = vector.extract_strided_slice %1237 {offsets = [0, 0], sizes = [4, 32], strides = [1, 1]} : vector<4x64xf32> to vector<4x32xf32>
    %1239 = vector.extract_strided_slice %1237 {offsets = [0, 32], sizes = [4, 32], strides = [1, 1]} : vector<4x64xf32> to vector<4x32xf32>
    %cst_297 = arith.constant 0.000000e+00 : f32
    %1240 = vector.broadcast %cst_297 : f32 to vector<4x32xf32>
    %1241 = arith.maximumf %1239, %1240 : vector<4x32xf32>
    %1242 = vector.broadcast %cst_297 : f32 to vector<4x32xf32>
    %1243 = arith.subf %1239, %1242 : vector<4x32xf32>
    %1244 = arith.cmpf one, %1243, %1243 : vector<4x32xf32>
    %1245 = vector.broadcast %cst_297 : f32 to vector<4x32xf32>
    %1246 = arith.addf %1239, %1245 : vector<4x32xf32>
    %1247 = math.absf %1243 : vector<4x32xf32>
    %cst_298 = arith.constant 0.000000e+00 : f32
    %1248 = vector.broadcast %cst_298 : f32 to vector<4x32xf32>
    %1249 = arith.subf %1248, %1247 : vector<4x32xf32>
    %1250 = math.exp %1249 : vector<4x32xf32>
    %1251 = math.log1p %1250 : vector<4x32xf32>
    %1252 = arith.addf %1241, %1251 : vector<4x32xf32>
    %1253 = arith.select %1244, %1246, %1252 : vector<4x32xi1>, vector<4x32xf32>
    %cst_299 = arith.constant 1.1920929E-7 : f32
    %1254 = vector.broadcast %cst_299 : f32 to vector<4x32xf32>
    %1255 = arith.addf %1253, %1254 : vector<4x32xf32>
    %cst_300 = arith.constant dense<0.000000e+00> : vector<4x128xf32>
    %1256 = tpu.matmul %1119, %83, %cst_300 {dimension_numbers = #tpu.dot_dimension_numbers<[1], [0], [0], [1], [0, 0, 1, 1], [], []>} : vector<4x32xf32>, vector<32x128xf32>, vector<4x128xf32> -> vector<4x128xf32>
    %1257 = arith.addf %77, %1256 : vector<4x128xf32>
    %cst_301 = arith.constant dense<0.000000e+00> : vector<4x128xf32>
    %1258 = tpu.matmul %1100, %89, %cst_301 {dimension_numbers = #tpu.dot_dimension_numbers<[1], [0], [0], [1], [0, 0, 1, 1], [], []>} : vector<4x32xf32>, vector<32x128xf32>, vector<4x128xf32> -> vector<4x128xf32>
    %1259 = arith.addf %1257, %1258 : vector<4x128xf32>
    %1260 = arith.negf %1259 : vector<4x128xf32>
    %1261 = math.exp %1260 : vector<4x128xf32>
    %cst_302 = arith.constant 1.000000e+00 : f32
    %1262 = vector.broadcast %cst_302 : f32 to vector<4x128xf32>
    %1263 = arith.addf %1262, %1261 : vector<4x128xf32>
    %1264 = arith.divf %1262, %1263 : vector<4x128xf32>
    %1265 = math.tanh %1259 : vector<4x128xf32>
    %1266 = vector.extract_strided_slice %1264 {offsets = [0, 32], sizes = [4, 32], strides = [1, 1]} : vector<4x128xf32> to vector<4x32xf32>
    %1267 = arith.mulf %1266, %1097 : vector<4x32xf32>
    %1268 = vector.extract_strided_slice %1264 {offsets = [0, 0], sizes = [4, 32], strides = [1, 1]} : vector<4x128xf32> to vector<4x32xf32>
    %1269 = vector.extract_strided_slice %1265 {offsets = [0, 64], sizes = [4, 32], strides = [1, 1]} : vector<4x128xf32> to vector<4x32xf32>
    %1270 = arith.mulf %1268, %1269 : vector<4x32xf32>
    %1271 = arith.addf %1267, %1270 : vector<4x32xf32>
    %1272 = vector.extract_strided_slice %1264 {offsets = [0, 96], sizes = [4, 32], strides = [1, 1]} : vector<4x128xf32> to vector<4x32xf32>
    %1273 = math.tanh %1271 : vector<4x32xf32>
    %1274 = arith.mulf %1272, %1273 : vector<4x32xf32>
    %cst_303 = arith.constant dense<0.000000e+00> : vector<4x128xf32>
    %1275 = tpu.matmul %1274, %95, %cst_303 {dimension_numbers = #tpu.dot_dimension_numbers<[1], [0], [0], [1], [0, 0, 1, 1], [], []>} : vector<4x32xf32>, vector<32x128xf32>, vector<4x128xf32> -> vector<4x128xf32>
    %1276 = arith.addf %65, %1275 : vector<4x128xf32>
    %cst_304 = arith.constant dense<0.000000e+00> : vector<4x128xf32>
    %1277 = tpu.matmul %1119, %101, %cst_304 {dimension_numbers = #tpu.dot_dimension_numbers<[1], [0], [0], [1], [0, 0, 1, 1], [], []>} : vector<4x32xf32>, vector<32x128xf32>, vector<4x128xf32> -> vector<4x128xf32>
    %1278 = arith.addf %1276, %1277 : vector<4x128xf32>
    %1279 = arith.negf %1278 : vector<4x128xf32>
    %1280 = math.exp %1279 : vector<4x128xf32>
    %cst_305 = arith.constant 1.000000e+00 : f32
    %1281 = vector.broadcast %cst_305 : f32 to vector<4x128xf32>
    %1282 = arith.addf %1281, %1280 : vector<4x128xf32>
    %1283 = arith.divf %1281, %1282 : vector<4x128xf32>
    %1284 = math.tanh %1278 : vector<4x128xf32>
    %1285 = vector.extract_strided_slice %1283 {offsets = [0, 32], sizes = [4, 32], strides = [1, 1]} : vector<4x128xf32> to vector<4x32xf32>
    %1286 = arith.mulf %1285, %1116 : vector<4x32xf32>
    %1287 = vector.extract_strided_slice %1283 {offsets = [0, 0], sizes = [4, 32], strides = [1, 1]} : vector<4x128xf32> to vector<4x32xf32>
    %1288 = vector.extract_strided_slice %1284 {offsets = [0, 64], sizes = [4, 32], strides = [1, 1]} : vector<4x128xf32> to vector<4x32xf32>
    %1289 = arith.mulf %1287, %1288 : vector<4x32xf32>
    %1290 = arith.addf %1286, %1289 : vector<4x32xf32>
    %1291 = vector.extract_strided_slice %1283 {offsets = [0, 96], sizes = [4, 32], strides = [1, 1]} : vector<4x128xf32> to vector<4x32xf32>
    %1292 = math.tanh %1290 : vector<4x32xf32>
    %1293 = arith.mulf %1291, %1292 : vector<4x32xf32>
    %cst_306 = arith.constant dense<0.000000e+00> : vector<4x64xf32>
    %1294 = tpu.matmul %1293, %2, %cst_306 {dimension_numbers = #tpu.dot_dimension_numbers<[1], [0], [0], [1], [0, 0, 1, 1], [], []>} : vector<4x32xf32>, vector<32x64xf32>, vector<4x64xf32> -> vector<4x64xf32>
    %1295 = arith.addf %1294, %5 : vector<4x64xf32>
    %1296 = vector.extract_strided_slice %1295 {offsets = [0, 0], sizes = [4, 32], strides = [1, 1]} : vector<4x64xf32> to vector<4x32xf32>
    %1297 = vector.extract_strided_slice %1295 {offsets = [0, 32], sizes = [4, 32], strides = [1, 1]} : vector<4x64xf32> to vector<4x32xf32>
    %cst_307 = arith.constant 0.000000e+00 : f32
    %1298 = vector.broadcast %cst_307 : f32 to vector<4x32xf32>
    %1299 = arith.maximumf %1297, %1298 : vector<4x32xf32>
    %1300 = vector.broadcast %cst_307 : f32 to vector<4x32xf32>
    %1301 = arith.subf %1297, %1300 : vector<4x32xf32>
    %1302 = arith.cmpf one, %1301, %1301 : vector<4x32xf32>
    %1303 = vector.broadcast %cst_307 : f32 to vector<4x32xf32>
    %1304 = arith.addf %1297, %1303 : vector<4x32xf32>
    %1305 = math.absf %1301 : vector<4x32xf32>
    %cst_308 = arith.constant 0.000000e+00 : f32
    %1306 = vector.broadcast %cst_308 : f32 to vector<4x32xf32>
    %1307 = arith.subf %1306, %1305 : vector<4x32xf32>
    %1308 = math.exp %1307 : vector<4x32xf32>
    %1309 = math.log1p %1308 : vector<4x32xf32>
    %1310 = arith.addf %1299, %1309 : vector<4x32xf32>
    %1311 = arith.select %1302, %1304, %1310 : vector<4x32xi1>, vector<4x32xf32>
    %cst_309 = arith.constant 1.1920929E-7 : f32
    %1312 = vector.broadcast %cst_309 : f32 to vector<4x32xf32>
    %1313 = arith.addf %1311, %1312 : vector<4x32xf32>
    %1314 = tpu.concatenate %0, %140, %310, %484, %658, %832, %1006, %1180 in 1 : vector<4x32xf32>, vector<4x32xf32>, vector<4x32xf32>, vector<4x32xf32>, vector<4x32xf32>, vector<4x32xf32>, vector<4x32xf32>, vector<4x32xf32> -> vector<4x256xf32>
    %c0_310 = arith.constant 0 : index
    %c0_311 = arith.constant 0 : index
    %c0_312 = arith.constant 0 : index
    %1315 = vector.load %arg13[%c0_310, %c0_311, %c0_312] : memref<3x4x256xf32, #tpu.memory_space<vmem>>, vector<1x4x256xf32>
    %1316 = vector.shape_cast %1315 : vector<1x4x256xf32> to vector<4x256xf32>
    %1317 = vector.shape_cast %1314 : vector<4x256xf32> to vector<1x4x256xf32>
    tpu.vector_store %arg13[%c0_310, %c0_311, %c0_312], %1317 {strides = array<i32>} : memref<3x4x256xf32, #tpu.memory_space<vmem>>, vector<1x4x256xf32>,
    %1318 = tpu.concatenate %1, %157, %327, %501, %675, %849, %1023, %1197 in 1 : vector<4x32xf32>, vector<4x32xf32>, vector<4x32xf32>, vector<4x32xf32>, vector<4x32xf32>, vector<4x32xf32>, vector<4x32xf32>, vector<4x32xf32> -> vector<4x256xf32>
    %c0_313 = arith.constant 0 : index
    %c0_314 = arith.constant 0 : index
    %c0_315 = arith.constant 0 : index
    %1319 = vector.load %arg14[%c0_313, %c0_314, %c0_315] : memref<3x4x256xf32, #tpu.memory_space<vmem>>, vector<1x4x256xf32>
    %1320 = vector.shape_cast %1319 : vector<1x4x256xf32> to vector<4x256xf32>
    %1321 = vector.shape_cast %1318 : vector<4x256xf32> to vector<1x4x256xf32>
    tpu.vector_store %arg14[%c0_313, %c0_314, %c0_315], %1321 {strides = array<i32>} : memref<3x4x256xf32, #tpu.memory_space<vmem>>, vector<1x4x256xf32>,
    %1322 = tpu.concatenate %0, %196, %368, %542, %716, %890, %1064, %1238 in 1 : vector<4x32xf32>, vector<4x32xf32>, vector<4x32xf32>, vector<4x32xf32>, vector<4x32xf32>, vector<4x32xf32>, vector<4x32xf32>, vector<4x32xf32> -> vector<4x256xf32>
    %c1_316 = arith.constant 1 : index
    %c0_317 = arith.constant 0 : index
    %c0_318 = arith.constant 0 : index
    %1323 = vector.load %arg13[%c1_316, %c0_317, %c0_318] : memref<3x4x256xf32, #tpu.memory_space<vmem>>, vector<1x4x256xf32>
    %1324 = vector.shape_cast %1323 : vector<1x4x256xf32> to vector<4x256xf32>
    %1325 = vector.shape_cast %1322 : vector<4x256xf32> to vector<1x4x256xf32>
    tpu.vector_store %arg13[%c1_316, %c0_317, %c0_318], %1325 {strides = array<i32>} : memref<3x4x256xf32, #tpu.memory_space<vmem>>, vector<1x4x256xf32>,
    %1326 = tpu.concatenate %1, %213, %385, %559, %733, %907, %1081, %1255 in 1 : vector<4x32xf32>, vector<4x32xf32>, vector<4x32xf32>, vector<4x32xf32>, vector<4x32xf32>, vector<4x32xf32>, vector<4x32xf32>, vector<4x32xf32> -> vector<4x256xf32>
    %c1_319 = arith.constant 1 : index
    %c0_320 = arith.constant 0 : index
    %c0_321 = arith.constant 0 : index
    %1327 = vector.load %arg14[%c1_319, %c0_320, %c0_321] : memref<3x4x256xf32, #tpu.memory_space<vmem>>, vector<1x4x256xf32>
    %1328 = vector.shape_cast %1327 : vector<1x4x256xf32> to vector<4x256xf32>
    %1329 = vector.shape_cast %1326 : vector<4x256xf32> to vector<1x4x256xf32>
    tpu.vector_store %arg14[%c1_319, %c0_320, %c0_321], %1329 {strides = array<i32>} : memref<3x4x256xf32, #tpu.memory_space<vmem>>, vector<1x4x256xf32>,
    %1330 = tpu.concatenate %0, %252, %426, %600, %774, %948, %1122, %1296 in 1 : vector<4x32xf32>, vector<4x32xf32>, vector<4x32xf32>, vector<4x32xf32>, vector<4x32xf32>, vector<4x32xf32>, vector<4x32xf32>, vector<4x32xf32> -> vector<4x256xf32>
    %c2_322 = arith.constant 2 : index
    %c0_323 = arith.constant 0 : index
    %c0_324 = arith.constant 0 : index
    %1331 = vector.load %arg13[%c2_322, %c0_323, %c0_324] : memref<3x4x256xf32, #tpu.memory_space<vmem>>, vector<1x4x256xf32>
    %1332 = vector.shape_cast %1331 : vector<1x4x256xf32> to vector<4x256xf32>
    %1333 = vector.shape_cast %1330 : vector<4x256xf32> to vector<1x4x256xf32>
    tpu.vector_store %arg13[%c2_322, %c0_323, %c0_324], %1333 {strides = array<i32>} : memref<3x4x256xf32, #tpu.memory_space<vmem>>, vector<1x4x256xf32>,
    %1334 = tpu.concatenate %1, %269, %443, %617, %791, %965, %1139, %1313 in 1 : vector<4x32xf32>, vector<4x32xf32>, vector<4x32xf32>, vector<4x32xf32>, vector<4x32xf32>, vector<4x32xf32>, vector<4x32xf32>, vector<4x32xf32> -> vector<4x256xf32>
    %c2_325 = arith.constant 2 : index
    %c0_326 = arith.constant 0 : index
    %c0_327 = arith.constant 0 : index
    %1335 = vector.load %arg14[%c2_325, %c0_326, %c0_327] : memref<3x4x256xf32, #tpu.memory_space<vmem>>, vector<1x4x256xf32>
    %1336 = vector.shape_cast %1335 : vector<1x4x256xf32> to vector<4x256xf32>
    %1337 = vector.shape_cast %1334 : vector<4x256xf32> to vector<1x4x256xf32>
    tpu.vector_store %arg14[%c2_325, %c0_326, %c0_327], %1337 {strides = array<i32>} : memref<3x4x256xf32, #tpu.memory_space<vmem>>, vector<1x4x256xf32>,
    return
  }
}

</mosaic_0001>

<bundles_post_ra>
// kernel: generative_forward.1
= control target key start
LH: loop header
LB: loop body
LE: loop exit
PB: predicated region body
PF: predicated region fallthrough
CT: control target
= control target key end

     0   :  { %vm164_vm0 = vcmask 261120   ;;  %s5490_s25 = smov 64   ;;  %s5491_s28 = smov 32   ;;  %s7968_s5 = inlined_call_operand.vmem [shape: f32[3,32,128], index: 5, kind: input, shape index: {}]   ;;  %s7969_s9 = inlined_call_operand.vmem [shape: f32[3,2,32], index: 9, kind: input, shape index: {}]   ;;  %s7970_s10 = inlined_call_operand.vmem [shape: f32[3,2,32], index: 10, kind: input, shape index: {}]   ;;  %s7971_s2 = inlined_call_operand.vmem [shape: f32[3,4,128], index: 2, kind: input, shape index: {}]   ;;  %s7972_s7 = inlined_call_operand.vmem [shape: f32[3,32,128], index: 7, kind: input, shape index: {}]   ;;  %s7973_s6 = inlined_call_operand.vmem [shape: f32[3,32,128], index: 6, kind: input, shape index: {}]   ;;  %s7974_s8 = inlined_call_operand.vmem [shape: f32[3,1,128], index: 8, kind: input, shape index: {}]   ;;  %s7975_s4 = inlined_call_operand.vmem [shape: f32[3,32,128], index: 4, kind: input, shape index: {}]   ;;  %s7976_s11 = inlined_call_operand.vmem [shape: f32[32,64], index: 11, kind: input, shape index: {}]   ;;  %s7977_s12 = inlined_call_operand.vmem [shape: f32[1,64], index: 12, kind: input, shape index: {}]   ;;  %s7978_s3 = inlined_call_operand.vmem [shape: f32[3,4,128], index: 3, kind: input, shape index: {}]   ;;  %s7979_s0 = inlined_call_operand.vmem [shape: f32[4,32], index: 0, kind: input, shape index: {}]   ;;  %s7980_s13 = inlined_call_operand.vmem [shape: f32[3,4,256], index: 13, kind: output, shape index: {0}]   ;;  %s7981_s1 = inlined_call_operand.vmem [shape: f32[4,32], index: 1, kind: input, shape index: {}]   ;;  %s7982_s14 = inlined_call_operand.vmem [shape: f32[3,4,256], index: 14, kind: output, shape index: {1}]  }
   0x1   :  { %v5571_v0 = vld [vmem:[%s7968_s5 + $0x18] sm:$0xff]  ;;  %v5576_v1 = vld [vmem:[%s7968_s5 + $0x10] sm:$0xff]  ;;  %v5582_v2 = vld [vmem:[%s7968_s5 + $0x8] sm:$0xff] }
   0x2   :  { %180 = vmatpush.msra.mxu0 %v5571_v0  ;;  %v5588_v3 = vld [vmem:[%s7968_s5] sm:$0xff]  ;;  %v5607_v13 = vld [vmem:[%s7968_s5 + $0x38] sm:$0xff]  ;;  %v5612_v14 = vld [vmem:[%s7968_s5 + $0x30] sm:$0xff] }
   0x3   :  { %v4907_v4 = vld [vmem:[%s7969_s9] ss:$0 sm:$0xff]  ;;  %v5618_v16 = vld [vmem:[%s7968_s5 + $0x28] sm:$0xff]  ;;  %v4909_v19 = vld [vmem:[%s7969_s9 + $0x2] ss:$0 sm:$0xff] }
   0x4   :  { %181 = vmatpush.msra.mxu0 %v5576_v1  ;;  %v98_v5 = vld [vmem:[%s7971_s2] sm:$0xf]  ;;  %v5636_v30 = vld [vmem:[%s7968_s5 + $0x58] sm:$0xff]  ;;  %v5641_v31 = vld [vmem:[%s7968_s5 + $0x50] sm:$0xff] }
   0x5   :  { %v4908_v9 = vld [vmem:[%s7970_s10] ss:$0 sm:$0xff]  ;;  %v5647_v32 = vld [vmem:[%s7968_s5 + $0x48] sm:$0xff]  ;;  %v4910_v34 = vld [vmem:[%s7969_s9 + $0x4] ss:$0 sm:$0xff] }
   0x6   :  { %182 = vmatpush.msra.mxu0 %v5582_v2  ;;  %v5624_v18 = vld [vmem:[%s7968_s5 + $0x20] sm:$0xff]  ;;  %v5668_v41 = vld [vmem:[%s7972_s7 + $0x18] sm:$0xff]  ;;  %v5673_v42 = vld [vmem:[%s7972_s7 + $0x10] sm:$0xff] }
   0x7   :  { %v5653_v33 = vld [vmem:[%s7968_s5 + $0x40] sm:$0xff]  ;;  %271 = vmatpush.msra.mxu2 %v5668_v41  ;;  %v5679_v43 = vld [vmem:[%s7973_s6 + $0x18] sm:$0xff]  ;;  %v5684_v44 = vld [vmem:[%s7973_s6 + $0x10] sm:$0xff] }
   0x8   :  { %183 = vmatpush.msra.mxu0 %v5588_v3  ;;  %247 = vmatpush.msra.mxu1 %v5679_v43  ;;  %v5690_v45 = vld [vmem:[%s7972_s7 + $0x8] sm:$0xff]  ;;  %v5702_v47 = vld [vmem:[%s7972_s7] sm:$0xff] }
   0x9   :  { %4756 = vmatmul.msk.f32.vlgmr.msra.gmra.mxu0 %vm164_vm0, %v4907_v4  ;;  %272 = vmatpush.msra.mxu2 %v5673_v42  ;;  %v5696_v46 = vld [vmem:[%s7973_s6 + $0x8] sm:$0xff]  ;;  %v4911_v48 = vld [vmem:[%s7969_s9 + $0x1] ss:$0 sm:$0xff]  ;;  %v4720_v53 = vld [vmem:[%s7971_s2 + $0x4] sm:$0xf] }
   0xa   :  { %380 = vmatpush.msrb.mxu0 %v5607_v13  ;;  %248 = vmatpush.msra.mxu1 %v5684_v44  ;;  %v5711_v49 = vld [vmem:[%s7973_s6] sm:$0xff]  ;;  %v4721_v50 = vld [vmem:[%s7971_s2 + $0x8] sm:$0xf] }
   0xb   :  { %273 = vmatpush.msra.mxu2 %v5690_v45  ;;  %v4912_v63 = vld [vmem:[%s7970_s10 + $0x2] ss:$0 sm:$0xff] }
   0xc   :  { %381 = vmatpush.msrb.mxu0 %v5612_v14  ;;  %249 = vmatpush.msra.mxu1 %v5696_v46 }
   0xd   :  { %274 = vmatpush.msra.mxu2 %v5702_v47 }
   0xe   :  { %382 = vmatpush.msrb.mxu0 %v5618_v16  ;;  %4759 = vmatmul.msk.f32.vlgmr.msra.gmra.mxu2 %vm164_vm0, %v4911_v48 }
   0xf   :  { %250 = vmatpush.msra.mxu1 %v5711_v49 }
  0x10   :  { %383 = vmatpush.msrb.mxu0 %v5624_v18 }
  0x11   :  { %4762 = vmatmul.msk.f32.vlgmr.msrb.gmra.mxu0 %vm164_vm0, %v4909_v19 }
  0x12   :  { %580 = vmatpush.msra.mxu0 %v5636_v30 }
  0x14   :  { %581 = vmatpush.msra.mxu0 %v5641_v31 }
  0x16   :  { %582 = vmatpush.msra.mxu0 %v5647_v32 }
  0x18   :  { %583 = vmatpush.msra.mxu0 %v5653_v33 }
  0x19   :  { %4768 = vmatmul.msk.f32.vlgmr.msra.gmra.mxu0 %vm164_vm0, %v4910_v34 }
  0x86   :  { %v185_v6 = vpop.f32.mrf.mxu0 }
  0x87   :  { %v188_v7 = vadd.f32 %v185_v6, %v98_v5 }
  0x89   :  { %4923 = vtanh.f32 %v188_v7  ;;  %v4757_v10 = vmul.f32 -1.442695, %v188_v7 }
  0x8b   :  { %4925 = vpow2.f32 %v4757_v10 }
  0x8e   :  { %v385_v40 = vpop.f32.mrf.mxu0 }
  0x8f   :  { %v4924_v8 = vpop.eup %4923  ;;  %v388_v55 = vadd.f32 %v4720_v53, %v385_v40 }
  0x90   :  { %215 = vrot.lane.b32.xlu0 %v4924_v8, %s5490_s25 }
  0x91   :  { %v4926_v11 = vpop.eup %4925  ;;  %v4763_v59 = vmul.f32 -1.442695, %v388_v55 }
  0x92   :  { %v192_v12 = vadd.f32 1.0, %v4926_v11 }
  0x94   :  { %4927 = vrcp.f32 %v192_v12  ;;  %v204_v23 = vand.u32 2147483648, %v192_v12  ;;  %vm198_vm2 = vweird.f32 %v192_v12  ;;  %v202_v24 = vand.u32 2147483647, %v192_v12 }
  0x96   :  { %v205_v26 = vor.u32 1.1754944e-38, %v204_v23  ;;  %vm203_vm4 = vcmp.eq.f32.partialorder %v202_v24, 8.507059e+37  ;;  %v585_v51 = vpop.f32.mrf.mxu0 }
  0x97   :  { %v588_v52 = vadd.f32 %v4721_v50, %v585_v51  ;;  %v5746_v51 = vld [vmem:[%s7974_s8] ss:$0 sm:$0xff] }
  0x98   :  { %210 = vrot.lane.b32.xlu0 %v4908_v9, %s5491_s28 }
  0x99   :  { %v4769_v61 = vmul.f32 -1.442695, %v588_v52 }
  0x9a   :  { %v4928_v15 = vpop.eup %4927 }
  0x9b   :  { %v194_v17 = vmul.f32 %v4928_v15, %v192_v12  ;;  %vm199_vm1 = vweird.f32 %v4928_v15 }
  0x9c   :  { %vm200_vm3 = vmor %vm198_vm2, %vm199_vm1 }
  0x9d   :  { %v195_v20 = vsub.f32 1.0, %v194_v17 }
  0x9f   :  { %v196_v21 = vmul.f32 %v4928_v15, %v195_v20 }
  0xa1   :  { %v197_v22 = vadd.f32 %v4928_v15, %v196_v21 }
  0xa3   :  { %v201_v25 = vsel %vm200_vm3, %v4928_v15, %v197_v22 }
  0xa4   :  { %v206_v28 = vsel %vm203_vm4, %v205_v26, %v201_v25 }
 0x102   :  { %v216_v27 = vpop.permute.xlu0 %215 }
 0x103   :  { %v218_v29 = vmul.f32 %v216_v27, %v206_v28 }
 0x105   :  { %220 = vrot.lane.b32.xlu1 %v218_v29, %s5491_s28 }
 0x10a   :  { %v211_v35 = vpop.permute.xlu0 %210 }
 0x10b   :  { %v213_v36 = vmul.f32 %v211_v35, %v206_v28 }
 0x177   :  { %v221_v37 = vpop.permute.xlu1 %220 }
 0x178   :  { %v5661_v38 = vadd.f32 %v221_v37, %v213_v36  ;;  %v4913_v36 = vld [vmem:[%s7970_s10 + $0x1] ss:$0 sm:$0xff] }
 0x17a   :  { %4929 = vtanh.f32 %v5661_v38 }
 0x17b   :  { %4931 = vtanh.f32 %v588_v52 }
 0x17c   :  { %4933 = vtanh.f32 %v388_v55  ;;  %v276_v55 = vpop.f32.mrf.mxu2 }
 0x17d   :  { %4935 = vpow2.f32 %v4763_v59 }
 0x17e   :  { %4937 = vpow2.f32 %v4769_v61 }
 0x180   :  { %v4930_v39 = vpop.eup %4929 }
 0x181   :  { %226 = vrot.lane.b32.xlu1 %v4930_v39, %s5490_s25  ;;  %v4932_v54 = vpop.eup %4931 }
 0x182   :  { %615 = vrot.lane.b32.xlu0 %v4932_v54, %s5490_s25  ;;  %v4934_v58 = vpop.eup %4933 }
 0x183   :  { %v4936_v60 = vpop.eup %4935 }
 0x184   :  { %v392_v62 = vadd.f32 1.0, %v4936_v60  ;;  %v4938_v4 = vpop.eup %4937  ;;  %v4915_v60 = vld [vmem:[%s7970_s10 + $0x4] ss:$0 sm:$0xff] }
 0x185   :  { %v592_v6 = vadd.f32 1.0, %v4938_v4 }
 0x186   :  { %4939 = vrcp.f32 %v392_v62  ;;  %vm398_vm5 = vweird.f32 %v392_v62  ;;  %v404_v12 = vand.u32 2147483648, %v392_v62  ;;  %v402_v17 = vand.u32 2147483647, %v392_v62 }
 0x187   :  { %4941 = vrcp.f32 %v592_v6  ;;  %vm598_vm9 = vweird.f32 %v592_v6  ;;  %v604_v26 = vand.u32 2147483648, %v592_v6  ;;  %v602_v29 = vand.u32 2147483647, %v592_v6 }
 0x188   :  { %v405_v21 = vor.u32 1.1754944e-38, %v404_v12  ;;  %vm403_vm8 = vcmp.eq.f32.partialorder %v402_v17, 8.507059e+37  ;;  %v5772_v12 = vld [vmem:[%s7973_s6 + $0x38] sm:$0xff]  ;;  %v5779_v17 = vld [vmem:[%s7973_s6 + $0x30] sm:$0xff] }
 0x189   :  { %v605_v34 = vor.u32 1.1754944e-38, %v604_v26  ;;  %vm603_vm12 = vcmp.eq.f32.partialorder %v602_v29, 8.507059e+37  ;;  %447 = vmatpush.msrb.mxu1 %v5772_v12 }
 0x18b   :  { %448 = vmatpush.msrb.mxu1 %v5779_v17 }
 0x18c   :  { %v4940_v5 = vpop.eup %4939 }
 0x18d   :  { %v394_v7 = vmul.f32 %v4940_v5, %v392_v62  ;;  %v4942_v9 = vpop.eup %4941  ;;  %vm399_vm6 = vweird.f32 %v4940_v5 }
 0x18e   :  { %v594_v11 = vmul.f32 %v4942_v9, %v592_v6  ;;  %vm400_vm7 = vmor %vm398_vm5, %vm399_vm6  ;;  %vm599_vm10 = vweird.f32 %v4942_v9 }
 0x18f   :  { %v395_v8 = vsub.f32 1.0, %v394_v7  ;;  %vm600_vm11 = vmor %vm598_vm9, %vm599_vm10 }
 0x190   :  { %v595_v20 = vsub.f32 1.0, %v594_v11  ;;  %v5767_v11 = vld [vmem:[%s7972_s7 + $0x30] sm:$0xff] }
 0x191   :  { %v396_v10 = vmul.f32 %v4940_v5, %v395_v8 }
 0x192   :  { %v596_v23 = vmul.f32 %v4942_v9, %v595_v20  ;;  %v5784_v20 = vld [vmem:[%s7972_s7 + $0x28] sm:$0xff] }
 0x193   :  { %v397_v15 = vadd.f32 %v4940_v5, %v396_v10  ;;  %v5762_v10 = vld [vmem:[%s7972_s7 + $0x38] sm:$0xff] }
 0x194   :  { %471 = vmatpush.msrb.mxu2 %v5762_v10 }
 0x195   :  { %v401_v22 = vsel %vm400_vm7, %v4940_v5, %v397_v15 }
 0x196   :  { %v406_v24 = vsel %vm403_vm8, %v405_v21, %v401_v22  ;;  %v5789_v21 = vld [vmem:[%s7973_s6 + $0x28] sm:$0xff]  ;;  %472 = vmatpush.msrb.mxu2 %v5767_v11  ;;  %v5796_v22 = vld [vmem:[%s7972_s7 + $0x20] sm:$0xff] }
 0x197   :  { %449 = vmatpush.msrb.mxu1 %v5789_v21 }
 0x198   :  { %473 = vmatpush.msrb.mxu2 %v5784_v20 }
 0x19a   :  { %474 = vmatpush.msrb.mxu2 %v5796_v22 }
 0x1f3   :  { %v227_v56 = vpop.permute.xlu1 %226 }
 0x1f4   :  { %v229_v57 = vmul.f32 %v227_v56, %v206_v28  ;;  %v597_v28 = vadd.f32 %v4942_v9, %v596_v23  ;;  %v616_v39 = vpop.permute.xlu0 %615  ;;  %v4916_v23 = vld [vmem:[%s7969_s9 + $0x3] ss:$0 sm:$0xff] }
 0x1f5   :  { %4765 = vmatmul.msk.f32.vlgmr.msrb.gmra.mxu2 %vm164_vm0, %v4916_v23  ;;  %v5870_v23 = vld [vmem:[%s7973_s6 + $0x50] sm:$0xff] }
 0x1f6   :  { %231 = vrot.lane.b32.xlu2 %v229_v57, %s5491_s28  ;;  %v601_v35 = vsel %vm600_vm11, %v4942_v9, %v597_v28 }
 0x1f7   :  { %v5738_v37 = vsel %vm603_vm12, %v605_v34, %v601_v35 }
 0x1f8   :  { %v618_v40 = vmul.f32 %v616_v39, %v5738_v37 }
 0x1fe   :  { %415 = vrot.lane.b32.xlu2 %v4934_v58, %s5490_s25 }
 0x206   :  { %410 = vrot.lane.b32.xlu2 %v4912_v63, %s5491_s28 }
 0x20e   :  { %620 = vrot.lane.b32.xlu2 %v618_v40, %s5491_s28 }
 0x250   :  { %v5730_v19 = vpop.permute.xlu2 %231 }
 0x251   :  { %4758 = vmatmul.msk.f32.vlgmr.msra.gmra.mxu1 %vm164_vm0, %v5730_v19 }
 0x258   :  { %v416_v25 = vpop.permute.xlu2 %415 }
 0x259   :  { %v418_v27 = vmul.f32 %v416_v25, %v406_v24 }
 0x25b   :  { %420 = vrot.lane.b32.xlu0 %v418_v27, %s5491_s28 }
 0x260   :  { %v411_v48 = vpop.permute.xlu2 %410 }
 0x261   :  { %v413_v50 = vmul.f32 %v411_v48, %v406_v24 }
 0x263   :  { %301 = vrot.lane.b32.xlu0 %v4913_v36, %s5491_s28 }
 0x268   :  { %v621_v62 = vpop.permute.xlu2 %620 }
 0x2cd   :  { %v421_v52 = vpop.permute.xlu0 %420 }
 0x2ce   :  { %v5748_v53 = vadd.f32 %v421_v52, %v413_v50  ;;  %v252_v54 = vpop.f32.mrf.mxu1 }
 0x2cf   :  { %v255_v56 = vadd.f32 %v5746_v51, %v252_v54 }
 0x2d0   :  { %4943 = vtanh.f32 %v5748_v53 }
 0x2d1   :  { %v279_v57 = vadd.f32 %v276_v55, %v255_v56 }
 0x2d3   :  { %4945 = vtanh.f32 %v279_v57  ;;  %v4760_v61 = vmul.f32 -1.442695, %v279_v57 }
 0x2d5   :  { %4947 = vpow2.f32 %v4760_v61  ;;  %v302_v54 = vpop.permute.xlu0 %301  ;;  %v5834_v61 = vld [vmem:[%s7972_s7 + $0x58] sm:$0xff] }
 0x2d6   :  { %v4944_v58 = vpop.eup %4943  ;;  %671 = vmatpush.msra.mxu2 %v5834_v61 }
 0x2d7   :  { %426 = vrot.lane.b32.xlu2 %v4944_v58, %s5490_s25 }
 0x2d9   :  { %v4946_v59 = vpop.eup %4945 }
 0x2da   :  { %306 = vrot.lane.b32.xlu1 %v4946_v59, %s5490_s25 }
 0x2db   :  { %v4948_v63 = vpop.eup %4947 }
 0x2dc   :  { %v283_v4 = vadd.f32 1.0, %v4948_v63 }
 0x2de   :  { %4949 = vrcp.f32 %v283_v4  ;;  %v295_v26 = vand.u32 2147483648, %v283_v4  ;;  %vm289_vm14 = vweird.f32 %v283_v4  ;;  %v293_v27 = vand.u32 2147483647, %v283_v4 }
 0x2e0   :  { %v296_v29 = vor.u32 1.1754944e-38, %v295_v26  ;;  %vm294_vm1 = vcmp.eq.f32.partialorder %v293_v27, 8.507059e+37  ;;  %v4919_v26 = vld [vmem:[%s7969_s9 + $0x5] ss:$0 sm:$0xff]  ;;  %v5885_v27 = vld [vmem:[%s7973_s6 + $0x48] sm:$0xff] }
 0x2e2   :  { %610 = vrot.lane.b32.xlu1 %v4915_v60, %s5491_s28 }
 0x2e4   :  { %v4950_v7 = vpop.eup %4949 }
 0x2e5   :  { %v285_v8 = vmul.f32 %v4950_v7, %v283_v4  ;;  %vm290_vm13 = vweird.f32 %v4950_v7  ;;  %v476_v4 = vpop.f32.mrf.mxu2 }
 0x2e6   :  { %vm291_vm15 = vmor %vm289_vm14, %vm290_vm13 }
 0x2e7   :  { %v286_v9 = vsub.f32 1.0, %v285_v8  ;;  %v5853_v8 = vld [vmem:[%s7972_s7 + $0x50] sm:$0xff] }
 0x2e8   :  { %672 = vmatpush.msra.mxu2 %v5853_v8 }
 0x2e9   :  { %v287_v15 = vmul.f32 %v4950_v7, %v286_v9  ;;  %v5860_v9 = vld [vmem:[%s7973_s6 + $0x58] sm:$0xff] }
 0x2eb   :  { %v288_v25 = vadd.f32 %v4950_v7, %v287_v15  ;;  %v5865_v15 = vld [vmem:[%s7972_s7 + $0x48] sm:$0xff] }
 0x2ec   :  { %673 = vmatpush.msra.mxu2 %v5865_v15 }
 0x2ed   :  { %v292_v28 = vsel %vm291_vm15, %v4950_v7, %v288_v25  ;;  %v4918_v7 = vld [vmem:[%s7970_s10 + $0x3] ss:$0 sm:$0xff] }
 0x2ee   :  { %v5811_v34 = vsel %vm294_vm1, %v296_v29, %v292_v28  ;;  %v5877_v25 = vld [vmem:[%s7972_s7 + $0x40] sm:$0xff] }
 0x2ef   :  { %v304_v55 = vmul.f32 %v302_v54, %v5811_v34  ;;  %674 = vmatpush.msra.mxu2 %v5877_v25  ;;  %v5893_v28 = vld [vmem:[%s7973_s6 + $0x40] sm:$0xff] }
 0x2f0   :  { %4771 = vmatmul.msk.f32.vlgmr.msra.gmra.mxu2 %vm164_vm0, %v4919_v26 }
 0x2f1   :  { %861 = vmatpush.msrb.mxu2 %v5679_v43 }
 0x2f3   :  { %862 = vmatpush.msrb.mxu2 %v5684_v44  ;;  %v5954_v44 = vld [vmem:[%s7975_s4] sm:$0xff] }
 0x2f5   :  { %863 = vmatpush.msrb.mxu2 %v5696_v46  ;;  %v5959_v46 = vld [vmem:[%s7976_s11] sm:$0xff] }
 0x2f7   :  { %864 = vmatpush.msrb.mxu2 %v5711_v49 }
 0x2f9   :  { %1005 = vmatpush.msra.mxu2 %v5607_v13  ;;  %v5930_v13 = vld [vmem:[%s7975_s4 + $0x10] sm:$0xff] }
 0x2fb   :  { %1006 = vmatpush.msra.mxu2 %v5612_v14  ;;  %v5937_v14 = vld [vmem:[%s7976_s11 + $0x10] sm:$0xff] }
 0x2fd   :  { %1007 = vmatpush.msra.mxu2 %v5618_v16  ;;  %v5942_v16 = vld [vmem:[%s7975_s4 + $0x8] sm:$0xff] }
 0x2ff   :  { %1008 = vmatpush.msra.mxu2 %v5624_v18  ;;  %v5947_v18 = vld [vmem:[%s7976_s11 + $0x8] sm:$0xff] }
 0x331   :  { %v427_v5 = vpop.permute.xlu2 %426 }
 0x332   :  { %v429_v6 = vmul.f32 %v427_v5, %v406_v24  ;;  %v5804_v24 = vld [vmem:[%s7973_s6 + $0x20] sm:$0xff] }
 0x333   :  { %450 = vmatpush.msrb.mxu1 %v5804_v24 }
 0x334   :  { %431 = vrot.lane.b32.xlu2 %v429_v6, %s5491_s28 }
 0x335   :  { %647 = vmatpush.msra.mxu1 %v5860_v9 }
 0x337   :  { %648 = vmatpush.msra.mxu1 %v5870_v23 }
 0x339   :  { %649 = vmatpush.msra.mxu1 %v5885_v27 }
 0x33b   :  { %650 = vmatpush.msra.mxu1 %v5893_v28 }
 0x34c   :  { %v307_v35 = vpop.permute.xlu1 %306 }
 0x34d   :  { %v309_v36 = vmul.f32 %v307_v35, %v5811_v34 }
 0x34f   :  { %311 = vrot.lane.b32.xlu1 %v309_v36, %s5491_s28  ;;  %v5991_v36 = vld [vmem:[%s7974_s8 + $0x2] ss:$0 sm:$0xff] }
 0x354   :  { %v611_v39 = vpop.permute.xlu1 %610 }
 0x355   :  { %v613_v40 = vmul.f32 %v611_v39, %v5738_v37 }
 0x357   :  { %v5816_v48 = vadd.f32 %v621_v62, %v613_v40  ;;  %v5840_v62 = vld [vmem:[%s7974_s8 + $0x1] ss:$0 sm:$0xff] }
 0x359   :  { %4951 = vtanh.f32 %v5816_v48 }
 0x35f   :  { %v4952_v50 = vpop.eup %4951 }
 0x360   :  { %626 = vrot.lane.b32.xlu0 %v4952_v50, %s5490_s25 }
 0x373   :  { %v676_v50 = vpop.f32.mrf.mxu2 }
 0x38e   :  { %v5820_v52 = vpop.permute.xlu2 %431 }
 0x38f   :  { %4764 = vmatmul.msk.f32.vlgmr.msrb.gmra.mxu1 %vm164_vm0, %v5820_v52 }
 0x390   :  { %798 = vmatpush.msrb.mxu1 %v5571_v0 }
 0x392   :  { %799 = vmatpush.msrb.mxu1 %v5576_v1 }
 0x394   :  { %800 = vmatpush.msrb.mxu1 %v5582_v2  ;;  %v5920_v2 = vld [vmem:[%s7975_s4 + $0x18] sm:$0xff] }
 0x395   :  { %777 = vmatpush.msrb.mxu0 %v5920_v2 }
 0x396   :  { %801 = vmatpush.msrb.mxu1 %v5588_v3  ;;  %v5925_v3 = vld [vmem:[%s7976_s11 + $0x18] sm:$0xff] }
 0x397   :  { %338 = vmatpush.msra.mxu3 %v5925_v3  ;;  %778 = vmatpush.msrb.mxu0 %v5930_v13 }
 0x399   :  { %339 = vmatpush.msra.mxu3 %v5937_v14  ;;  %779 = vmatpush.msrb.mxu0 %v5942_v16 }
 0x39b   :  { %340 = vmatpush.msra.mxu3 %v5947_v18  ;;  %780 = vmatpush.msrb.mxu0 %v5954_v44 }
 0x39d   :  { %341 = vmatpush.msra.mxu3 %v5959_v46  ;;  %945 = vmatpush.msra.mxu0 %v5925_v3 }
 0x39f   :  { %538 = vmatpush.msrb.mxu3 %v5925_v3  ;;  %946 = vmatpush.msra.mxu0 %v5937_v14 }
 0x3a1   :  { %539 = vmatpush.msrb.mxu3 %v5937_v14  ;;  %947 = vmatpush.msra.mxu0 %v5947_v18 }
 0x3a3   :  { %540 = vmatpush.msrb.mxu3 %v5947_v18  ;;  %948 = vmatpush.msra.mxu0 %v5959_v46 }
 0x3a5   :  { %541 = vmatpush.msrb.mxu3 %v5959_v46 }
 0x3c1   :  { %v312_v56 = vpop.permute.xlu1 %311 }
 0x3c2   :  { %v5825_v57 = vadd.f32 %v312_v56, %v304_v55 }
 0x3c4   :  { %4953 = vtanh.f32 %v5825_v57 }
 0x3ca   :  { %v4954_v58 = vpop.eup %4953 }
 0x3cb   :  { %317 = vrot.lane.b32.xlu1 %v4954_v58, %s5490_s25 }
 0x3d2   :  { %v627_v59 = vpop.permute.xlu0 %626 }
 0x3d3   :  { %v629_v60 = vmul.f32 %v627_v59, %v5738_v37 }
 0x3d5   :  { %631 = vrot.lane.b32.xlu0 %v629_v60, %s5491_s28 }
 0x40c   :  { %v452_v63 = vpop.f32.mrf.mxu1 }
 0x40d   :  { %v455_v5 = vadd.f32 %v5840_v62, %v452_v63 }
 0x40f   :  { %v5843_v6 = vadd.f32 %v476_v4, %v455_v5 }
 0x411   :  { %4955 = vtanh.f32 %v5843_v6  ;;  %v4766_v49 = vmul.f32 -1.442695, %v5843_v6 }
 0x413   :  { %4957 = vpow2.f32 %v4766_v49 }
 0x417   :  { %v4956_v37 = vpop.eup %4955 }
 0x418   :  { %506 = vrot.lane.b32.xlu2 %v4956_v37, %s5490_s25 }
 0x419   :  { %v4958_v29 = vpop.eup %4957 }
 0x420   :  { %501 = vrot.lane.b32.xlu2 %v4918_v7, %s5491_s28 }
 0x43d   :  { %v318_v43 = vpop.permute.xlu1 %317 }
 0x43e   :  { %v320_v0 = vmul.f32 %v318_v43, %v5811_v34  ;;  %v483_v34 = vadd.f32 1.0, %v4958_v29 }
 0x440   :  { %322 = vrot.lane.b32.xlu1 %v320_v0, %s5491_s28  ;;  %4959 = vrcp.f32 %v483_v34  ;;  %v495_v63 = vand.u32 2147483648, %v483_v34  ;;  %vm489_vm3 = vweird.f32 %v483_v34  ;;  %v493_v4 = vand.u32 2147483647, %v483_v34 }
 0x442   :  { %v496_v37 = vor.u32 1.1754944e-38, %v495_v63  ;;  %vm494_vm5 = vcmp.eq.f32.partialorder %v493_v4, 8.507059e+37 }
 0x446   :  { %v4960_v35 = vpop.eup %4959 }
 0x447   :  { %v5911_v1 = vpop.permute.xlu0 %631  ;;  %v485_v39 = vmul.f32 %v4960_v35, %v483_v34  ;;  %vm490_vm2 = vweird.f32 %v4960_v35  ;;  %v6002_v34 = vld [vmem:[%s7978_s3] sm:$0xf] }
 0x448   :  { %4770 = vmatmul.msk.f32.vlgmr.msra.gmra.mxu1 %vm164_vm0, %v5911_v1  ;;  %vm491_vm4 = vmor %vm489_vm3, %vm490_vm2 }
 0x449   :  { %v486_v55 = vsub.f32 1.0, %v485_v39 }
 0x44b   :  { %v487_v58 = vmul.f32 %v4960_v35, %v486_v55 }
 0x44d   :  { %v488_v59 = vadd.f32 %v4960_v35, %v487_v58 }
 0x44f   :  { %v492_v5 = vsel %vm491_vm4, %v4960_v35, %v488_v59 }
 0x450   :  { %4775 = vmatmul.msk.f32.vlgmr.msrb.gmra.mxu1 %vm164_vm0, %v5730_v19  ;;  %v5995_v7 = vsel %vm494_vm5, %v496_v37, %v492_v5  ;;  %v4922_v5 = vld [vmem:[%s7970_s10 + $0x5] ss:$0 sm:$0xff] }
 0x472   :  { %v507_v6 = vpop.permute.xlu2 %506 }
 0x473   :  { %v509_v26 = vmul.f32 %v507_v6, %v5995_v7 }
 0x4b2   :  { %v5974_v19 = vpop.permute.xlu1 %322 }
 0x4b3   :  { %4761 = vmatmul.msk.f32.vlgmr.msra.gmra.mxu3 %vm164_vm0, %v5974_v19  ;;  %4774 = vmatmul.msk.f32.vlgmr.msrb.gmra.mxu0 %vm164_vm0, %v5974_v19 }
 0x4b4   :  { %738 = vmatpush.msra.mxu3 %v5925_v3  ;;  %1089 = vmatpush.msrb.mxu0 %v5762_v10 }
 0x4b6   :  { %739 = vmatpush.msra.mxu3 %v5937_v14  ;;  %1090 = vmatpush.msrb.mxu0 %v5767_v11 }
 0x4b8   :  { %740 = vmatpush.msra.mxu3 %v5947_v18  ;;  %1091 = vmatpush.msrb.mxu0 %v5784_v20 }
 0x4ba   :  { %741 = vmatpush.msra.mxu3 %v5959_v46  ;;  %1092 = vmatpush.msrb.mxu0 %v5796_v22 }
 0x4c5   :  { %v652_v40 = vpop.f32.mrf.mxu1 }
 0x4c6   :  { %v655_v54 = vadd.f32 %v5991_v36, %v652_v40 }
 0x4c8   :  { %v679_v56 = vadd.f32 %v676_v50, %v655_v54 }
 0x4ca   :  { %4961 = vtanh.f32 %v679_v56  ;;  %v4772_v43 = vmul.f32 -1.442695, %v679_v56 }
 0x4cc   :  { %4963 = vpow2.f32 %v4772_v43 }
 0x4cd   :  { %v803_v50 = vpop.f32.mrf.mxu1 }
 0x4d0   :  { %v4962_v60 = vpop.eup %4961 }
 0x4d1   :  { %706 = vrot.lane.b32.xlu0 %v4962_v60, %s5490_s25 }
 0x4d2   :  { %v4964_v0 = vpop.eup %4963 }
 0x4d3   :  { %v683_v49 = vadd.f32 1.0, %v4964_v0  ;;  %v502_v0 = vpop.permute.xlu2 %501 }
 0x4d5   :  { %4965 = vrcp.f32 %v683_v49  ;;  %v695_v60 = vand.u32 2147483648, %v683_v49  ;;  %vm689_vm7 = vweird.f32 %v683_v49  ;;  %v693_v63 = vand.u32 2147483647, %v683_v49 }
 0x4d7   :  { %v696_v6 = vor.u32 1.1754944e-38, %v695_v60  ;;  %vm694_vm9 = vcmp.eq.f32.partialorder %v693_v63, 8.507059e+37 }
 0x4d9   :  { %511 = vrot.lane.b32.xlu0 %v509_v26, %s5491_s28 }
 0x4db   :  { %v4966_v29 = vpop.eup %4965 }
 0x4dc   :  { %v685_v39 = vmul.f32 %v4966_v29, %v683_v49  ;;  %vm690_vm6 = vweird.f32 %v4966_v29 }
 0x4dd   :  { %vm691_vm8 = vmor %vm689_vm7, %vm690_vm6 }
 0x4de   :  { %v686_v55 = vsub.f32 1.0, %v685_v39 }
 0x4e0   :  { %v687_v58 = vmul.f32 %v4966_v29, %v686_v55 }
 0x4e2   :  { %v688_v59 = vadd.f32 %v4966_v29, %v687_v58 }
 0x4e4   :  { %v692_v4 = vsel %vm691_vm8, %v4966_v29, %v688_v59 }
 0x4e5   :  { %v697_v26 = vsel %vm694_vm9, %v696_v6, %v692_v4 }
 0x530   :  { %v782_v35 = vpop.f32.mrf.mxu0 }
 0x531   :  { %v785_v40 = vadd.f32 %v782_v35, %v6002_v34  ;;  %v504_v35 = vmul.f32 %v502_v0, %v5995_v7 }
 0x533   :  { %v806_v54 = vadd.f32 %v803_v50, %v785_v40 }
 0x535   :  { %4967 = vtanh.f32 %v806_v54  ;;  %v4776_v40 = vmul.f32 -1.442695, %v806_v54 }
 0x53b   :  { %v4968_v56 = vpop.eup %4967 }
 0x53c   :  { %829 = vrot.lane.b32.xlu1 %v4968_v56, %s5490_s25 }
 0x543   :  { %v707_v37 = vpop.permute.xlu0 %706 }
 0x544   :  { %v709_v43 = vmul.f32 %v707_v37, %v697_v26  ;;  %701 = vrot.lane.b32.xlu1 %v4922_v5, %s5491_s28 }
 0x546   :  { %711 = vrot.lane.b32.xlu2 %v709_v43, %s5491_s28 }
 0x54b   :  { %v512_v39 = vpop.permute.xlu0 %511 }
 0x54c   :  { %v6012_v49 = vadd.f32 %v512_v39, %v504_v35 }
 0x54e   :  { %4969 = vtanh.f32 %v6012_v49 }
 0x54f   :  { %4971 = vpow2.f32 %v4776_v40 }
 0x554   :  { %v4970_v29 = vpop.eup %4969 }
 0x555   :  { %517 = vrot.lane.b32.xlu1 %v4970_v29, %s5490_s25  ;;  %v4972_v50 = vpop.eup %4971 }
 0x556   :  { %v810_v55 = vadd.f32 1.0, %v4972_v50 }
 0x558   :  { %4973 = vrcp.f32 %v810_v55  ;;  %v822_v4 = vand.u32 2147483648, %v810_v55  ;;  %vm816_vm11 = vweird.f32 %v810_v55  ;;  %v820_v5 = vand.u32 2147483647, %v810_v55 }
 0x55a   :  { %v823_v37 = vor.u32 1.1754944e-38, %v822_v4  ;;  %vm821_vm13 = vcmp.eq.f32.partialorder %v820_v5, 8.507059e+37 }
 0x55e   :  { %v4974_v58 = vpop.eup %4973 }
 0x55f   :  { %v812_v56 = vmul.f32 %v4974_v58, %v810_v55  ;;  %vm817_vm10 = vweird.f32 %v4974_v58 }
 0x560   :  { %vm818_vm12 = vmor %vm816_vm11, %vm817_vm10 }
 0x561   :  { %v813_v59 = vsub.f32 1.0, %v812_v56  ;;  %v6026_v56 = vld [vmem:[%s7975_s4 + $0x38] sm:$0xff] }
 0x562   :  { %984 = vmatpush.msra.mxu1 %v6026_v56 }
 0x563   :  { %v814_v60 = vmul.f32 %v4974_v58, %v813_v59  ;;  %v6031_v59 = vld [vmem:[%s7975_s4 + $0x30] sm:$0xff] }
 0x564   :  { %985 = vmatpush.msra.mxu1 %v6031_v59 }
 0x565   :  { %v815_v63 = vadd.f32 %v4974_v58, %v814_v60  ;;  %v6037_v60 = vld [vmem:[%s7975_s4 + $0x28] sm:$0xff] }
 0x566   :  { %986 = vmatpush.msra.mxu1 %v6037_v60 }
 0x567   :  { %v819_v6 = vsel %vm818_vm12, %v4974_v58, %v815_v63 }
 0x568   :  { %v824_v0 = vsel %vm821_vm13, %v823_v37, %v819_v6 }
 0x569   :  { %v827_v5 = vmul.f32 %v824_v0, %v5661_v38 }
 0x5a0   :  { %v712_v29 = vpop.permute.xlu2 %711 }
 0x5ae   :  { %v830_v43 = vpop.permute.xlu1 %829 }
 0x5af   :  { %v832_v54 = vmul.f32 %v830_v43, %v824_v0 }
 0x5b1   :  { %834 = vrot.lane.b32.xlu0 %v832_v54, %s5491_s28 }
 0x5b6   :  { %v702_v35 = vpop.permute.xlu1 %701 }
 0x5b7   :  { %v704_v39 = vmul.f32 %v702_v35, %v697_v26 }
 0x5b9   :  { %v6017_v40 = vadd.f32 %v712_v29, %v704_v39 }
 0x5bb   :  { %4975 = vtanh.f32 %v6017_v40 }
 0x5c1   :  { %v4976_v50 = vpop.eup %4975 }
 0x5c2   :  { %717 = vrot.lane.b32.xlu2 %v4976_v50, %s5490_s25 }
 0x5c7   :  { %v518_v55 = vpop.permute.xlu1 %517 }
 0x5c8   :  { %v520_v58 = vmul.f32 %v518_v55, %v5995_v7  ;;  %v6043_v7 = vld [vmem:[%s7975_s4 + $0x20] sm:$0xff] }
 0x5c9   :  { %987 = vmatpush.msra.mxu1 %v6043_v7 }
 0x5ca   :  { %522 = vrot.lane.b32.xlu1 %v520_v58, %s5491_s28 }
 0x5cb   :  { %1152 = vmatpush.msrb.mxu1 %v5925_v3 }
 0x5cd   :  { %1153 = vmatpush.msrb.mxu1 %v5937_v14 }
 0x5cf   :  { %1154 = vmatpush.msrb.mxu1 %v5947_v18 }
 0x5d1   :  { %1155 = vmatpush.msrb.mxu1 %v5959_v46 }
 0x61c   :  { %v718_v63 = vpop.permute.xlu2 %717 }
 0x61d   :  { %v720_v4 = vmul.f32 %v718_v63, %v697_v26 }
 0x61f   :  { %722 = vrot.lane.b32.xlu2 %v720_v4, %s5491_s28 }
 0x623   :  { %v835_v6 = vpop.permute.xlu0 %834 }
 0x624   :  { %v6053_v37 = vadd.f32 %v835_v6, %v827_v5 }
 0x626   :  { %4977 = vtanh.f32 %v6053_v37 }
 0x62c   :  { %v4978_v43 = vpop.eup %4977 }
 0x62d   :  { %840 = vrot.lane.b32.xlu0 %v4978_v43, %s5490_s25 }
 0x63c   :  { %v6057_v54 = vpop.permute.xlu1 %522 }
 0x63d   :  { %4767 = vmatmul.msk.f32.vlgmr.msrb.gmra.mxu3 %vm164_vm0, %v6057_v54  ;;  %4781 = vmatmul.msk.f32.vlgmr.msra.gmra.mxu1 %vm164_vm0, %v6057_v54 }
 0x63e   :  { %882 = vmatpush.msrb.mxu3 %v5668_v41  ;;  %1296 = vmatpush.msra.mxu1 %v5834_v61 }
 0x640   :  { %883 = vmatpush.msrb.mxu3 %v5673_v42  ;;  %1297 = vmatpush.msra.mxu1 %v5853_v8 }
 0x642   :  { %884 = vmatpush.msrb.mxu3 %v5690_v45  ;;  %1298 = vmatpush.msra.mxu1 %v5865_v15 }
 0x644   :  { %885 = vmatpush.msrb.mxu3 %v5702_v47  ;;  %1299 = vmatpush.msra.mxu1 %v5877_v25 }
 0x679   :  { %v6071_v38 = vpop.permute.xlu2 %722 }
 0x67a   :  { %4773 = vmatmul.msk.f32.vlgmr.msra.gmra.mxu3 %vm164_vm0, %v6071_v38 }
 0x67b   :  { %1068 = vmatpush.msra.mxu3 %v5772_v12  ;;  %v6089_v12 = vld [vmem:[%s7975_s4 + $0x58] sm:$0xff] }
 0x67d   :  { %1069 = vmatpush.msra.mxu3 %v5779_v17 }
 0x67f   :  { %1070 = vmatpush.msra.mxu3 %v5789_v21 }
 0x681   :  { %1071 = vmatpush.msra.mxu3 %v5804_v24 }
 0x682   :  { %4778 = vmatmul.msk.f32.vlgmr.msrb.gmra.mxu3 %vm164_vm0, %v5974_v19 }
 0x683   :  { %1212 = vmatpush.msrb.mxu3 %v5636_v30  ;;  %v6098_v30 = vld [vmem:[%s7975_s4 + $0x50] sm:$0xff] }
 0x685   :  { %1213 = vmatpush.msrb.mxu3 %v5641_v31  ;;  %v6104_v31 = vld [vmem:[%s7975_s4 + $0x48] sm:$0xff] }
 0x687   :  { %1214 = vmatpush.msrb.mxu3 %v5647_v32  ;;  %v6110_v32 = vld [vmem:[%s7975_s4 + $0x40] sm:$0xff] }
 0x689   :  { %1215 = vmatpush.msrb.mxu3 %v5653_v33  ;;  %v6126_v33 = vpop.f32.mrf.mxu3 }
 0x68a   :  { %7995 = vst [vmem:[#allocation2_spill] sm:$0xff] %v6126_v33 }
 0x69f   :  { %v841_v26 = vpop.permute.xlu0 %840 }
 0x6a0   :  { %v843_v35 = vmul.f32 %v841_v26, %v824_v0 }
 0x6a2   :  { %845 = vrot.lane.b32.xlu0 %v843_v35, %s5491_s28 }
 0x6c0   :  { %v6128_v21 = vpop.f32.mrf.mxu3 }
 0x6c1   :  { %7996 = vst [vmem:[#allocation3_spill] sm:$0xff] %v6128_v21 }
 0x6fd   :  { %v6130_v24 = vpop.f32.mrf.mxu3 }
 0x6fe   :  { %7997 = vst [vmem:[#allocation4_spill] sm:$0xff] %v6130_v24 }
 0x705   :  { %v887_v0 = vpop.f32.mrf.mxu3 }
 0x714   :  { %v6091_v17 = vpop.permute.xlu0 %845 }
 0x715   :  { %4777 = vmatmul.msk.f32.vlgmr.msrb.gmra.mxu2 %vm164_vm0, %v6091_v17 }
 0x716   :  { %1191 = vmatpush.msrb.mxu2 %v6089_v12 }
 0x718   :  { %1192 = vmatpush.msrb.mxu2 %v6098_v30 }
 0x71a   :  { %1193 = vmatpush.msrb.mxu2 %v6104_v31 }
 0x71c   :  { %1194 = vmatpush.msrb.mxu2 %v6110_v32 }
 0x71d   :  { %4782 = vmatmul.msk.f32.vlgmr.msra.gmra.mxu2 %vm164_vm0, %v5820_v52 }
 0x71e   :  { %1359 = vmatpush.msra.mxu2 %v5925_v3 }
 0x720   :  { %1360 = vmatpush.msra.mxu2 %v5937_v14 }
 0x722   :  { %1361 = vmatpush.msra.mxu2 %v5947_v18 }
 0x724   :  { %1362 = vmatpush.msra.mxu2 %v5959_v46 }
 0x725   :  { %4788 = vmatmul.msk.f32.vlgmr.msrb.gmra.mxu2 %vm164_vm0, %v6071_v38 }
 0x726   :  { %1503 = vmatpush.msrb.mxu2 %v5668_v41  ;;  %v6136_v41 = vld [vmem:[%s7978_s3 + $0x4] sm:$0xf] }
 0x728   :  { %1504 = vmatpush.msrb.mxu2 %v5673_v42  ;;  %v989_v42 = vpop.f32.mrf.mxu1 }
 0x72a   :  { %1505 = vmatpush.msrb.mxu2 %v5690_v45  ;;  %v992_v45 = vadd.f32 %v6136_v41, %v989_v42 }
 0x72c   :  { %1506 = vmatpush.msrb.mxu2 %v5702_v47 }
 0x798   :  { %v866_v52 = vpop.f32.mrf.mxu2 }
 0x799   :  { %v869_v19 = vadd.f32 %v5746_v51, %v866_v52 }
 0x79b   :  { %v890_v39 = vadd.f32 %v887_v0, %v869_v19 }
 0x79d   :  { %4979 = vtanh.f32 %v890_v39  ;;  %v4779_v4 = vmul.f32 -1.442695, %v890_v39 }
 0x7a0   :  { %v1010_v47 = vpop.f32.mrf.mxu2 }
 0x7a1   :  { %v1013_v29 = vadd.f32 %v1010_v47, %v992_v45 }
 0x7a3   :  { %v4980_v50 = vpop.eup %4979  ;;  %4981 = vtanh.f32 %v1013_v29  ;;  %v4783_v51 = vmul.f32 -1.442695, %v1013_v29 }
 0x7a4   :  { %913 = vrot.lane.b32.xlu1 %v4980_v50, %s5490_s25 }
 0x7a5   :  { %4983 = vpow2.f32 %v4783_v51 }
 0x7a9   :  { %v4982_v55 = vpop.eup %4981 }
 0x7aa   :  { %1036 = vrot.lane.b32.xlu2 %v4982_v55, %s5490_s25 }
 0x7ab   :  { %v4984_v58 = vpop.eup %4983 }
 0x7ac   :  { %v1017_v63 = vadd.f32 1.0, %v4984_v58 }
 0x7ae   :  { %4985 = vrcp.f32 %v1017_v63  ;;  %v1029_v0 = vand.u32 2147483648, %v1017_v63  ;;  %vm1023_vm15 = vweird.f32 %v1017_v63  ;;  %v1027_v42 = vand.u32 2147483647, %v1017_v63 }
 0x7af   :  { %4987 = vpow2.f32 %v4779_v4 }
 0x7b0   :  { %v1030_v29 = vor.u32 1.1754944e-38, %v1029_v0  ;;  %vm1028_vm2 = vcmp.eq.f32.partialorder %v1027_v42, 8.507059e+37 }
 0x7b4   :  { %v4986_v5 = vpop.eup %4985 }
 0x7b5   :  { %v1019_v6 = vmul.f32 %v4986_v5, %v1017_v63  ;;  %v4988_v43 = vpop.eup %4987  ;;  %vm1024_vm14 = vweird.f32 %v4986_v5 }
 0x7b6   :  { %v894_v35 = vadd.f32 1.0, %v4988_v43  ;;  %vm1025_vm1 = vmor %vm1023_vm15, %vm1024_vm14 }
 0x7b7   :  { %v1020_v26 = vsub.f32 1.0, %v1019_v6 }
 0x7b8   :  { %4989 = vrcp.f32 %v894_v35  ;;  %v906_v43 = vand.u32 2147483648, %v894_v35  ;;  %vm900_vm4 = vweird.f32 %v894_v35 }
 0x7b9   :  { %v1021_v52 = vmul.f32 %v4986_v5, %v1020_v26  ;;  %v904_v26 = vand.u32 2147483647, %v894_v35 }
 0x7bb   :  { %v1022_v19 = vadd.f32 %v4986_v5, %v1021_v52  ;;  %v907_v52 = vor.u32 1.1754944e-38, %v906_v43  ;;  %vm905_vm6 = vcmp.eq.f32.partialorder %v904_v26, 8.507059e+37 }
 0x7bd   :  { %v1026_v47 = vsel %vm1025_vm1, %v4986_v5, %v1022_v19 }
 0x7be   :  { %v4990_v45 = vpop.eup %4989  ;;  %v1031_v55 = vsel %vm1028_vm2, %v1030_v29, %v1026_v47 }
 0x7bf   :  { %v896_v50 = vmul.f32 %v4990_v45, %v894_v35  ;;  %vm901_vm3 = vweird.f32 %v4990_v45  ;;  %v1034_v42 = vmul.f32 %v1031_v55, %v5748_v53 }
 0x7c0   :  { %vm902_vm5 = vmor %vm900_vm4, %vm901_vm3 }
 0x7c1   :  { %v897_v58 = vsub.f32 1.0, %v896_v50 }
 0x7c3   :  { %v898_v4 = vmul.f32 %v4990_v45, %v897_v58 }
 0x7c5   :  { %v899_v6 = vadd.f32 %v4990_v45, %v898_v4 }
 0x7c7   :  { %v903_v63 = vsel %vm902_vm5, %v4990_v45, %v899_v6 }
 0x7c8   :  { %v908_v19 = vsel %vm905_vm6, %v907_v52, %v903_v63 }
 0x7c9   :  { %v911_v35 = vmul.f32 %v908_v19, %v5825_v57 }
 0x804   :  { %v1037_v39 = vpop.permute.xlu2 %1036 }
 0x805   :  { %v1039_v51 = vmul.f32 %v1037_v39, %v1031_v55 }
 0x807   :  { %1041 = vrot.lane.b32.xlu1 %v1039_v51, %s5491_s28 }
 0x816   :  { %v914_v5 = vpop.permute.xlu1 %913 }
 0x817   :  { %v916_v0 = vmul.f32 %v914_v5, %v908_v19 }
 0x819   :  { %918 = vrot.lane.b32.xlu0 %v916_v0, %s5491_s28 }
 0x879   :  { %v1042_v47 = vpop.permute.xlu1 %1041 }
 0x87a   :  { %v6144_v29 = vadd.f32 %v1042_v47, %v1034_v42 }
 0x87c   :  { %4991 = vtanh.f32 %v6144_v29 }
 0x882   :  { %v4992_v50 = vpop.eup %4991 }
 0x883   :  { %1047 = vrot.lane.b32.xlu0 %v4992_v50, %s5490_s25 }
 0x88b   :  { %v919_v45 = vpop.permute.xlu0 %918 }
 0x88c   :  { %v6149_v39 = vadd.f32 %v919_v45, %v911_v35 }
 0x88e   :  { %4993 = vtanh.f32 %v6149_v39 }
 0x894   :  { %v4994_v51 = vpop.eup %4993 }
 0x895   :  { %924 = vrot.lane.b32.xlu2 %v4994_v51, %s5490_s25 }
 0x8ef   :  { %v925_v58 = vpop.permute.xlu2 %924 }
 0x8f0   :  { %v927_v53 = vmul.f32 %v925_v58, %v908_v19 }
 0x8f2   :  { %929 = vrot.lane.b32.xlu1 %v927_v53, %s5491_s28 }
 0x8f5   :  { %v1048_v4 = vpop.permute.xlu0 %1047 }
 0x8f6   :  { %v1050_v6 = vmul.f32 %v1048_v4, %v1031_v55 }
 0x8f8   :  { %1052 = vrot.lane.b32.xlu2 %v1050_v6, %s5491_s28 }
 0x952   :  { %v6155_v43 = vpop.permute.xlu2 %1052 }
 0x953   :  { %4784 = vmatmul.msk.f32.vlgmr.msra.gmra.mxu3 %vm164_vm0, %v6155_v43 }
 0x954   :  { %1398 = vmatpush.msra.mxu3 %v5920_v2 }
 0x956   :  { %1399 = vmatpush.msra.mxu3 %v5930_v13 }
 0x958   :  { %1400 = vmatpush.msra.mxu3 %v5942_v16 }
 0x95a   :  { %1401 = vmatpush.msra.mxu3 %v5954_v44 }
 0x95b   :  { %4789 = vmatmul.msk.f32.vlgmr.msrb.gmra.mxu3 %vm164_vm0, %v5911_v1 }
 0x95c   :  { %1566 = vmatpush.msrb.mxu3 %v5925_v3 }
 0x95e   :  { %1567 = vmatpush.msrb.mxu3 %v5937_v14 }
 0x960   :  { %1568 = vmatpush.msrb.mxu3 %v5947_v18 }
 0x962   :  { %1569 = vmatpush.msrb.mxu3 %v5959_v46 }
 0x964   :  { %v6169_v57 = vpop.permute.xlu1 %929 }
 0x965   :  { %4780 = vmatmul.msk.f32.vlgmr.msra.gmra.mxu0 %vm164_vm0, %v6169_v57  ;;  %4795 = vmatmul.msk.f32.vlgmr.msra.gmra.mxu3 %vm164_vm0, %v6169_v57 }
 0x966   :  { %1275 = vmatpush.msra.mxu0 %v5860_v9  ;;  %1710 = vmatpush.msra.mxu3 %v5762_v10  ;;  %v6188_v9 = vld [vmem:[%s7968_s5 + $0x18] sm:$0xff]  ;;  %v6194_v10 = vld [vmem:[%s7968_s5 + $0x10] sm:$0xff] }
 0x968   :  { %1276 = vmatpush.msra.mxu0 %v5870_v23  ;;  %1711 = vmatpush.msra.mxu3 %v5767_v11  ;;  %v6200_v11 = vld [vmem:[%s7968_s5 + $0x8] sm:$0xff] }
 0x969   :  { %v6212_v23 = vld [vmem:[%s7978_s3 + $0x8] sm:$0xf] }
 0x96a   :  { %1277 = vmatpush.msra.mxu0 %v5885_v27  ;;  %1712 = vmatpush.msra.mxu3 %v5784_v20  ;;  %v6206_v20 = vld [vmem:[%s7968_s5] sm:$0xff]  ;;  %v1196_v27 = vpop.f32.mrf.mxu2 }
 0x96c   :  { %1278 = vmatpush.msra.mxu0 %v5893_v28  ;;  %1713 = vmatpush.msra.mxu3 %v5796_v22  ;;  %v1199_v28 = vadd.f32 %v6212_v23, %v1196_v27 }
 0x96d   :  { %4785 = vmatmul.msk.f32.vlgmr.msrb.gmra.mxu0 %vm164_vm0, %v6057_v54 }
 0x96e   :  { %1419 = vmatpush.msrb.mxu0 %v6188_v9 }
 0x970   :  { %1420 = vmatpush.msrb.mxu0 %v6194_v10 }
 0x972   :  { %1421 = vmatpush.msrb.mxu0 %v6200_v11 }
 0x974   :  { %1422 = vmatpush.msrb.mxu0 %v6206_v20 }
 0x9d6   :  { %v1073_v22 = vpop.f32.mrf.mxu3 }
 0x9d7   :  { %v1076_v44 = vadd.f32 %v5840_v62, %v1073_v22 }
 0x9de   :  { %v1217_v1 = vpop.f32.mrf.mxu3 }
 0x9df   :  { %v1220_v2 = vadd.f32 %v1217_v1, %v1199_v28 }
 0x9e1   :  { %4995 = vtanh.f32 %v1220_v2  ;;  %v4790_v63 = vmul.f32 -1.442695, %v1220_v2 }
 0x9e2   :  { %v6215_v13 = vpop.f32.mrf.mxu0 }
 0x9e3   :  { %7998 = vst [vmem:[#allocation5_spill] sm:$0xff] %v6215_v13 }
 0x9e7   :  { %v4996_v16 = vpop.eup %4995 }
 0x9e8   :  { %1243 = vrot.lane.b32.xlu1 %v4996_v16, %s5490_s25 }
 0x9ea   :  { %v1094_v54 = vpop.f32.mrf.mxu0 }
 0x9eb   :  { %v1097_v55 = vadd.f32 %v1094_v54, %v1076_v44 }
 0x9ed   :  { %4997 = vtanh.f32 %v1097_v55  ;;  %v4786_v5 = vmul.f32 -1.442695, %v1097_v55 }
 0x9ee   :  { %4999 = vpow2.f32 %v4790_v63 }
 0x9ef   :  { %5001 = vpow2.f32 %v4786_v5 }
 0x9f3   :  { %v4998_v26 = vpop.eup %4997 }
 0x9f4   :  { %1120 = vrot.lane.b32.xlu0 %v4998_v26, %s5490_s25  ;;  %v5000_v52 = vpop.eup %4999 }
 0x9f5   :  { %v1224_v19 = vadd.f32 1.0, %v5000_v52  ;;  %v5002_v0 = vpop.eup %5001 }
 0x9f6   :  { %v1101_v47 = vadd.f32 1.0, %v5002_v0 }
 0x9f7   :  { %5003 = vrcp.f32 %v1224_v19  ;;  %v1236_v53 = vand.u32 2147483648, %v1224_v19  ;;  %vm1230_vm8 = vweird.f32 %v1224_v19  ;;  %v1234_v4 = vand.u32 2147483647, %v1224_v19 }
 0x9f8   :  { %5005 = vrcp.f32 %v1101_v47  ;;  %v1113_v54 = vand.u32 2147483648, %v1101_v47  ;;  %vm1107_vm12 = vweird.f32 %v1101_v47  ;;  %v1111_v55 = vand.u32 2147483647, %v1101_v47 }
 0x9f9   :  { %v1237_v27 = vor.u32 1.1754944e-38, %v1236_v53  ;;  %vm1235_vm10 = vcmp.eq.f32.partialorder %v1234_v4, 8.507059e+37 }
 0x9fa   :  { %v1114_v63 = vor.u32 1.1754944e-38, %v1113_v54  ;;  %vm1112_vm14 = vcmp.eq.f32.partialorder %v1111_v55, 8.507059e+37 }
 0x9fd   :  { %v5004_v42 = vpop.eup %5003 }
 0x9fe   :  { %v1226_v50 = vmul.f32 %v5004_v42, %v1224_v19  ;;  %v5006_v45 = vpop.eup %5005  ;;  %vm1231_vm7 = vweird.f32 %v5004_v42 }
 0x9ff   :  { %v1103_v58 = vmul.f32 %v5006_v45, %v1101_v47  ;;  %vm1232_vm9 = vmor %vm1230_vm8, %vm1231_vm7  ;;  %vm1108_vm11 = vweird.f32 %v5006_v45 }
 0xa00   :  { %v1227_v35 = vsub.f32 1.0, %v1226_v50  ;;  %vm1109_vm13 = vmor %vm1107_vm12, %vm1108_vm11 }
 0xa01   :  { %v1104_v22 = vsub.f32 1.0, %v1103_v58 }
 0xa02   :  { %v1228_v62 = vmul.f32 %v5004_v42, %v1227_v35 }
 0xa03   :  { %v1105_v16 = vmul.f32 %v5006_v45, %v1104_v22  ;;  %v1403_v22 = vpop.f32.mrf.mxu3 }
 0xa04   :  { %v1229_v51 = vadd.f32 %v5004_v42, %v1228_v62 }
 0xa05   :  { %v1106_v44 = vadd.f32 %v5006_v45, %v1105_v16 }
 0xa06   :  { %v1233_v6 = vsel %vm1232_vm9, %v5004_v42, %v1229_v51 }
 0xa07   :  { %v1238_v1 = vsel %vm1235_vm10, %v1237_v27, %v1233_v6  ;;  %v1110_v26 = vsel %vm1109_vm13, %v5006_v45, %v1106_v44  ;;  %v1406_v27 = vadd.f32 %v1403_v22, %v6002_v34 }
 0xa08   :  { %v1115_v5 = vsel %vm1112_vm14, %v1114_v63, %v1110_v26  ;;  %v1241_v47 = vmul.f32 %v1238_v1, %v5816_v48 }
 0xa09   :  { %v1118_v0 = vmul.f32 %v1115_v5, %v6012_v49 }
 0xa5a   :  { %v1244_v28 = vpop.permute.xlu1 %1243 }
 0xa5b   :  { %v1246_v2 = vmul.f32 %v1244_v28, %v1238_v1 }
 0xa5d   :  { %1248 = vrot.lane.b32.xlu0 %v1246_v2, %s5491_s28 }
 0xa66   :  { %v1121_v52 = vpop.permute.xlu0 %1120 }
 0xa67   :  { %v1123_v19 = vmul.f32 %v1121_v52, %v1115_v5 }
 0xa69   :  { %1125 = vrot.lane.b32.xlu2 %v1123_v19, %s5491_s28 }
 0xac3   :  { %v1126_v42 = vpop.permute.xlu2 %1125 }
 0xac4   :  { %v6223_v50 = vadd.f32 %v1126_v42, %v1118_v0 }
 0xac6   :  { %5007 = vtanh.f32 %v6223_v50 }
 0xacc   :  { %v5008_v35 = vpop.eup %5007 }
 0xacd   :  { %1131 = vrot.lane.b32.xlu1 %v5008_v35, %s5490_s25 }
 0xacf   :  { %v1249_v62 = vpop.permute.xlu0 %1248 }
 0xad0   :  { %v6228_v45 = vadd.f32 %v1249_v62, %v1241_v47 }
 0xad2   :  { %5009 = vtanh.f32 %v6228_v45 }
 0xad8   :  { %v5010_v51 = vpop.eup %5009 }
 0xad9   :  { %1254 = vrot.lane.b32.xlu2 %v5010_v51, %s5490_s25 }
 0xb33   :  { %v1255_v58 = vpop.permute.xlu2 %1254 }
 0xb34   :  { %v1257_v49 = vmul.f32 %v1255_v58, %v1238_v1 }
 0xb36   :  { %1259 = vrot.lane.b32.xlu1 %v1257_v49, %s5491_s28 }
 0xb3f   :  { %v1132_v53 = vpop.permute.xlu1 %1131 }
 0xb40   :  { %v1134_v4 = vmul.f32 %v1132_v53, %v1115_v5 }
 0xb42   :  { %1136 = vrot.lane.b32.xlu0 %v1134_v4, %s5491_s28 }
 0xba8   :  { %v6234_v6 = vpop.permute.xlu1 %1259 }
 0xba9   :  { %4791 = vmatmul.msk.f32.vlgmr.msra.gmra.mxu0 %vm164_vm0, %v6234_v6 }
 0xbaa   :  { %1605 = vmatpush.msra.mxu0 %v6026_v56  ;;  %v6253_v56 = vld [vmem:[%s7973_s6 + $0x18] sm:$0xff] }
 0xbac   :  { %1606 = vmatpush.msra.mxu0 %v6031_v59  ;;  %v6260_v59 = vld [vmem:[%s7973_s6 + $0x10] sm:$0xff] }
 0xbae   :  { %1607 = vmatpush.msra.mxu0 %v6037_v60  ;;  %v6269_v60 = vld [vmem:[%s7973_s6 + $0x8] sm:$0xff] }
 0xbb0   :  { %1608 = vmatpush.msra.mxu0 %v6043_v7  ;;  %v6276_v7 = vld [vmem:[%s7973_s6] sm:$0xff] }
 0xbb1   :  { %4796 = vmatmul.msk.f32.vlgmr.msrb.gmra.mxu0 %vm164_vm0, %v6091_v17  ;;  %v6285_v17 = vld [vmem:[%s7968_s5 + $0x38] sm:$0xff] }
 0xbb2   :  { %1773 = vmatpush.msrb.mxu0 %v5925_v3 }
 0xbb4   :  { %v6245_v48 = vpop.permute.xlu0 %1136  ;;  %1774 = vmatpush.msrb.mxu0 %v5937_v14 }
 0xbb5   :  { %4787 = vmatmul.msk.f32.vlgmr.msrb.gmra.mxu1 %vm164_vm0, %v6245_v48 }
 0xbb6   :  { %1482 = vmatpush.msrb.mxu1 %v6253_v56  ;;  %1775 = vmatpush.msrb.mxu0 %v5947_v18 }
 0xbb8   :  { %1483 = vmatpush.msrb.mxu1 %v6260_v59  ;;  %1776 = vmatpush.msrb.mxu0 %v5959_v46 }
 0xbb9   :  { %4802 = vmatmul.msk.f32.vlgmr.msra.gmra.mxu0 %vm164_vm0, %v6245_v48 }
 0xbba   :  { %1484 = vmatpush.msrb.mxu1 %v6269_v60  ;;  %1917 = vmatpush.msra.mxu0 %v5834_v61  ;;  %v6292_v61 = vld [vmem:[%s7968_s5 + $0x30] sm:$0xff] }
 0xbbc   :  { %1485 = vmatpush.msrb.mxu1 %v6276_v7  ;;  %1918 = vmatpush.msra.mxu0 %v5853_v8  ;;  %v6299_v8 = vld [vmem:[%s7968_s5 + $0x28] sm:$0xff] }
 0xbbd   :  { %4792 = vmatmul.msk.f32.vlgmr.msra.gmra.mxu1 %vm164_vm0, %v6071_v38 }
 0xbbe   :  { %1626 = vmatpush.msra.mxu1 %v6285_v17  ;;  %1919 = vmatpush.msra.mxu0 %v5865_v15  ;;  %v6305_v15 = vld [vmem:[%s7968_s5 + $0x20] sm:$0xff] }
 0xbc0   :  { %1627 = vmatpush.msra.mxu1 %v6292_v61  ;;  %1920 = vmatpush.msra.mxu0 %v5877_v25 }
 0xbc2   :  { %1628 = vmatpush.msra.mxu1 %v6299_v8 }
 0xbc4   :  { %1629 = vmatpush.msra.mxu1 %v6305_v15 }
 0xc26   :  { %v1280_v38 = vpop.f32.mrf.mxu0 }
 0xc27   :  { %v1283_v16 = vadd.f32 %v5991_v36, %v1280_v38 }
 0xc2e   :  { %v1424_v28 = vpop.f32.mrf.mxu0 }
 0xc2f   :  { %v1427_v25 = vadd.f32 %v1424_v28, %v1406_v27 }
 0xc31   :  { %5011 = vtanh.f32 %v1427_v25  ;;  %v4797_v34 = vmul.f32 -1.442695, %v1427_v25 }
 0xc32   :  { %v6309_v1 = vpop.f32.mrf.mxu1 }
 0xc33   :  { %7999 = vst [vmem:[#allocation6_spill] sm:$0xff] %v6309_v1 }
 0xc37   :  { %v5012_v2 = vpop.eup %5011 }
 0xc38   :  { %1450 = vrot.lane.b32.xlu0 %v5012_v2, %s5490_s25 }
 0xc3a   :  { %v1301_v44 = vpop.f32.mrf.mxu1 }
 0xc3b   :  { %v1304_v54 = vadd.f32 %v1301_v44, %v1283_v16 }
 0xc3d   :  { %5013 = vtanh.f32 %v1304_v54  ;;  %v4793_v26 = vmul.f32 -1.442695, %v1304_v54 }
 0xc3f   :  { %5015 = vpow2.f32 %v4793_v26 }
 0xc40   :  { %5017 = vpow2.f32 %v4797_v34 }
 0xc43   :  { %v5014_v55 = vpop.eup %5013 }
 0xc44   :  { %1327 = vrot.lane.b32.xlu2 %v5014_v55, %s5490_s25 }
 0xc45   :  { %v5016_v63 = vpop.eup %5015 }
 0xc46   :  { %v1308_v52 = vadd.f32 1.0, %v5016_v63  ;;  %v5018_v5 = vpop.eup %5017 }
 0xc47   :  { %v1431_v0 = vadd.f32 1.0, %v5018_v5 }
 0xc48   :  { %5019 = vrcp.f32 %v1308_v52  ;;  %v1320_v58 = vand.u32 2147483648, %v1308_v52  ;;  %vm1314_vm1 = vweird.f32 %v1308_v52  ;;  %v1318_v49 = vand.u32 2147483647, %v1308_v52 }
 0xc49   :  { %5021 = vrcp.f32 %v1431_v0  ;;  %v1443_v16 = vand.u32 2147483648, %v1431_v0  ;;  %vm1437_vm5 = vweird.f32 %v1431_v0  ;;  %v1441_v44 = vand.u32 2147483647, %v1431_v0 }
 0xc4a   :  { %v1321_v38 = vor.u32 1.1754944e-38, %v1320_v58  ;;  %vm1319_vm3 = vcmp.eq.f32.partialorder %v1318_v49, 8.507059e+37 }
 0xc4b   :  { %v1444_v55 = vor.u32 1.1754944e-38, %v1443_v16  ;;  %vm1442_vm7 = vcmp.eq.f32.partialorder %v1441_v44, 8.507059e+37  ;;  %v1610_v16 = vpop.f32.mrf.mxu0 }
 0xc4c   :  { %v1613_v44 = vadd.f32 %v6136_v41, %v1610_v16 }
 0xc4e   :  { %v5020_v19 = vpop.eup %5019 }
 0xc4f   :  { %v1310_v42 = vmul.f32 %v5020_v19, %v1308_v52  ;;  %v5022_v47 = vpop.eup %5021  ;;  %vm1315_vm15 = vweird.f32 %v5020_v19 }
 0xc50   :  { %v1433_v51 = vmul.f32 %v5022_v47, %v1431_v0  ;;  %vm1316_vm2 = vmor %vm1314_vm1, %vm1315_vm15  ;;  %vm1438_vm4 = vweird.f32 %v5022_v47 }
 0xc51   :  { %v1311_v35 = vsub.f32 1.0, %v1310_v42  ;;  %vm1439_vm6 = vmor %vm1437_vm5, %vm1438_vm4 }
 0xc52   :  { %v1434_v4 = vsub.f32 1.0, %v1433_v51 }
 0xc53   :  { %v1312_v36 = vmul.f32 %v5020_v19, %v1311_v35 }
 0xc54   :  { %v1435_v25 = vmul.f32 %v5022_v47, %v1434_v4  ;;  %v6347_v4 = vld [vmem:[%s7973_s6 + $0x28] sm:$0xff] }
 0xc55   :  { %v1313_v62 = vadd.f32 %v5020_v19, %v1312_v36 }
 0xc56   :  { %v1436_v2 = vadd.f32 %v5022_v47, %v1435_v25  ;;  %v6385_v25 = vld [vmem:[%s7968_s5 + $0x40] sm:$0xff] }
 0xc57   :  { %v1317_v53 = vsel %vm1316_vm2, %v5020_v19, %v1313_v62 }
 0xc58   :  { %v1322_v27 = vsel %vm1319_vm3, %v1321_v38, %v1317_v53  ;;  %v1440_v54 = vsel %vm1439_vm6, %v5022_v47, %v1436_v2  ;;  %v6341_v53 = vld [vmem:[%s7973_s6 + $0x30] sm:$0xff]  ;;  %v6353_v38 = vld [vmem:[%s7973_s6 + $0x20] sm:$0xff] }
 0xc59   :  { %v1445_v63 = vsel %vm1442_vm7, %v1444_v55, %v1440_v54  ;;  %v1325_v0 = vmul.f32 %v1322_v27, %v6017_v40  ;;  %v6335_v40 = vld [vmem:[%s7973_s6 + $0x38] sm:$0xff] }
 0xc5a   :  { %v1448_v52 = vmul.f32 %v1445_v63, %v6053_v37 }
 0xc9e   :  { %v1328_v22 = vpop.permute.xlu2 %1327 }
 0xc9f   :  { %v1330_v28 = vmul.f32 %v1328_v22, %v1322_v27  ;;  %v6361_v22 = vld [vmem:[%s7968_s5 + $0x58] sm:$0xff] }
 0xca1   :  { %1332 = vrot.lane.b32.xlu1 %v1330_v28, %s5491_s28  ;;  %v6369_v28 = vld [vmem:[%s7968_s5 + $0x50] sm:$0xff] }
 0xcaa   :  { %v1451_v26 = vpop.permute.xlu0 %1450 }
 0xcab   :  { %v1453_v34 = vmul.f32 %v1451_v26, %v1445_v63 }
 0xcad   :  { %1455 = vrot.lane.b32.xlu2 %v1453_v34, %s5491_s28 }
 0xd07   :  { %v1456_v5 = vpop.permute.xlu2 %1455 }
 0xd08   :  { %v6317_v19 = vadd.f32 %v1456_v5, %v1448_v52 }
 0xd0a   :  { %5023 = vtanh.f32 %v6317_v19 }
 0xd10   :  { %v5024_v42 = vpop.eup %5023 }
 0xd11   :  { %1461 = vrot.lane.b32.xlu1 %v5024_v42, %s5490_s25 }
 0xd13   :  { %v1333_v35 = vpop.permute.xlu1 %1332 }
 0xd14   :  { %v6322_v36 = vadd.f32 %v1333_v35, %v1325_v0 }
 0xd16   :  { %5025 = vtanh.f32 %v6322_v36 }
 0xd1c   :  { %v5026_v47 = vpop.eup %5025 }
 0xd1d   :  { %1338 = vrot.lane.b32.xlu0 %v5026_v47, %s5490_s25 }
 0xd83   :  { %v1462_v62 = vpop.permute.xlu1 %1461 }
 0xd84   :  { %v1464_v37 = vmul.f32 %v1462_v62, %v1445_v63 }
 0xd86   :  { %1466 = vrot.lane.b32.xlu0 %v1464_v37, %s5491_s28 }
 0xd8f   :  { %v1339_v51 = vpop.permute.xlu0 %1338 }
 0xd90   :  { %v1341_v58 = vmul.f32 %v1339_v51, %v1322_v27 }
 0xd92   :  { %1343 = vrot.lane.b32.xlu2 %v1341_v58, %s5491_s28 }
 0xdec   :  { %v6328_v49 = vpop.permute.xlu2 %1343 }
 0xded   :  { %4794 = vmatmul.msk.f32.vlgmr.msra.gmra.mxu2 %vm164_vm0, %v6328_v49 }
 0xdee   :  { %1689 = vmatpush.msra.mxu2 %v6335_v40 }
 0xdf0   :  { %1690 = vmatpush.msra.mxu2 %v6341_v53 }
 0xdf2   :  { %1691 = vmatpush.msra.mxu2 %v6347_v4 }
 0xdf4   :  { %1692 = vmatpush.msra.mxu2 %v6353_v38 }
 0xdf5   :  { %4799 = vmatmul.msk.f32.vlgmr.msrb.gmra.mxu2 %vm164_vm0, %v6169_v57  ;;  %v6378_v57 = vld [vmem:[%s7968_s5 + $0x48] sm:$0xff] }
 0xdf6   :  { %1833 = vmatpush.msrb.mxu2 %v6361_v22 }
 0xdf8   :  { %v6364_v27 = vpop.permute.xlu0 %1466  ;;  %1834 = vmatpush.msrb.mxu2 %v6369_v28 }
 0xdf9   :  { %4798 = vmatmul.msk.f32.vlgmr.msrb.gmra.mxu1 %vm164_vm0, %v6364_v27 }
 0xdfa   :  { %1812 = vmatpush.msrb.mxu1 %v6089_v12  ;;  %1835 = vmatpush.msrb.mxu2 %v6378_v57  ;;  %v6401_v12 = vld [vmem:[%s7972_s7 + $0x18] sm:$0xff] }
 0xdfc   :  { %1813 = vmatpush.msrb.mxu1 %v6098_v30  ;;  %1836 = vmatpush.msrb.mxu2 %v6385_v25 }
 0xdfe   :  { %1814 = vmatpush.msrb.mxu1 %v6104_v31  ;;  %v6427_v31 = vld [vmem:[%s7974_s8] ss:$0 sm:$0xff] }
 0xe00   :  { %1815 = vmatpush.msrb.mxu1 %v6110_v32 }
 0xe01   :  { %4803 = vmatmul.msk.f32.vlgmr.msra.gmra.mxu1 %vm164_vm0, %v6155_v43 }
 0xe02   :  { %1980 = vmatpush.msra.mxu1 %v5925_v3  ;;  %v6407_v3 = vld [vmem:[%s7972_s7 + $0x10] sm:$0xff] }
 0xe04   :  { %1981 = vmatpush.msra.mxu1 %v5937_v14  ;;  %v6413_v14 = vld [vmem:[%s7972_s7 + $0x8] sm:$0xff] }
 0xe06   :  { %1982 = vmatpush.msra.mxu1 %v5947_v18  ;;  %v6419_v18 = vld [vmem:[%s7972_s7] sm:$0xff] }
 0xe08   :  { %1983 = vmatpush.msra.mxu1 %v5959_v46 }
 0xe09   :  { %4809 = vmatmul.msk.f32.vlgmr.msrb.gmra.mxu1 %vm164_vm0, %v6328_v49 }
 0xe0a   :  { %2124 = vmatpush.msrb.mxu1 %v6401_v12 }
 0xe0c   :  { %2125 = vmatpush.msrb.mxu1 %v6407_v3 }
 0xe0e   :  { %2126 = vmatpush.msrb.mxu1 %v6413_v14 }
 0xe10   :  { %2127 = vmatpush.msrb.mxu1 %v6419_v18 }
 0xe70   :  { %v6422_v46 = vpop.f32.mrf.mxu2 }
 0xe71   :  { %8000 = vst [vmem:[#allocation7_spill] sm:$0xff] %v6422_v46 }
 0xe76   :  { %v1487_v30 = vpop.f32.mrf.mxu1 }
 0xe77   :  { %v1490_v32 = vadd.f32 %v6427_v31, %v1487_v30 }
 0xe78   :  { %v1508_v43 = vpop.f32.mrf.mxu2 }
 0xe79   :  { %v1511_v2 = vadd.f32 %v1508_v43, %v1490_v32 }
 0xe7b   :  { %5027 = vtanh.f32 %v1511_v2  ;;  %v4800_v42 = vmul.f32 -1.442695, %v1511_v2 }
 0xe7e   :  { %v1631_v54 = vpop.f32.mrf.mxu1 }
 0xe7f   :  { %v1634_v55 = vadd.f32 %v1631_v54, %v1613_v44 }
 0xe81   :  { %v5028_v26 = vpop.eup %5027  ;;  %5029 = vtanh.f32 %v1634_v55  ;;  %v4804_v34 = vmul.f32 -1.442695, %v1634_v55 }
 0xe82   :  { %1534 = vrot.lane.b32.xlu1 %v5028_v26, %s5490_s25 }
 0xe83   :  { %5031 = vpow2.f32 %v4804_v34 }
 0xe87   :  { %v5030_v63 = vpop.eup %5029 }
 0xe88   :  { %1657 = vrot.lane.b32.xlu2 %v5030_v63, %s5490_s25 }
 0xe89   :  { %v5032_v52 = vpop.eup %5031 }
 0xe8a   :  { %v1638_v5 = vadd.f32 1.0, %v5032_v52 }
 0xe8c   :  { %5033 = vrcp.f32 %v1638_v5  ;;  %v1650_v58 = vand.u32 2147483648, %v1638_v5  ;;  %vm1644_vm9 = vweird.f32 %v1638_v5  ;;  %v1648_v30 = vand.u32 2147483647, %v1638_v5 }
 0xe8d   :  { %5035 = vpow2.f32 %v4800_v42 }
 0xe8e   :  { %v1651_v16 = vor.u32 1.1754944e-38, %v1650_v58  ;;  %vm1649_vm11 = vcmp.eq.f32.partialorder %v1648_v30, 8.507059e+37 }
 0xe92   :  { %v5034_v0 = vpop.eup %5033 }
 0xe93   :  { %v1640_v35 = vmul.f32 %v5034_v0, %v1638_v5  ;;  %v5036_v47 = vpop.eup %5035  ;;  %vm1645_vm8 = vweird.f32 %v5034_v0 }
 0xe94   :  { %v1515_v62 = vadd.f32 1.0, %v5036_v47  ;;  %vm1646_vm10 = vmor %vm1644_vm9, %vm1645_vm8 }
 0xe95   :  { %v1641_v41 = vsub.f32 1.0, %v1640_v35 }
 0xe96   :  { %5037 = vrcp.f32 %v1515_v62  ;;  %v1527_v52 = vand.u32 2147483648, %v1515_v62  ;;  %vm1521_vm13 = vweird.f32 %v1515_v62  ;;  %v1525_v42 = vand.u32 2147483647, %v1515_v62 }
 0xe97   :  { %v1642_v37 = vmul.f32 %v5034_v0, %v1641_v41 }
 0xe98   :  { %v1528_v35 = vor.u32 1.1754944e-38, %v1527_v52  ;;  %vm1526_vm15 = vcmp.eq.f32.partialorder %v1525_v42, 8.507059e+37  ;;  %v6480_v52 = vld [vmem:[%s7976_s11 + $0x18] sm:$0xff]  ;;  %v6486_v42 = vld [vmem:[%s7976_s11 + $0x10] sm:$0xff] }
 0xe99   :  { %v1643_v51 = vadd.f32 %v5034_v0, %v1642_v37 }
 0xe9b   :  { %v1647_v43 = vsel %vm1646_vm10, %v5034_v0, %v1643_v51 }
 0xe9c   :  { %v5038_v32 = vpop.eup %5037  ;;  %v1652_v54 = vsel %vm1649_vm11, %v1651_v16, %v1647_v43 }
 0xe9d   :  { %v1517_v44 = vmul.f32 %v5038_v32, %v1515_v62  ;;  %vm1522_vm12 = vweird.f32 %v5038_v32  ;;  %v1655_v37 = vmul.f32 %v1652_v54, %v6144_v29 }
 0xe9e   :  { %vm1523_vm14 = vmor %vm1521_vm13, %vm1522_vm12 }
 0xe9f   :  { %v1518_v26 = vsub.f32 1.0, %v1517_v44 }
 0xea1   :  { %v1519_v63 = vmul.f32 %v5038_v32, %v1518_v26 }
 0xea3   :  { %v1520_v34 = vadd.f32 %v5038_v32, %v1519_v63  ;;  %v6460_v63 = vld [vmem:[%s7975_s4 + $0x10] sm:$0xff] }
 0xea5   :  { %v1524_v5 = vsel %vm1523_vm14, %v5038_v32, %v1520_v34  ;;  %v6472_v34 = vld [vmem:[%s7975_s4] sm:$0xff] }
 0xea6   :  { %v1529_v47 = vsel %vm1526_vm15, %v1528_v35, %v1524_v5  ;;  %v6492_v5 = vld [vmem:[%s7976_s11 + $0x8] sm:$0xff] }
 0xea7   :  { %v1532_v62 = vmul.f32 %v1529_v47, %v6149_v39  ;;  %v6454_v39 = vld [vmem:[%s7975_s4 + $0x18] sm:$0xff] }
 0xee2   :  { %v1658_v2 = vpop.permute.xlu2 %1657 }
 0xee3   :  { %v1660_v55 = vmul.f32 %v1658_v2, %v1652_v54 }
 0xee5   :  { %1662 = vrot.lane.b32.xlu1 %v1660_v55, %s5491_s28 }
 0xef4   :  { %v1535_v0 = vpop.permute.xlu1 %1534 }
 0xef5   :  { %v1537_v41 = vmul.f32 %v1535_v0, %v1529_v47  ;;  %v6510_v0 = vld [vmem:[%s7973_s6 + $0x58] sm:$0xff] }
 0xef7   :  { %1539 = vrot.lane.b32.xlu0 %v1537_v41, %s5491_s28  ;;  %v6522_v41 = vld [vmem:[%s7973_s6 + $0x50] sm:$0xff] }
 0xf57   :  { %v1663_v51 = vpop.permute.xlu1 %1662 }
 0xf58   :  { %v6436_v58 = vadd.f32 %v1663_v51, %v1655_v37  ;;  %v6528_v37 = vld [vmem:[%s7972_s7 + $0x30] sm:$0xff]  ;;  %v6534_v51 = vld [vmem:[%s7973_s6 + $0x48] sm:$0xff] }
 0xf5a   :  { %5039 = vtanh.f32 %v6436_v58 }
 0xf60   :  { %v5040_v30 = vpop.eup %5039 }
 0xf61   :  { %1668 = vrot.lane.b32.xlu0 %v5040_v30, %s5490_s25  ;;  %v6540_v30 = vld [vmem:[%s7972_s7 + $0x28] sm:$0xff] }
 0xf69   :  { %v1540_v32 = vpop.permute.xlu0 %1539 }
 0xf6a   :  { %v6441_v43 = vadd.f32 %v1540_v32, %v1532_v62  ;;  %v6546_v62 = vld [vmem:[%s7973_s6 + $0x40] sm:$0xff] }
 0xf6b   :  { %8001 = vst [vmem:[#allocation8_spill] sm:$0xff] %v6546_v62  ;;  %v6552_v32 = vld [vmem:[%s7972_s7 + $0x20] sm:$0xff] }
 0xf6c   :  { %5041 = vtanh.f32 %v6441_v43  ;;  %8002 = vst [vmem:[#allocation9_spill] sm:$0xff] %v6552_v32 }
 0xf72   :  { %v5042_v16 = vpop.eup %5041 }
 0xf73   :  { %1545 = vrot.lane.b32.xlu2 %v5042_v16, %s5490_s25 }
 0xfcd   :  { %v1546_v44 = vpop.permute.xlu2 %1545 }
 0xfce   :  { %v1548_v29 = vmul.f32 %v1546_v44, %v1529_v47  ;;  %v6516_v47 = vld [vmem:[%s7972_s7 + $0x38] sm:$0xff]  ;;  %v1817_v44 = vpop.f32.mrf.mxu1 }
 0xfd0   :  { %1550 = vrot.lane.b32.xlu1 %v1548_v29, %s5491_s28  ;;  %v1820_v29 = vadd.f32 %v6212_v23, %v1817_v44 }
 0xfd3   :  { %v1669_v2 = vpop.permute.xlu0 %1668 }
 0xfd4   :  { %v1671_v55 = vmul.f32 %v1669_v2, %v1652_v54  ;;  %v6466_v54 = vld [vmem:[%s7975_s4 + $0x8] sm:$0xff] }
 0xfd6   :  { %1673 = vrot.lane.b32.xlu2 %v1671_v55, %s5491_s28 }
0x1030   :  { %v6447_v26 = vpop.permute.xlu2 %1673 }
0x1031   :  { %4805 = vmatmul.msk.f32.vlgmr.msra.gmra.mxu2 %vm164_vm0, %v6447_v26 }
0x1032   :  { %2019 = vmatpush.msra.mxu2 %v6454_v39 }
0x1034   :  { %2020 = vmatpush.msra.mxu2 %v6460_v63 }
0x1036   :  { %2021 = vmatpush.msra.mxu2 %v6466_v54 }
0x1038   :  { %2022 = vmatpush.msra.mxu2 %v6472_v34 }
0x1039   :  { %4810 = vmatmul.msk.f32.vlgmr.msrb.gmra.mxu2 %vm164_vm0, %v6234_v6  ;;  %v6498_v6 = vld [vmem:[%s7976_s11] sm:$0xff] }
0x103a   :  { %2187 = vmatpush.msrb.mxu2 %v6480_v52 }
0x103c   :  { %2188 = vmatpush.msrb.mxu2 %v6486_v42 }
0x103e   :  { %2189 = vmatpush.msrb.mxu2 %v6492_v5 }
0x1040   :  { %2190 = vmatpush.msrb.mxu2 %v6498_v6 }
0x1042   :  { %v6501_v35 = vpop.permute.xlu1 %1550 }
0x1043   :  { %4801 = vmatmul.msk.f32.vlgmr.msrb.gmra.mxu3 %vm164_vm0, %v6501_v35  ;;  %4816 = vmatmul.msk.f32.vlgmr.msra.gmra.mxu2 %vm164_vm0, %v6501_v35 }
0x1044   :  { %1896 = vmatpush.msrb.mxu3 %v6510_v0  ;;  %2331 = vmatpush.msra.mxu2 %v6516_v47 }
0x1046   :  { %1897 = vmatpush.msrb.mxu3 %v6522_v41  ;;  %2332 = vmatpush.msra.mxu2 %v6528_v37 }
0x1048   :  { %1898 = vmatpush.msrb.mxu3 %v6534_v51  ;;  %2333 = vmatpush.msra.mxu2 %v6540_v30 }
0x104a   :  { %1899 = vmatpush.msrb.mxu3 %v6546_v62  ;;  %2334 = vmatpush.msra.mxu2 %v6552_v32 }
0x104b   :  { %4806 = vmatmul.msk.f32.vlgmr.msra.gmra.mxu3 %vm164_vm0, %v6245_v48 }
0x104c   :  { %2040 = vmatpush.msra.mxu3 %v6188_v9  ;;  %v6568_v9 = vld [vmem:[%s7974_s8 + $0x1] ss:$0 sm:$0xff] }
0x104d   :  { %8004 = vst [vmem:[#allocation11_spill] sm:$0xff] %v6568_v9 }
0x104e   :  { %2041 = vmatpush.msra.mxu3 %v6194_v10 }
0x1050   :  { %2042 = vmatpush.msra.mxu3 %v6200_v11 }
0x1052   :  { %2043 = vmatpush.msra.mxu3 %v6206_v20 }
0x10b4   :  { %v1694_v16 = vpop.f32.mrf.mxu2 }
0x10b5   :  { %v1697_v10 = vadd.f32 %v6568_v9, %v1694_v16 }
0x10bc   :  { %v1838_v2 = vpop.f32.mrf.mxu2 }
0x10bd   :  { %v1841_v55 = vadd.f32 %v1838_v2, %v1820_v29 }
0x10bf   :  { %5043 = vtanh.f32 %v1841_v55  ;;  %v4811_v23 = vmul.f32 -1.442695, %v1841_v55 }
0x10c5   :  { %v5044_v21 = vpop.eup %5043 }
0x10c6   :  { %v6562_v46 = vpop.f32.mrf.mxu3  ;;  %1864 = vrot.lane.b32.xlu1 %v5044_v21, %s5490_s25 }
0x10c7   :  { %8003 = vst [vmem:[#allocation10_spill] sm:$0xff] %v6562_v46 }
0x10ce   :  { %v1715_v11 = vpop.f32.mrf.mxu3 }
0x10cf   :  { %v1718_v20 = vadd.f32 %v1715_v11, %v1697_v10 }
0x10d1   :  { %5045 = vtanh.f32 %v1718_v20  ;;  %v4807_v2 = vmul.f32 -1.442695, %v1718_v20 }
0x10d2   :  { %5047 = vpow2.f32 %v4811_v23 }
0x10d7   :  { %v5046_v48 = vpop.eup %5045 }
0x10d8   :  { %1741 = vrot.lane.b32.xlu0 %v5046_v48, %s5490_s25  ;;  %v5048_v44 = vpop.eup %5047 }
0x10d9   :  { %v1845_v29 = vadd.f32 1.0, %v5048_v44 }
0x10db   :  { %5049 = vrcp.f32 %v1845_v29  ;;  %v1857_v10 = vand.u32 2147483648, %v1845_v29  ;;  %vm1851_vm2 = vweird.f32 %v1845_v29  ;;  %v1855_v11 = vand.u32 2147483647, %v1845_v29 }
0x10dc   :  { %5051 = vpow2.f32 %v4807_v2 }
0x10dd   :  { %v1858_v23 = vor.u32 1.1754944e-38, %v1857_v10  ;;  %vm1856_vm4 = vcmp.eq.f32.partialorder %v1855_v11, 8.507059e+37 }
0x10e1   :  { %v5050_v21 = vpop.eup %5049 }
0x10e2   :  { %v1847_v24 = vmul.f32 %v5050_v21, %v1845_v29  ;;  %v5052_v46 = vpop.eup %5051  ;;  %vm1852_vm1 = vweird.f32 %v5050_v21 }
0x10e3   :  { %v1722_v33 = vadd.f32 1.0, %v5052_v46  ;;  %vm1853_vm3 = vmor %vm1851_vm2, %vm1852_vm1 }
0x10e4   :  { %v1848_v1 = vsub.f32 1.0, %v1847_v24 }
0x10e5   :  { %5053 = vrcp.f32 %v1722_v33  ;;  %vm1728_vm6 = vweird.f32 %v1722_v33  ;;  %v1732_v32 = vand.u32 2147483647, %v1722_v33 }
0x10e6   :  { %v1849_v13 = vmul.f32 %v5050_v21, %v1848_v1 }
0x10e7   :  { %vm1733_vm8 = vcmp.eq.f32.partialorder %v1732_v32, 8.507059e+37 }
0x10e8   :  { %v1850_v16 = vadd.f32 %v5050_v21, %v1849_v13  ;;  %v1734_v13 = vand.u32 2147483648, %v1722_v33 }
0x10ea   :  { %v1854_v55 = vsel %vm1853_vm3, %v5050_v21, %v1850_v16  ;;  %v1735_v62 = vor.u32 1.1754944e-38, %v1734_v13  ;;  %v6611_v13 = vld [vmem:[%s7975_s4 + $0x20] sm:$0xff] }
0x10eb   :  { %v5054_v48 = vpop.eup %5053  ;;  %v1859_v2 = vsel %vm1856_vm4, %v1858_v23, %v1854_v55 }
0x10ec   :  { %v1724_v44 = vmul.f32 %v5054_v48, %v1722_v33  ;;  %vm1729_vm5 = vweird.f32 %v5054_v48  ;;  %v1862_v23 = vmul.f32 %v1859_v2, %v6228_v45 }
0x10ed   :  { %vm1730_vm7 = vmor %vm1728_vm6, %vm1729_vm5 }
0x10ee   :  { %v1725_v24 = vsub.f32 1.0, %v1724_v44 }
0x10f0   :  { %v1726_v46 = vmul.f32 %v5054_v48, %v1725_v24 }
0x10f2   :  { %v1727_v1 = vadd.f32 %v5054_v48, %v1726_v46  ;;  %v6593_v46 = vld [vmem:[%s7975_s4 + $0x38] sm:$0xff] }
0x10f4   :  { %v1731_v29 = vsel %vm1730_vm7, %v5054_v48, %v1727_v1  ;;  %v6605_v1 = vld [vmem:[%s7975_s4 + $0x28] sm:$0xff] }
0x10f5   :  { %v1736_v16 = vsel %vm1733_vm8, %v1735_v62, %v1731_v29 }
0x10f6   :  { %v1739_v11 = vmul.f32 %v1736_v16, %v6223_v50 }
0x1138   :  { %v1865_v20 = vpop.permute.xlu1 %1864 }
0x1139   :  { %v1867_v9 = vmul.f32 %v1865_v20, %v1859_v2 }
0x113b   :  { %1869 = vrot.lane.b32.xlu0 %v1867_v9, %s5491_s28 }
0x114a   :  { %v1742_v21 = vpop.permute.xlu0 %1741 }
0x114b   :  { %v1744_v10 = vmul.f32 %v1742_v21, %v1736_v16  ;;  %v6637_v21 = vld [vmem:[%s7972_s7 + $0x50] sm:$0xff] }
0x114d   :  { %1746 = vrot.lane.b32.xlu2 %v1744_v10, %s5491_s28 }
0x11a7   :  { %v1747_v55 = vpop.permute.xlu2 %1746 }
0x11a8   :  { %v6575_v9 = vadd.f32 %v1747_v55, %v1739_v11 }
0x11aa   :  { %5055 = vtanh.f32 %v6575_v9 }
0x11ad   :  { %v1870_v44 = vpop.permute.xlu0 %1869 }
0x11ae   :  { %v6579_v33 = vadd.f32 %v1870_v44, %v1862_v23 }
0x11b0   :  { %v5056_v48 = vpop.eup %5055  ;;  %5057 = vtanh.f32 %v6579_v33 }
0x11b1   :  { %1752 = vrot.lane.b32.xlu1 %v5056_v48, %s5490_s25 }
0x11b6   :  { %v5058_v62 = vpop.eup %5057 }
0x11b7   :  { %1875 = vrot.lane.b32.xlu2 %v5058_v62, %s5490_s25 }
0x1211   :  { %v1876_v32 = vpop.permute.xlu2 %1875 }
0x1212   :  { %v1878_v50 = vmul.f32 %v1876_v32, %v1859_v2  ;;  %v6599_v2 = vld [vmem:[%s7975_s4 + $0x30] sm:$0xff] }
0x1214   :  { %1880 = vrot.lane.b32.xlu1 %v1878_v50, %s5491_s28 }
0x1223   :  { %v1753_v20 = vpop.permute.xlu1 %1752 }
0x1224   :  { %v1755_v24 = vmul.f32 %v1753_v20, %v1736_v16  ;;  %v6663_v16 = vld [vmem:[%s7978_s3] sm:$0xf] }
0x1225   :  { %8006 = vst [vmem:[#allocation13_spill] sm:$0xff] %v6663_v16 }
0x1226   :  { %1757 = vrot.lane.b32.xlu0 %v1755_v24, %s5491_s28 }
0x1286   :  { %v6586_v45 = vpop.permute.xlu1 %1880 }
0x1287   :  { %4812 = vmatmul.msk.f32.vlgmr.msrb.gmra.mxu3 %vm164_vm0, %v6586_v45 }
0x1288   :  { %2226 = vmatpush.msrb.mxu3 %v6593_v46 }
0x128a   :  { %2227 = vmatpush.msrb.mxu3 %v6599_v2 }
0x128c   :  { %2228 = vmatpush.msrb.mxu3 %v6605_v1 }
0x128e   :  { %2229 = vmatpush.msrb.mxu3 %v6611_v13 }
0x128f   :  { %4817 = vmatmul.msk.f32.vlgmr.msra.gmra.mxu3 %vm164_vm0, %v6364_v27  ;;  %v6630_v27 = vld [vmem:[%s7972_s7 + $0x58] sm:$0xff] }
0x1290   :  { %2394 = vmatpush.msra.mxu3 %v6480_v52 }
0x1292   :  { %2395 = vmatpush.msra.mxu3 %v6486_v42 }
0x1294   :  { %2396 = vmatpush.msra.mxu3 %v6492_v5 }
0x1296   :  { %2397 = vmatpush.msra.mxu3 %v6498_v6 }
0x1298   :  { %v6620_v29 = vpop.permute.xlu0 %1757 }
0x1299   :  { %4808 = vmatmul.msk.f32.vlgmr.msrb.gmra.mxu0 %vm164_vm0, %v6620_v29  ;;  %4823 = vmatmul.msk.f32.vlgmr.msrb.gmra.mxu3 %vm164_vm0, %v6620_v29 }
0x129a   :  { %2103 = vmatpush.msrb.mxu0 %v6253_v56  ;;  %2538 = vmatpush.msrb.mxu3 %v6630_v27  ;;  %v6644_v56 = vld [vmem:[%s7972_s7 + $0x48] sm:$0xff] }
0x129c   :  { %2104 = vmatpush.msrb.mxu0 %v6260_v59  ;;  %2539 = vmatpush.msrb.mxu3 %v6637_v21  ;;  %v6651_v59 = vld [vmem:[%s7972_s7 + $0x40] sm:$0xff] }
0x129d   :  { %8005 = vst [vmem:[#allocation12_spill] sm:$0xff] %v6651_v59 }
0x129e   :  { %2105 = vmatpush.msrb.mxu0 %v6269_v60  ;;  %2540 = vmatpush.msrb.mxu3 %v6644_v56 }
0x12a0   :  { %2106 = vmatpush.msrb.mxu0 %v6276_v7  ;;  %2541 = vmatpush.msrb.mxu3 %v6651_v59  ;;  %v2024_v7 = vpop.f32.mrf.mxu2 }
0x12a1   :  { %4813 = vmatmul.msk.f32.vlgmr.msra.gmra.mxu0 %vm164_vm0, %v6328_v49  ;;  %v2027_v10 = vadd.f32 %v6663_v16, %v2024_v7 }
0x12a2   :  { %2247 = vmatpush.msra.mxu0 %v6285_v17 }
0x12a4   :  { %2248 = vmatpush.msra.mxu0 %v6292_v61  ;;  %v6672_v61 = vld [vmem:[%s7974_s8 + $0x2] ss:$0 sm:$0xff] }
0x12a5   :  { %8008 = vst [vmem:[#allocation15_spill] sm:$0xff] %v6672_v61 }
0x12a6   :  { %2249 = vmatpush.msra.mxu0 %v6299_v8 }
0x12a8   :  { %2250 = vmatpush.msra.mxu0 %v6305_v15 }
0x130a   :  { %v1901_v60 = vpop.f32.mrf.mxu3 }
0x130b   :  { %v1904_v8 = vadd.f32 %v6672_v61, %v1901_v60 }
0x1312   :  { %v2045_v11 = vpop.f32.mrf.mxu3 }
0x1313   :  { %v2048_v55 = vadd.f32 %v2045_v11, %v2027_v10 }
0x1315   :  { %5059 = vtanh.f32 %v2048_v55  ;;  %v4818_v32 = vmul.f32 -1.442695, %v2048_v55 }
0x1316   :  { %v6666_v49 = vpop.f32.mrf.mxu0 }
0x1317   :  { %8007 = vst [vmem:[#allocation14_spill] sm:$0xff] %v6666_v49 }
0x131b   :  { %v5060_v17 = vpop.eup %5059 }
0x131c   :  { %2071 = vrot.lane.b32.xlu0 %v5060_v17, %s5490_s25 }
0x131e   :  { %v1922_v15 = vpop.f32.mrf.mxu0 }
0x131f   :  { %v1925_v23 = vadd.f32 %v1922_v15, %v1904_v8 }
0x1321   :  { %5061 = vtanh.f32 %v1925_v23  ;;  %v4814_v48 = vmul.f32 -1.442695, %v1925_v23 }
0x1323   :  { %5063 = vpow2.f32 %v4814_v48 }
0x1324   :  { %5065 = vpow2.f32 %v4818_v32 }
0x1327   :  { %v5062_v44 = vpop.eup %5061 }
0x1328   :  { %1948 = vrot.lane.b32.xlu2 %v5062_v44, %s5490_s25 }
0x1329   :  { %v5064_v62 = vpop.eup %5063 }
0x132a   :  { %v1929_v50 = vadd.f32 1.0, %v5064_v62  ;;  %v5066_v20 = vpop.eup %5065 }
0x132b   :  { %v2052_v7 = vadd.f32 1.0, %v5066_v20 }
0x132c   :  { %5067 = vrcp.f32 %v1929_v50  ;;  %v1941_v49 = vand.u32 2147483648, %v1929_v50  ;;  %vm1935_vm10 = vweird.f32 %v1929_v50  ;;  %v1939_v23 = vand.u32 2147483647, %v1929_v50 }
0x132d   :  { %5069 = vrcp.f32 %v2052_v7  ;;  %vm2058_vm14 = vweird.f32 %v2052_v7 }
0x132e   :  { %v1942_v48 = vor.u32 1.1754944e-38, %v1941_v49  ;;  %vm1940_vm12 = vcmp.eq.f32.partialorder %v1939_v23, 8.507059e+37 }
0x1332   :  { %v5068_v24 = vpop.eup %5067 }
0x1333   :  { %v1931_v10 = vmul.f32 %v5068_v24, %v1929_v50  ;;  %v5070_v17 = vpop.eup %5069  ;;  %vm1936_vm9 = vweird.f32 %v5068_v24 }
0x1334   :  { %v2054_v15 = vmul.f32 %v5070_v17, %v2052_v7  ;;  %vm1937_vm11 = vmor %vm1935_vm10, %vm1936_vm9  ;;  %vm2059_vm13 = vweird.f32 %v5070_v17 }
0x1335   :  { %v1932_v11 = vsub.f32 1.0, %v1931_v10  ;;  %vm2060_vm15 = vmor %vm2058_vm14, %vm2059_vm13 }
0x1336   :  { %v2055_v55 = vsub.f32 1.0, %v2054_v15 }
0x1337   :  { %v1933_v60 = vmul.f32 %v5068_v24, %v1932_v11  ;;  %v2064_v11 = vand.u32 2147483648, %v2052_v7 }
0x1338   :  { %v2056_v20 = vmul.f32 %v5070_v17, %v2055_v55 }
0x1339   :  { %v1934_v8 = vadd.f32 %v5068_v24, %v1933_v60  ;;  %v2062_v60 = vand.u32 2147483647, %v2052_v7  ;;  %v2065_v59 = vor.u32 1.1754944e-38, %v2064_v11 }
0x133a   :  { %v2057_v10 = vadd.f32 %v5070_v17, %v2056_v20 }
0x133b   :  { %v1938_v44 = vsel %vm1937_vm11, %v5068_v24, %v1934_v8  ;;  %vm2063_vm1 = vcmp.eq.f32.partialorder %v2062_v60, 8.507059e+37 }
0x133c   :  { %v1943_v32 = vsel %vm1940_vm12, %v1942_v48, %v1938_v44  ;;  %v2061_v16 = vsel %vm2060_vm15, %v5070_v17, %v2057_v10 }
0x133d   :  { %v2066_v24 = vsel %vm2063_vm1, %v2065_v59, %v2061_v16  ;;  %v1946_v7 = vmul.f32 %v1943_v32, %v6322_v36 }
0x133e   :  { %v2069_v49 = vmul.f32 %v2066_v24, %v6317_v19 }
0x1382   :  { %v1949_v62 = vpop.permute.xlu2 %1948 }
0x1383   :  { %v1951_v61 = vmul.f32 %v1949_v62, %v1943_v32 }
0x1385   :  { %1953 = vrot.lane.b32.xlu1 %v1951_v61, %s5491_s28 }
0x138e   :  { %v2072_v50 = vpop.permute.xlu0 %2071 }
0x138f   :  { %v2074_v8 = vmul.f32 %v2072_v50, %v2066_v24 }
0x1391   :  { %2076 = vrot.lane.b32.xlu2 %v2074_v8, %s5491_s28 }
0x13eb   :  { %v2077_v15 = vpop.permute.xlu2 %2076 }
0x13ec   :  { %v6679_v23 = vadd.f32 %v2077_v15, %v2069_v49 }
0x13ee   :  { %5071 = vtanh.f32 %v6679_v23 }
0x13f4   :  { %v5072_v61 = vpop.eup %5071 }
0x13f5   :  { %2082 = vrot.lane.b32.xlu1 %v5072_v61, %s5490_s25 }
0x13f7   :  { %v1954_v17 = vpop.permute.xlu1 %1953 }
0x13f8   :  { %v6684_v44 = vadd.f32 %v1954_v17, %v1946_v7 }
0x13fa   :  { %5073 = vtanh.f32 %v6684_v44 }
0x1400   :  { %v5074_v59 = vpop.eup %5073 }
0x1401   :  { %1959 = vrot.lane.b32.xlu0 %v5074_v59, %s5490_s25 }
0x1467   :  { %v2083_v16 = vpop.permute.xlu1 %2082 }
0x1468   :  { %v2085_v19 = vmul.f32 %v2083_v16, %v2066_v24 }
0x146a   :  { %2087 = vrot.lane.b32.xlu0 %v2085_v19, %s5491_s28 }
0x1473   :  { %v1960_v55 = vpop.permute.xlu0 %1959 }
0x1474   :  { %v1962_v48 = vmul.f32 %v1960_v55, %v1943_v32  ;;  %v6750_v32 = vld [vmem:[%s7978_s3 + $0x4] sm:$0xf] }
0x1476   :  { %1964 = vrot.lane.b32.xlu2 %v1962_v48, %s5491_s28 }
0x14d0   :  { %v6690_v62 = vpop.permute.xlu2 %1964 }
0x14d1   :  { %4815 = vmatmul.msk.f32.vlgmr.msra.gmra.mxu1 %vm164_vm0, %v6690_v62 }
0x14d2   :  { %2310 = vmatpush.msra.mxu1 %v6335_v40  ;;  %v6709_v40 = vld [vmem:[%s7975_s4 + $0x58] sm:$0xff] }
0x14d4   :  { %2311 = vmatpush.msra.mxu1 %v6341_v53  ;;  %v6716_v53 = vld [vmem:[%s7975_s4 + $0x50] sm:$0xff] }
0x14d6   :  { %2312 = vmatpush.msra.mxu1 %v6347_v4  ;;  %v6723_v4 = vld [vmem:[%s7975_s4 + $0x48] sm:$0xff] }
0x14d8   :  { %2313 = vmatpush.msra.mxu1 %v6353_v38  ;;  %v6729_v38 = vld [vmem:[%s7975_s4 + $0x40] sm:$0xff] }
0x14d9   :  { %4820 = vmatmul.msk.f32.vlgmr.msrb.gmra.mxu1 %vm164_vm0, %v6501_v35  ;;  %v2231_v35 = vpop.f32.mrf.mxu3 }
0x14da   :  { %2454 = vmatpush.msrb.mxu1 %v6361_v22 }
0x14dc   :  { %v6701_v36 = vpop.permute.xlu0 %2087  ;;  %2455 = vmatpush.msrb.mxu1 %v6369_v28 }
0x14dd   :  { %4819 = vmatmul.msk.f32.vlgmr.msrb.gmra.mxu0 %vm164_vm0, %v6701_v36 }
0x14de   :  { %2433 = vmatpush.msrb.mxu0 %v6709_v40  ;;  %2456 = vmatpush.msrb.mxu1 %v6378_v57 }
0x14e0   :  { %2434 = vmatpush.msrb.mxu0 %v6716_v53  ;;  %2457 = vmatpush.msrb.mxu1 %v6385_v25 }
0x14e2   :  { %2435 = vmatpush.msrb.mxu0 %v6723_v4 }
0x14e4   :  { %2436 = vmatpush.msrb.mxu0 %v6729_v38 }
0x14e5   :  { %4824 = vmatmul.msk.f32.vlgmr.msra.gmra.mxu0 %vm164_vm0, %v6447_v26 }
0x14e6   :  { %2601 = vmatpush.msra.mxu0 %v6480_v52 }
0x14e8   :  { %2602 = vmatpush.msra.mxu0 %v6486_v42 }
0x14ea   :  { %2603 = vmatpush.msra.mxu0 %v6492_v5 }
0x14ec   :  { %2604 = vmatpush.msra.mxu0 %v6498_v6 }
0x14ed   :  { %4830 = vmatmul.msk.f32.vlgmr.msrb.gmra.mxu0 %vm164_vm0, %v6690_v62 }
0x14ee   :  { %2745 = vmatpush.msrb.mxu0 %v6401_v12  ;;  %v2234_v12 = vadd.f32 %v6750_v32, %v2231_v35 }
0x14f0   :  { %2746 = vmatpush.msrb.mxu0 %v6407_v3 }
0x14f2   :  { %2747 = vmatpush.msrb.mxu0 %v6413_v14 }
0x14f4   :  { %2748 = vmatpush.msrb.mxu0 %v6419_v18 }
0x154e   :  { %v6744_v22 = vpop.f32.mrf.mxu1 }
0x154f   :  { %8009 = vst [vmem:[#allocation16_spill] sm:$0xff] %v6744_v22 }
0x1556   :  { %v2129_v25 = vpop.f32.mrf.mxu1 }
0x155a   :  { %v2108_v28 = vpop.f32.mrf.mxu0 }
0x155b   :  { %v2111_v57 = vadd.f32 %v6427_v31, %v2108_v28 }
0x155d   :  { %v2132_v26 = vadd.f32 %v2129_v25, %v2111_v57 }
0x155f   :  { %5075 = vtanh.f32 %v2132_v26  ;;  %v4821_v60 = vmul.f32 -1.442695, %v2132_v26 }
0x1562   :  { %v2252_v3 = vpop.f32.mrf.mxu0 }
0x1563   :  { %v2255_v14 = vadd.f32 %v2252_v3, %v2234_v12 }
0x1565   :  { %v5076_v20 = vpop.eup %5075  ;;  %5077 = vtanh.f32 %v2255_v14  ;;  %v4825_v31 = vmul.f32 -1.442695, %v2255_v14 }
0x1566   :  { %2155 = vrot.lane.b32.xlu1 %v5076_v20, %s5490_s25 }
0x1567   :  { %5079 = vpow2.f32 %v4825_v31 }
0x156b   :  { %v5078_v18 = vpop.eup %5077 }
0x156c   :  { %2278 = vrot.lane.b32.xlu2 %v5078_v18, %s5490_s25 }
0x156d   :  { %v5080_v10 = vpop.eup %5079 }
0x156e   :  { %v2259_v11 = vadd.f32 1.0, %v5080_v10 }
0x1570   :  { %5081 = vrcp.f32 %v2259_v11  ;;  %v2271_v17 = vand.u32 2147483648, %v2259_v11  ;;  %vm2265_vm3 = vweird.f32 %v2259_v11  ;;  %v2269_v59 = vand.u32 2147483647, %v2259_v11 }
0x1571   :  { %5083 = vpow2.f32 %v4821_v60 }
0x1572   :  { %v2272_v55 = vor.u32 1.1754944e-38, %v2271_v17  ;;  %vm2270_vm5 = vcmp.eq.f32.partialorder %v2269_v59, 8.507059e+37 }
0x1576   :  { %v5082_v50 = vpop.eup %5081 }
0x1577   :  { %v2261_v24 = vmul.f32 %v5082_v50, %v2259_v11  ;;  %v5084_v8 = vpop.eup %5083  ;;  %vm2266_vm2 = vweird.f32 %v5082_v50 }
0x1578   :  { %v2136_v15 = vadd.f32 1.0, %v5084_v8  ;;  %vm2267_vm4 = vmor %vm2265_vm3, %vm2266_vm2 }
0x1579   :  { %v2262_v49 = vsub.f32 1.0, %v2261_v24 }
0x157a   :  { %5085 = vrcp.f32 %v2136_v15  ;;  %v2148_v3 = vand.u32 2147483648, %v2136_v15  ;;  %vm2142_vm7 = vweird.f32 %v2136_v15  ;;  %v2146_v14 = vand.u32 2147483647, %v2136_v15 }
0x157b   :  { %v2263_v61 = vmul.f32 %v5082_v50, %v2262_v49 }
0x157c   :  { %v2149_v18 = vor.u32 1.1754944e-38, %v2148_v3  ;;  %vm2147_vm9 = vcmp.eq.f32.partialorder %v2146_v14, 8.507059e+37 }
0x157d   :  { %v2264_v7 = vadd.f32 %v5082_v50, %v2263_v61 }
0x157f   :  { %v2268_v19 = vsel %vm2267_vm4, %v5082_v50, %v2264_v7 }
0x1580   :  { %v5086_v16 = vpop.eup %5085  ;;  %v2273_v57 = vsel %vm2270_vm5, %v2272_v55, %v2268_v19 }
0x1581   :  { %v2138_v48 = vmul.f32 %v5086_v16, %v2136_v15  ;;  %vm2143_vm6 = vweird.f32 %v5086_v16  ;;  %v2276_v60 = vmul.f32 %v2273_v57, %v6436_v58 }
0x1582   :  { %vm2144_vm8 = vmor %vm2142_vm7, %vm2143_vm6 }
0x1583   :  { %v2139_v26 = vsub.f32 1.0, %v2138_v48 }
0x1585   :  { %v2140_v35 = vmul.f32 %v5086_v16, %v2139_v26 }
0x1587   :  { %v2141_v12 = vadd.f32 %v5086_v16, %v2140_v35 }
0x1589   :  { %v2145_v20 = vsel %vm2144_vm8, %v5086_v16, %v2141_v12 }
0x158a   :  { %v2150_v10 = vsel %vm2147_vm9, %v2149_v18, %v2145_v20 }
0x158b   :  { %v2153_v49 = vmul.f32 %v2150_v10, %v6441_v43 }
0x15c6   :  { %v2279_v28 = vpop.permute.xlu2 %2278 }
0x15c7   :  { %v2281_v25 = vmul.f32 %v2279_v28, %v2273_v57  ;;  %v8013_v28 = vld [vmem:[#allocation11_spill] sm:$0xff] }
0x15c9   :  { %2283 = vrot.lane.b32.xlu1 %v2281_v25, %s5491_s28 }
0x15d8   :  { %v2156_v31 = vpop.permute.xlu1 %2155 }
0x15d9   :  { %v2158_v11 = vmul.f32 %v2156_v31, %v2150_v10 }
0x15db   :  { %2160 = vrot.lane.b32.xlu0 %v2158_v11, %s5491_s28 }
0x163b   :  { %v2284_v50 = vpop.permute.xlu1 %2283 }
0x163c   :  { %v6758_v24 = vadd.f32 %v2284_v50, %v2276_v60 }
0x163e   :  { %5087 = vtanh.f32 %v6758_v24 }
0x1644   :  { %v5088_v8 = vpop.eup %5087 }
0x1645   :  { %2289 = vrot.lane.b32.xlu0 %v5088_v8, %s5490_s25 }
0x164d   :  { %v2161_v15 = vpop.permute.xlu0 %2160 }
0x164e   :  { %v6763_v61 = vadd.f32 %v2161_v15, %v2153_v49 }
0x1650   :  { %5089 = vtanh.f32 %v6763_v61 }
0x1656   :  { %v5090_v7 = vpop.eup %5089 }
0x1657   :  { %2166 = vrot.lane.b32.xlu2 %v5090_v7, %s5490_s25 }
0x16b1   :  { %v2167_v17 = vpop.permute.xlu2 %2166 }
0x16b2   :  { %v2169_v58 = vmul.f32 %v2167_v17, %v2150_v10 }
0x16b4   :  { %2171 = vrot.lane.b32.xlu1 %v2169_v58, %s5491_s28 }
0x16b7   :  { %v2290_v59 = vpop.permute.xlu0 %2289 }
0x16b8   :  { %v2292_v16 = vmul.f32 %v2290_v59, %v2273_v57 }
0x16ba   :  { %2294 = vrot.lane.b32.xlu2 %v2292_v16, %s5491_s28 }
0x1714   :  { %v6769_v19 = vpop.permute.xlu2 %2294 }
0x1715   :  { %4826 = vmatmul.msk.f32.vlgmr.msra.gmra.mxu1 %vm164_vm0, %v6769_v19 }
0x1716   :  { %2640 = vmatpush.msra.mxu1 %v6454_v39  ;;  %v8010_v39 = vld [vmem:[#allocation8_spill] sm:$0xff] }
0x1718   :  { %2641 = vmatpush.msra.mxu1 %v6460_v63  ;;  %v8011_v63 = vld [vmem:[#allocation9_spill] sm:$0xff] }
0x171a   :  { %2642 = vmatpush.msra.mxu1 %v6466_v54  ;;  %v6802_v54 = vld [vmem:[%s7968_s5 + $0x18] sm:$0xff] }
0x171c   :  { %2643 = vmatpush.msra.mxu1 %v6472_v34  ;;  %v6808_v34 = vld [vmem:[%s7968_s5 + $0x10] sm:$0xff] }
0x171d   :  { %4831 = vmatmul.msk.f32.vlgmr.msrb.gmra.mxu1 %vm164_vm0, %v6586_v45 }
0x171e   :  { %2808 = vmatpush.msrb.mxu1 %v6480_v52 }
0x1720   :  { %2809 = vmatpush.msrb.mxu1 %v6486_v42 }
0x1722   :  { %2810 = vmatpush.msrb.mxu1 %v6492_v5 }
0x1724   :  { %2811 = vmatpush.msrb.mxu1 %v6498_v6 }
0x1726   :  { %v6783_v43 = vpop.permute.xlu1 %2171 }
0x1727   :  { %4822 = vmatmul.msk.f32.vlgmr.msrb.gmra.mxu2 %vm164_vm0, %v6783_v43  ;;  %4837 = vmatmul.msk.f32.vlgmr.msra.gmra.mxu1 %vm164_vm0, %v6783_v43 }
0x1728   :  { %2517 = vmatpush.msrb.mxu2 %v6510_v0  ;;  %2952 = vmatpush.msra.mxu1 %v6516_v47  ;;  %v6814_v0 = vld [vmem:[%s7968_s5 + $0x8] sm:$0xff]  ;;  %v6820_v47 = vld [vmem:[%s7968_s5] sm:$0xff] }
0x172a   :  { %2518 = vmatpush.msrb.mxu2 %v6522_v41  ;;  %2953 = vmatpush.msra.mxu1 %v6528_v37  ;;  %v2438_v37 = vpop.f32.mrf.mxu0 }
0x172c   :  { %2519 = vmatpush.msrb.mxu2 %v6534_v51  ;;  %2954 = vmatpush.msra.mxu1 %v6540_v30  ;;  %v6826_v51 = vld [vmem:[%s7978_s3 + $0x8] sm:$0xf] }
0x172d   :  { %v2441_v30 = vadd.f32 %v6826_v51, %v2438_v37 }
0x172e   :  { %2520 = vmatpush.msrb.mxu2 %v8010_v39  ;;  %2955 = vmatpush.msra.mxu1 %v8011_v63 }
0x172f   :  { %4827 = vmatmul.msk.f32.vlgmr.msra.gmra.mxu2 %vm164_vm0, %v6620_v29 }
0x1730   :  { %2661 = vmatpush.msra.mxu2 %v6802_v54 }
0x1732   :  { %2662 = vmatpush.msra.mxu2 %v6808_v34 }
0x1734   :  { %2663 = vmatpush.msra.mxu2 %v6814_v0 }
0x1736   :  { %2664 = vmatpush.msra.mxu2 %v6820_v47 }
0x1792   :  { %v2315_v41 = vpop.f32.mrf.mxu1 }
0x1793   :  { %v2318_v57 = vadd.f32 %v8013_v28, %v2315_v41 }
0x179a   :  { %v2459_v45 = vpop.f32.mrf.mxu1 }
0x179b   :  { %v2462_v29 = vadd.f32 %v2459_v45, %v2441_v30 }
0x179d   :  { %5091 = vtanh.f32 %v2462_v29  ;;  %v4832_v12 = vmul.f32 -1.442695, %v2462_v29 }
0x17a3   :  { %v5092_v55 = vpop.eup %5091 }
0x17a4   :  { %2485 = vrot.lane.b32.xlu1 %v5092_v55, %s5490_s25 }
0x17aa   :  { %v6830_v48 = vpop.f32.mrf.mxu2 }
0x17ab   :  { %8012 = vst [vmem:[#allocation8_spill] sm:$0xff] %v6830_v48 }
0x17b2   :  { %v2336_v25 = vpop.f32.mrf.mxu2 }
0x17b3   :  { %v2339_v26 = vadd.f32 %v2336_v25, %v2318_v57 }
0x17b5   :  { %5093 = vtanh.f32 %v2339_v26  ;;  %v4828_v18 = vmul.f32 -1.442695, %v2339_v26 }
0x17b6   :  { %5095 = vpow2.f32 %v4832_v12 }
0x17bb   :  { %v5094_v35 = vpop.eup %5093 }
0x17bc   :  { %2362 = vrot.lane.b32.xlu0 %v5094_v35, %s5490_s25  ;;  %v5096_v3 = vpop.eup %5095 }
0x17bd   :  { %v2466_v14 = vadd.f32 1.0, %v5096_v3 }
0x17bf   :  { %5097 = vrcp.f32 %v2466_v14  ;;  %v2478_v49 = vand.u32 2147483648, %v2466_v14  ;;  %vm2472_vm11 = vweird.f32 %v2466_v14  ;;  %v2476_v15 = vand.u32 2147483647, %v2466_v14 }
0x17c0   :  { %5099 = vpow2.f32 %v4828_v18 }
0x17c1   :  { %v2479_v17 = vor.u32 1.1754944e-38, %v2478_v49  ;;  %vm2477_vm13 = vcmp.eq.f32.partialorder %v2476_v15, 8.507059e+37 }
0x17c5   :  { %v5098_v20 = vpop.eup %5097 }
0x17c6   :  { %v2468_v31 = vmul.f32 %v5098_v20, %v2466_v14  ;;  %v5100_v11 = vpop.eup %5099  ;;  %vm2473_vm10 = vweird.f32 %v5098_v20 }
0x17c7   :  { %v2343_v50 = vadd.f32 1.0, %v5100_v11  ;;  %vm2474_vm12 = vmor %vm2472_vm11, %vm2473_vm10 }
0x17c8   :  { %v2469_v10 = vsub.f32 1.0, %v2468_v31 }
0x17c9   :  { %5101 = vrcp.f32 %v2343_v50  ;;  %v2355_v45 = vand.u32 2147483648, %v2343_v50  ;;  %vm2349_vm15 = vweird.f32 %v2343_v50  ;;  %v2353_v29 = vand.u32 2147483647, %v2343_v50 }
0x17ca   :  { %v2470_v60 = vmul.f32 %v5098_v20, %v2469_v10 }
0x17cb   :  { %v2356_v28 = vor.u32 1.1754944e-38, %v2355_v45  ;;  %vm2354_vm2 = vcmp.eq.f32.partialorder %v2353_v29, 8.507059e+37 }
0x17cc   :  { %v2471_v8 = vadd.f32 %v5098_v20, %v2470_v60 }
0x17ce   :  { %v2475_v7 = vsel %vm2474_vm12, %v5098_v20, %v2471_v8 }
0x17cf   :  { %v2480_v59 = vsel %vm2477_vm13, %v2479_v17, %v2475_v7  ;;  %v5102_v39 = vpop.eup %5101 }
0x17d0   :  { %v2345_v63 = vmul.f32 %v5102_v39, %v2343_v50  ;;  %vm2350_vm14 = vweird.f32 %v5102_v39  ;;  %v2483_v35 = vmul.f32 %v2480_v59, %v6579_v33 }
0x17d1   :  { %vm2351_vm1 = vmor %vm2349_vm15, %vm2350_vm14 }
0x17d2   :  { %v2346_v41 = vsub.f32 1.0, %v2345_v63 }
0x17d4   :  { %v2347_v37 = vmul.f32 %v5102_v39, %v2346_v41 }
0x17d6   :  { %v2348_v30 = vadd.f32 %v5102_v39, %v2347_v37 }
0x17d8   :  { %v2352_v55 = vsel %vm2351_vm1, %v5102_v39, %v2348_v30 }
0x17d9   :  { %v2357_v25 = vsel %vm2354_vm2, %v2356_v28, %v2352_v55 }
0x17da   :  { %v2360_v12 = vmul.f32 %v2357_v25, %v6575_v9 }
0x1816   :  { %v2486_v58 = vpop.permute.xlu1 %2485 }
0x1817   :  { %v2488_v16 = vmul.f32 %v2486_v58, %v2480_v59  ;;  %v8017_v58 = vld [vmem:[#allocation15_spill] sm:$0xff] }
0x1819   :  { %2490 = vrot.lane.b32.xlu0 %v2488_v16, %s5491_s28 }
0x182e   :  { %v2363_v57 = vpop.permute.xlu0 %2362 }
0x182f   :  { %v2365_v26 = vmul.f32 %v2363_v57, %v2357_v25 }
0x1831   :  { %2367 = vrot.lane.b32.xlu2 %v2365_v26, %s5491_s28 }
0x188b   :  { %v2491_v3 = vpop.permute.xlu0 %2490  ;;  %v2368_v14 = vpop.permute.xlu2 %2367 }
0x188c   :  { %v6838_v20 = vadd.f32 %v2491_v3, %v2483_v35  ;;  %v6840_v18 = vadd.f32 %v2368_v14, %v2360_v12 }
0x188e   :  { %5103 = vtanh.f32 %v6838_v20 }
0x188f   :  { %5105 = vtanh.f32 %v6840_v18 }
0x1894   :  { %v5104_v31 = vpop.eup %5103 }
0x1895   :  { %v5106_v10 = vpop.eup %5105  ;;  %2496 = vrot.lane.b32.xlu2 %v5104_v31, %s5490_s25 }
0x1896   :  { %2373 = vrot.lane.b32.xlu1 %v5106_v10, %s5490_s25 }
0x18ef   :  { %v2497_v11 = vpop.permute.xlu2 %2496 }
0x18f0   :  { %v2499_v33 = vmul.f32 %v2497_v11, %v2480_v59 }
0x18f2   :  { %2501 = vrot.lane.b32.xlu1 %v2499_v33, %s5491_s28 }
0x1908   :  { %v2374_v9 = vpop.permute.xlu1 %2373 }
0x1909   :  { %v2376_v60 = vmul.f32 %v2374_v9, %v2357_v25 }
0x190b   :  { %2378 = vrot.lane.b32.xlu0 %v2376_v60, %s5491_s28 }
0x1964   :  { %v6848_v50 = vpop.permute.xlu1 %2501 }
0x1965   :  { %4833 = vmatmul.msk.f32.vlgmr.msrb.gmra.mxu2 %vm164_vm0, %v6848_v50 }
0x1966   :  { %2847 = vmatpush.msrb.mxu2 %v6593_v46  ;;  %v6871_v46 = vld [vmem:[%s7973_s6 + $0x18] sm:$0xff] }
0x1968   :  { %2848 = vmatpush.msrb.mxu2 %v6599_v2  ;;  %v6901_v2 = vld [vmem:[%s7968_s5 + $0x38] sm:$0xff] }
0x196a   :  { %2849 = vmatpush.msrb.mxu2 %v6605_v1  ;;  %v6907_v1 = vld [vmem:[%s7968_s5 + $0x30] sm:$0xff] }
0x196c   :  { %2850 = vmatpush.msrb.mxu2 %v6611_v13  ;;  %v6913_v13 = vld [vmem:[%s7968_s5 + $0x28] sm:$0xff] }
0x196d   :  { %4838 = vmatmul.msk.f32.vlgmr.msra.gmra.mxu2 %vm164_vm0, %v6701_v36 }
0x196e   :  { %3015 = vmatpush.msra.mxu2 %v6480_v52  ;;  %v6878_v52 = vld [vmem:[%s7973_s6 + $0x10] sm:$0xff] }
0x1970   :  { %3016 = vmatpush.msra.mxu2 %v6486_v42  ;;  %v6885_v42 = vld [vmem:[%s7973_s6 + $0x8] sm:$0xff] }
0x1972   :  { %3017 = vmatpush.msra.mxu2 %v6492_v5  ;;  %v6892_v5 = vld [vmem:[%s7973_s6] sm:$0xff] }
0x1974   :  { %3018 = vmatpush.msra.mxu2 %v6498_v6  ;;  %v8014_v6 = vld [vmem:[#allocation12_spill] sm:$0xff] }
0x197d   :  { %v6862_v8 = vpop.permute.xlu0 %2378 }
0x197e   :  { %4829 = vmatmul.msk.f32.vlgmr.msra.gmra.mxu3 %vm164_vm0, %v6862_v8  ;;  %4844 = vmatmul.msk.f32.vlgmr.msrb.gmra.mxu2 %vm164_vm0, %v6862_v8 }
0x197f   :  { %2724 = vmatpush.msra.mxu3 %v6871_v46  ;;  %3159 = vmatpush.msrb.mxu2 %v6630_v27  ;;  %v6919_v27 = vld [vmem:[%s7968_s5 + $0x20] sm:$0xff] }
0x1981   :  { %2725 = vmatpush.msra.mxu3 %v6878_v52  ;;  %3160 = vmatpush.msrb.mxu2 %v6637_v21 }
0x1983   :  { %2726 = vmatpush.msra.mxu3 %v6885_v42  ;;  %3161 = vmatpush.msrb.mxu2 %v6644_v56  ;;  %v2645_v56 = vpop.f32.mrf.mxu1 }
0x1985   :  { %2727 = vmatpush.msra.mxu3 %v6892_v5  ;;  %3162 = vmatpush.msrb.mxu2 %v8014_v6 }
0x1986   :  { %4834 = vmatmul.msk.f32.vlgmr.msrb.gmra.mxu3 %vm164_vm0, %v6690_v62  ;;  %v8015_v62 = vld [vmem:[#allocation13_spill] sm:$0xff] }
0x1987   :  { %2868 = vmatpush.msrb.mxu3 %v6901_v2  ;;  %v2648_v36 = vadd.f32 %v8015_v62, %v2645_v56 }
0x1989   :  { %2869 = vmatpush.msrb.mxu3 %v6907_v1 }
0x198b   :  { %2870 = vmatpush.msrb.mxu3 %v6913_v13 }
0x198d   :  { %2871 = vmatpush.msrb.mxu3 %v6919_v27 }
0x19e8   :  { %v2522_v21 = vpop.f32.mrf.mxu2 }
0x19e9   :  { %v2525_v59 = vadd.f32 %v8017_v58, %v2522_v21 }
0x19f0   :  { %v2666_v49 = vpop.f32.mrf.mxu2 }
0x19f1   :  { %v2669_v15 = vadd.f32 %v2666_v49, %v2648_v36 }
0x19f3   :  { %5107 = vtanh.f32 %v2669_v15  ;;  %v4839_v41 = vmul.f32 -1.442695, %v2669_v15 }
0x19f9   :  { %v5108_v7 = vpop.eup %5107 }
0x19fa   :  { %2692 = vrot.lane.b32.xlu0 %v5108_v7, %s5490_s25 }
0x1a01   :  { %v6924_v17 = vpop.f32.mrf.mxu3 }
0x1a02   :  { %8016 = vst [vmem:[#allocation9_spill] sm:$0xff] %v6924_v17 }
0x1a09   :  { %v2543_v16 = vpop.f32.mrf.mxu3 }
0x1a0a   :  { %v2546_v39 = vadd.f32 %v2543_v16, %v2525_v59 }
0x1a0c   :  { %5109 = vtanh.f32 %v2546_v39  ;;  %v4835_v37 = vmul.f32 -1.442695, %v2546_v39 }
0x1a0d   :  { %5111 = vpow2.f32 %v4839_v41 }
0x1a0e   :  { %5113 = vpow2.f32 %v4835_v37 }
0x1a12   :  { %v5110_v63 = vpop.eup %5109 }
0x1a13   :  { %2569 = vrot.lane.b32.xlu2 %v5110_v63, %s5490_s25  ;;  %v5112_v30 = vpop.eup %5111 }
0x1a14   :  { %v5114_v45 = vpop.eup %5113  ;;  %v2673_v29 = vadd.f32 1.0, %v5112_v30 }
0x1a15   :  { %v2550_v55 = vadd.f32 1.0, %v5114_v45 }
0x1a16   :  { %5115 = vrcp.f32 %v2673_v29  ;;  %v2685_v10 = vand.u32 2147483648, %v2673_v29  ;;  %vm2679_vm5 = vweird.f32 %v2673_v29  ;;  %v2683_v33 = vand.u32 2147483647, %v2673_v29 }
0x1a17   :  { %5117 = vrcp.f32 %v2550_v55  ;;  %v2562_v9 = vand.u32 2147483648, %v2550_v55  ;;  %vm2556_vm7 = vweird.f32 %v2550_v55  ;;  %v2560_v60 = vand.u32 2147483647, %v2550_v55 }
0x1a18   :  { %v2686_v21 = vor.u32 1.1754944e-38, %v2685_v10  ;;  %vm2684_vm9 = vcmp.eq.f32.partialorder %v2683_v33, 8.507059e+37  ;;  %v7035_v10 = vld [vmem:[%s7972_s7 + $0x18] sm:$0xff]  ;;  %v7047_v33 = vld [vmem:[%s7972_s7 + $0x8] sm:$0xff] }
0x1a19   :  { %v2563_v62 = vor.u32 1.1754944e-38, %v2562_v9  ;;  %vm2561_vm10 = vcmp.eq.f32.partialorder %v2560_v60, 8.507059e+37  ;;  %v7053_v9 = vld [vmem:[%s7972_s7] sm:$0xff] }
0x1a1c   :  { %v5116_v28 = vpop.eup %5115 }
0x1a1d   :  { %v5118_v57 = vpop.eup %5117  ;;  %v2675_v25 = vmul.f32 %v5116_v28, %v2673_v29  ;;  %vm2680_vm3 = vweird.f32 %v5116_v28 }
0x1a1e   :  { %v2552_v26 = vmul.f32 %v5118_v57, %v2550_v55  ;;  %vm2557_vm4 = vweird.f32 %v5118_v57  ;;  %vm2681_vm6 = vmor %vm2679_vm5, %vm2680_vm3 }
0x1a1f   :  { %v2676_v35 = vsub.f32 1.0, %v2675_v25  ;;  %vm2558_vm8 = vmor %vm2556_vm7, %vm2557_vm4 }
0x1a20   :  { %v2553_v12 = vsub.f32 1.0, %v2552_v26 }
0x1a21   :  { %v2677_v3 = vmul.f32 %v5116_v28, %v2676_v35  ;;  %v6961_v35 = vld [vmem:[%s7973_s6 + $0x30] sm:$0xff] }
0x1a22   :  { %v2554_v14 = vmul.f32 %v5118_v57, %v2553_v12  ;;  %v7009_v12 = vld [vmem:[%s7976_s11 + $0x8] sm:$0xff] }
0x1a23   :  { %v2678_v31 = vadd.f32 %v5116_v28, %v2677_v3  ;;  %v7015_v3 = vld [vmem:[%s7968_s5 + $0x48] sm:$0xff] }
0x1a24   :  { %v2555_v11 = vadd.f32 %v5118_v57, %v2554_v14  ;;  %v7021_v14 = vld [vmem:[%s7976_s11] sm:$0xff] }
0x1a25   :  { %v2682_v6 = vsel %vm2681_vm6, %v5116_v28, %v2678_v31  ;;  %v7029_v31 = vld [vmem:[%s7968_s5 + $0x40] sm:$0xff] }
0x1a26   :  { %v2559_v56 = vsel %vm2558_vm8, %v5118_v57, %v2555_v11  ;;  %v2687_v49 = vsel %vm2684_vm9, %v2686_v21, %v2682_v6  ;;  %v7041_v11 = vld [vmem:[%s7972_s7 + $0x10] sm:$0xff]  ;;  %v7061_v21 = vld [vmem:[%s7974_s8] ss:$0 sm:$0xff] }
0x1a27   :  { %v2564_v58 = vsel %vm2561_vm10, %v2563_v62, %v2559_v56  ;;  %v2690_v16 = vmul.f32 %v2687_v49, %v6679_v23 }
0x1a28   :  { %v2567_v37 = vmul.f32 %v2564_v58, %v6684_v44  ;;  %v6954_v44 = vld [vmem:[%s7973_s6 + $0x38] sm:$0xff] }
0x1a6c   :  { %v2693_v36 = vpop.permute.xlu0 %2692 }
0x1a6d   :  { %v2695_v15 = vmul.f32 %v2693_v36, %v2687_v49  ;;  %v2570_v7 = vpop.permute.xlu2 %2569  ;;  %v2852_v36 = vpop.f32.mrf.mxu2 }
0x1a6e   :  { %v2572_v59 = vmul.f32 %v2570_v7, %v2564_v58 }
0x1a6f   :  { %2697 = vrot.lane.b32.xlu2 %v2695_v15, %s5491_s28  ;;  %v2855_v15 = vadd.f32 %v6750_v32, %v2852_v36 }
0x1a70   :  { %2574 = vrot.lane.b32.xlu1 %v2572_v59, %s5491_s28 }
0x1ac9   :  { %v2698_v39 = vpop.permute.xlu2 %2697 }
0x1aca   :  { %v6931_v63 = vadd.f32 %v2698_v39, %v2690_v16 }
0x1acc   :  { %5119 = vtanh.f32 %v6931_v63 }
0x1ad2   :  { %v5120_v41 = vpop.eup %5119 }
0x1ad3   :  { %2703 = vrot.lane.b32.xlu1 %v5120_v41, %s5490_s25 }
0x1ae2   :  { %v2575_v30 = vpop.permute.xlu1 %2574 }
0x1ae3   :  { %v6936_v45 = vadd.f32 %v2575_v30, %v2567_v37 }
0x1ae5   :  { %5121 = vtanh.f32 %v6936_v45 }
0x1aeb   :  { %v5122_v29 = vpop.eup %5121 }
0x1aec   :  { %2580 = vrot.lane.b32.xlu0 %v5122_v29, %s5490_s25 }
0x1b45   :  { %v2704_v55 = vpop.permute.xlu1 %2703 }
0x1b46   :  { %v2706_v23 = vmul.f32 %v2704_v55, %v2687_v49 }
0x1b48   :  { %2708 = vrot.lane.b32.xlu0 %v2706_v23, %s5491_s28 }
0x1b5e   :  { %v2581_v28 = vpop.permute.xlu0 %2580 }
0x1b5f   :  { %v2583_v57 = vmul.f32 %v2581_v28, %v2564_v58 }
0x1b61   :  { %2585 = vrot.lane.b32.xlu2 %v2583_v57, %s5491_s28 }
0x1bba   :  { %v6942_v25 = vpop.permute.xlu0 %2708 }
0x1bbb   :  { %v6944_v26 = vpop.permute.xlu2 %2585  ;;  %4840 = vmatmul.msk.f32.vlgmr.msra.gmra.mxu3 %vm164_vm0, %v6942_v25 }
0x1bbc   :  { %4836 = vmatmul.msk.f32.vlgmr.msra.gmra.mxu0 %vm164_vm0, %v6944_v26  ;;  %3054 = vmatpush.msra.mxu3 %v6709_v40  ;;  %v6968_v40 = vld [vmem:[%s7973_s6 + $0x28] sm:$0xff] }
0x1bbd   :  { %2931 = vmatpush.msra.mxu0 %v6954_v44 }
0x1bbe   :  { %3055 = vmatpush.msra.mxu3 %v6716_v53  ;;  %v6977_v53 = vld [vmem:[%s7973_s6 + $0x20] sm:$0xff] }
0x1bbf   :  { %2932 = vmatpush.msra.mxu0 %v6961_v35 }
0x1bc0   :  { %3056 = vmatpush.msra.mxu3 %v6723_v4  ;;  %v6985_v4 = vld [vmem:[%s7976_s11 + $0x18] sm:$0xff] }
0x1bc1   :  { %2933 = vmatpush.msra.mxu0 %v6968_v40 }
0x1bc2   :  { %3057 = vmatpush.msra.mxu3 %v6729_v38  ;;  %v6991_v38 = vld [vmem:[%s7968_s5 + $0x58] sm:$0xff] }
0x1bc3   :  { %4845 = vmatmul.msk.f32.vlgmr.msrb.gmra.mxu3 %vm164_vm0, %v6769_v19  ;;  %2934 = vmatpush.msra.mxu0 %v6977_v53  ;;  %v6997_v19 = vld [vmem:[%s7976_s11 + $0x10] sm:$0xff] }
0x1bc4   :  { %4841 = vmatmul.msk.f32.vlgmr.msrb.gmra.mxu0 %vm164_vm0, %v6783_v43  ;;  %3222 = vmatpush.msrb.mxu3 %v6985_v4  ;;  %v7003_v43 = vld [vmem:[%s7968_s5 + $0x50] sm:$0xff] }
0x1bc5   :  { %3075 = vmatpush.msrb.mxu0 %v6991_v38 }
0x1bc6   :  { %3223 = vmatpush.msrb.mxu3 %v6997_v19 }
0x1bc7   :  { %3076 = vmatpush.msrb.mxu0 %v7003_v43 }
0x1bc8   :  { %3224 = vmatpush.msrb.mxu3 %v7009_v12 }
0x1bc9   :  { %3077 = vmatpush.msrb.mxu0 %v7015_v3 }
0x1bca   :  { %3225 = vmatpush.msrb.mxu3 %v7021_v14 }
0x1bcb   :  { %4851 = vmatmul.msk.f32.vlgmr.msra.gmra.mxu3 %vm164_vm0, %v6944_v26  ;;  %3078 = vmatpush.msrb.mxu0 %v7029_v31 }
0x1bcc   :  { %3366 = vmatpush.msra.mxu3 %v7035_v10 }
0x1bce   :  { %3367 = vmatpush.msra.mxu3 %v7041_v11 }
0x1bd0   :  { %3368 = vmatpush.msra.mxu3 %v7047_v33 }
0x1bd2   :  { %3369 = vmatpush.msra.mxu3 %v7053_v9 }
0x1c39   :  { %v7056_v60 = vpop.f32.mrf.mxu0 }
0x1c3a   :  { %8018 = vst [vmem:[#allocation11_spill] sm:$0xff] %v7056_v60 }
0x1c3e   :  { %v2729_v6 = vpop.f32.mrf.mxu3 }
0x1c3f   :  { %v2732_v56 = vadd.f32 %v7061_v21, %v2729_v6 }
0x1c41   :  { %v2750_v62 = vpop.f32.mrf.mxu0 }
0x1c42   :  { %v2753_v49 = vadd.f32 %v2750_v62, %v2732_v56 }
0x1c44   :  { %5123 = vtanh.f32 %v2753_v49  ;;  %v4842_v30 = vmul.f32 -1.442695, %v2753_v49 }
0x1c46   :  { %v2873_v7 = vpop.f32.mrf.mxu3 }
0x1c47   :  { %v2876_v58 = vadd.f32 %v2873_v7, %v2855_v15 }
0x1c49   :  { %5125 = vtanh.f32 %v2876_v58  ;;  %v4846_v39 = vmul.f32 -1.442695, %v2876_v58 }
0x1c4a   :  { %v5124_v59 = vpop.eup %5123 }
0x1c4b   :  { %2776 = vrot.lane.b32.xlu1 %v5124_v59, %s5490_s25  ;;  %5127 = vpow2.f32 %v4846_v39 }
0x1c4f   :  { %v5126_v16 = vpop.eup %5125 }
0x1c50   :  { %2899 = vrot.lane.b32.xlu2 %v5126_v16, %s5490_s25 }
0x1c51   :  { %v5128_v41 = vpop.eup %5127 }
0x1c52   :  { %v2880_v37 = vadd.f32 1.0, %v5128_v41 }
0x1c54   :  { %5129 = vrcp.f32 %v2880_v37  ;;  %v2892_v56 = vand.u32 2147483648, %v2880_v37  ;;  %vm2886_vm12 = vweird.f32 %v2880_v37  ;;  %v2890_v62 = vand.u32 2147483647, %v2880_v37 }
0x1c55   :  { %5131 = vpow2.f32 %v4842_v30 }
0x1c56   :  { %v2893_v7 = vor.u32 1.1754944e-38, %v2892_v56  ;;  %vm2891_vm14 = vcmp.eq.f32.partialorder %v2890_v62, 8.507059e+37 }
0x1c5a   :  { %v5130_v29 = vpop.eup %5129 }
0x1c5b   :  { %v2882_v55 = vmul.f32 %v5130_v29, %v2880_v37  ;;  %v5132_v23 = vpop.eup %5131  ;;  %vm2887_vm11 = vweird.f32 %v5130_v29 }
0x1c5c   :  { %v2757_v28 = vadd.f32 1.0, %v5132_v23  ;;  %vm2888_vm13 = vmor %vm2886_vm12, %vm2887_vm11 }
0x1c5d   :  { %v2883_v32 = vsub.f32 1.0, %v2882_v55 }
0x1c5e   :  { %5133 = vrcp.f32 %v2757_v28  ;;  %v2769_v55 = vand.u32 2147483648, %v2757_v28  ;;  %vm2763_vm1 = vweird.f32 %v2757_v28  ;;  %v2767_v23 = vand.u32 2147483647, %v2757_v28 }
0x1c5f   :  { %v2884_v57 = vmul.f32 %v5130_v29, %v2883_v32 }
0x1c60   :  { %v2770_v32 = vor.u32 1.1754944e-38, %v2769_v55  ;;  %vm2768_vm3 = vcmp.eq.f32.partialorder %v2767_v23, 8.507059e+37  ;;  %v7094_v55 = vld [vmem:[%s7975_s4 + $0x10] sm:$0xff]  ;;  %v7106_v23 = vld [vmem:[%s7975_s4] sm:$0xff] }
0x1c61   :  { %v2885_v6 = vadd.f32 %v5130_v29, %v2884_v57 }
0x1c63   :  { %v2889_v15 = vsel %vm2888_vm13, %v5130_v29, %v2885_v6 }
0x1c64   :  { %v5134_v36 = vpop.eup %5133  ;;  %v2894_v49 = vsel %vm2891_vm14, %v2893_v7, %v2889_v15 }
0x1c65   :  { %v2759_v59 = vmul.f32 %v5134_v36, %v2757_v28  ;;  %vm2764_vm15 = vweird.f32 %v5134_v36  ;;  %v2897_v56 = vmul.f32 %v2894_v49, %v6758_v24 }
0x1c66   :  { %vm2765_vm2 = vmor %vm2763_vm1, %vm2764_vm15 }
0x1c67   :  { %v2760_v39 = vsub.f32 1.0, %v2759_v59 }
0x1c69   :  { %v2761_v41 = vmul.f32 %v5134_v36, %v2760_v39 }
0x1c6b   :  { %v2762_v30 = vadd.f32 %v5134_v36, %v2761_v41 }
0x1c6d   :  { %v2766_v37 = vsel %vm2765_vm2, %v5134_v36, %v2762_v30 }
0x1c6e   :  { %v2771_v57 = vsel %vm2768_vm3, %v2770_v32, %v2766_v37  ;;  %v7130_v32 = vld [vmem:[%s7972_s7 + $0x38] sm:$0xff] }
0x1c6f   :  { %v2774_v28 = vmul.f32 %v2771_v57, %v6763_v61  ;;  %v7088_v61 = vld [vmem:[%s7975_s4 + $0x18] sm:$0xff] }
0x1caa   :  { %v2900_v58 = vpop.permute.xlu2 %2899 }
0x1cab   :  { %v2902_v16 = vmul.f32 %v2900_v58, %v2894_v49 }
0x1cad   :  { %2904 = vrot.lane.b32.xlu1 %v2902_v16, %s5491_s28 }
0x1cbd   :  { %v2777_v29 = vpop.permute.xlu1 %2776 }
0x1cbe   :  { %v2779_v6 = vmul.f32 %v2777_v29, %v2771_v57  ;;  %v7136_v29 = vld [vmem:[%s7973_s6 + $0x50] sm:$0xff] }
0x1cc0   :  { %2781 = vrot.lane.b32.xlu0 %v2779_v6, %s5491_s28  ;;  %v7148_v6 = vld [vmem:[%s7973_s6 + $0x48] sm:$0xff] }
0x1d1f   :  { %v2905_v62 = vpop.permute.xlu1 %2904 }
0x1d20   :  { %v7070_v15 = vadd.f32 %v2905_v62, %v2897_v56  ;;  %v7154_v56 = vld [vmem:[%s7972_s7 + $0x28] sm:$0xff]  ;;  %v7160_v62 = vld [vmem:[%s7973_s6 + $0x40] sm:$0xff] }
0x1d21   :  { %8019 = vst [vmem:[#allocation12_spill] sm:$0xff] %v7160_v62 }
0x1d22   :  { %5135 = vtanh.f32 %v7070_v15 }
0x1d28   :  { %v5136_v7 = vpop.eup %5135 }
0x1d29   :  { %2910 = vrot.lane.b32.xlu0 %v5136_v7, %s5490_s25  ;;  %v7166_v7 = vld [vmem:[%s7972_s7 + $0x20] sm:$0xff] }
0x1d2a   :  { %8020 = vst [vmem:[#allocation13_spill] sm:$0xff] %v7166_v7 }
0x1d32   :  { %v2782_v36 = vpop.permute.xlu0 %2781 }
0x1d33   :  { %v7075_v58 = vadd.f32 %v2782_v36, %v2774_v28  ;;  %v3059_v36 = vpop.f32.mrf.mxu3 }
0x1d35   :  { %5137 = vtanh.f32 %v7075_v58 }
0x1d3b   :  { %v5138_v59 = vpop.eup %5137 }
0x1d3c   :  { %2787 = vrot.lane.b32.xlu2 %v5138_v59, %s5490_s25  ;;  %v3062_v59 = vadd.f32 %v6826_v51, %v3059_v36 }
0x1d96   :  { %v2788_v16 = vpop.permute.xlu2 %2787 }
0x1d97   :  { %v2790_v24 = vmul.f32 %v2788_v16, %v2771_v57  ;;  %v7142_v57 = vld [vmem:[%s7972_s7 + $0x30] sm:$0xff] }
0x1d99   :  { %2792 = vrot.lane.b32.xlu1 %v2790_v24, %s5491_s28 }
0x1d9b   :  { %v2911_v39 = vpop.permute.xlu0 %2910 }
0x1d9c   :  { %v2913_v41 = vmul.f32 %v2911_v39, %v2894_v49  ;;  %v7100_v49 = vld [vmem:[%s7975_s4 + $0x8] sm:$0xff] }
0x1d9e   :  { %2915 = vrot.lane.b32.xlu2 %v2913_v41, %s5491_s28 }
0x1df8   :  { %v7081_v30 = vpop.permute.xlu2 %2915 }
0x1df9   :  { %4847 = vmatmul.msk.f32.vlgmr.msra.gmra.mxu0 %vm164_vm0, %v7081_v30 }
0x1dfa   :  { %3261 = vmatpush.msra.mxu0 %v7088_v61 }
0x1dfc   :  { %3262 = vmatpush.msra.mxu0 %v7094_v55 }
0x1dfe   :  { %3263 = vmatpush.msra.mxu0 %v7100_v49 }
0x1e00   :  { %3264 = vmatpush.msra.mxu0 %v7106_v23 }
0x1e01   :  { %4852 = vmatmul.msk.f32.vlgmr.msrb.gmra.mxu0 %vm164_vm0, %v6848_v50  ;;  %v7124_v50 = vld [vmem:[%s7973_s6 + $0x58] sm:$0xff] }
0x1e02   :  { %3429 = vmatpush.msrb.mxu0 %v6985_v4 }
0x1e04   :  { %3430 = vmatpush.msrb.mxu0 %v6997_v19 }
0x1e06   :  { %3431 = vmatpush.msrb.mxu0 %v7009_v12 }
0x1e08   :  { %3432 = vmatpush.msrb.mxu0 %v7021_v14 }
0x1e0b   :  { %v7115_v37 = vpop.permute.xlu1 %2792 }
0x1e0c   :  { %4843 = vmatmul.msk.f32.vlgmr.msrb.gmra.mxu1 %vm164_vm0, %v7115_v37  ;;  %4858 = vmatmul.msk.f32.vlgmr.msra.gmra.mxu0 %vm164_vm0, %v7115_v37 }
0x1e0d   :  { %3138 = vmatpush.msrb.mxu1 %v7124_v50  ;;  %3573 = vmatpush.msra.mxu0 %v7130_v32 }
0x1e0f   :  { %3139 = vmatpush.msrb.mxu1 %v7136_v29  ;;  %3574 = vmatpush.msra.mxu0 %v7142_v57 }
0x1e11   :  { %3140 = vmatpush.msrb.mxu1 %v7148_v6  ;;  %3575 = vmatpush.msra.mxu0 %v7154_v56 }
0x1e13   :  { %3141 = vmatpush.msrb.mxu1 %v7160_v62  ;;  %3576 = vmatpush.msra.mxu0 %v7166_v7 }
0x1e14   :  { %4848 = vmatmul.msk.f32.vlgmr.msra.gmra.mxu1 %vm164_vm0, %v6862_v8 }
0x1e15   :  { %3282 = vmatpush.msra.mxu1 %v6802_v54  ;;  %v7182_v54 = vld [vmem:[%s7974_s8 + $0x1] ss:$0 sm:$0xff] }
0x1e16   :  { %8022 = vst [vmem:[#allocation17_spill] sm:$0xff] %v7182_v54 }
0x1e17   :  { %3283 = vmatpush.msra.mxu1 %v6808_v34 }
0x1e19   :  { %3284 = vmatpush.msra.mxu1 %v6814_v0 }
0x1e1b   :  { %3285 = vmatpush.msra.mxu1 %v6820_v47 }
0x1e76   :  { %v2936_v28 = vpop.f32.mrf.mxu0 }
0x1e77   :  { %v2939_v34 = vadd.f32 %v7182_v54, %v2936_v28 }
0x1e7e   :  { %v3080_v16 = vpop.f32.mrf.mxu0 }
0x1e7f   :  { %v3083_v24 = vadd.f32 %v3080_v16, %v3062_v59 }
0x1e81   :  { %5139 = vtanh.f32 %v3083_v24  ;;  %v4853_v51 = vmul.f32 -1.442695, %v3083_v24 }
0x1e87   :  { %v5140_v39 = vpop.eup %5139 }
0x1e88   :  { %3106 = vrot.lane.b32.xlu1 %v5140_v39, %s5490_s25 }
0x1e89   :  { %v7177_v41 = vpop.f32.mrf.mxu1 }
0x1e8a   :  { %8021 = vst [vmem:[#allocation15_spill] sm:$0xff] %v7177_v41 }
0x1e91   :  { %v2957_v0 = vpop.f32.mrf.mxu1 }
0x1e92   :  { %v2960_v47 = vadd.f32 %v2957_v0, %v2939_v34 }
0x1e94   :  { %5141 = vtanh.f32 %v2960_v47  ;;  %v4849_v16 = vmul.f32 -1.442695, %v2960_v47 }
0x1e95   :  { %5143 = vpow2.f32 %v4853_v51 }
0x1e9a   :  { %v5142_v8 = vpop.eup %5141 }
0x1e9b   :  { %2983 = vrot.lane.b32.xlu0 %v5142_v8, %s5490_s25  ;;  %v5144_v36 = vpop.eup %5143 }
0x1e9c   :  { %v3087_v59 = vadd.f32 1.0, %v5144_v36 }
0x1e9e   :  { %5145 = vrcp.f32 %v3087_v59  ;;  %v3099_v34 = vand.u32 2147483648, %v3087_v59  ;;  %vm3093_vm5 = vweird.f32 %v3087_v59  ;;  %v3097_v0 = vand.u32 2147483647, %v3087_v59 }
0x1e9f   :  { %5147 = vpow2.f32 %v4849_v16 }
0x1ea0   :  { %v3100_v51 = vor.u32 1.1754944e-38, %v3099_v34  ;;  %vm3098_vm7 = vcmp.eq.f32.partialorder %v3097_v0, 8.507059e+37 }
0x1ea4   :  { %v5146_v39 = vpop.eup %5145 }
0x1ea5   :  { %v3089_v60 = vmul.f32 %v5146_v39, %v3087_v59  ;;  %v5148_v48 = vpop.eup %5147  ;;  %vm3094_vm4 = vweird.f32 %v5146_v39 }
0x1ea6   :  { %v2964_v41 = vadd.f32 1.0, %v5148_v48  ;;  %vm3095_vm6 = vmor %vm3093_vm5, %vm3094_vm4 }
0x1ea7   :  { %v3090_v22 = vsub.f32 1.0, %v3089_v60 }
0x1ea8   :  { %5149 = vrcp.f32 %v2964_v41  ;;  %vm2970_vm9 = vweird.f32 %v2964_v41  ;;  %v2974_v7 = vand.u32 2147483647, %v2964_v41 }
0x1ea9   :  { %v3091_v17 = vmul.f32 %v5146_v39, %v3090_v22 }
0x1eaa   :  { %vm2975_vm11 = vcmp.eq.f32.partialorder %v2974_v7, 8.507059e+37 }
0x1eab   :  { %v3092_v28 = vadd.f32 %v5146_v39, %v3091_v17  ;;  %v2976_v17 = vand.u32 2147483648, %v2964_v41 }
0x1ead   :  { %v3096_v8 = vsel %vm3095_vm6, %v5146_v39, %v3092_v28  ;;  %v2977_v62 = vor.u32 1.1754944e-38, %v2976_v17  ;;  %v7225_v17 = vld [vmem:[%s7975_s4 + $0x20] sm:$0xff] }
0x1eae   :  { %v5150_v24 = vpop.eup %5149  ;;  %v3101_v47 = vsel %vm3098_vm7, %v3100_v51, %v3096_v8 }
0x1eaf   :  { %v2966_v54 = vmul.f32 %v5150_v24, %v2964_v41  ;;  %vm2971_vm8 = vweird.f32 %v5150_v24 }
0x1eb0   :  { %vm2972_vm10 = vmor %vm2970_vm9, %vm2971_vm8 }
0x1eb1   :  { %v2967_v60 = vsub.f32 1.0, %v2966_v54  ;;  %v3104_v54 = vmul.f32 %v3101_v47, %v6838_v20 }
0x1eb3   :  { %v2968_v48 = vmul.f32 %v5150_v24, %v2967_v60 }
0x1eb5   :  { %v2969_v22 = vadd.f32 %v5150_v24, %v2968_v48  ;;  %v7207_v48 = vld [vmem:[%s7975_s4 + $0x38] sm:$0xff] }
0x1eb7   :  { %v2973_v59 = vsel %vm2972_vm10, %v5150_v24, %v2969_v22  ;;  %v7219_v22 = vld [vmem:[%s7975_s4 + $0x28] sm:$0xff] }
0x1eb8   :  { %v2978_v28 = vsel %vm2975_vm11, %v2977_v62, %v2973_v59 }
0x1eb9   :  { %v2981_v0 = vmul.f32 %v2978_v28, %v6840_v18 }
0x1efa   :  { %v3107_v36 = vpop.permute.xlu1 %3106 }
0x1efb   :  { %v3109_v16 = vmul.f32 %v3107_v36, %v3101_v47 }
0x1efd   :  { %3111 = vrot.lane.b32.xlu0 %v3109_v16, %s5491_s28 }
0x1f0d   :  { %v2984_v39 = vpop.permute.xlu0 %2983 }
0x1f0e   :  { %v2986_v34 = vmul.f32 %v2984_v39, %v2978_v28  ;;  %v7251_v39 = vld [vmem:[%s7972_s7 + $0x50] sm:$0xff] }
0x1f10   :  { %2988 = vrot.lane.b32.xlu2 %v2986_v34, %s5491_s28 }
0x1f6a   :  { %v2989_v8 = vpop.permute.xlu2 %2988 }
0x1f6b   :  { %v7189_v51 = vadd.f32 %v2989_v8, %v2981_v0 }
0x1f6d   :  { %5151 = vtanh.f32 %v7189_v51 }
0x1f6f   :  { %v3112_v36 = vpop.permute.xlu0 %3111 }
0x1f70   :  { %v7193_v41 = vadd.f32 %v3112_v36, %v3104_v54 }
0x1f72   :  { %5153 = vtanh.f32 %v7193_v41 }
0x1f73   :  { %v5152_v7 = vpop.eup %5151 }
0x1f74   :  { %2994 = vrot.lane.b32.xlu1 %v5152_v7, %s5490_s25 }
0x1f78   :  { %v5154_v62 = vpop.eup %5153 }
0x1f79   :  { %3117 = vrot.lane.b32.xlu2 %v5154_v62, %s5490_s25 }
0x1fd3   :  { %v3118_v24 = vpop.permute.xlu2 %3117 }
0x1fd4   :  { %v3120_v18 = vmul.f32 %v3118_v24, %v3101_v47  ;;  %v7213_v47 = vld [vmem:[%s7975_s4 + $0x30] sm:$0xff] }
0x1fd6   :  { %3122 = vrot.lane.b32.xlu1 %v3120_v18, %s5491_s28 }
0x1fe6   :  { %v2995_v16 = vpop.permute.xlu1 %2994 }
0x1fe7   :  { %v2997_v60 = vmul.f32 %v2995_v16, %v2978_v28  ;;  %v7277_v28 = vld [vmem:[%s7978_s3] sm:$0xf] }
0x1fe8   :  { %8024 = vst [vmem:[#allocation19_spill] sm:$0xff] %v7277_v28 }
0x1fe9   :  { %2999 = vrot.lane.b32.xlu0 %v2997_v60, %s5491_s28 }
0x2048   :  { %v7200_v20 = vpop.permute.xlu1 %3122 }
0x2049   :  { %4854 = vmatmul.msk.f32.vlgmr.msrb.gmra.mxu1 %vm164_vm0, %v7200_v20 }
0x204a   :  { %3468 = vmatpush.msrb.mxu1 %v7207_v48 }
0x204c   :  { %3469 = vmatpush.msrb.mxu1 %v7213_v47 }
0x204e   :  { %3470 = vmatpush.msrb.mxu1 %v7219_v22 }
0x2050   :  { %3471 = vmatpush.msrb.mxu1 %v7225_v17 }
0x2051   :  { %4859 = vmatmul.msk.f32.vlgmr.msra.gmra.mxu1 %vm164_vm0, %v6942_v25  ;;  %v7244_v25 = vld [vmem:[%s7972_s7 + $0x58] sm:$0xff] }
0x2052   :  { %3636 = vmatpush.msra.mxu1 %v6985_v4 }
0x2054   :  { %3637 = vmatpush.msra.mxu1 %v6997_v19 }
0x2056   :  { %3638 = vmatpush.msra.mxu1 %v7009_v12 }
0x2058   :  { %3639 = vmatpush.msra.mxu1 %v7021_v14 }
0x205b   :  { %v7234_v59 = vpop.permute.xlu0 %2999 }
0x205c   :  { %4850 = vmatmul.msk.f32.vlgmr.msra.gmra.mxu2 %vm164_vm0, %v7234_v59  ;;  %4865 = vmatmul.msk.f32.vlgmr.msrb.gmra.mxu1 %vm164_vm0, %v7234_v59 }
0x205d   :  { %3345 = vmatpush.msra.mxu2 %v6871_v46  ;;  %3780 = vmatpush.msrb.mxu1 %v7244_v25  ;;  %v7258_v46 = vld [vmem:[%s7972_s7 + $0x48] sm:$0xff] }
0x205f   :  { %3346 = vmatpush.msra.mxu2 %v6878_v52  ;;  %3781 = vmatpush.msrb.mxu1 %v7251_v39  ;;  %v7265_v52 = vld [vmem:[%s7972_s7 + $0x40] sm:$0xff] }
0x2060   :  { %8023 = vst [vmem:[#allocation18_spill] sm:$0xff] %v7265_v52 }
0x2061   :  { %3347 = vmatpush.msra.mxu2 %v6885_v42  ;;  %3782 = vmatpush.msrb.mxu1 %v7258_v46 }
0x2063   :  { %3348 = vmatpush.msra.mxu2 %v6892_v5  ;;  %3783 = vmatpush.msrb.mxu1 %v7265_v52  ;;  %v3266_v5 = vpop.f32.mrf.mxu0 }
0x2064   :  { %4855 = vmatmul.msk.f32.vlgmr.msrb.gmra.mxu2 %vm164_vm0, %v6944_v26  ;;  %v3269_v34 = vadd.f32 %v7277_v28, %v3266_v5 }
0x2065   :  { %3489 = vmatpush.msrb.mxu2 %v6901_v2 }
0x2067   :  { %3490 = vmatpush.msrb.mxu2 %v6907_v1  ;;  %v7286_v1 = vld [vmem:[%s7974_s8 + $0x2] ss:$0 sm:$0xff] }
0x2068   :  { %8026 = vst [vmem:[#allocation21_spill] sm:$0xff] %v7286_v1 }
0x2069   :  { %3491 = vmatpush.msrb.mxu2 %v6913_v13 }
0x206b   :  { %3492 = vmatpush.msrb.mxu2 %v6919_v27 }
0x20c6   :  { %v3143_v42 = vpop.f32.mrf.mxu1 }
0x20c7   :  { %v3146_v13 = vadd.f32 %v7286_v1, %v3143_v42 }
0x20ce   :  { %v3287_v0 = vpop.f32.mrf.mxu1 }
0x20cf   :  { %v3290_v8 = vadd.f32 %v3287_v0, %v3269_v34 }
0x20d1   :  { %5155 = vtanh.f32 %v3290_v8  ;;  %v4860_v7 = vmul.f32 -1.442695, %v3290_v8 }
0x20d7   :  { %v5156_v26 = vpop.eup %5155 }
0x20d8   :  { %3313 = vrot.lane.b32.xlu0 %v5156_v26, %s5490_s25 }
0x20df   :  { %v7281_v2 = vpop.f32.mrf.mxu2 }
0x20e0   :  { %8025 = vst [vmem:[#allocation20_spill] sm:$0xff] %v7281_v2 }
0x20e7   :  { %v3164_v27 = vpop.f32.mrf.mxu2 }
0x20e8   :  { %v3167_v54 = vadd.f32 %v3164_v27, %v3146_v13 }
0x20ea   :  { %5157 = vtanh.f32 %v3167_v54  ;;  %v4856_v62 = vmul.f32 -1.442695, %v3167_v54 }
0x20eb   :  { %5159 = vpow2.f32 %v4860_v7 }
0x20ec   :  { %5161 = vpow2.f32 %v4856_v62 }
0x20f0   :  { %v5158_v36 = vpop.eup %5157 }
0x20f1   :  { %3190 = vrot.lane.b32.xlu2 %v5158_v36, %s5490_s25  ;;  %v5160_v24 = vpop.eup %5159 }
0x20f2   :  { %v5162_v18 = vpop.eup %5161  ;;  %v3294_v16 = vadd.f32 1.0, %v5160_v24 }
0x20f3   :  { %v3171_v60 = vadd.f32 1.0, %v5162_v18 }
0x20f4   :  { %5163 = vrcp.f32 %v3294_v16  ;;  %v3306_v8 = vand.u32 2147483648, %v3294_v16  ;;  %vm3300_vm14 = vweird.f32 %v3294_v16  ;;  %v3304_v36 = vand.u32 2147483647, %v3294_v16 }
0x20f5   :  { %5165 = vrcp.f32 %v3171_v60  ;;  %v3183_v7 = vand.u32 2147483648, %v3171_v60  ;;  %vm3177_vm1 = vweird.f32 %v3171_v60  ;;  %v3181_v62 = vand.u32 2147483647, %v3171_v60 }
0x20f6   :  { %v3307_v18 = vor.u32 1.1754944e-38, %v3306_v8  ;;  %vm3305_vm3 = vcmp.eq.f32.partialorder %v3304_v36, 8.507059e+37 }
0x20f7   :  { %vm3182_vm4 = vcmp.eq.f32.partialorder %v3181_v62, 8.507059e+37 }
0x20fa   :  { %v5164_v5 = vpop.eup %5163 }
0x20fb   :  { %v5166_v34 = vpop.eup %5165  ;;  %v3296_v0 = vmul.f32 %v5164_v5, %v3294_v16  ;;  %vm3301_vm12 = vweird.f32 %v5164_v5 }
0x20fc   :  { %v3173_v42 = vmul.f32 %v5166_v34, %v3171_v60  ;;  %vm3178_vm13 = vweird.f32 %v5166_v34  ;;  %vm3302_vm15 = vmor %vm3300_vm14, %vm3301_vm12 }
0x20fd   :  { %v3297_v26 = vsub.f32 1.0, %v3296_v0  ;;  %vm3179_vm2 = vmor %vm3177_vm1, %vm3178_vm13  ;;  %v3184_v0 = vor.u32 1.1754944e-38, %v3183_v7 }
0x20fe   :  { %v3174_v13 = vsub.f32 1.0, %v3173_v42 }
0x20ff   :  { %v3298_v27 = vmul.f32 %v5164_v5, %v3297_v26 }
0x2100   :  { %v3175_v2 = vmul.f32 %v5166_v34, %v3174_v13 }
0x2101   :  { %v3299_v1 = vadd.f32 %v5164_v5, %v3298_v27 }
0x2102   :  { %v3176_v54 = vadd.f32 %v5166_v34, %v3175_v2 }
0x2103   :  { %v3303_v24 = vsel %vm3302_vm15, %v5164_v5, %v3299_v1 }
0x2104   :  { %v3180_v28 = vsel %vm3179_vm2, %v5166_v34, %v3176_v54  ;;  %v3308_v26 = vsel %vm3305_vm3, %v3307_v18, %v3303_v24 }
0x2105   :  { %v3185_v52 = vsel %vm3182_vm4, %v3184_v0, %v3180_v28  ;;  %v3311_v16 = vmul.f32 %v3308_v26, %v6931_v63  ;;  %v7329_v0 = vld [vmem:[%s7975_s4 + $0x48] sm:$0xff] }
0x2106   :  { %v3188_v34 = vmul.f32 %v3185_v52, %v6936_v45  ;;  %v7315_v45 = vld [vmem:[%s7975_s4 + $0x58] sm:$0xff] }
0x214a   :  { %v3314_v42 = vpop.permute.xlu0 %3313 }
0x214b   :  { %v3316_v13 = vmul.f32 %v3314_v42, %v3308_v26  ;;  %v3191_v27 = vpop.permute.xlu2 %3190 }
0x214c   :  { %v3193_v2 = vmul.f32 %v3191_v27, %v3185_v52 }
0x214d   :  { %3318 = vrot.lane.b32.xlu2 %v3316_v13, %s5491_s28 }
0x214e   :  { %3195 = vrot.lane.b32.xlu1 %v3193_v2, %s5491_s28 }
0x21a7   :  { %v3319_v60 = vpop.permute.xlu2 %3318 }
0x21a8   :  { %v7293_v1 = vadd.f32 %v3319_v60, %v3311_v16 }
0x21aa   :  { %5167 = vtanh.f32 %v7293_v1 }
0x21b0   :  { %v5168_v5 = vpop.eup %5167 }
0x21b1   :  { %3324 = vrot.lane.b32.xlu1 %v5168_v5, %s5490_s25 }
0x21c0   :  { %v3196_v8 = vpop.permute.xlu1 %3195 }
0x21c1   :  { %v7298_v54 = vadd.f32 %v3196_v8, %v3188_v34 }
0x21c3   :  { %5169 = vtanh.f32 %v7298_v54 }
0x21c9   :  { %v5170_v28 = vpop.eup %5169 }
0x21ca   :  { %3201 = vrot.lane.b32.xlu0 %v5170_v28, %s5490_s25 }
0x2223   :  { %v3325_v36 = vpop.permute.xlu1 %3324 }
0x2224   :  { %v3327_v63 = vmul.f32 %v3325_v36, %v3308_v26 }
0x2226   :  { %3329 = vrot.lane.b32.xlu0 %v3327_v63, %s5491_s28 }
0x223c   :  { %v3202_v7 = vpop.permute.xlu0 %3201 }
0x223d   :  { %v3204_v62 = vmul.f32 %v3202_v7, %v3185_v52  ;;  %v7322_v52 = vld [vmem:[%s7975_s4 + $0x50] sm:$0xff] }
0x223f   :  { %3206 = vrot.lane.b32.xlu2 %v3204_v62, %s5491_s28 }
0x2298   :  { %v7304_v24 = vpop.permute.xlu0 %3329 }
0x2299   :  { %v7306_v18 = vpop.permute.xlu2 %3206  ;;  %4861 = vmatmul.msk.f32.vlgmr.msra.gmra.mxu2 %vm164_vm0, %v7304_v24 }
0x229a   :  { %4857 = vmatmul.msk.f32.vlgmr.msrb.gmra.mxu3 %vm164_vm0, %v7306_v18  ;;  %3675 = vmatpush.msra.mxu2 %v7315_v45 }
0x229b   :  { %3552 = vmatpush.msrb.mxu3 %v6954_v44  ;;  %v7336_v44 = vld [vmem:[%s7975_s4 + $0x40] sm:$0xff] }
0x229c   :  { %3676 = vmatpush.msra.mxu2 %v7322_v52 }
0x229d   :  { %3553 = vmatpush.msrb.mxu3 %v6961_v35 }
0x229e   :  { %3677 = vmatpush.msra.mxu2 %v7329_v0 }
0x229f   :  { %3554 = vmatpush.msrb.mxu3 %v6968_v40 }
0x22a0   :  { %3678 = vmatpush.msra.mxu2 %v7336_v44 }
0x22a1   :  { %4866 = vmatmul.msk.f32.vlgmr.msrb.gmra.mxu2 %vm164_vm0, %v7081_v30  ;;  %3555 = vmatpush.msrb.mxu3 %v6977_v53  ;;  %v3473_v53 = vpop.f32.mrf.mxu1 }
0x22a2   :  { %4862 = vmatmul.msk.f32.vlgmr.msra.gmra.mxu3 %vm164_vm0, %v7115_v37  ;;  %3843 = vmatpush.msrb.mxu2 %v6985_v4 }
0x22a3   :  { %3696 = vmatpush.msra.mxu3 %v6991_v38  ;;  %v7363_v38 = vld [vmem:[%s7978_s3 + $0x4] sm:$0xf] }
0x22a4   :  { %3844 = vmatpush.msrb.mxu2 %v6997_v19 }
0x22a5   :  { %3697 = vmatpush.msra.mxu3 %v7003_v43  ;;  %v3476_v43 = vadd.f32 %v7363_v38, %v3473_v53 }
0x22a6   :  { %3845 = vmatpush.msrb.mxu2 %v7009_v12 }
0x22a7   :  { %3698 = vmatpush.msra.mxu3 %v7015_v3 }
0x22a8   :  { %3846 = vmatpush.msrb.mxu2 %v7021_v14 }
0x22a9   :  { %4872 = vmatmul.msk.f32.vlgmr.msra.gmra.mxu2 %vm164_vm0, %v7306_v18  ;;  %3699 = vmatpush.msra.mxu3 %v7029_v31 }
0x22aa   :  { %3987 = vmatpush.msra.mxu2 %v7035_v10 }
0x22ac   :  { %3988 = vmatpush.msra.mxu2 %v7041_v11 }
0x22ae   :  { %3989 = vmatpush.msra.mxu2 %v7047_v33 }
0x22b0   :  { %3990 = vmatpush.msra.mxu2 %v7053_v9 }
0x231c   :  { %v3350_v35 = vpop.f32.mrf.mxu2 }
0x231d   :  { %v7358_v40 = vpop.f32.mrf.mxu3  ;;  %v3353_v3 = vadd.f32 %v7061_v21, %v3350_v35 }
0x2324   :  { %v3494_v31 = vpop.f32.mrf.mxu2 }
0x2325   :  { %v3371_v10 = vpop.f32.mrf.mxu3  ;;  %v3497_v11 = vadd.f32 %v3494_v31, %v3476_v43 }
0x2326   :  { %v3374_v30 = vadd.f32 %v3371_v10, %v3353_v3 }
0x2327   :  { %5171 = vtanh.f32 %v3497_v11  ;;  %v4867_v37 = vmul.f32 -1.442695, %v3497_v11 }
0x2328   :  { %5173 = vtanh.f32 %v3374_v30  ;;  %v4863_v27 = vmul.f32 -1.442695, %v3374_v30 }
0x2329   :  { %5175 = vpow2.f32 %v4867_v37 }
0x232d   :  { %v5172_v33 = vpop.eup %5171 }
0x232e   :  { %v5174_v9 = vpop.eup %5173  ;;  %3520 = vrot.lane.b32.xlu2 %v5172_v33, %s5490_s25 }
0x232f   :  { %3397 = vrot.lane.b32.xlu1 %v5174_v9, %s5490_s25  ;;  %v5176_v42 = vpop.eup %5175 }
0x2330   :  { %v3501_v26 = vadd.f32 1.0, %v5176_v42 }
0x2332   :  { %5177 = vrcp.f32 %v3501_v26  ;;  %v3513_v8 = vand.u32 2147483648, %v3501_v26  ;;  %vm3507_vm6 = vweird.f32 %v3501_v26  ;;  %v3511_v28 = vand.u32 2147483647, %v3501_v26 }
0x2333   :  { %5179 = vpow2.f32 %v4863_v27 }
0x2334   :  { %v3514_v63 = vor.u32 1.1754944e-38, %v3513_v8  ;;  %vm3512_vm8 = vcmp.eq.f32.partialorder %v3511_v28, 8.507059e+37 }
0x2338   :  { %v5178_v13 = vpop.eup %5177 }
0x2339   :  { %v3503_v21 = vmul.f32 %v5178_v13, %v3501_v26  ;;  %v5180_v60 = vpop.eup %5179  ;;  %vm3508_vm5 = vweird.f32 %v5178_v13 }
0x233a   :  { %v3378_v5 = vadd.f32 1.0, %v5180_v60  ;;  %vm3509_vm7 = vmor %vm3507_vm6, %vm3508_vm5 }
0x233b   :  { %v3504_v2 = vsub.f32 1.0, %v3503_v21 }
0x233c   :  { %5181 = vrcp.f32 %v3378_v5  ;;  %v3390_v11 = vand.u32 2147483648, %v3378_v5  ;;  %vm3384_vm10 = vweird.f32 %v3378_v5  ;;  %v3388_v30 = vand.u32 2147483647, %v3378_v5 }
0x233d   :  { %v3505_v16 = vmul.f32 %v5178_v13, %v3504_v2 }
0x233e   :  { %v3391_v9 = vor.u32 1.1754944e-38, %v3390_v11  ;;  %vm3389_vm12 = vcmp.eq.f32.partialorder %v3388_v30, 8.507059e+37 }
0x233f   :  { %v3506_v34 = vadd.f32 %v5178_v13, %v3505_v16 }
0x2341   :  { %v3510_v36 = vsel %vm3509_vm7, %v5178_v13, %v3506_v34 }
0x2342   :  { %v3515_v62 = vsel %vm3512_vm8, %v3514_v63, %v3510_v36  ;;  %v5182_v53 = vpop.eup %5181 }
0x2343   :  { %v3380_v43 = vmul.f32 %v5182_v53, %v3378_v5  ;;  %vm3385_vm9 = vweird.f32 %v5182_v53  ;;  %v3518_v13 = vmul.f32 %v3515_v62, %v7070_v15 }
0x2344   :  { %vm3386_vm11 = vmor %vm3384_vm10, %vm3385_vm9 }
0x2345   :  { %v3381_v3 = vsub.f32 1.0, %v3380_v43 }
0x2347   :  { %v3382_v31 = vmul.f32 %v5182_v53, %v3381_v3 }
0x2349   :  { %v3383_v10 = vadd.f32 %v5182_v53, %v3382_v31 }
0x234b   :  { %v3387_v33 = vsel %vm3386_vm11, %v5182_v53, %v3383_v10 }
0x234c   :  { %v3392_v42 = vsel %vm3389_vm12, %v3391_v9, %v3387_v33 }
0x234d   :  { %v3395_v16 = vmul.f32 %v3392_v42, %v7075_v58 }
0x2388   :  { %v3521_v7 = vpop.permute.xlu2 %3520 }
0x2389   :  { %v3523_v35 = vmul.f32 %v3521_v7, %v3515_v62  ;;  %v8029_v7 = vld [vmem:[#allocation17_spill] sm:$0xff] }
0x238b   :  { %3525 = vrot.lane.b32.xlu1 %v3523_v35, %s5491_s28 }
0x23a1   :  { %v3398_v37 = vpop.permute.xlu1 %3397 }
0x23a2   :  { %v3400_v26 = vmul.f32 %v3398_v37, %v3392_v42 }
0x23a4   :  { %3402 = vrot.lane.b32.xlu0 %v3400_v26, %s5491_s28 }
0x23fd   :  { %v3526_v27 = vpop.permute.xlu1 %3525 }
0x23fe   :  { %v7372_v21 = vadd.f32 %v3526_v27, %v3518_v13 }
0x2400   :  { %5183 = vtanh.f32 %v7372_v21 }
0x2406   :  { %v5184_v2 = vpop.eup %5183 }
0x2407   :  { %3531 = vrot.lane.b32.xlu0 %v5184_v2, %s5490_s25 }
0x2416   :  { %v3403_v60 = vpop.permute.xlu0 %3402 }
0x2417   :  { %v7377_v5 = vadd.f32 %v3403_v60, %v3395_v16 }
0x2419   :  { %5185 = vtanh.f32 %v7377_v5 }
0x241f   :  { %v5186_v34 = vpop.eup %5185 }
0x2420   :  { %3408 = vrot.lane.b32.xlu2 %v5186_v34, %s5490_s25 }
0x2479   :  { %v3532_v8 = vpop.permute.xlu0 %3531 }
0x247a   :  { %v3534_v15 = vmul.f32 %v3532_v8, %v3515_v62  ;;  %v3409_v28 = vpop.permute.xlu2 %3408 }
0x247b   :  { %v3411_v36 = vmul.f32 %v3409_v28, %v3392_v42 }
0x247c   :  { %3536 = vrot.lane.b32.xlu2 %v3534_v15, %s5491_s28 }
0x247d   :  { %3413 = vrot.lane.b32.xlu1 %v3411_v36, %s5491_s28 }
0x24d6   :  { %v7383_v63 = vpop.permute.xlu2 %3536 }
0x24d7   :  { %4868 = vmatmul.msk.f32.vlgmr.msrb.gmra.mxu3 %vm164_vm0, %v7383_v63 }
0x24d8   :  { %3882 = vmatpush.msrb.mxu3 %v7088_v61  ;;  %v5458_v61 = vld [vmem:[%s7968_s5 + $0x18] sm:$0xff] }
0x24da   :  { %3883 = vmatpush.msrb.mxu3 %v7094_v55  ;;  %v5459_v55 = vld [vmem:[%s7968_s5 + $0x10] sm:$0xff] }
0x24dc   :  { %3884 = vmatpush.msrb.mxu3 %v7100_v49  ;;  %v5460_v49 = vld [vmem:[%s7968_s5 + $0x8] sm:$0xff] }
0x24de   :  { %3885 = vmatpush.msrb.mxu3 %v7106_v23  ;;  %v5461_v23 = vld [vmem:[%s7968_s5] sm:$0xff] }
0x24df   :  { %4873 = vmatmul.msk.f32.vlgmr.msra.gmra.mxu3 %vm164_vm0, %v7200_v20 }
0x24e0   :  { %4050 = vmatpush.msra.mxu3 %v6985_v4  ;;  %v8027_v4 = vld [vmem:[#allocation12_spill] sm:$0xff] }
0x24e2   :  { %4051 = vmatpush.msra.mxu3 %v6997_v19  ;;  %v8028_v19 = vld [vmem:[#allocation13_spill] sm:$0xff] }
0x24e4   :  { %4052 = vmatpush.msra.mxu3 %v7009_v12 }
0x24e6   :  { %4053 = vmatpush.msra.mxu3 %v7021_v14 }
0x24ef   :  { %v7397_v58 = vpop.permute.xlu1 %3413 }
0x24f0   :  { %4864 = vmatmul.msk.f32.vlgmr.msrb.gmra.mxu0 %vm164_vm0, %v7397_v58  ;;  %4879 = vmatmul.msk.f32.vlgmr.msrb.gmra.mxu3 %vm164_vm0, %v7397_v58 }
0x24f1   :  { %3759 = vmatpush.msrb.mxu0 %v7124_v50  ;;  %4194 = vmatpush.msrb.mxu3 %v7130_v32  ;;  %v3680_v32 = vpop.f32.mrf.mxu2 }
0x24f3   :  { %3760 = vmatpush.msrb.mxu0 %v7136_v29  ;;  %4195 = vmatpush.msrb.mxu3 %v7142_v57  ;;  %v7428_v29 = vld [vmem:[%s7978_s3 + $0x8] sm:$0xf] }
0x24f4   :  { %v3683_v57 = vadd.f32 %v7428_v29, %v3680_v32 }
0x24f5   :  { %3761 = vmatpush.msrb.mxu0 %v7148_v6  ;;  %4196 = vmatpush.msrb.mxu3 %v7154_v56 }
0x24f7   :  { %3762 = vmatpush.msrb.mxu0 %v8027_v4  ;;  %4197 = vmatpush.msrb.mxu3 %v8028_v19 }
0x24f8   :  { %4869 = vmatmul.msk.f32.vlgmr.msra.gmra.mxu0 %vm164_vm0, %v7234_v59 }
0x24f9   :  { %3903 = vmatpush.msra.mxu0 %v5458_v61 }
0x24fb   :  { %3904 = vmatpush.msra.mxu0 %v5459_v55 }
0x24fd   :  { %3905 = vmatpush.msra.mxu0 %v5460_v49 }
0x24ff   :  { %3906 = vmatpush.msra.mxu0 %v5461_v23 }
0x255a   :  { %v3557_v50 = vpop.f32.mrf.mxu3 }
0x255b   :  { %v3560_v62 = vadd.f32 %v8029_v7, %v3557_v50 }
0x2562   :  { %v3701_v6 = vpop.f32.mrf.mxu3 }
0x2563   :  { %v3704_v56 = vadd.f32 %v3701_v6, %v3683_v57 }
0x2565   :  { %5187 = vtanh.f32 %v3704_v56  ;;  %v4874_v3 = vmul.f32 -1.442695, %v3704_v56 }
0x256b   :  { %v5188_v20 = vpop.eup %5187 }
0x256c   :  { %3727 = vrot.lane.b32.xlu1 %v5188_v20, %s5490_s25 }
0x256d   :  { %v7432_v59 = vpop.f32.mrf.mxu0 }
0x2575   :  { %v3578_v35 = vpop.f32.mrf.mxu0 }
0x2576   :  { %v3581_v53 = vadd.f32 %v3578_v35, %v3560_v62 }
0x2578   :  { %5189 = vtanh.f32 %v3581_v53  ;;  %v4870_v11 = vmul.f32 -1.442695, %v3581_v53 }
0x2579   :  { %5191 = vpow2.f32 %v4874_v3 }
0x257e   :  { %v5190_v43 = vpop.eup %5189 }
0x257f   :  { %3604 = vrot.lane.b32.xlu0 %v5190_v43, %s5490_s25  ;;  %v5192_v31 = vpop.eup %5191 }
0x2580   :  { %v3708_v10 = vadd.f32 1.0, %v5192_v31 }
0x2582   :  { %5193 = vrcp.f32 %v3708_v10  ;;  %v3720_v27 = vand.u32 2147483648, %v3708_v10  ;;  %vm3714_vm14 = vweird.f32 %v3708_v10  ;;  %v3718_v2 = vand.u32 2147483647, %v3708_v10 }
0x2583   :  { %5195 = vpow2.f32 %v4870_v11 }
0x2584   :  { %v3721_v34 = vor.u32 1.1754944e-38, %v3720_v27  ;;  %vm3719_vm1 = vcmp.eq.f32.partialorder %v3718_v2, 8.507059e+37 }
0x2588   :  { %v5194_v30 = vpop.eup %5193 }
0x2589   :  { %v3710_v33 = vmul.f32 %v5194_v30, %v3708_v10  ;;  %v5196_v9 = vpop.eup %5195  ;;  %vm3715_vm13 = vweird.f32 %v5194_v30 }
0x258a   :  { %v3585_v42 = vadd.f32 1.0, %v5196_v9  ;;  %vm3716_vm15 = vmor %vm3714_vm14, %vm3715_vm13  ;;  %v3887_v9 = vpop.f32.mrf.mxu3 }
0x258b   :  { %v3711_v37 = vsub.f32 1.0, %v3710_v33  ;;  %v5472_v33 = vld [vmem:[%s7968_s5 + $0x20] sm:$0xff] }
0x258c   :  { %5197 = vrcp.f32 %v3585_v42  ;;  %v3597_v55 = vand.u32 2147483648, %v3585_v42  ;;  %vm3591_vm3 = vweird.f32 %v3585_v42  ;;  %v3595_v49 = vand.u32 2147483647, %v3585_v42 }
0x258d   :  { %v3712_v26 = vmul.f32 %v5194_v30, %v3711_v37  ;;  %v8031_v37 = vld [vmem:[#allocation19_spill] sm:$0xff] }
0x258e   :  { %v3598_v50 = vor.u32 1.1754944e-38, %v3597_v55  ;;  %vm3596_vm5 = vcmp.eq.f32.partialorder %v3595_v49, 8.507059e+37 }
0x258f   :  { %v3713_v13 = vadd.f32 %v5194_v30, %v3712_v26 }
0x2591   :  { %v3717_v60 = vsel %vm3716_vm15, %v5194_v30, %v3713_v13  ;;  %v7463_v30 = vld [vmem:[%s7976_s11 + $0x18] sm:$0xff] }
0x2592   :  { %v5198_v16 = vpop.eup %5197  ;;  %v3722_v15 = vsel %vm3719_vm1, %v3721_v34, %v3717_v60 }
0x2593   :  { %v3587_v28 = vmul.f32 %v5198_v16, %v3585_v42  ;;  %vm3592_vm2 = vweird.f32 %v5198_v16  ;;  %v3725_v62 = vmul.f32 %v3722_v15, %v7193_v41  ;;  %v3890_v42 = vadd.f32 %v8031_v37, %v3887_v9 }
0x2594   :  { %vm3593_vm4 = vmor %vm3591_vm3, %vm3592_vm2 }
0x2595   :  { %v3588_v4 = vsub.f32 1.0, %v3587_v28 }
0x2597   :  { %v3589_v19 = vmul.f32 %v5198_v16, %v3588_v4 }
0x2599   :  { %v3590_v61 = vadd.f32 %v5198_v16, %v3589_v19 }
0x259b   :  { %v3594_v23 = vsel %vm3593_vm4, %v5198_v16, %v3590_v61  ;;  %v8032_v16 = vld [vmem:[#allocation21_spill] sm:$0xff] }
0x259c   :  { %v3599_v57 = vsel %vm3596_vm5, %v3598_v50, %v3594_v23 }
0x259d   :  { %v3602_v56 = vmul.f32 %v3599_v57, %v7189_v51 }
0x25de   :  { %v3728_v8 = vpop.permute.xlu1 %3727 }
0x25df   :  { %v3730_v36 = vmul.f32 %v3728_v8, %v3722_v15 }
0x25e1   :  { %3732 = vrot.lane.b32.xlu0 %v3730_v36, %s5491_s28 }
0x25f1   :  { %v3605_v32 = vpop.permute.xlu0 %3604 }
0x25f2   :  { %v3607_v6 = vmul.f32 %v3605_v32, %v3599_v57 }
0x25f4   :  { %3609 = vrot.lane.b32.xlu2 %v3607_v6, %s5491_s28 }
0x264e   :  { %v3610_v20 = vpop.permute.xlu2 %3609 }
0x264f   :  { %v7439_v7 = vadd.f32 %v3610_v20, %v3602_v56 }
0x2651   :  { %5199 = vtanh.f32 %v7439_v7 }
0x2653   :  { %v3733_v35 = vpop.permute.xlu0 %3732 }
0x2654   :  { %v7443_v53 = vadd.f32 %v3733_v35, %v3725_v62 }
0x2656   :  { %5201 = vtanh.f32 %v7443_v53 }
0x2657   :  { %v5200_v43 = vpop.eup %5199 }
0x2658   :  { %3615 = vrot.lane.b32.xlu1 %v5200_v43, %s5490_s25 }
0x265c   :  { %v5202_v3 = vpop.eup %5201 }
0x265d   :  { %3738 = vrot.lane.b32.xlu2 %v5202_v3, %s5490_s25 }
0x26b7   :  { %v3739_v31 = vpop.permute.xlu2 %3738 }
0x26b8   :  { %v3741_v51 = vmul.f32 %v3739_v31, %v3722_v15 }
0x26ba   :  { %3743 = vrot.lane.b32.xlu1 %v3741_v51, %s5491_s28 }
0x26ca   :  { %v3616_v10 = vpop.permute.xlu1 %3615 }
0x26cb   :  { %v3618_v11 = vmul.f32 %v3616_v10, %v3599_v57 }
0x26cd   :  { %3620 = vrot.lane.b32.xlu0 %v3618_v11, %s5491_s28 }
0x272c   :  { %v7450_v41 = vpop.permute.xlu1 %3743 }
0x272d   :  { %4875 = vmatmul.msk.f32.vlgmr.msrb.gmra.mxu0 %vm164_vm0, %v7450_v41 }
0x272e   :  { %4089 = vmatpush.msrb.mxu0 %v7207_v48  ;;  %v7469_v48 = vld [vmem:[%s7976_s11 + $0x10] sm:$0xff] }
0x2730   :  { %4090 = vmatpush.msrb.mxu0 %v7213_v47 }
0x2732   :  { %4091 = vmatpush.msrb.mxu0 %v7219_v22  ;;  %v5465_v22 = vld [vmem:[%s7973_s6 + $0x18] sm:$0xff] }
0x2734   :  { %4092 = vmatpush.msrb.mxu0 %v7225_v17  ;;  %v5468_v17 = vld [vmem:[%s7973_s6] sm:$0xff] }
0x2735   :  { %4880 = vmatmul.msk.f32.vlgmr.msra.gmra.mxu0 %vm164_vm0, %v7304_v24  ;;  %v5470_v24 = vld [vmem:[%s7968_s5 + $0x30] sm:$0xff] }
0x2736   :  { %4257 = vmatpush.msra.mxu0 %v7463_v30 }
0x2738   :  { %4258 = vmatpush.msra.mxu0 %v7469_v48 }
0x273a   :  { %4259 = vmatpush.msra.mxu0 %v7009_v12  ;;  %v5466_v12 = vld [vmem:[%s7973_s6 + $0x10] sm:$0xff] }
0x273c   :  { %4260 = vmatpush.msra.mxu0 %v7021_v14  ;;  %v5467_v14 = vld [vmem:[%s7973_s6 + $0x8] sm:$0xff] }
0x273f   :  { %v7474_v47 = vpop.permute.xlu0 %3620 }
0x2740   :  { %4871 = vmatmul.msk.f32.vlgmr.msra.gmra.mxu1 %vm164_vm0, %v7474_v47  ;;  %4886 = vmatmul.msk.f32.vlgmr.msrb.gmra.mxu0 %vm164_vm0, %v7474_v47 }
0x2741   :  { %3966 = vmatpush.msra.mxu1 %v5465_v22  ;;  %4401 = vmatpush.msrb.mxu0 %v7244_v25  ;;  %v8030_v25 = vld [vmem:[#allocation18_spill] sm:$0xff] }
0x2743   :  { %3967 = vmatpush.msra.mxu1 %v5466_v12  ;;  %4402 = vmatpush.msrb.mxu0 %v7251_v39  ;;  %v5469_v39 = vld [vmem:[%s7968_s5 + $0x38] sm:$0xff] }
0x2745   :  { %3968 = vmatpush.msra.mxu1 %v5467_v14  ;;  %4403 = vmatpush.msrb.mxu0 %v7258_v46  ;;  %v5471_v46 = vld [vmem:[%s7968_s5 + $0x28] sm:$0xff] }
0x2747   :  { %3969 = vmatpush.msra.mxu1 %v5468_v17  ;;  %4404 = vmatpush.msrb.mxu0 %v8030_v25 }
0x2748   :  { %4876 = vmatmul.msk.f32.vlgmr.msrb.gmra.mxu1 %vm164_vm0, %v7306_v18 }
0x2749   :  { %4110 = vmatpush.msrb.mxu1 %v5469_v39 }
0x274b   :  { %4111 = vmatpush.msrb.mxu1 %v5470_v24 }
0x274d   :  { %4112 = vmatpush.msrb.mxu1 %v5471_v46 }
0x274f   :  { %4113 = vmatpush.msrb.mxu1 %v5472_v33 }
0x27aa   :  { %v3764_v18 = vpop.f32.mrf.mxu0 }
0x27ab   :  { %v3767_v60 = vadd.f32 %v8032_v16, %v3764_v18 }
0x27b2   :  { %v3908_v26 = vpop.f32.mrf.mxu0 }
0x27b3   :  { %v3911_v13 = vadd.f32 %v3908_v26, %v3890_v42 }
0x27b5   :  { %5203 = vtanh.f32 %v3911_v13  ;;  %v4881_v36 = vmul.f32 -1.442695, %v3911_v13 }
0x27bb   :  { %v5204_v27 = vpop.eup %5203 }
0x27bc   :  { %3934 = vrot.lane.b32.xlu0 %v5204_v27, %s5490_s25 }
0x27bd   :  { %v7512_v2 = vpop.f32.mrf.mxu1 }
0x27c5   :  { %v3785_v34 = vpop.f32.mrf.mxu1 }
0x27c6   :  { %v3788_v8 = vadd.f32 %v3785_v34, %v3767_v60 }
0x27c8   :  { %5205 = vtanh.f32 %v3788_v8  ;;  %v4877_v28 = vmul.f32 -1.442695, %v3788_v8 }
0x27ca   :  { %5207 = vpow2.f32 %v4877_v28 }
0x27cb   :  { %5209 = vpow2.f32 %v4881_v36  ;;  %v5475_v36 = vld [vmem:[%s7973_s6 + $0x28] sm:$0xff] }
0x27ce   :  { %v5206_v15 = vpop.eup %5205 }
0x27cf   :  { %3811 = vrot.lane.b32.xlu2 %v5206_v15, %s5490_s25  ;;  %v5474_v15 = vld [vmem:[%s7973_s6 + $0x30] sm:$0xff] }
0x27d0   :  { %v5208_v4 = vpop.eup %5207 }
0x27d1   :  { %v3792_v19 = vadd.f32 1.0, %v5208_v4  ;;  %v5210_v61 = vpop.eup %5209  ;;  %v5476_v4 = vld [vmem:[%s7973_s6 + $0x20] sm:$0xff] }
0x27d2   :  { %v3915_v55 = vadd.f32 1.0, %v5210_v61  ;;  %v4094_v61 = vpop.f32.mrf.mxu0 }
0x27d3   :  { %5211 = vrcp.f32 %v3792_v19  ;;  %v3804_v62 = vand.u32 2147483648, %v3792_v19  ;;  %vm3798_vm7 = vweird.f32 %v3792_v19  ;;  %v3802_v43 = vand.u32 2147483647, %v3792_v19 }
0x27d4   :  { %5213 = vrcp.f32 %v3915_v55  ;;  %v3927_v10 = vand.u32 2147483648, %v3915_v55  ;;  %vm3921_vm11 = vweird.f32 %v3915_v55  ;;  %v3925_v12 = vand.u32 2147483647, %v3915_v55 }
0x27d5   :  { %v3805_v31 = vor.u32 1.1754944e-38, %v3804_v62  ;;  %vm3803_vm10 = vcmp.eq.f32.partialorder %v3802_v43, 8.507059e+37 }
0x27d6   :  { %v3928_v25 = vor.u32 1.1754944e-38, %v3927_v10  ;;  %vm3926_vm13 = vcmp.eq.f32.partialorder %v3925_v12, 8.507059e+37 }
0x27d9   :  { %v5212_v49 = vpop.eup %5211 }
0x27da   :  { %v3794_v23 = vmul.f32 %v5212_v49, %v3792_v19  ;;  %v5214_v50 = vpop.eup %5213  ;;  %vm3799_vm6 = vweird.f32 %v5212_v49  ;;  %v5477_v19 = vld [vmem:[%s7968_s5 + $0x58] sm:$0xff] }
0x27db   :  { %v3917_v57 = vmul.f32 %v5214_v50, %v3915_v55  ;;  %vm3800_vm8 = vmor %vm3798_vm7, %vm3799_vm6  ;;  %vm3922_vm9 = vweird.f32 %v5214_v50  ;;  %v4097_v55 = vadd.f32 %v7363_v38, %v4094_v61 }
0x27dc   :  { %v3795_v32 = vsub.f32 1.0, %v3794_v23  ;;  %vm3923_vm12 = vmor %vm3921_vm11, %vm3922_vm9 }
0x27dd   :  { %v3918_v56 = vsub.f32 1.0, %v3917_v57 }
0x27de   :  { %v3796_v6 = vmul.f32 %v5212_v49, %v3795_v32 }
0x27df   :  { %v3919_v35 = vmul.f32 %v5214_v50, %v3918_v56 }
0x27e0   :  { %v3797_v20 = vadd.f32 %v5212_v49, %v3796_v6 }
0x27e1   :  { %v3920_v51 = vadd.f32 %v5214_v50, %v3919_v35 }
0x27e2   :  { %v3801_v3 = vsel %vm3800_vm8, %v5212_v49, %v3797_v20 }
0x27e3   :  { %v3806_v22 = vsel %vm3803_vm10, %v3805_v31, %v3801_v3  ;;  %v3924_v17 = vsel %vm3923_vm12, %v5214_v50, %v3920_v51 }
0x27e4   :  { %v3929_v24 = vsel %vm3926_vm13, %v3928_v25, %v3924_v17  ;;  %v3809_v42 = vmul.f32 %v3806_v22, %v7298_v54  ;;  %v5473_v54 = vld [vmem:[%s7973_s6 + $0x38] sm:$0xff] }
0x27e5   :  { %v3932_v33 = vmul.f32 %v3929_v24, %v7293_v1 }
0x2829   :  { %v3812_v11 = vpop.permute.xlu2 %3811 }
0x282a   :  { %v3814_v14 = vmul.f32 %v3812_v11, %v3806_v22 }
0x282c   :  { %3816 = vrot.lane.b32.xlu1 %v3814_v14, %s5491_s28 }
0x282e   :  { %v3935_v39 = vpop.permute.xlu0 %3934 }
0x282f   :  { %v3937_v46 = vmul.f32 %v3935_v39, %v3929_v24 }
0x2831   :  { %3939 = vrot.lane.b32.xlu2 %v3937_v46, %s5491_s28 }
0x288b   :  { %v3940_v18 = vpop.permute.xlu2 %3939 }
0x288c   :  { %v3942_v9 = vadd.f32 %v3940_v18, %v3932_v33 }
0x288e   :  { %5215 = vtanh.f32 %v3942_v9 }
0x2894   :  { %v5216_v37 = vpop.eup %5215 }
0x2895   :  { %3945 = vrot.lane.b32.xlu1 %v5216_v37, %s5490_s25 }
0x289e   :  { %v3817_v26 = vpop.permute.xlu1 %3816 }
0x289f   :  { %v7521_v13 = vadd.f32 %v3817_v26, %v3809_v42 }
0x28a1   :  { %5217 = vtanh.f32 %v7521_v13 }
0x28a7   :  { %v5218_v27 = vpop.eup %5217 }
0x28a8   :  { %3822 = vrot.lane.b32.xlu0 %v5218_v27, %s5490_s25 }
0x2907   :  { %v3946_v16 = vpop.permute.xlu1 %3945 }
0x2908   :  { %v3948_v60 = vmul.f32 %v3946_v16, %v3929_v24 }
0x290a   :  { %3950 = vrot.lane.b32.xlu0 %v3948_v60, %s5491_s28 }
0x291a   :  { %v3823_v1 = vpop.permute.xlu0 %3822 }
0x291b   :  { %v3825_v34 = vmul.f32 %v3823_v1, %v3806_v22 }
0x291d   :  { %3827 = vrot.lane.b32.xlu2 %v3825_v34, %s5491_s28 }
0x2977   :  { %v7527_v8 = vpop.permute.xlu2 %3827 }
0x2978   :  { %4878 = vmatmul.msk.f32.vlgmr.msrb.gmra.mxu2 %vm164_vm0, %v7527_v8 }
0x2979   :  { %4173 = vmatpush.msrb.mxu2 %v5473_v54 }
0x297b   :  { %4174 = vmatpush.msrb.mxu2 %v5474_v15 }
0x297c   :  { %v3951_v28 = vpop.permute.xlu0 %3950 }
0x297d   :  { %4882 = vmatmul.msk.f32.vlgmr.msra.gmra.mxu1 %vm164_vm0, %v3951_v28  ;;  %4175 = vmatpush.msrb.mxu2 %v5475_v36 }
0x297e   :  { %4296 = vmatpush.msra.mxu1 %v7315_v45  ;;  %v5478_v45 = vld [vmem:[%s7968_s5 + $0x50] sm:$0xff] }
0x297f   :  { %4176 = vmatpush.msrb.mxu2 %v5476_v4 }
0x2980   :  { %4883 = vmatmul.msk.f32.vlgmr.msra.gmra.mxu2 %vm164_vm0, %v7397_v58  ;;  %4297 = vmatpush.msra.mxu1 %v7322_v52  ;;  %v5479_v52 = vld [vmem:[%s7968_s5 + $0x48] sm:$0xff] }
0x2981   :  { %4317 = vmatpush.msra.mxu2 %v5477_v19 }
0x2982   :  { %4298 = vmatpush.msra.mxu1 %v7329_v0  ;;  %v5480_v0 = vld [vmem:[%s7968_s5 + $0x40] sm:$0xff] }
0x2983   :  { %4318 = vmatpush.msra.mxu2 %v5478_v45 }
0x2984   :  { %4299 = vmatpush.msra.mxu1 %v7336_v44  ;;  %v5481_v44 = vld [vmem:[%s7976_s11 + $0x8] sm:$0xff] }
0x2985   :  { %4887 = vmatmul.msk.f32.vlgmr.msrb.gmra.mxu1 %vm164_vm0, %v7383_v63  ;;  %4319 = vmatpush.msra.mxu2 %v5479_v52  ;;  %v5482_v63 = vld [vmem:[%s7976_s11] sm:$0xff] }
0x2986   :  { %4464 = vmatpush.msrb.mxu1 %v7463_v30 }
0x2987   :  { %4320 = vmatpush.msra.mxu2 %v5480_v0 }
0x2988   :  { %4465 = vmatpush.msrb.mxu1 %v7469_v48  ;;  %v5483_v48 = vld [vmem:[%s7974_s8] ss:$0 sm:$0xff] }
0x298a   :  { %4466 = vmatpush.msrb.mxu1 %v5481_v44 }
0x298c   :  { %4467 = vmatpush.msrb.mxu1 %v5482_v63 }
0x298d   :  { %4893 = vmatmul.msk.f32.vlgmr.msra.gmra.mxu1 %vm164_vm0, %v7527_v8 }
0x29fa   :  { %v3971_v58 = vpop.f32.mrf.mxu1 }
0x29fb   :  { %v7574_v30 = vpop.f32.mrf.mxu2  ;;  %v3974_v49 = vadd.f32 %v5483_v48, %v3971_v58  ;;  %v5485_v48 = vld [vmem:[%s7973_s6 + $0x50] sm:$0xff] }
0x2a02   :  { %v4115_v23 = vpop.f32.mrf.mxu1 }
0x2a03   :  { %v3992_v50 = vpop.f32.mrf.mxu2  ;;  %v4118_v32 = vadd.f32 %v4115_v23, %v4097_v55  ;;  %v5484_v55 = vld [vmem:[%s7973_s6 + $0x58] sm:$0xff] }
0x2a04   :  { %v3995_v57 = vadd.f32 %v3992_v50, %v3974_v49  ;;  %v5486_v49 = vld [vmem:[%s7973_s6 + $0x48] sm:$0xff] }
0x2a05   :  { %5219 = vtanh.f32 %v4118_v32  ;;  %v4888_v20 = vmul.f32 -1.442695, %v4118_v32 }
0x2a06   :  { %5221 = vtanh.f32 %v3995_v57  ;;  %v4884_v43 = vmul.f32 -1.442695, %v3995_v57 }
0x2a07   :  { %5223 = vpow2.f32 %v4888_v20 }
0x2a0a   :  { %v4301_v50 = vpop.f32.mrf.mxu1 }
0x2a0b   :  { %v5220_v6 = vpop.eup %5219  ;;  %v4304_v32 = vadd.f32 %v7428_v29, %v4301_v50 }
0x2a0c   :  { %v5222_v56 = vpop.eup %5221  ;;  %4141 = vrot.lane.b32.xlu2 %v5220_v6, %s5490_s25 }
0x2a0d   :  { %4018 = vrot.lane.b32.xlu1 %v5222_v56, %s5490_s25  ;;  %v5224_v38 = vpop.eup %5223 }
0x2a0e   :  { %v4122_v62 = vadd.f32 1.0, %v5224_v38  ;;  %v5488_v38 = vld [vmem:[%s7974_s8 + $0x1] ss:$0 sm:$0xff] }
0x2a10   :  { %5225 = vrcp.f32 %v4122_v62  ;;  %v4134_v12 = vand.u32 2147483648, %v4122_v62  ;;  %vm4128_vm15 = vweird.f32 %v4122_v62  ;;  %v4132_v14 = vand.u32 2147483647, %v4122_v62 }
0x2a11   :  { %5227 = vpow2.f32 %v4884_v43 }
0x2a12   :  { %v4135_v25 = vor.u32 1.1754944e-38, %v4134_v12  ;;  %vm4133_vm2 = vcmp.eq.f32.partialorder %v4132_v14, 8.507059e+37 }
0x2a16   :  { %v5226_v35 = vpop.eup %5225 }
0x2a17   :  { %v4124_v3 = vmul.f32 %v5226_v35, %v4122_v62  ;;  %v5228_v10 = vpop.eup %5227  ;;  %vm4129_vm14 = vweird.f32 %v5226_v35 }
0x2a18   :  { %v3999_v11 = vadd.f32 1.0, %v5228_v10  ;;  %vm4130_vm1 = vmor %vm4128_vm15, %vm4129_vm14 }
0x2a19   :  { %v4125_v31 = vsub.f32 1.0, %v4124_v3 }
0x2a1a   :  { %5229 = vrcp.f32 %v3999_v11  ;;  %v4011_v26 = vand.u32 2147483648, %v3999_v11  ;;  %vm4005_vm4 = vweird.f32 %v3999_v11  ;;  %v4009_v27 = vand.u32 2147483647, %v3999_v11 }
0x2a1b   :  { %v4126_v51 = vmul.f32 %v5226_v35, %v4125_v31 }
0x2a1c   :  { %v4012_v60 = vor.u32 1.1754944e-38, %v4011_v26  ;;  %vm4010_vm6 = vcmp.eq.f32.partialorder %v4009_v27, 8.507059e+37 }
0x2a1d   :  { %v4127_v22 = vadd.f32 %v5226_v35, %v4126_v51 }
0x2a1f   :  { %v4131_v17 = vsel %vm4130_vm1, %v5226_v35, %v4127_v22 }
0x2a20   :  { %v4136_v24 = vsel %vm4133_vm2, %v4135_v25, %v4131_v17  ;;  %v5230_v33 = vpop.eup %5229 }
0x2a21   :  { %v4001_v18 = vmul.f32 %v5230_v33, %v3999_v11  ;;  %vm4006_vm3 = vweird.f32 %v5230_v33  ;;  %v4139_v15 = vmul.f32 %v4136_v24, %v7372_v21 }
0x2a22   :  { %vm4007_vm5 = vmor %vm4005_vm4, %vm4006_vm3 }
0x2a23   :  { %v4002_v9 = vsub.f32 1.0, %v4001_v18 }
0x2a25   :  { %v4003_v37 = vmul.f32 %v5230_v33, %v4002_v9 }
0x2a27   :  { %v4004_v42 = vadd.f32 %v5230_v33, %v4003_v37 }
0x2a29   :  { %v4008_v16 = vsel %vm4007_vm5, %v5230_v33, %v4004_v42 }
0x2a2a   :  { %v4013_v34 = vsel %vm4010_vm6, %v4012_v60, %v4008_v16 }
0x2a2b   :  { %v4016_v19 = vmul.f32 %v4013_v34, %v7377_v5 }
0x2a66   :  { %v4142_v39 = vpop.permute.xlu2 %4141 }
0x2a67   :  { %v4144_v46 = vmul.f32 %v4142_v39, %v4136_v24 }
0x2a69   :  { %4146 = vrot.lane.b32.xlu1 %v4144_v46, %s5491_s28 }
0x2a7f   :  { %v4019_v1 = vpop.permute.xlu1 %4018 }
0x2a80   :  { %v4021_v54 = vmul.f32 %v4019_v1, %v4013_v34 }
0x2a82   :  { %4023 = vrot.lane.b32.xlu0 %v4021_v54, %s5491_s28 }
0x2adb   :  { %v4147_v28 = vpop.permute.xlu1 %4146 }
0x2adc   :  { %v4149_v36 = vadd.f32 %v4147_v28, %v4139_v15 }
0x2ade   :  { %5231 = vtanh.f32 %v4149_v36 }
0x2ae4   :  { %v5232_v4 = vpop.eup %5231 }
0x2ae5   :  { %4152 = vrot.lane.b32.xlu0 %v5232_v4, %s5490_s25 }
0x2af4   :  { %v4024_v45 = vpop.permute.xlu0 %4023 }
0x2af5   :  { %v4026_v52 = vadd.f32 %v4024_v45, %v4016_v19 }
0x2af7   :  { %5233 = vtanh.f32 %v4026_v52 }
0x2afd   :  { %v5234_v0 = vpop.eup %5233 }
0x2afe   :  { %4029 = vrot.lane.b32.xlu2 %v5234_v0, %s5490_s25 }
0x2b57   :  { %v4153_v44 = vpop.permute.xlu0 %4152 }
0x2b58   :  { %v4155_v63 = vmul.f32 %v4153_v44, %v4136_v24  ;;  %v4030_v58 = vpop.permute.xlu2 %4029 }
0x2b59   :  { %v4032_v61 = vmul.f32 %v4030_v58, %v4013_v34 }
0x2b5a   :  { %4157 = vrot.lane.b32.xlu2 %v4155_v63, %s5491_s28 }
0x2b5b   :  { %4034 = vrot.lane.b32.xlu1 %v4032_v61, %s5491_s28 }
0x2bb4   :  { %v4158_v21 = vpop.permute.xlu2 %4157 }
0x2bb5   :  { %4889 = vmatmul.msk.f32.vlgmr.msrb.gmra.mxu2 %vm164_vm0, %v4158_v21 }
0x2bbd   :  { %4894 = vmatmul.msk.f32.vlgmr.msra.gmra.mxu2 %vm164_vm0, %v7450_v41  ;;  %v5487_v41 = vld [vmem:[%s7973_s6 + $0x40] sm:$0xff] }
0x2bcd   :  { %v4035_v5 = vpop.permute.xlu1 %4034 }
0x2bce   :  { %4885 = vmatmul.msk.f32.vlgmr.msra.gmra.mxu3 %vm164_vm0, %v4035_v5 }
0x2bcf   :  { %4380 = vmatpush.msra.mxu3 %v5484_v55 }
0x2bd1   :  { %4381 = vmatpush.msra.mxu3 %v5485_v48 }
0x2bd3   :  { %4382 = vmatpush.msra.mxu3 %v5486_v49 }
0x2bd5   :  { %4383 = vmatpush.msra.mxu3 %v5487_v41 }
0x2bd6   :  { %4890 = vmatmul.msk.f32.vlgmr.msrb.gmra.mxu3 %vm164_vm0, %v7474_v47 }
0x2c38   :  { %v4178_v23 = vpop.f32.mrf.mxu2 }
0x2c39   :  { %v4181_v62 = vadd.f32 %v5488_v38, %v4178_v23  ;;  %v5489_v23 = vld [vmem:[%s7974_s8 + $0x2] ss:$0 sm:$0xff]  ;;  %s5492_s8 = smov 96  }
0x2c40   :  { %v4322_v57 = vpop.f32.mrf.mxu2 }
0x2c41   :  { %v4325_v6 = vadd.f32 %v4322_v57, %v4304_v32 }
0x2c43   :  { %5235 = vtanh.f32 %v4325_v6  ;;  %v4895_v29 = vmul.f32 -1.442695, %v4325_v6 }
0x2c49   :  { %v5236_v56 = vpop.eup %5235 }
0x2c4a   :  { %4348 = vrot.lane.b32.xlu1 %v5236_v56, %s5490_s25 }
0x2c51   :  { %v7610_v20 = vpop.f32.mrf.mxu3 }
0x2c59   :  { %v4199_v35 = vpop.f32.mrf.mxu3 }
0x2c5a   :  { %v4202_v43 = vadd.f32 %v4199_v35, %v4181_v62  ;;  %v8033_v35 = vld [vmem:[#allocation5_spill] sm:$0xff] }
0x2c5c   :  { %5237 = vtanh.f32 %v4202_v43  ;;  %v4891_v10 = vmul.f32 -1.442695, %v4202_v43 }
0x2c5d   :  { %5239 = vpow2.f32 %v4895_v29 }
0x2c62   :  { %v5238_v47 = vpop.eup %5237 }
0x2c63   :  { %4225 = vrot.lane.b32.xlu0 %v5238_v47, %s5490_s25  ;;  %v5240_v3 = vpop.eup %5239 }
0x2c64   :  { %v4329_v31 = vadd.f32 1.0, %v5240_v3 }
0x2c66   :  { %5241 = vrcp.f32 %v4329_v31  ;;  %v4341_v39 = vand.u32 2147483648, %v4329_v31  ;;  %vm4335_vm8 = vweird.f32 %v4329_v31  ;;  %v4339_v24 = vand.u32 2147483647, %v4329_v31 }
0x2c67   :  { %5243 = vpow2.f32 %v4891_v10 }
0x2c68   :  { %v4342_v33 = vor.u32 1.1754944e-38, %v4341_v39  ;;  %vm4340_vm10 = vcmp.eq.f32.partialorder %v4339_v24, 8.507059e+37 }
0x2c6c   :  { %v5242_v51 = vpop.eup %5241 }
0x2c6d   :  { %v4331_v11 = vmul.f32 %v5242_v51, %v4329_v31  ;;  %v5244_v14 = vpop.eup %5243  ;;  %vm4336_vm7 = vweird.f32 %v5242_v51 }
0x2c6e   :  { %v4206_v17 = vadd.f32 1.0, %v5244_v14  ;;  %vm4337_vm9 = vmor %vm4335_vm8, %vm4336_vm7 }
0x2c6f   :  { %v4332_v22 = vsub.f32 1.0, %v4331_v11 }
0x2c70   :  { %5245 = vrcp.f32 %v4206_v17  ;;  %v4218_v1 = vand.u32 2147483648, %v4206_v17  ;;  %vm4212_vm12 = vweird.f32 %v4206_v17  ;;  %v4216_v34 = vand.u32 2147483647, %v4206_v17 }
0x2c71   :  { %v4333_v12 = vmul.f32 %v5242_v51, %v4332_v22 }
0x2c72   :  { %v4219_v15 = vor.u32 1.1754944e-38, %v4218_v1  ;;  %vm4217_vm14 = vcmp.eq.f32.partialorder %v4216_v34, 8.507059e+37 }
0x2c73   :  { %v4334_v25 = vadd.f32 %v5242_v51, %v4333_v12 }
0x2c75   :  { %v4338_v46 = vsel %vm4337_vm9, %v5242_v51, %v4334_v25 }
0x2c76   :  { %v4343_v9 = vsel %vm4340_vm10, %v4342_v33, %v4338_v46  ;;  %v5246_v42 = vpop.eup %5245 }
0x2c77   :  { %v4208_v26 = vmul.f32 %v5246_v42, %v4206_v17  ;;  %vm4213_vm11 = vweird.f32 %v5246_v42  ;;  %v4346_v19 = vmul.f32 %v4343_v9, %v7443_v53 }
0x2c78   :  { %vm4214_vm13 = vmor %vm4212_vm12, %vm4213_vm11 }
0x2c79   :  { %v4209_v27 = vsub.f32 1.0, %v4208_v26 }
0x2c7b   :  { %v4210_v16 = vmul.f32 %v5246_v42, %v4209_v27  ;;  %v8034_v27 = vld [vmem:[#allocation9_spill] sm:$0xff] }
0x2c7d   :  { %v4211_v60 = vadd.f32 %v5246_v42, %v4210_v16 }
0x2c7f   :  { %v4215_v54 = vsel %vm4214_vm13, %v5246_v42, %v4211_v60 }
0x2c80   :  { %v4220_v36 = vsel %vm4217_vm14, %v4219_v15, %v4215_v54  ;;  %v8035_v54 = vld [vmem:[#allocation2_spill] sm:$0xff] }
0x2c81   :  { %v4223_v52 = vmul.f32 %v4220_v36, %v7439_v7 }
0x2cbc   :  { %v4349_v18 = vpop.permute.xlu1 %4348 }
0x2cbd   :  { %v4351_v37 = vmul.f32 %v4349_v18, %v4343_v9 }
0x2cbf   :  { %4353 = vrot.lane.b32.xlu0 %v4351_v37, %s5491_s28 }
0x2cd5   :  { %v4226_v28 = vpop.permute.xlu0 %4225 }
0x2cd6   :  { %v4228_v4 = vmul.f32 %v4226_v28, %v4220_v36 }
0x2cd8   :  { %4230 = vrot.lane.b32.xlu2 %v4228_v4, %s5491_s28 }
0x2d31   :  { %v4354_v45 = vpop.permute.xlu0 %4353 }
0x2d32   :  { %v4356_v0 = vadd.f32 %v4354_v45, %v4346_v19  ;;  %v4231_v44 = vpop.permute.xlu2 %4230 }
0x2d33   :  { %v4233_v63 = vadd.f32 %v4231_v44, %v4223_v52 }
0x2d34   :  { %5247 = vtanh.f32 %v4356_v0 }
0x2d35   :  { %5249 = vtanh.f32 %v4233_v63 }
0x2d3a   :  { %v5248_v58 = vpop.eup %5247 }
0x2d3b   :  { %v5250_v61 = vpop.eup %5249  ;;  %4359 = vrot.lane.b32.xlu2 %v5248_v58, %s5490_s25 }
0x2d3c   :  { %4236 = vrot.lane.b32.xlu1 %v5250_v61, %s5490_s25 }
0x2d95   :  { %v4360_v21 = vpop.permute.xlu2 %4359 }
0x2d96   :  { %v4362_v5 = vmul.f32 %v4360_v21, %v4343_v9 }
0x2d98   :  { %4364 = vrot.lane.b32.xlu1 %v4362_v5, %s5491_s28  ;;  %v8036_v5 = vld [vmem:[#allocation15_spill] sm:$0xff] }
0x2dae   :  { %v4237_v55 = vpop.permute.xlu1 %4236 }
0x2daf   :  { %v4239_v53 = vmul.f32 %v4237_v55, %v4220_v36 }
0x2db1   :  { %4241 = vrot.lane.b32.xlu0 %v4239_v53, %s5491_s28 }
0x2e0a   :  { %v4365_v7 = vpop.permute.xlu1 %4364 }
0x2e0b   :  { %4896 = vmatmul.msk.f32.vlgmr.msra.gmra.mxu3 %vm164_vm0, %v4365_v7 }
0x2e23   :  { %v4242_v48 = vpop.permute.xlu0 %4241 }
0x2e24   :  { %4892 = vmatmul.msk.f32.vlgmr.msra.gmra.mxu0 %vm164_vm0, %v4242_v48 }
0x2e2c   :  { %4897 = vmatmul.msk.f32.vlgmr.msrb.gmra.mxu0 %vm164_vm0, %v7527_v8  ;;  %v7637_v8 = vld [vmem:[%s7977_s12] ss:$0 sm:$0xff] }
0x2e2d   :  { %v7641_v43 = vadd.f32 %v7637_v8, %v8033_v35  ;;  %v7646_v31 = vadd.f32 %v7637_v8, %v7432_v59  ;;  %v7655_v16 = vadd.f32 %v7637_v8, %v8034_v27  ;;  %v7659_v15 = vadd.f32 %v7637_v8, %v8035_v54 }
0x2e2e   :  { %v7666_v52 = vadd.f32 %v7637_v8, %v7512_v2  ;;  %v7671_v55 = vadd.f32 %v7637_v8, %v8036_v5 }
0x2e2f   :  { %v956_v47 = vand.u32 2147483647, %v7641_v43  ;;  %v3440_v11 = vand.u32 2147483647, %v7646_v31  ;;  %v2405_v28 = vand.u32 2147483647, %v7655_v16  ;;  %vm954_vm5 = vcmp.ne.f32.partialorder %v7641_v43, %v7641_v43 }
0x2e30   :  { %v953_v61 = vmax.f32 %v7641_v43, 0.0  ;;  %v3647_v53 = vand.u32 2147483647, %v7666_v52  ;;  %vm3438_vm7 = vcmp.ne.f32.partialorder %v7646_v31, %v7646_v31  ;;  %vm2403_vm9 = vcmp.ne.f32.partialorder %v7655_v16, %v7655_v16 }
0x2e31   :  { %v957_v3 = vsub.f32 0.0, %v956_v47  ;;  %v3441_v12 = vsub.f32 0.0, %v3440_v11  ;;  %v2406_v45 = vsub.f32 0.0, %v2405_v28  ;;  %vm3645_vm11 = vcmp.ne.f32.partialorder %v7666_v52, %v7666_v52 }
0x2e33   :  { %v958_v10 = vmul.f32 1.442695, %v957_v3  ;;  %v3442_v17 = vmul.f32 1.442695, %v3441_v12  ;;  %v2407_v21 = vmul.f32 1.442695, %v2406_v45 }
0x2e8e   :  { %v4385_v41 = vpop.f32.mrf.mxu3 }
0x2e8f   :  { %v4388_v50 = vadd.f32 %v5489_v23, %v4385_v41  ;;  %v3648_v23 = vsub.f32 0.0, %v3647_v53 }
0x2ea1   :  { %v7628_v49 = vpop.f32.mrf.mxu0 }
0x2ea9   :  { %v4406_v32 = vpop.f32.mrf.mxu0 }
0x2eaa   :  { %v4409_v57 = vadd.f32 %v4406_v32, %v4388_v50  ;;  %v7680_v50 = vadd.f32 %v7637_v8, %v7628_v49 }
0x2eac   :  { %5251 = vtanh.f32 %v4409_v57  ;;  %v4898_v56 = vmul.f32 -1.442695, %v4409_v57  ;;  %vm4266_vm13 = vcmp.ne.f32.partialorder %v7680_v50, %v7680_v50 }
0x2eae   :  { %5253 = vpow2.f32 %v4898_v56  ;;  %v3437_v56 = vmax.f32 %v7646_v31, 0.0 }
0x2eb2   :  { %v5252_v6 = vpop.eup %5251 }
0x2eb3   :  { %4432 = vrot.lane.b32.xlu2 %v5252_v6, %s5490_s25 }
0x2eb4   :  { %v5254_v38 = vpop.eup %5253 }
0x2eb5   :  { %v4413_v62 = vadd.f32 1.0, %v5254_v38  ;;  %v3649_v38 = vmul.f32 1.442695, %v3648_v23 }
0x2eb7   :  { %5255 = vrcp.f32 %v4413_v62  ;;  %v4425_v39 = vand.u32 2147483648, %v4413_v62  ;;  %vm4419_vm1 = vweird.f32 %v4413_v62  ;;  %v4423_v46 = vand.u32 2147483647, %v4413_v62 }
0x2eb8   :  { %5257 = vpow2.f32 %v958_v10 }
0x2eb9   :  { %5259 = vpow2.f32 %v3442_v17  ;;  %v4426_v59 = vor.u32 1.1754944e-38, %v4425_v39  ;;  %vm4424_vm3 = vcmp.eq.f32.partialorder %v4423_v46, 8.507059e+37 }
0x2ebd   :  { %v5256_v29 = vpop.eup %5255 }
0x2ebe   :  { %v4415_v51 = vmul.f32 %v5256_v29, %v4413_v62  ;;  %vm4420_vm15 = vweird.f32 %v5256_v29  ;;  %v5258_v24 = vpop.eup %5257  ;;  %v4268_v62 = vand.u32 2147483647, %v7680_v50 }
0x2ebf   :  { %vm4421_vm2 = vmor %vm4419_vm1, %vm4420_vm15  ;;  %v960_v18 = vadd.f32 1.0, %v5258_v24  ;;  %v5260_v26 = vpop.eup %5259  ;;  %v963_v60 = vmul.f32 -0.5, %v5258_v24  ;;  %v966_v4 = vand.u32 2147483647, %v5258_v24 }
0x2ec0   :  { %v4416_v22 = vsub.f32 1.0, %v4415_v51  ;;  %v3444_v1 = vadd.f32 1.0, %v5260_v26  ;;  %v3447_v44 = vmul.f32 -0.5, %v5260_v26  ;;  %v3450_v41 = vand.u32 2147483647, %v5260_v26 }
0x2ec1   :  { %5261 = vlog2.f32 %v960_v18  ;;  %v964_v36 = vadd.f32 1.0, %v963_v60  ;;  %vm967_vm4 = vcmp.lt.f32.partialorder %v966_v4, 0.0004427343  ;;  %v4269_v3 = vsub.f32 0.0, %v4268_v62 }
0x2ec2   :  { %v4417_v14 = vmul.f32 %v5256_v29, %v4416_v22  ;;  %5263 = vlog2.f32 %v3444_v1  ;;  %v3448_v7 = vadd.f32 1.0, %v3447_v44  ;;  %vm3451_vm6 = vcmp.lt.f32.partialorder %v3450_v41, 0.0004427343 }
0x2ec3   :  { %v965_v0 = vmul.f32 %v5258_v24, %v964_v36  ;;  %5265 = vpow2.f32 %v2407_v21  ;;  %v4270_v10 = vmul.f32 1.442695, %v4269_v3  ;;  %v2402_v60 = vmax.f32 %v7655_v16, 0.0 }
0x2ec4   :  { %v4418_v25 = vadd.f32 %v5256_v29, %v4417_v14  ;;  %v3449_v32 = vmul.f32 %v5260_v26, %v3448_v7  ;;  %5267 = vpow2.f32 %v3649_v38  ;;  %v3644_v44 = vmax.f32 %v7666_v52, 0.0 }
0x2ec5   :  { %v4265_v41 = vmax.f32 %v7680_v50, 0.0  ;;  %v7720_v62 = vadd.f32 %v7637_v8, %v7610_v20 }
0x2ec6   :  { %v4422_v33 = vsel %vm4421_vm2, %v5256_v29, %v4418_v25  ;;  %v8037_v25 = vld [vmem:[#allocation6_spill] sm:$0xff] }
0x2ec7   :  { %v7649_v37 = vsel %vm4424_vm3, %v4426_v59, %v4422_v33  ;;  %v5262_v34 = vpop.eup %5261  ;;  %v7692_v39 = vadd.f32 %v7637_v8, %v8037_v25  ;;  %vm4059_vm2 = vcmp.ne.f32.partialorder %v7720_v62, %v7720_v62 }
0x2ec8   :  { %v962_v19 = vmul.f32 0.6931472, %v5262_v34  ;;  %v5264_v58 = vpop.eup %5263  ;;  %v4430_v3 = vmul.f32 %v7649_v37, %v7521_v13 }
0x2ec9   :  { %v3446_v2 = vmul.f32 0.6931472, %v5264_v58  ;;  %v5266_v29 = vpop.eup %5265 }
0x2eca   :  { %v968_v63 = vsel %vm967_vm4, %v965_v0, %v962_v19  ;;  %v2409_v51 = vadd.f32 1.0, %v5266_v29  ;;  %v5268_v22 = vpop.eup %5267  ;;  %v2412_v12 = vmul.f32 -0.5, %v5266_v29  ;;  %v2415_v46 = vand.u32 2147483647, %v5266_v29 }
0x2ecb   :  { %v969_v48 = vadd.f32 %v968_v63, %v953_v61  ;;  %v3452_v6 = vsel %vm3451_vm6, %v3449_v32, %v3446_v2  ;;  %v3651_v14 = vadd.f32 1.0, %v5268_v22  ;;  %v3657_v54 = vand.u32 2147483647, %v5268_v22 }
0x2ecc   :  { %v3453_v47 = vadd.f32 %v3452_v6, %v3437_v56  ;;  %5269 = vlog2.f32 %v2409_v51  ;;  %v2413_v24 = vadd.f32 1.0, %v2412_v12  ;;  %vm2416_vm8 = vcmp.lt.f32.partialorder %v2415_v46, 0.0004427343  ;;  %v8038_v6 = vld [vmem:[#allocation10_spill] sm:$0xff] }
0x2ecd   :  { %v970_v57 = vsel %vm954_vm5, %v7641_v43, %v969_v48  ;;  %5271 = vpow2.f32 %v4270_v10  ;;  %vm3658_vm10 = vcmp.lt.f32.partialorder %v3657_v54, 0.0004427343  ;;  %v7715_v56 = vadd.f32 %v7637_v8, %v8038_v6 }
0x2ece   :  { %v971_v35 = vadd.f32 1.1920929e-07, %v970_v57  ;;  %v3454_v49 = vsel %vm3438_vm7, %v7646_v31, %v3453_v47  ;;  %5273 = vlog2.f32 %v3651_v14  ;;  %v2414_v18 = vmul.f32 %v5266_v29, %v2413_v24 }
0x2ecf   :  { %v3455_v11 = vadd.f32 1.1920929e-07, %v3454_v49  ;;  %v4061_v47 = vand.u32 2147483647, %v7720_v62  ;;  %vm1575_vm15 = vcmp.ne.f32.partialorder %v7715_v56, %v7715_v56  ;;  %vm1161_vm6 = vcmp.ne.f32.partialorder %v7692_v39, %v7692_v39 }
0x2ed1   :  { %v4062_v29 = vsub.f32 0.0, %v4061_v47 }
0x2ed2   :  { %v5270_v17 = vpop.eup %5269 }
0x2ed3   :  { %v5272_v33 = vpop.eup %5271  ;;  %v2411_v59 = vmul.f32 0.6931472, %v5270_v17  ;;  %v4063_v49 = vmul.f32 1.442695, %v4062_v29 }
0x2ed4   :  { %v5274_v27 = vpop.eup %5273  ;;  %v4275_v4 = vmul.f32 -0.5, %v5272_v33  ;;  %v4278_v21 = vand.u32 2147483647, %v5272_v33 }
0x2ed5   :  { %v2417_v26 = vsel %vm2416_vm8, %v2414_v18, %v2411_v59  ;;  %v3653_v28 = vmul.f32 0.6931472, %v5274_v27 }
0x2ed6   :  { %v2418_v34 = vadd.f32 %v2417_v26, %v2402_v60  ;;  %v4276_v58 = vadd.f32 1.0, %v4275_v4  ;;  %vm4279_vm12 = vcmp.lt.f32.partialorder %v4278_v21, 0.0004427343  ;;  %v8042_v21 = vld [vmem:[#allocation16_spill] sm:$0xff] }
0x2ed8   :  { %v2419_v19 = vsel %vm2403_vm9, %v7655_v16, %v2418_v34  ;;  %v4277_v53 = vmul.f32 %v5272_v33, %v4276_v58  ;;  %v8040_v58 = vld [vmem:[#allocation4_spill] sm:$0xff] }
0x2ed9   :  { %v2420_v63 = vadd.f32 1.1920929e-07, %v2419_v19 }
0x2f0d   :  { %v4433_v9 = vpop.permute.xlu2 %4432 }
0x2f0e   :  { %v4435_v42 = vmul.f32 %v4433_v9, %v7649_v37  ;;  %v3654_v9 = vmul.f32 -0.5, %v5268_v22 }
0x2f10   :  { %4437 = vrot.lane.b32.xlu0 %v4435_v42, %s5491_s28  ;;  %v4272_v42 = vadd.f32 1.0, %v5272_v33  ;;  %v3655_v1 = vadd.f32 1.0, %v3654_v9 }
0x2f12   :  { %5275 = vlog2.f32 %v4272_v42  ;;  %v3656_v36 = vmul.f32 %v5268_v22, %v3655_v1  ;;  %v1574_v42 = vmax.f32 %v7715_v56, 0.0 }
0x2f14   :  { %v3659_v45 = vsel %vm3658_vm10, %v3656_v36, %v3653_v28  ;;  %v4058_v28 = vmax.f32 %v7720_v62, 0.0 }
0x2f15   :  { %v3660_v61 = vadd.f32 %v3659_v45, %v3644_v44  ;;  %v8039_v45 = vld [vmem:[#allocation14_spill] sm:$0xff]  ;;  %v7750_v44 = vadd.f32 %v7637_v8, %v7358_v40 }
0x2f17   :  { %v3661_v7 = vsel %vm3645_vm11, %v7666_v52, %v3660_v61  ;;  %v7762_v61 = vadd.f32 %v7637_v8, %v8040_v58 }
0x2f18   :  { %4492 = vrot.lane.b32.xlu0 %v7659_v15, %s5491_s28  ;;  %v5276_v0 = vpop.eup %5275  ;;  %v3662_v2 = vadd.f32 1.1920929e-07, %v3661_v7 }
0x2f19   :  { %v4274_v5 = vmul.f32 0.6931472, %v5276_v0  ;;  %v7742_v0 = vadd.f32 %v7637_v8, %v8039_v45 }
0x2f1b   :  { %v4280_v48 = vsel %vm4279_vm12, %v4277_v53, %v4274_v5  ;;  %v8043_v5 = vld [vmem:[#allocation8_spill] sm:$0xff] }
0x2f1c   :  { %v4281_v23 = vadd.f32 %v4280_v48, %v4265_v41  ;;  %v7778_v53 = vadd.f32 %v7637_v8, %v8043_v5 }
0x2f1e   :  { %v4282_v32 = vsel %vm4266_vm13, %v7680_v50, %v4281_v23  ;;  %v2198_v7 = vand.u32 2147483647, %v7778_v53  ;;  %vm2196_vm4 = vcmp.ne.f32.partialorder %v7778_v53, %v7778_v53 }
0x2f1f   :  { %v4283_v57 = vadd.f32 1.1920929e-07, %v4282_v32 }
0x2f20   :  { %4504 = vrot.lane.b32.xlu0 %v7671_v55, %s5491_s28  ;;  %v2199_v48 = vsub.f32 0.0, %v2198_v7 }
0x2f22   :  { %v2200_v41 = vmul.f32 1.442695, %v2199_v48 }
0x2f28   :  { %4531 = vrot.lane.b32.xlu0 %v971_v35, %s5491_s28 }
0x2f30   :  { %4543 = vrot.lane.b32.xlu0 %v3455_v11, %s5491_s28 }
0x2f38   :  { %4567 = vrot.lane.b32.xlu0 %v7692_v39, %s5490_s25 }
0x2f40   :  { %4579 = vrot.lane.b32.xlu0 %v7666_v52, %s5490_s25  ;;  %v1577_v52 = vand.u32 2147483647, %v7715_v56 }
0x2f42   :  { %v1578_v38 = vsub.f32 0.0, %v1577_v52 }
0x2f44   :  { %v1579_v35 = vmul.f32 1.442695, %v1578_v38  ;;  %v8044_v38 = vld [vmem:[#allocation11_spill] sm:$0xff] }
0x2f46   :  { %5277 = vpow2.f32 %v1579_v35  ;;  %v7788_v35 = vadd.f32 %v7637_v8, %v8044_v38 }
0x2f48   :  { %4608 = vrot.lane.b32.xlu0 %v2420_v63, %s5492_s8  ;;  %v7756_v63 = vadd.f32 %v7637_v8, %v7574_v30  ;;  %v7774_v30 = vadd.f32 %v7637_v8, %v8042_v21  ;;  %v8046_v21 = vld [vmem:[#allocation20_spill] sm:$0xff]  ;;  %vm2610_vm8 = vcmp.ne.f32.partialorder %v7788_v35, %v7788_v35 }
0x2f49   :  { %v7811_v5 = vadd.f32 %v7637_v8, %v8046_v21 }
0x2f4a   :  { %vm3852_vm10 = vcmp.ne.f32.partialorder %v7756_v63, %v7756_v63 }
0x2f4c   :  { %v5278_v11 = vpop.eup %5277 }
0x2f4d   :  { %v1581_v22 = vadd.f32 1.0, %v5278_v11  ;;  %v1584_v20 = vmul.f32 -0.5, %v5278_v11  ;;  %v1587_v46 = vand.u32 2147483647, %v5278_v11 }
0x2f4f   :  { %v1585_v24 = vadd.f32 1.0, %v1584_v20  ;;  %vm1588_vm14 = vcmp.lt.f32.partialorder %v1587_v46, 0.0004427343 }
0x2f50   :  { %4612 = vrot.lane.b32.xlu0 %v3662_v2, %s5491_s28 }
0x2f51   :  { %v1586_v33 = vmul.f32 %v5278_v11, %v1585_v24 }
0x2f58   :  { %4616 = vrot.lane.b32.xlu0 %v4283_v57, %s5490_s25  ;;  %v1163_v57 = vand.u32 2147483647, %v7692_v39 }
0x2f5a   :  { %v1164_v52 = vsub.f32 0.0, %v1163_v57 }
0x2f82   :  { %v4438_v51 = vpop.permute.xlu0 %4437 }
0x2f83   :  { %v4440_v10 = vadd.f32 %v4438_v51, %v4430_v3  ;;  %v1165_v3 = vmul.f32 1.442695, %v1164_v52 }
0x2f85   :  { %5279 = vtanh.f32 %v4440_v10 }
0x2f86   :  { %5281 = vpow2.f32 %v4063_v49  ;;  %v2612_v49 = vand.u32 2147483647, %v7788_v35 }
0x2f87   :  { %5283 = vlog2.f32 %v1581_v22 }
0x2f8b   :  { %v5280_v12 = vpop.eup %5279 }
0x2f8c   :  { %v5282_v14 = vpop.eup %5281  ;;  %4443 = vrot.lane.b32.xlu1 %v5280_v12, %s5490_s25 }
0x2f8d   :  { %v4065_v17 = vadd.f32 1.0, %v5282_v14  ;;  %v5284_v25 = vpop.eup %5283  ;;  %v4068_v59 = vmul.f32 -0.5, %v5282_v14  ;;  %v4071_v60 = vand.u32 2147483647, %v5282_v14 }
0x2f8e   :  { %v1583_v13 = vmul.f32 0.6931472, %v5284_v25 }
0x2f8f   :  { %5285 = vlog2.f32 %v4065_v17  ;;  %v4069_v26 = vadd.f32 1.0, %v4068_v59  ;;  %vm4072_vm1 = vcmp.lt.f32.partialorder %v4071_v60, 0.0004427343  ;;  %v3854_v17 = vand.u32 2147483647, %v7756_v63  ;;  %v8045_v60 = vld [vmem:[#allocation3_spill] sm:$0xff] }
0x2f90   :  { %v1589_v18 = vsel %vm1588_vm14, %v1586_v33, %v1583_v13  ;;  %5287 = vpow2.f32 %v2200_v41 }
0x2f91   :  { %v1590_v27 = vadd.f32 %v1589_v18, %v1574_v42  ;;  %v4070_v34 = vmul.f32 %v5282_v14, %v4069_v26  ;;  %v2195_v14 = vmax.f32 %v7778_v53, 0.0  ;;  %v3855_v46 = vsub.f32 0.0, %v3854_v17 }
0x2f93   :  { %v3856_v59 = vmul.f32 1.442695, %v3855_v46 }
0x2f94   :  { %4496 = vrot.lane.b32.xlu1 %v7641_v43, %s5490_s25  ;;  %v1591_v43 = vsel %vm1575_vm15, %v7715_v56, %v1590_v27  ;;  %vm4516_vm15 = vcmask 523264  }
0x2f95   :  { %v5286_v9 = vpop.eup %5285  ;;  %v1592_v36 = vadd.f32 1.1920929e-07, %v1591_v43 }
0x2f96   :  { %v4067_v1 = vmul.f32 0.6931472, %v5286_v9  ;;  %v5288_v2 = vpop.eup %5287 }
0x2f97   :  { %v2202_v23 = vadd.f32 1.0, %v5288_v2  ;;  %v2205_v47 = vmul.f32 -0.5, %v5288_v2  ;;  %v2208_v10 = vand.u32 2147483647, %v5288_v2 }
0x2f98   :  { %v4073_v54 = vsel %vm4072_vm1, %v4070_v34, %v4067_v1  ;;  %v7804_v1 = vadd.f32 %v7637_v8, %v8045_v60  ;;  %vm4518_vm1 = vcmask 785408  }
0x2f99   :  { %v4074_v4 = vadd.f32 %v4073_v54, %v4058_v28  ;;  %5289 = vlog2.f32 %v2202_v23  ;;  %v2206_v51 = vadd.f32 1.0, %v2205_v47  ;;  %vm2209_vm3 = vcmp.lt.f32.partialorder %v2208_v10, 0.0004427343 }
0x2f9a   :  { %5291 = vpow2.f32 %v1165_v3 }
0x2f9b   :  { %v2207_v22 = vmul.f32 %v5288_v2, %v2206_v51 }
0x2f9c   :  { %4508 = vrot.lane.b32.xlu1 %v7646_v31, %s5490_s25  ;;  %v4075_v31 = vsel %vm4059_vm2, %v7720_v62, %v4074_v4  ;;  %vm4526_vm2 = vcmask 1043456  }
0x2f9d   :  { %v4076_v19 = vadd.f32 1.1920929e-07, %v4075_v31 }
0x2f9f   :  { %v5290_v29 = vpop.eup %5289 }
0x2fa0   :  { %v2204_v11 = vmul.f32 0.6931472, %v5290_v29  ;;  %v5292_v24 = vpop.eup %5291  ;;  %v2609_v29 = vmax.f32 %v7788_v35, 0.0 }
0x2fa1   :  { %v1167_v13 = vadd.f32 1.0, %v5292_v24  ;;  %v1170_v26 = vmul.f32 -0.5, %v5292_v24  ;;  %v1173_v54 = vand.u32 2147483647, %v5292_v24 }
0x2fa2   :  { %v2210_v12 = vsel %vm2209_vm3, %v2207_v22, %v2204_v11  ;;  %vm347_vm3 = vcmp.ne.f32.partialorder %v7659_v15, %v7659_v15 }
0x2fa3   :  { %v2211_v25 = vadd.f32 %v2210_v12, %v2195_v14  ;;  %v1171_v43 = vadd.f32 1.0, %v1170_v26  ;;  %vm1174_vm5 = vcmp.lt.f32.partialorder %v1173_v54, 0.0004427343  ;;  %v349_v26 = vand.u32 2147483647, %v7659_v15 }
0x2fa4   :  { %4535 = vrot.lane.b32.xlu1 %v1592_v36, %s5490_s25 }
0x2fa5   :  { %v1172_v4 = vmul.f32 %v5292_v24, %v1171_v43  ;;  %v350_v60 = vsub.f32 0.0, %v349_v26 }
0x2fa7   :  { %v351_v43 = vmul.f32 1.442695, %v350_v60 }
0x2fac   :  { %4547 = vrot.lane.b32.xlu1 %v4076_v19, %s5490_s25 }
0x2fb4   :  { %4571 = vrot.lane.b32.xlu1 %v7742_v0, %s5492_s8 }
0x2fbc   :  { %4583 = vrot.lane.b32.xlu1 %v7680_v50, %s5492_s8  ;;  %v8041_v50 = vld [vmem:[#allocation7_spill] sm:$0xff] }
0x2fbd   :  { %v7768_v40 = vadd.f32 %v7637_v8, %v8041_v50  ;;  %v1160_v50 = vmax.f32 %v7692_v39, 0.0 }
0x2fbf   :  { %v1370_v33 = vand.u32 2147483647, %v7768_v40  ;;  %vm1368_vm12 = vcmp.ne.f32.partialorder %v7768_v40, %v7768_v40 }
0x2fc1   :  { %v1371_v42 = vsub.f32 0.0, %v1370_v33 }
0x2fc3   :  { %v1372_v34 = vmul.f32 1.442695, %v1371_v42 }
0x2fc4   :  { %4645 = vrot.lane.b32.xlu1 %v7750_v44, %s5491_s28 }
0x2fcc   :  { %4649 = vrot.lane.b32.xlu1 %v7756_v63, %s5490_s25 }
0x2fd4   :  { %4633 = vrot.lane.b32.xlu1 %v7762_v61, %s5491_s28 }
0x2fdc   :  { %4637 = vrot.lane.b32.xlu1 %v7768_v40, %s5490_s25 }
0x2fe4   :  { %4641 = vrot.lane.b32.xlu1 %v7774_v30, %s5492_s8 }
0x2ffe   :  { %v4444_v32 = vpop.permute.xlu1 %4443 }
0x2fff   :  { %v4446_v6 = vmul.f32 %v4444_v32, %v7649_v37  ;;  %v2613_v37 = vsub.f32 0.0, %v2612_v49 }
0x3001   :  { %4448 = vrot.lane.b32.xlu2 %v4446_v6, %s5491_s28  ;;  %v2614_v20 = vmul.f32 1.442695, %v2613_v37 }
0x3003   :  { %5293 = vpow2.f32 %v2614_v20  ;;  %v3851_v20 = vmax.f32 %v7756_v63, 0.0 }
0x3004   :  { %5295 = vlog2.f32 %v1167_v13 }
0x3005   :  { %5297 = vpow2.f32 %v3856_v59 }
0x3009   :  { %4500 = vrot.lane.b32.xlu2 %v7715_v56, %s5492_s8  ;;  %v2212_v56 = vsel %vm2196_vm4, %v7778_v53, %v2211_v25  ;;  %v5294_v9 = vpop.eup %5293  ;;  %vm2817_vm4 = vcmp.ne.f32.partialorder %v7671_v55, %v7671_v55 }
0x300a   :  { %v2213_v18 = vadd.f32 1.1920929e-07, %v2212_v56  ;;  %v5296_v27 = vpop.eup %5295  ;;  %v2619_v31 = vmul.f32 -0.5, %v5294_v9  ;;  %v2622_v41 = vand.u32 2147483647, %v5294_v9 }
0x300b   :  { %v5298_v28 = vpop.eup %5297  ;;  %v1169_v36 = vmul.f32 0.6931472, %v5296_v27 }
0x300c   :  { %v3858_v19 = vadd.f32 1.0, %v5298_v28  ;;  %v2620_v7 = vadd.f32 1.0, %v2619_v31  ;;  %v3861_v57 = vmul.f32 -0.5, %v5298_v28  ;;  %vm2623_vm7 = vcmp.lt.f32.partialorder %v2622_v41, 0.0004427343 }
0x300d   :  { %v1175_v45 = vsel %vm1174_vm5, %v1172_v4, %v1169_v36  ;;  %v3864_v10 = vand.u32 2147483647, %v5298_v28  ;;  %v4497_v4 = vpop.permute.xlu1 %4496 }
0x300e   :  { %v1176_v48 = vadd.f32 %v1175_v45, %v1160_v50  ;;  %v2621_v32 = vmul.f32 %v5294_v9, %v2620_v7  ;;  %v3862_v49 = vadd.f32 1.0, %v3861_v57 }
0x300f   :  { %vm3865_vm9 = vcmp.lt.f32.partialorder %v3864_v10, 0.0004427343 }
0x3010   :  { %v1177_v6 = vsel %vm1161_vm6, %v7692_v39, %v1176_v48  ;;  %v3863_v37 = vmul.f32 %v5298_v28, %v3862_v49  ;;  %v4493_v28 = vpop.permute.xlu0 %4492  ;;  %vm3231_vm6 = vcmp.ne.f32.partialorder %v7750_v44, %v7750_v44 }
0x3011   :  { %4512 = vrot.lane.b32.xlu2 %v7720_v62, %s5492_s8  ;;  %v2616_v62 = vadd.f32 1.0, %v5294_v9  ;;  %v1178_v3 = vadd.f32 1.1920929e-07, %v1177_v6 }
0x3013   :  { %5299 = vlog2.f32 %v2616_v62  ;;  %v2819_v62 = vand.u32 2147483647, %v7671_v55 }
0x3014   :  { %5301 = vpow2.f32 %v1372_v34 }
0x3015   :  { %5303 = vlog2.f32 %v3858_v19  ;;  %v2820_v34 = vsub.f32 0.0, %v2819_v62 }
0x3017   :  { %v2821_v54 = vmul.f32 1.442695, %v2820_v34  ;;  %v7866_v34 = vld [vmem:[%s7981_s1] sm:$0xf] }
0x3018   :  { %v4505_v50 = vpop.permute.xlu0 %4504 }
0x3019   :  { %4539 = vrot.lane.b32.xlu2 %v2213_v18, %s5492_s8  ;;  %v5300_v58 = vpop.eup %5299  ;;  %v1367_v18 = vmax.f32 %v7768_v40, 0.0 }
0x301a   :  { %v5302_v2 = vpop.eup %5301  ;;  %v2618_v23 = vmul.f32 0.6931472, %v5300_v58 }
0x301b   :  { %v1374_v52 = vadd.f32 1.0, %v5302_v2  ;;  %v5304_v47 = vpop.eup %5303  ;;  %v1377_v22 = vmul.f32 -0.5, %v5302_v2  ;;  %v1380_v46 = vand.u32 2147483647, %v5302_v2 }
0x301c   :  { %v2624_v38 = vsel %vm2623_vm7, %v2621_v32, %v2618_v23  ;;  %v3860_v11 = vmul.f32 0.6931472, %v5304_v47 }
0x301d   :  { %v2625_v51 = vadd.f32 %v2624_v38, %v2609_v29  ;;  %5305 = vlog2.f32 %v1374_v52  ;;  %v1378_v25 = vadd.f32 1.0, %v1377_v22  ;;  %vm1381_vm11 = vcmp.lt.f32.partialorder %v1380_v46, 0.0004427343  ;;  %v7842_v22 = vld [vmem:[%s7979_s0] sm:$0xf] }
0x301e   :  { %v3866_v12 = vsel %vm3865_vm9, %v3863_v37, %v3860_v11  ;;  %5307 = vpow2.f32 %v351_v43  ;;  %v346_v11 = vmax.f32 %v7659_v15, 0.0  ;;  %v3233_v37 = vand.u32 2147483647, %v7750_v44 }
0x301f   :  { %v2626_v39 = vsel %vm2610_vm8, %v7788_v35, %v2625_v51  ;;  %v3867_v24 = vadd.f32 %v3866_v12, %v3851_v20  ;;  %v1379_v13 = vmul.f32 %v5302_v2, %v1378_v25  ;;  %5309 = vpow2.f32 %v2821_v54 }
0x3020   :  { %v2627_v17 = vadd.f32 1.1920929e-07, %v2626_v39  ;;  %v4532_v29 = vpop.permute.xlu0 %4531  ;;  %v2816_v39 = vmax.f32 %v7671_v55, 0.0  ;;  %v4520_v12 = vsel %vm164_vm0, %v7778_v53, %v4505_v50  ;;  %vm1989_vm8 = vcmp.ne.f32.partialorder %v7774_v30, %v7774_v30 }
0x3021   :  { %4563 = vrot.lane.b32.xlu2 %v7804_v1, %s5491_s28  ;;  %v3868_v33 = vsel %vm3852_vm10, %v7756_v63, %v3867_v24  ;;  %v4515_v24 = vsel %vm164_vm0, %v7842_v22, %v4493_v28 }
0x3022   :  { %v3869_v9 = vadd.f32 1.1920929e-07, %v3868_v33 }
0x3023   :  { %v5306_v14 = vpop.eup %5305 }
0x3024   :  { %v1376_v56 = vmul.f32 0.6931472, %v5306_v14  ;;  %v5308_v36 = vpop.eup %5307 }
0x3025   :  { %v5310_v31 = vpop.eup %5309  ;;  %v353_v19 = vadd.f32 1.0, %v5308_v36  ;;  %v356_v21 = vmul.f32 -0.5, %v5308_v36  ;;  %v359_v32 = vand.u32 2147483647, %v5308_v36 }
0x3026   :  { %v1382_v59 = vsel %vm1381_vm11, %v1379_v13, %v1376_v56  ;;  %v2823_v45 = vadd.f32 1.0, %v5310_v31  ;;  %v2826_v7 = vmul.f32 -0.5, %v5310_v31  ;;  %v2829_v6 = vand.u32 2147483647, %v5310_v31 }
0x3027   :  { %v1383_v42 = vadd.f32 %v1382_v59, %v1367_v18  ;;  %5311 = vlog2.f32 %v353_v19  ;;  %v357_v2 = vadd.f32 1.0, %v356_v21  ;;  %vm360_vm13 = vcmp.lt.f32.partialorder %v359_v32, 0.0004427343 }
0x3028   :  { %5313 = vlog2.f32 %v2823_v45  ;;  %v2827_v23 = vadd.f32 1.0, %v2826_v7  ;;  %vm2830_vm14 = vcmp.lt.f32.partialorder %v2829_v6, 0.0004427343  ;;  %v3234_v56 = vsub.f32 0.0, %v3233_v37 }
0x3029   :  { %4575 = vrot.lane.b32.xlu2 %v7811_v5, %s5491_s28  ;;  %v1384_v27 = vsel %vm1368_vm12, %v7768_v40, %v1383_v42  ;;  %v4509_v40 = vpop.permute.xlu1 %4508  ;;  %v358_v47 = vmul.f32 %v5308_v36, %v357_v2  ;;  %v4517_v13 = vsel %vm4516_vm15, %v4515_v24, %v4497_v4  ;;  %v4544_v42 = vpop.permute.xlu0 %4543  ;;  %v3230_v37 = vmax.f32 %v7750_v44, 0.0 }
0x302a   :  { %v1385_v63 = vadd.f32 1.1920929e-07, %v1384_v27  ;;  %v4521_v20 = vsel %vm4516_vm15, %v4520_v12, %v4509_v40  ;;  %v3235_v26 = vmul.f32 1.442695, %v3234_v56  ;;  %vm1782_vm12 = vcmp.ne.f32.partialorder %v7742_v0, %v7742_v0 }
0x302c   :  { %5315 = vpow2.f32 %v3235_v26 }
0x302d   :  { %v5312_v48 = vpop.eup %5311 }
0x302e   :  { %v5314_v41 = vpop.eup %5313  ;;  %v355_v52 = vmul.f32 0.6931472, %v5312_v48 }
0x302f   :  { %v2825_v38 = vmul.f32 0.6931472, %v5314_v41 }
0x3030   :  { %v361_v51 = vsel %vm360_vm13, %v358_v47, %v355_v52 }
0x3031   :  { %4600 = vrot.lane.b32.xlu2 %v1178_v3, %s5491_s28  ;;  %v2828_v3 = vmul.f32 %v5310_v31, %v2827_v23  ;;  %v4536_v49 = vpop.permute.xlu1 %4535  ;;  %v362_v14 = vadd.f32 %v361_v51, %v346_v11  ;;  %v4568_v19 = vpop.permute.xlu0 %4567 }
0x3032   :  { %v5316_v45 = vpop.eup %5315 }
0x3033   :  { %v2831_v10 = vsel %vm2830_vm14, %v2828_v3, %v2825_v38  ;;  %v363_v59 = vsel %vm347_vm3, %v7659_v15, %v362_v14  ;;  %v3237_v40 = vadd.f32 1.0, %v5316_v45 }
0x3034   :  { %v2832_v25 = vadd.f32 %v2831_v10, %v2816_v39  ;;  %v364_v27 = vadd.f32 1.1920929e-07, %v363_v59 }
0x3035   :  { %5317 = vlog2.f32 %v3237_v40 }
0x3036   :  { %v4550_v43 = vsel %vm164_vm0, %v7866_v34, %v364_v27 }
0x3037   :  { %v4551_v28 = vsel %vm4516_vm15, %v4550_v43, %v4532_v29 }
0x3038   :  { %v4552_v4 = vsel %vm4518_vm1, %v4551_v28, %v4536_v49 }
0x3039   :  { %4678 = vrot.lane.b32.xlu2 %v2627_v17, %s5492_s8  ;;  %v4548_v62 = vpop.permute.xlu1 %4547  ;;  %v4580_v48 = vpop.permute.xlu0 %4579 }
0x303b   :  { %v5318_v38 = vpop.eup %5317 }
0x303c   :  { %v3239_v51 = vmul.f32 0.6931472, %v5318_v38 }
0x3041   :  { %4682 = vrot.lane.b32.xlu2 %v3869_v9, %s5491_s28  ;;  %v2833_v9 = vsel %vm2817_vm4, %v7671_v55, %v2832_v25  ;;  %vm747_vm4 = vcmp.ne.f32.partialorder %v7762_v61, %v7762_v61 }
0x3042   :  { %v2834_v60 = vadd.f32 1.1920929e-07, %v2833_v9 }
0x3049   :  { %4670 = vrot.lane.b32.xlu2 %v1385_v63, %s5491_s28 }
0x305b   :  { %v4449_v58 = vpop.permute.xlu2 %4448 }
0x305c   :  { %4899 = vmatmul.msk.f32.vlgmr.msrb.gmra.mxu1 %vm164_vm0, %v4449_v58  ;;  %v4572_v58 = vpop.permute.xlu1 %4571 }
0x3063   :  { %v4501_v57 = vpop.permute.xlu2 %4500 }
0x3064   :  { %v4519_v53 = vsel %vm4518_vm1, %v4517_v13, %v4501_v57  ;;  %v4584_v2 = vpop.permute.xlu1 %4583  ;;  %v3240_v57 = vmul.f32 -0.5, %v5316_v45 }
0x3066   :  { %v3241_v3 = vadd.f32 1.0, %v3240_v57 }
0x3068   :  { %v3242_v10 = vmul.f32 %v5316_v45, %v3241_v3 }
0x306b   :  { %v4513_v17 = vpop.permute.xlu2 %4512 }
0x306c   :  { %v4522_v46 = vsel %vm4518_vm1, %v4521_v20, %v4513_v17 }
0x306d   :  { %v4525_v33 = vrot.slane %v4522_v46, 4  ;;  %v1991_v46 = vand.u32 2147483647, %v7774_v30 }
0x306f   :  { %v4527_v18 = vsel %vm4526_vm2, %v4519_v53, %v4525_v33  ;;  %v1992_v56 = vsub.f32 0.0, %v1991_v46 }
0x3070   :  { %4529 = vst [vmem:[%s7980_s13] sm:$0xff] %v4527_v18  ;;  %v1784_v18 = vand.u32 2147483647, %v7742_v0 }
0x3071   :  { %v1993_v13 = vmul.f32 1.442695, %v1992_v56 }
0x3072   :  { %v1785_v26 = vsub.f32 0.0, %v1784_v18 }
0x3073   :  { %v4540_v63 = vpop.permute.xlu2 %4539  ;;  %5319 = vpow2.f32 %v1993_v13 }
0x3074   :  { %v4553_v15 = vsel %vm164_vm0, %v4540_v63, %v2834_v60  ;;  %v1786_v60 = vmul.f32 1.442695, %v1785_v26  ;;  %v3026_v26 = vand.u32 2147483647, %v7811_v5 }
0x3075   :  { %v4554_v55 = vsel %vm4516_vm15, %v4553_v15, %v4544_v42  ;;  %v1988_v15 = vmax.f32 %v7774_v30, 0.0 }
0x3076   :  { %v4555_v54 = vsel %vm4518_vm1, %v4554_v55, %v4548_v62 }
0x3077   :  { %v4558_v36 = vrot.slane %v4555_v54, 4 }
0x3079   :  { %v4559_v31 = vsel %vm4526_vm2, %v4552_v4, %v4558_v36  ;;  %v5320_v33 = vpop.eup %5319 }
0x307a   :  { %4561 = vst [vmem:[%s7982_s14] sm:$0xff] %v4559_v31  ;;  %v1995_v53 = vadd.f32 1.0, %v5320_v33  ;;  %v1998_v59 = vmul.f32 -0.5, %v5320_v33  ;;  %v2001_v42 = vand.u32 2147483647, %v5320_v33 }
0x307b   :  { %v4564_v50 = vpop.permute.xlu2 %4563 }
0x307c   :  { %v4586_v21 = vsel %vm164_vm0, %v7842_v22, %v4564_v50  ;;  %5321 = vlog2.f32 %v1995_v53  ;;  %vm2002_vm7 = vcmp.lt.f32.partialorder %v2001_v42, 0.0004427343 }
0x307d   :  { %v4587_v23 = vsel %vm4516_vm15, %v4586_v21, %v4568_v19  ;;  %5323 = vpow2.f32 %v1786_v60 }
0x307e   :  { %v4588_v47 = vsel %vm4518_vm1, %v4587_v23, %v4572_v58 }
0x3082   :  { %v5322_v9 = vpop.eup %5321 }
0x3083   :  { %v4576_v7 = vpop.permute.xlu2 %4575  ;;  %v1997_v62 = vmul.f32 0.6931472, %v5322_v9  ;;  %v5324_v19 = vpop.eup %5323  ;;  %v749_v9 = vand.u32 2147483647, %v7762_v61 }
0x3084   :  { %v4589_v41 = vsel %vm164_vm0, %v7655_v16, %v4576_v7  ;;  %v3243_v16 = vand.u32 2147483647, %v5316_v45  ;;  %v1788_v58 = vadd.f32 1.0, %v5324_v19  ;;  %v1791_v21 = vmul.f32 -0.5, %v5324_v19 }
0x3085   :  { %v4590_v32 = vsel %vm4516_vm15, %v4589_v41, %v4580_v48 }
0x3086   :  { %v4591_v6 = vsel %vm4518_vm1, %v4590_v32, %v4584_v2  ;;  %vm3244_vm5 = vcmp.lt.f32.partialorder %v3243_v16, 0.0004427343  ;;  %v1792_v2 = vadd.f32 1.0, %v1791_v21  ;;  %v1794_v32 = vand.u32 2147483647, %v5324_v19 }
0x3087   :  { %v4594_v52 = vrot.slane %v4591_v6, 4  ;;  %v3245_v11 = vsel %vm3244_vm5, %v3242_v10, %v3239_v51  ;;  %v1781_v16 = vmax.f32 %v7742_v0, 0.0  ;;  %vm3024_vm5 = vcmp.ne.f32.partialorder %v7811_v5, %v7811_v5 }
0x3088   :  { %v3246_v39 = vadd.f32 %v3245_v11, %v3230_v37  ;;  %vm1795_vm10 = vcmp.lt.f32.partialorder %v1794_v32, 0.0004427343 }
0x3089   :  { %v4595_v29 = vsel %vm4526_vm2, %v4588_v47, %v4594_v52  ;;  %v1793_v47 = vmul.f32 %v5324_v19, %v1792_v2 }
0x308a   :  { %4900 = vst [vmem:[%s7980_s13 + $0x8] sm:$0xff] %v4595_v29  ;;  %v3247_v14 = vsel %vm3231_vm6, %v7750_v44, %v3246_v39  ;;  %v1999_v44 = vadd.f32 1.0, %v1998_v59  ;;  %vm547_vm6 = vcmp.ne.f32.partialorder %v7804_v1, %v7804_v1 }
0x308b   :  { %v7891_v49 = vpop.permute.xlu2 %4600  ;;  %v3248_v20 = vadd.f32 1.1920929e-07, %v3247_v14 }
0x308c   :  { %v2000_v27 = vmul.f32 %v5320_v33, %v1999_v44 }
0x308e   :  { %v2003_v63 = vsel %vm2002_vm7, %v2000_v27, %v1997_v62  ;;  %v3027_v27 = vsub.f32 0.0, %v3026_v26 }
0x308f   :  { %v2004_v54 = vadd.f32 %v2003_v63, %v1988_v15 }
0x3090   :  { %v3028_v63 = vmul.f32 1.442695, %v3027_v27 }
0x3091   :  { %v2005_v4 = vsel %vm1989_vm8, %v7774_v30, %v2004_v54 }
0x3092   :  { %v2006_v45 = vadd.f32 1.1920929e-07, %v2005_v4 }
0x3093   :  { %v4679_v12 = vpop.permute.xlu2 %4678 }
0x3094   :  { %v4692_v17 = vsel %vm164_vm0, %v4679_v12, %v3248_v20  ;;  %v4646_v12 = vpop.permute.xlu1 %4645 }
0x3095   :  { %v4659_v46 = vsel %vm164_vm0, %v7788_v35, %v4646_v12  ;;  %v750_v35 = vsub.f32 0.0, %v749_v9 }
0x3097   :  { %v751_v62 = vmul.f32 1.442695, %v750_v35 }
0x309b   :  { %v4683_v25 = vpop.permute.xlu2 %4682 }
0x309c   :  { %v7899_v24 = vsel %vm4516_vm15, %v4692_v17, %v4683_v25  ;;  %v4650_v14 = vpop.permute.xlu1 %4649 }
0x309d   :  { %v4660_v56 = vsel %vm4516_vm15, %v4659_v46, %v4650_v14 }
0x30a3   :  { %v7916_v25 = vpop.permute.xlu2 %4670 }
0x30a4   :  { %v4634_v20 = vpop.permute.xlu1 %4633 }
0x30a5   :  { %v4656_v53 = vsel %vm164_vm0, %v7842_v22, %v4634_v20  ;;  %v549_v22 = vand.u32 2147483647, %v7804_v1 }
0x30a7   :  { %v550_v60 = vsub.f32 0.0, %v549_v22 }
0x30a9   :  { %v551_v15 = vmul.f32 1.442695, %v550_v60 }
0x30ac   :  { %v4638_v17 = vpop.permute.xlu1 %4637 }
0x30ad   :  { %v4657_v59 = vsel %vm4516_vm15, %v4656_v53, %v4638_v17 }
0x30b4   :  { %v4642_v13 = vpop.permute.xlu1 %4641 }
0x30b5   :  { %v4658_v44 = vsel %vm4518_vm1, %v4657_v59, %v4642_v13 }
0x30d9   :  { %v4469_v55 = vpop.f32.mrf.mxu1 }
0x30da   :  { %v4470_v43 = vadd.f32 %v7637_v8, %v4469_v55 }
0x30dc   :  { %v4475_v28 = vand.u32 2147483647, %v4470_v43  ;;  %4653 = vrot.lane.b32.xlu2 %v4470_v43, %s5492_s8  ;;  %v4472_v52 = vmax.f32 %v4470_v43, 0.0  ;;  %vm4473_vm11 = vcmp.ne.f32.partialorder %v4470_v43, %v4470_v43 }
0x30de   :  { %v4476_v36 = vsub.f32 0.0, %v4475_v28  ;;  %v4609_v28 = vpop.permute.xlu0 %4608 }
0x30e0   :  { %v4477_v31 = vmul.f32 1.442695, %v4476_v36 }
0x30e2   :  { %5325 = vpow2.f32 %v4477_v31 }
0x30e3   :  { %5327 = vlog2.f32 %v1788_v58 }
0x30e4   :  { %4674 = vrot.lane.b32.xlu2 %v2006_v45, %s5490_s25 }
0x30e8   :  { %v5326_v50 = vpop.eup %5325 }
0x30e9   :  { %v4479_v8 = vadd.f32 1.0, %v5326_v50  ;;  %v4482_v40 = vmul.f32 -0.5, %v5326_v50  ;;  %v5328_v48 = vpop.eup %5327  ;;  %v4485_v41 = vand.u32 2147483647, %v5326_v50 }
0x30ea   :  { %v1790_v6 = vmul.f32 0.6931472, %v5328_v48 }
0x30eb   :  { %5329 = vlog2.f32 %v4479_v8  ;;  %v4483_v7 = vadd.f32 1.0, %v4482_v40  ;;  %vm4486_vm9 = vcmp.lt.f32.partialorder %v4485_v41, 0.0004427343  ;;  %v4613_v8 = vpop.permute.xlu0 %4612 }
0x30ec   :  { %v1796_v3 = vsel %vm1795_vm10, %v1793_v47, %v1790_v6  ;;  %5331 = vpow2.f32 %v751_v62 }
0x30ed   :  { %v4484_v57 = vmul.f32 %v5326_v50, %v4483_v7  ;;  %v1797_v11 = vadd.f32 %v1796_v3, %v1781_v16  ;;  %5333 = vpow2.f32 %v3028_v63 }
0x30ee   :  { %5335 = vpow2.f32 %v551_v15 }
0x30ef   :  { %v1798_v37 = vsel %vm1782_vm12, %v7742_v0, %v1797_v11 }
0x30f0   :  { %v1799_v39 = vadd.f32 1.1920929e-07, %v1798_v37 }
0x30f1   :  { %v5330_v23 = vpop.eup %5329 }
0x30f2   :  { %v4481_v30 = vmul.f32 0.6931472, %v5330_v23  ;;  %v5332_v55 = vpop.eup %5331 }
0x30f3   :  { %v5334_v54 = vpop.eup %5333  ;;  %v756_v19 = vmul.f32 -0.5, %v5332_v55  ;;  %v759_v40 = vand.u32 2147483647, %v5332_v55  ;;  %v4617_v11 = vpop.permute.xlu0 %4616 }
0x30f4   :  { %v4487_v38 = vsel %vm4486_vm9, %v4484_v57, %v4481_v30  ;;  %v5336_v36 = vpop.eup %5335  ;;  %v3030_v4 = vadd.f32 1.0, %v5334_v54  ;;  %v3033_v58 = vmul.f32 -0.5, %v5334_v54  ;;  %v3036_v32 = vand.u32 2147483647, %v5334_v54 }
0x30f5   :  { %v4488_v29 = vadd.f32 %v4487_v38, %v4472_v52  ;;  %v553_v31 = vadd.f32 1.0, %v5336_v36  ;;  %v757_v50 = vadd.f32 1.0, %v756_v19  ;;  %v556_v21 = vmul.f32 -0.5, %v5336_v36 }
0x30f6   :  { %v3034_v41 = vadd.f32 1.0, %v3033_v58  ;;  %vm760_vm13 = vcmp.lt.f32.partialorder %v759_v40, 0.0004427343  ;;  %v746_v52 = vmax.f32 %v7762_v61, 0.0  ;;  %v559_v38 = vand.u32 2147483647, %v5336_v36 }
0x30f7   :  { %v4489_v51 = vsel %vm4473_vm11, %v4470_v43, %v4488_v29  ;;  %v753_v43 = vadd.f32 1.0, %v5332_v55  ;;  %v758_v2 = vmul.f32 %v5332_v55, %v757_v50  ;;  %v557_v57 = vadd.f32 1.0, %v556_v21 }
0x30f8   :  { %v4490_v10 = vadd.f32 1.1920929e-07, %v4489_v51  ;;  %v3035_v47 = vmul.f32 %v5334_v54, %v3034_v41  ;;  %vm3037_vm14 = vcmp.lt.f32.partialorder %v3036_v32, 0.0004427343  ;;  %vm560_vm3 = vcmp.lt.f32.partialorder %v559_v38, 0.0004427343 }
0x30f9   :  { %5337 = vlog2.f32 %v753_v43  ;;  %v558_v51 = vmul.f32 %v5336_v36, %v557_v57 }
0x30fa   :  { %4686 = vrot.lane.b32.xlu0 %v4490_v10, %s5490_s25  ;;  %5339 = vlog2.f32 %v3030_v4  ;;  %v3023_v10 = vmax.f32 %v7811_v5, 0.0 }
0x30fb   :  { %5341 = vlog2.f32 %v553_v31 }
0x30ff   :  { %v5338_v45 = vpop.eup %5337 }
0x3100   :  { %v755_v7 = vmul.f32 0.6931472, %v5338_v45  ;;  %v5340_v48 = vpop.eup %5339 }
0x3101   :  { %v5342_v23 = vpop.eup %5341  ;;  %v3032_v30 = vmul.f32 0.6931472, %v5340_v48 }
0x3102   :  { %4604 = vrot.lane.b32.xlu0 %v1799_v39, %s5490_s25  ;;  %v761_v6 = vsel %vm760_vm13, %v758_v2, %v755_v7  ;;  %v555_v29 = vmul.f32 0.6931472, %v5342_v23  ;;  %v546_v39 = vmax.f32 %v7804_v1, 0.0 }
0x3103   :  { %v762_v3 = vadd.f32 %v761_v6, %v746_v52  ;;  %v3038_v16 = vsel %vm3037_vm14, %v3035_v47, %v3032_v30 }
0x3104   :  { %v561_v37 = vsel %vm560_vm3, %v558_v51, %v555_v29  ;;  %v3039_v12 = vadd.f32 %v3038_v16, %v3023_v10 }
0x3105   :  { %v763_v14 = vsel %vm747_vm4, %v7762_v61, %v762_v3  ;;  %v562_v20 = vadd.f32 %v561_v37, %v546_v39 }
0x3106   :  { %v764_v17 = vadd.f32 1.1920929e-07, %v763_v14  ;;  %v3040_v46 = vsel %vm3024_vm5, %v7811_v5, %v3039_v12 }
0x3107   :  { %v3041_v53 = vadd.f32 1.1920929e-07, %v3040_v46 }
0x3109   :  { %v4622_v5 = vsel %vm164_vm0, %v4609_v28, %v3041_v53 }
0x3136   :  { %v4654_v33 = vpop.permute.xlu2 %4653 }
0x3137   :  { %v4661_v0 = vsel %vm4518_vm1, %v4660_v56, %v4654_v33  ;;  %v563_v56 = vsel %vm547_vm6, %v7804_v1, %v562_v20  ;;  %v4623_v1 = vsel %vm4516_vm15, %v4622_v5, %v4613_v8 }
0x3138   :  { %v4664_v18 = vrot.slane %v4661_v0, 4  ;;  %v4689_v0 = vsel %vm164_vm0, %v7866_v34, %v764_v17  ;;  %v564_v9 = vadd.f32 1.1920929e-07, %v563_v56  ;;  %v4624_v35 = vsel %vm4518_vm1, %v4623_v1, %v4617_v11 }
0x3139   :  { %v4690_v59 = vsel %vm4516_vm15, %v4689_v0, %v7916_v25  ;;  %v4627_v25 = vrot.slane %v4624_v35, 4 }
0x313a   :  { %v4665_v42 = vsel %vm4526_vm2, %v4658_v44, %v4664_v18 }
0x313b   :  { %4902 = vst [vmem:[%s7980_s13 + $0x10] sm:$0xff] %v4665_v42 }
0x313e   :  { %v4675_v13 = vpop.permute.xlu2 %4674 }
0x313f   :  { %v4691_v44 = vsel %vm4518_vm1, %v4690_v59, %v4675_v13 }
0x316c   :  { %v4687_v33 = vpop.permute.xlu0 %4686 }
0x316d   :  { %v4694_v61 = vsel %vm4518_vm1, %v7899_v24, %v4687_v33  ;;  %v4619_v24 = vsel %vm164_vm0, %v7866_v34, %v564_v9 }
0x316e   :  { %v4697_v18 = vrot.slane %v4694_v61, 4  ;;  %v4620_v26 = vsel %vm4516_vm15, %v4619_v24, %v7891_v49 }
0x3170   :  { %v4698_v42 = vsel %vm4526_vm2, %v4691_v44, %v4697_v18 }
0x3171   :  { %4903 = vst [vmem:[%s7982_s14 + $0x10] sm:$0xff] %v4698_v42 }
0x3174   :  { %v4605_v22 = vpop.permute.xlu0 %4604 }
0x3175   :  { %v4621_v62 = vsel %vm4518_vm1, %v4620_v26, %v4605_v22 }
0x3176   :  { %v4628_v27 = vsel %vm4526_vm2, %v4621_v62, %v4627_v25 }
0x3177   :  { %4901 = vst [vmem:[%s7982_s14 + $0x8] sm:$0xff] %v4628_v27 }

</bundles_post_ra>
